<compile_context>
chip_gen: v6e
topology: v6e:2x2x1
jax: 0.10.0
libtpu: 0.0.40
codegen_flags: <defaults>
</compile_context>

<pallas_src>
import functools

import jax
import jax.numpy as jnp
from jax.experimental import pallas as pl
from jax.experimental.pallas import tpu as pltpu

LANES = 128    # lane width: all channel dims are zero-padded to this
ALIGN = 16     # row alignment for bf16-packed frame stores


def _geometry(h, w):
    n = (h + 2) * (w + 2)            # rows of one flattened zero-padded frame
    s = w + 3                        # first valid output row inside the frame
    m = n - 2 * s                    # row span covering every valid pixel
    lead = (-s) % ALIGN              # leading zero rows so s_abs is aligned
    s_abs = s + lead                 # aligned first valid row in the r-row block
    r = ((lead + n + ALIGN - 1) // ALIGN) * ALIGN   # rows per image block
    return n, s, m, lead, s_abs, r


def _choose_block(b):
    """Images per grid step: big enough to amortize, >=2 grid steps when b>=2."""
    if b >= 16:
        return 8
    return max(1, b // 2)


# ------------------------------ fused kernel -------------------------------

def _siamese_fused_kernel(x_ref, mask_ref,
                          w1_ref, b1_ref, w2_ref, b2_ref, w3_ref, b3_ref,
                          fcw_ref, fcb_ref,
                          o_ref,
                          fa_ref, fb_ref,
                          *, offs, s_abs, mtot, m, r, bblk, bp, total_rows,
                          inv_hw):
    f32 = jnp.float32
    bf16 = jnp.bfloat16
    mask = mask_ref[...]                               # (mtot, 1) f32

    def conv_taps(src_ref, w_ref):
        """3x3 conv over the whole batch slab: 9 shifted (mtot,128)x(128,128)
        bf16 MXU dots with f32 accumulation."""
        acc = None
        for t, off in enumerate(offs):
            lhs = src_ref[s_abs + off:s_abs + off + mtot, :]   # bf16 slice
            d = jnp.dot(lhs, w_ref[t], preferred_element_type=f32)
            acc = d if acc is None else acc + d
        return acc

    def store_frame(frame_ref, act):
        """Masked activations -> zero-bordered bf16 frame slab.
        Only the tiny border strips are zeroed; the interior store is a
        16-row-aligned full-lane store."""
        frame_ref[0:s_abs, :] = jnp.zeros((s_abs, LANES), bf16)
        frame_ref[s_abs + mtot:total_rows, :] = jnp.zeros(
            (total_rows - s_abs - mtot, LANES), bf16)
        frame_ref[s_abs:s_abs + mtot, :] = (act * mask).astype(bf16)

    # conv1 + ReLU, taps read straight from the bf16 input block.
    a1 = jnp.maximum(conv_taps(x_ref, w1_ref) + b1_ref[...], 0.0)
    store_frame(fa_ref, a1)

    # conv2 + ReLU
    a2 = jnp.maximum(conv_taps(fa_ref, w2_ref) + b2_ref[...], 0.0)
    store_frame(fb_ref, a2)

    # conv3 + residual (skip = conv1 activation) + ReLU, masked to valid pixels
    a3 = jnp.maximum(conv_taps(fb_ref, w3_ref) + b3_ref[...] + a1, 0.0) * mask

    # Per-image global average pool + shared FC; one (bp,128) full-tile store.
    rows = [jnp.sum(a3[b * r:b * r + m, :], axis=0, keepdims=True)
            for b in range(bblk)]
    if bp > bblk:
        rows.append(jnp.zeros((bp - bblk, LANES), f32))
    pooled = jnp.concatenate(rows, axis=0) * inv_hw            # (bp, 128) f32
    o_ref[...] = jnp.dot(pooled.astype(bf16), fcw_ref[...],
                         preferred_element_type=f32) + fcb_ref[...]


# --------------------------- parameter packing -----------------------------

def init_params(key, c_in=4, c_mid=8, emb=16):
    """Deterministic synthetic parameters for net_in (small ResNet stem)."""
    ks = jax.random.split(key, 8)
    sc = 0.1
    return {
        "conv1_w": sc * jax.random.normal(ks[0], (c_mid, c_in, 3, 3), jnp.float32),
        "conv1_b": sc * jax.random.normal(ks[1], (c_mid,), jnp.float32),
        "conv2_w": sc * jax.random.normal(ks[2], (c_mid, c_mid, 3, 3), jnp.float32),
        "conv2_b": sc * jax.random.normal(ks[3], (c_mid,), jnp.float32),
        "conv3_w": sc * jax.random.normal(ks[4], (c_mid, c_mid, 3, 3), jnp.float32),
        "conv3_b": sc * jax.random.normal(ks[5], (c_mid,), jnp.float32),
        "fc_w":    sc * jax.random.normal(ks[6], (c_mid, emb), jnp.float32),
        "fc_b":    sc * jax.random.normal(ks[7], (emb,), jnp.float32),
    }


def pack_params(params):
    """One-time packing: PyTorch (Cout,Cin,3,3) -> lane-dense bf16 tap matrices."""
    def pack_conv(w_oihw, b):
        cout, cin = w_oihw.shape[0], w_oihw.shape[1]
        taps = jnp.transpose(w_oihw, (2, 3, 1, 0)).reshape(9, cin, cout)
        w9 = jnp.zeros((9, LANES, LANES), jnp.bfloat16)
        w9 = w9.at[:, :cin, :cout].set(taps.astype(jnp.bfloat16))
        bb = jnp.zeros((1, LANES), jnp.float32).at[0, :cout].set(
            b.astype(jnp.float32))
        return w9, bb

    w1, b1 = pack_conv(params["conv1_w"], params["conv1_b"])
    w2, b2 = pack_conv(params["conv2_w"], params["conv2_b"])
    w3, b3 = pack_conv(params["conv3_w"], params["conv3_b"])
    cmid, emb = params["fc_w"].shape
    fcw = jnp.zeros((LANES, LANES), jnp.bfloat16).at[:cmid, :emb].set(
        params["fc_w"].astype(jnp.bfloat16))
    fcb = jnp.zeros((1, LANES), jnp.float32).at[0, :emb].set(
        params["fc_b"].astype(jnp.float32))
    return {"w1": w1, "b1": b1, "w2": w2, "b2": b2, "w3": w3, "b3": b3,
            "fcw": fcw, "fcb": fcb}


# ------------------------------ forward pass --------------------------------

def siamese_forward(packed, x_nchw, *, emb_dim):
    """SiameseNetwork.forward(x) == net_in(x), one fused Pallas kernel."""
    # TODO(synk): the PyTorch module takes net_in as an injected submodule; a
    # concrete small ResNet-style embedding net is instantiated here.
    B, cin, H, W = x_nchw.shape
    n, s, m, lead, s_abs, r = _geometry(H, W)
    bblk = _choose_block(B)
    g = -(-B // bblk)                 # grid steps (>= 2 whenever B >= 2)
    b_pad = g * bblk
    mtot = (bblk - 1) * r + m         # interior slab rows per grid step
    total_rows = bblk * r             # frame slab rows per grid step
    bp = 8                            # output rows per block (full sublane tile)

    # NCHW -> zero-bordered flattened NHWC frames, channels padded to 128 lanes.
    x = jnp.transpose(x_nchw, (0, 2, 3, 1))
    x = jnp.pad(x, ((0, 0), (1, 1), (1, 1), (0, 0))).reshape(B, n, cin)
    x = jnp.pad(x, ((0, b_pad - B), (lead, r - lead - n), (0, LANES - cin)))
    x_frames = x.reshape(b_pad * r, LANES).astype(jnp.bfloat16)

    # Valid-pixel mask over the interior slab rows [s_abs, s_abs + mtot).
    q = jnp.arange(mtot)
    p = (q + s_abs) % r               # row inside this image's r-row block
    pf = p - lead                     # row inside the flattened (H+2)(W+2) frame
    fi, fj = pf // (W + 2), pf % (W + 2)
    valid = (pf >= 0) & (pf < n) & (fi >= 1) & (fi <= H) & (fj >= 1) & (fj <= W)
    mask = valid.astype(jnp.float32).reshape(mtot, 1)

    offs = tuple((dy - 1) * (W + 2) + (dx - 1)
                 for dy in range(3) for dx in range(3))
    kernel = functools.partial(_siamese_fused_kernel, offs=offs, s_abs=s_abs,
                               mtot=mtot, m=m, r=r, bblk=bblk, bp=bp,
                               total_rows=total_rows, inv_hw=1.0 / float(H * W))

    out = pl.pallas_call(
        kernel,
        out_shape=jax.ShapeDtypeStruct((g * bp, LANES), jnp.float32),
        grid=(g,),
        in_specs=[
            pl.BlockSpec((total_rows, LANES), lambda i: (i, 0)),   # input slab
            pl.BlockSpec((mtot, 1), lambda i: (0, 0)),             # pixel mask
            pl.BlockSpec((9, LANES, LANES), lambda i: (0, 0, 0)),  # conv1 taps
            pl.BlockSpec((1, LANES), lambda i: (0, 0)),            # conv1 bias
            pl.BlockSpec((9, LANES, LANES), lambda i: (0, 0, 0)),  # conv2 taps
            pl.BlockSpec((1, LANES), lambda i: (0, 0)),            # conv2 bias
            pl.BlockSpec((9, LANES, LANES), lambda i: (0, 0, 0)),  # conv3 taps
            pl.BlockSpec((1, LANES), lambda i: (0, 0)),            # conv3 bias
            pl.BlockSpec((LANES, LANES), lambda i: (0, 0)),        # fc weight
            pl.BlockSpec((1, LANES), lambda i: (0, 0)),            # fc bias
        ],
        out_specs=pl.BlockSpec((bp, LANES), lambda i: (i, 0)),
        scratch_shapes=[pltpu.VMEM((total_rows, LANES), jnp.bfloat16),
                        pltpu.VMEM((total_rows, LANES), jnp.bfloat16)],
        compiler_params=pltpu.CompilerParams(
            dimension_semantics=("parallel",),
            vmem_limit_bytes=32 * 1024 * 1024),
    )(x_frames, mask,
      packed["w1"], packed["b1"], packed["w2"], packed["b2"],
      packed["w3"], packed["b3"], packed["fcw"], packed["fcb"])

    out = out.reshape(g, bp, LANES)[:, :bblk, :].reshape(g * bblk, LANES)
    return out[:B, :emb_dim]          # (B, emb_dim) f32


# ------------------------------ reference -----------------------------------

def reference_forward(params, x_nchw):
    """Pure-JAX reference of the same net_in (sanity check only)."""
    def conv3x3(x, w, b):
        B, H, W, C = x.shape
        xp = jnp.pad(x, ((0, 0), (1, 1), (1, 1), (0, 0)))
        cols = [xp[:, dy:dy + H, dx:dx + W, :]
                for dy in range(3) for dx in range(3)]
        patches = jnp.stack(cols, axis=3).reshape(B, H, W, 9 * C)
        wm = jnp.transpose(w, (2, 3, 1, 0)).reshape(9 * C, w.shape[0])
        return patches @ wm + b

    x = jnp.transpose(x_nchw, (0, 2, 3, 1))
    h = jax.nn.relu(conv3x3(x, params["conv1_w"], params["conv1_b"]))
    g = jax.nn.relu(conv3x3(h, params["conv2_w"], params["conv2_b"]))
    y = jax.nn.relu(conv3x3(g, params["conv3_w"], params["conv3_b"]) + h)
    pooled = jnp.mean(y, axis=(1, 2))
    return pooled @ params["fc_w"] + params["fc_b"]


if __name__ == "__main__":
    key = jax.random.PRNGKey(0)
    k_param, k_x1, k_x2 = jax.random.split(key, 3)
    params = init_params(k_param, c_in=4, c_mid=8, emb=16)
    packed = pack_params(params)                      # one-time weight packing

    fwd = jax.jit(functools.partial(siamese_forward, emb_dim=16))

    # Small-batch path (Bblk=1, 2 grid steps), NCHW like PyTorch.
    x_small = jax.random.normal(k_x1, (2, 4, 16, 16), jnp.float32)
    out_small = jax.block_until_ready(fwd(packed, x_small))
    assert out_small.shape == (2, 16) and out_small.dtype == jnp.float32
    err = float(jnp.max(jnp.abs(out_small - reference_forward(params, x_small))))
    assert err < 5e-2, f"small-batch mismatch vs reference: max|diff|={err}"

    # Batch-blocked path (Bblk=8, 2 grid steps) exercising the stacked slab.
    x_big = jax.random.normal(k_x2, (16, 4, 16, 16), jnp.float32)
    out_big = jax.block_until_ready(fwd(packed, x_big))
    assert out_big.shape == (16, 16)
    err_big = float(jnp.max(jnp.abs(out_big - reference_forward(params, x_big))))
    assert err_big < 5e-2, f"batched mismatch vs reference: max|diff|={err_big}"

    print("KERNEL_OK")
</pallas_src>

<mosaic_0001>
module attributes {stable_mosaic.version = 11 : i64} {
  func.func @_siamese_fused_kernel(%arg0: i32, %arg1: memref<352x128xbf16, #tpu.memory_space<vmem>>, %arg2: memref<286x1xf32, #tpu.memory_space<vmem>>, %arg3: memref<9x128x128xbf16, #tpu.memory_space<vmem>>, %arg4: memref<1x128xf32, #tpu.memory_space<vmem>>, %arg5: memref<9x128x128xbf16, #tpu.memory_space<vmem>>, %arg6: memref<1x128xf32, #tpu.memory_space<vmem>>, %arg7: memref<9x128x128xbf16, #tpu.memory_space<vmem>>, %arg8: memref<1x128xf32, #tpu.memory_space<vmem>>, %arg9: memref<128x128xbf16, #tpu.memory_space<vmem>>, %arg10: memref<1x128xf32, #tpu.memory_space<vmem>>, %arg11: memref<8x128xf32, #tpu.memory_space<vmem>>, %arg12: memref<352x128xbf16, #tpu.memory_space<vmem>>, %arg13: memref<352x128xbf16, #tpu.memory_space<vmem>>) attributes {dimension_semantics = [#tpu.dimension_semantics<parallel>], iteration_bounds = array<i64: 2>, scalar_prefetch = 0 : i64, scratch_operands = 2 : i64, tpu.core_type = #tpu.core_type<tc>, window_params = [{transform_indices = @transform_0, window_bounds = array<i64: 352, 128>}, {pipeline_mode = #tpu.pipeline_mode<synchronous>, transform_indices = @transform_1, window_bounds = array<i64: 286, 1>}, {pipeline_mode = #tpu.pipeline_mode<synchronous>, transform_indices = @transform_2, window_bounds = array<i64: 9, 128, 128>}, {pipeline_mode = #tpu.pipeline_mode<synchronous>, transform_indices = @transform_3, window_bounds = array<i64: 1, 128>}, {pipeline_mode = #tpu.pipeline_mode<synchronous>, transform_indices = @transform_4, window_bounds = array<i64: 9, 128, 128>}, {pipeline_mode = #tpu.pipeline_mode<synchronous>, transform_indices = @transform_5, window_bounds = array<i64: 1, 128>}, {pipeline_mode = #tpu.pipeline_mode<synchronous>, transform_indices = @transform_6, window_bounds = array<i64: 9, 128, 128>}, {pipeline_mode = #tpu.pipeline_mode<synchronous>, transform_indices = @transform_7, window_bounds = array<i64: 1, 128>}, {pipeline_mode = #tpu.pipeline_mode<synchronous>, transform_indices = @transform_8, window_bounds = array<i64: 128, 128>}, {pipeline_mode = #tpu.pipeline_mode<synchronous>, transform_indices = @transform_9, window_bounds = array<i64: 1, 128>}, {transform_indices = @transform_10, window_bounds = array<i64: 8, 128>}]} {
    %c0 = arith.constant 0 : index
    %c0_0 = arith.constant 0 : index
    %0 = vector.load %arg2[%c0, %c0_0] : memref<286x1xf32, #tpu.memory_space<vmem>>, vector<286x1xf32>
    %c13 = arith.constant 13 : index
    %c0_1 = arith.constant 0 : index
    %1 = vector.load %arg1[%c13, %c0_1] : memref<352x128xbf16, #tpu.memory_space<vmem>>, vector<286x128xbf16>
    %c0_2 = arith.constant 0 : index
    %c0_3 = arith.constant 0 : index
    %c0_4 = arith.constant 0 : index
    %2 = vector.load %arg3[%c0_2, %c0_3, %c0_4] : memref<9x128x128xbf16, #tpu.memory_space<vmem>>, vector<1x128x128xbf16>
    %3 = vector.shape_cast %2 : vector<1x128x128xbf16> to vector<128x128xbf16>
    %cst = arith.constant dense<0.000000e+00> : vector<286x128xf32>
    %4 = tpu.matmul %1, %3, %cst {dimension_numbers = #tpu.dot_dimension_numbers<[1], [0], [0], [1], [0, 0, 1, 1], [], []>} : vector<286x128xbf16>, vector<128x128xbf16>, vector<286x128xf32> -> vector<286x128xf32>
    %c14 = arith.constant 14 : index
    %c0_5 = arith.constant 0 : index
    %5 = vector.load %arg1[%c14, %c0_5] : memref<352x128xbf16, #tpu.memory_space<vmem>>, vector<286x128xbf16>
    %c1 = arith.constant 1 : index
    %c0_6 = arith.constant 0 : index
    %c0_7 = arith.constant 0 : index
    %6 = vector.load %arg3[%c1, %c0_6, %c0_7] : memref<9x128x128xbf16, #tpu.memory_space<vmem>>, vector<1x128x128xbf16>
    %7 = vector.shape_cast %6 : vector<1x128x128xbf16> to vector<128x128xbf16>
    %cst_8 = arith.constant dense<0.000000e+00> : vector<286x128xf32>
    %8 = tpu.matmul %5, %7, %cst_8 {dimension_numbers = #tpu.dot_dimension_numbers<[1], [0], [0], [1], [0, 0, 1, 1], [], []>} : vector<286x128xbf16>, vector<128x128xbf16>, vector<286x128xf32> -> vector<286x128xf32>
    %9 = arith.addf %4, %8 : vector<286x128xf32>
    %c15 = arith.constant 15 : index
    %c0_9 = arith.constant 0 : index
    %10 = vector.load %arg1[%c15, %c0_9] : memref<352x128xbf16, #tpu.memory_space<vmem>>, vector<286x128xbf16>
    %c2 = arith.constant 2 : index
    %c0_10 = arith.constant 0 : index
    %c0_11 = arith.constant 0 : index
    %11 = vector.load %arg3[%c2, %c0_10, %c0_11] : memref<9x128x128xbf16, #tpu.memory_space<vmem>>, vector<1x128x128xbf16>
    %12 = vector.shape_cast %11 : vector<1x128x128xbf16> to vector<128x128xbf16>
    %cst_12 = arith.constant dense<0.000000e+00> : vector<286x128xf32>
    %13 = tpu.matmul %10, %12, %cst_12 {dimension_numbers = #tpu.dot_dimension_numbers<[1], [0], [0], [1], [0, 0, 1, 1], [], []>} : vector<286x128xbf16>, vector<128x128xbf16>, vector<286x128xf32> -> vector<286x128xf32>
    %14 = arith.addf %9, %13 : vector<286x128xf32>
    %c31 = arith.constant 31 : index
    %c0_13 = arith.constant 0 : index
    %15 = vector.load %arg1[%c31, %c0_13] : memref<352x128xbf16, #tpu.memory_space<vmem>>, vector<286x128xbf16>
    %c3 = arith.constant 3 : index
    %c0_14 = arith.constant 0 : index
    %c0_15 = arith.constant 0 : index
    %16 = vector.load %arg3[%c3, %c0_14, %c0_15] : memref<9x128x128xbf16, #tpu.memory_space<vmem>>, vector<1x128x128xbf16>
    %17 = vector.shape_cast %16 : vector<1x128x128xbf16> to vector<128x128xbf16>
    %cst_16 = arith.constant dense<0.000000e+00> : vector<286x128xf32>
    %18 = tpu.matmul %15, %17, %cst_16 {dimension_numbers = #tpu.dot_dimension_numbers<[1], [0], [0], [1], [0, 0, 1, 1], [], []>} : vector<286x128xbf16>, vector<128x128xbf16>, vector<286x128xf32> -> vector<286x128xf32>
    %19 = arith.addf %14, %18 : vector<286x128xf32>
    %c32 = arith.constant 32 : index
    %c0_17 = arith.constant 0 : index
    %20 = vector.load %arg1[%c32, %c0_17] : memref<352x128xbf16, #tpu.memory_space<vmem>>, vector<286x128xbf16>
    %c4 = arith.constant 4 : index
    %c0_18 = arith.constant 0 : index
    %c0_19 = arith.constant 0 : index
    %21 = vector.load %arg3[%c4, %c0_18, %c0_19] : memref<9x128x128xbf16, #tpu.memory_space<vmem>>, vector<1x128x128xbf16>
    %22 = vector.shape_cast %21 : vector<1x128x128xbf16> to vector<128x128xbf16>
    %cst_20 = arith.constant dense<0.000000e+00> : vector<286x128xf32>
    %23 = tpu.matmul %20, %22, %cst_20 {dimension_numbers = #tpu.dot_dimension_numbers<[1], [0], [0], [1], [0, 0, 1, 1], [], []>} : vector<286x128xbf16>, vector<128x128xbf16>, vector<286x128xf32> -> vector<286x128xf32>
    %24 = arith.addf %19, %23 : vector<286x128xf32>
    %c33 = arith.constant 33 : index
    %c0_21 = arith.constant 0 : index
    %25 = vector.load %arg1[%c33, %c0_21] : memref<352x128xbf16, #tpu.memory_space<vmem>>, vector<286x128xbf16>
    %c5 = arith.constant 5 : index
    %c0_22 = arith.constant 0 : index
    %c0_23 = arith.constant 0 : index
    %26 = vector.load %arg3[%c5, %c0_22, %c0_23] : memref<9x128x128xbf16, #tpu.memory_space<vmem>>, vector<1x128x128xbf16>
    %27 = vector.shape_cast %26 : vector<1x128x128xbf16> to vector<128x128xbf16>
    %cst_24 = arith.constant dense<0.000000e+00> : vector<286x128xf32>
    %28 = tpu.matmul %25, %27, %cst_24 {dimension_numbers = #tpu.dot_dimension_numbers<[1], [0], [0], [1], [0, 0, 1, 1], [], []>} : vector<286x128xbf16>, vector<128x128xbf16>, vector<286x128xf32> -> vector<286x128xf32>
    %29 = arith.addf %24, %28 : vector<286x128xf32>
    %c49 = arith.constant 49 : index
    %c0_25 = arith.constant 0 : index
    %30 = vector.load %arg1[%c49, %c0_25] : memref<352x128xbf16, #tpu.memory_space<vmem>>, vector<286x128xbf16>
    %c6 = arith.constant 6 : index
    %c0_26 = arith.constant 0 : index
    %c0_27 = arith.constant 0 : index
    %31 = vector.load %arg3[%c6, %c0_26, %c0_27] : memref<9x128x128xbf16, #tpu.memory_space<vmem>>, vector<1x128x128xbf16>
    %32 = vector.shape_cast %31 : vector<1x128x128xbf16> to vector<128x128xbf16>
    %cst_28 = arith.constant dense<0.000000e+00> : vector<286x128xf32>
    %33 = tpu.matmul %30, %32, %cst_28 {dimension_numbers = #tpu.dot_dimension_numbers<[1], [0], [0], [1], [0, 0, 1, 1], [], []>} : vector<286x128xbf16>, vector<128x128xbf16>, vector<286x128xf32> -> vector<286x128xf32>
    %34 = arith.addf %29, %33 : vector<286x128xf32>
    %c50 = arith.constant 50 : index
    %c0_29 = arith.constant 0 : index
    %35 = vector.load %arg1[%c50, %c0_29] : memref<352x128xbf16, #tpu.memory_space<vmem>>, vector<286x128xbf16>
    %c7 = arith.constant 7 : index
    %c0_30 = arith.constant 0 : index
    %c0_31 = arith.constant 0 : index
    %36 = vector.load %arg3[%c7, %c0_30, %c0_31] : memref<9x128x128xbf16, #tpu.memory_space<vmem>>, vector<1x128x128xbf16>
    %37 = vector.shape_cast %36 : vector<1x128x128xbf16> to vector<128x128xbf16>
    %cst_32 = arith.constant dense<0.000000e+00> : vector<286x128xf32>
    %38 = tpu.matmul %35, %37, %cst_32 {dimension_numbers = #tpu.dot_dimension_numbers<[1], [0], [0], [1], [0, 0, 1, 1], [], []>} : vector<286x128xbf16>, vector<128x128xbf16>, vector<286x128xf32> -> vector<286x128xf32>
    %39 = arith.addf %34, %38 : vector<286x128xf32>
    %c51 = arith.constant 51 : index
    %c0_33 = arith.constant 0 : index
    %40 = vector.load %arg1[%c51, %c0_33] : memref<352x128xbf16, #tpu.memory_space<vmem>>, vector<286x128xbf16>
    %c8 = arith.constant 8 : index
    %c0_34 = arith.constant 0 : index
    %c0_35 = arith.constant 0 : index
    %41 = vector.load %arg3[%c8, %c0_34, %c0_35] : memref<9x128x128xbf16, #tpu.memory_space<vmem>>, vector<1x128x128xbf16>
    %42 = vector.shape_cast %41 : vector<1x128x128xbf16> to vector<128x128xbf16>
    %cst_36 = arith.constant dense<0.000000e+00> : vector<286x128xf32>
    %43 = tpu.matmul %40, %42, %cst_36 {dimension_numbers = #tpu.dot_dimension_numbers<[1], [0], [0], [1], [0, 0, 1, 1], [], []>} : vector<286x128xbf16>, vector<128x128xbf16>, vector<286x128xf32> -> vector<286x128xf32>
    %44 = arith.addf %39, %43 : vector<286x128xf32>
    %c0_37 = arith.constant 0 : index
    %c0_38 = arith.constant 0 : index
    %45 = vector.load %arg4[%c0_37, %c0_38] : memref<1x128xf32, #tpu.memory_space<vmem>>, vector<1x128xf32>
    %46 = vector.broadcast %45 : vector<1x128xf32> to vector<286x128xf32>
    %47 = arith.addf %44, %46 : vector<286x128xf32>
    %cst_39 = arith.constant 0.000000e+00 : f32
    %48 = vector.broadcast %cst_39 : f32 to vector<286x128xf32>
    %49 = arith.maximumf %47, %48 : vector<286x128xf32>
    %cst_40 = arith.constant 0.000000e+00 : bf16
    %50 = vector.broadcast %cst_40 : bf16 to vector<32x128xbf16>
    %c0_41 = arith.constant 0 : index
    %c0_42 = arith.constant 0 : index
    %51 = vector.load %arg12[%c0_41, %c0_42] : memref<352x128xbf16, #tpu.memory_space<vmem>>, vector<32x128xbf16>
    tpu.vector_store %arg12[%c0_41, %c0_42], %50 {strides = array<i32>} : memref<352x128xbf16, #tpu.memory_space<vmem>>, vector<32x128xbf16>,
    %cst_43 = arith.constant 0.000000e+00 : bf16
    %52 = vector.broadcast %cst_43 : bf16 to vector<34x128xbf16>
    %c318 = arith.constant 318 : index
    %c0_44 = arith.constant 0 : index
    %53 = vector.load %arg12[%c318, %c0_44] : memref<352x128xbf16, #tpu.memory_space<vmem>>, vector<34x128xbf16>
    tpu.vector_store %arg12[%c318, %c0_44], %52 {strides = array<i32>} : memref<352x128xbf16, #tpu.memory_space<vmem>>, vector<34x128xbf16>,
    %54 = vector.broadcast %0 : vector<286x1xf32> to vector<286x128xf32>
    %55 = arith.mulf %49, %54 : vector<286x128xf32>
    %56 = arith.truncf %55 : vector<286x128xf32> to vector<286x128xbf16>
    %c32_45 = arith.constant 32 : index
    %c0_46 = arith.constant 0 : index
    %57 = vector.load %arg12[%c32_45, %c0_46] : memref<352x128xbf16, #tpu.memory_space<vmem>>, vector<286x128xbf16>
    tpu.vector_store %arg12[%c32_45, %c0_46], %56 {strides = array<i32>} : memref<352x128xbf16, #tpu.memory_space<vmem>>, vector<286x128xbf16>,
    %c13_47 = arith.constant 13 : index
    %c0_48 = arith.constant 0 : index
    %58 = vector.load %arg12[%c13_47, %c0_48] : memref<352x128xbf16, #tpu.memory_space<vmem>>, vector<286x128xbf16>
    %c0_49 = arith.constant 0 : index
    %c0_50 = arith.constant 0 : index
    %c0_51 = arith.constant 0 : index
    %59 = vector.load %arg5[%c0_49, %c0_50, %c0_51] : memref<9x128x128xbf16, #tpu.memory_space<vmem>>, vector<1x128x128xbf16>
    %60 = vector.shape_cast %59 : vector<1x128x128xbf16> to vector<128x128xbf16>
    %cst_52 = arith.constant dense<0.000000e+00> : vector<286x128xf32>
    %61 = tpu.matmul %58, %60, %cst_52 {dimension_numbers = #tpu.dot_dimension_numbers<[1], [0], [0], [1], [0, 0, 1, 1], [], []>} : vector<286x128xbf16>, vector<128x128xbf16>, vector<286x128xf32> -> vector<286x128xf32>
    %c14_53 = arith.constant 14 : index
    %c0_54 = arith.constant 0 : index
    %62 = vector.load %arg12[%c14_53, %c0_54] : memref<352x128xbf16, #tpu.memory_space<vmem>>, vector<286x128xbf16>
    %c1_55 = arith.constant 1 : index
    %c0_56 = arith.constant 0 : index
    %c0_57 = arith.constant 0 : index
    %63 = vector.load %arg5[%c1_55, %c0_56, %c0_57] : memref<9x128x128xbf16, #tpu.memory_space<vmem>>, vector<1x128x128xbf16>
    %64 = vector.shape_cast %63 : vector<1x128x128xbf16> to vector<128x128xbf16>
    %cst_58 = arith.constant dense<0.000000e+00> : vector<286x128xf32>
    %65 = tpu.matmul %62, %64, %cst_58 {dimension_numbers = #tpu.dot_dimension_numbers<[1], [0], [0], [1], [0, 0, 1, 1], [], []>} : vector<286x128xbf16>, vector<128x128xbf16>, vector<286x128xf32> -> vector<286x128xf32>
    %66 = arith.addf %61, %65 : vector<286x128xf32>
    %c15_59 = arith.constant 15 : index
    %c0_60 = arith.constant 0 : index
    %67 = vector.load %arg12[%c15_59, %c0_60] : memref<352x128xbf16, #tpu.memory_space<vmem>>, vector<286x128xbf16>
    %c2_61 = arith.constant 2 : index
    %c0_62 = arith.constant 0 : index
    %c0_63 = arith.constant 0 : index
    %68 = vector.load %arg5[%c2_61, %c0_62, %c0_63] : memref<9x128x128xbf16, #tpu.memory_space<vmem>>, vector<1x128x128xbf16>
    %69 = vector.shape_cast %68 : vector<1x128x128xbf16> to vector<128x128xbf16>
    %cst_64 = arith.constant dense<0.000000e+00> : vector<286x128xf32>
    %70 = tpu.matmul %67, %69, %cst_64 {dimension_numbers = #tpu.dot_dimension_numbers<[1], [0], [0], [1], [0, 0, 1, 1], [], []>} : vector<286x128xbf16>, vector<128x128xbf16>, vector<286x128xf32> -> vector<286x128xf32>
    %71 = arith.addf %66, %70 : vector<286x128xf32>
    %c31_65 = arith.constant 31 : index
    %c0_66 = arith.constant 0 : index
    %72 = vector.load %arg12[%c31_65, %c0_66] : memref<352x128xbf16, #tpu.memory_space<vmem>>, vector<286x128xbf16>
    %c3_67 = arith.constant 3 : index
    %c0_68 = arith.constant 0 : index
    %c0_69 = arith.constant 0 : index
    %73 = vector.load %arg5[%c3_67, %c0_68, %c0_69] : memref<9x128x128xbf16, #tpu.memory_space<vmem>>, vector<1x128x128xbf16>
    %74 = vector.shape_cast %73 : vector<1x128x128xbf16> to vector<128x128xbf16>
    %cst_70 = arith.constant dense<0.000000e+00> : vector<286x128xf32>
    %75 = tpu.matmul %72, %74, %cst_70 {dimension_numbers = #tpu.dot_dimension_numbers<[1], [0], [0], [1], [0, 0, 1, 1], [], []>} : vector<286x128xbf16>, vector<128x128xbf16>, vector<286x128xf32> -> vector<286x128xf32>
    %76 = arith.addf %71, %75 : vector<286x128xf32>
    %c32_71 = arith.constant 32 : index
    %c0_72 = arith.constant 0 : index
    %77 = vector.load %arg12[%c32_71, %c0_72] : memref<352x128xbf16, #tpu.memory_space<vmem>>, vector<286x128xbf16>
    %c4_73 = arith.constant 4 : index
    %c0_74 = arith.constant 0 : index
    %c0_75 = arith.constant 0 : index
    %78 = vector.load %arg5[%c4_73, %c0_74, %c0_75] : memref<9x128x128xbf16, #tpu.memory_space<vmem>>, vector<1x128x128xbf16>
    %79 = vector.shape_cast %78 : vector<1x128x128xbf16> to vector<128x128xbf16>
    %cst_76 = arith.constant dense<0.000000e+00> : vector<286x128xf32>
    %80 = tpu.matmul %77, %79, %cst_76 {dimension_numbers = #tpu.dot_dimension_numbers<[1], [0], [0], [1], [0, 0, 1, 1], [], []>} : vector<286x128xbf16>, vector<128x128xbf16>, vector<286x128xf32> -> vector<286x128xf32>
    %81 = arith.addf %76, %80 : vector<286x128xf32>
    %c33_77 = arith.constant 33 : index
    %c0_78 = arith.constant 0 : index
    %82 = vector.load %arg12[%c33_77, %c0_78] : memref<352x128xbf16, #tpu.memory_space<vmem>>, vector<286x128xbf16>
    %c5_79 = arith.constant 5 : index
    %c0_80 = arith.constant 0 : index
    %c0_81 = arith.constant 0 : index
    %83 = vector.load %arg5[%c5_79, %c0_80, %c0_81] : memref<9x128x128xbf16, #tpu.memory_space<vmem>>, vector<1x128x128xbf16>
    %84 = vector.shape_cast %83 : vector<1x128x128xbf16> to vector<128x128xbf16>
    %cst_82 = arith.constant dense<0.000000e+00> : vector<286x128xf32>
    %85 = tpu.matmul %82, %84, %cst_82 {dimension_numbers = #tpu.dot_dimension_numbers<[1], [0], [0], [1], [0, 0, 1, 1], [], []>} : vector<286x128xbf16>, vector<128x128xbf16>, vector<286x128xf32> -> vector<286x128xf32>
    %86 = arith.addf %81, %85 : vector<286x128xf32>
    %c49_83 = arith.constant 49 : index
    %c0_84 = arith.constant 0 : index
    %87 = vector.load %arg12[%c49_83, %c0_84] : memref<352x128xbf16, #tpu.memory_space<vmem>>, vector<286x128xbf16>
    %c6_85 = arith.constant 6 : index
    %c0_86 = arith.constant 0 : index
    %c0_87 = arith.constant 0 : index
    %88 = vector.load %arg5[%c6_85, %c0_86, %c0_87] : memref<9x128x128xbf16, #tpu.memory_space<vmem>>, vector<1x128x128xbf16>
    %89 = vector.shape_cast %88 : vector<1x128x128xbf16> to vector<128x128xbf16>
    %cst_88 = arith.constant dense<0.000000e+00> : vector<286x128xf32>
    %90 = tpu.matmul %87, %89, %cst_88 {dimension_numbers = #tpu.dot_dimension_numbers<[1], [0], [0], [1], [0, 0, 1, 1], [], []>} : vector<286x128xbf16>, vector<128x128xbf16>, vector<286x128xf32> -> vector<286x128xf32>
    %91 = arith.addf %86, %90 : vector<286x128xf32>
    %c50_89 = arith.constant 50 : index
    %c0_90 = arith.constant 0 : index
    %92 = vector.load %arg12[%c50_89, %c0_90] : memref<352x128xbf16, #tpu.memory_space<vmem>>, vector<286x128xbf16>
    %c7_91 = arith.constant 7 : index
    %c0_92 = arith.constant 0 : index
    %c0_93 = arith.constant 0 : index
    %93 = vector.load %arg5[%c7_91, %c0_92, %c0_93] : memref<9x128x128xbf16, #tpu.memory_space<vmem>>, vector<1x128x128xbf16>
    %94 = vector.shape_cast %93 : vector<1x128x128xbf16> to vector<128x128xbf16>
    %cst_94 = arith.constant dense<0.000000e+00> : vector<286x128xf32>
    %95 = tpu.matmul %92, %94, %cst_94 {dimension_numbers = #tpu.dot_dimension_numbers<[1], [0], [0], [1], [0, 0, 1, 1], [], []>} : vector<286x128xbf16>, vector<128x128xbf16>, vector<286x128xf32> -> vector<286x128xf32>
    %96 = arith.addf %91, %95 : vector<286x128xf32>
    %c51_95 = arith.constant 51 : index
    %c0_96 = arith.constant 0 : index
    %97 = vector.load %arg12[%c51_95, %c0_96] : memref<352x128xbf16, #tpu.memory_space<vmem>>, vector<286x128xbf16>
    %c8_97 = arith.constant 8 : index
    %c0_98 = arith.constant 0 : index
    %c0_99 = arith.constant 0 : index
    %98 = vector.load %arg5[%c8_97, %c0_98, %c0_99] : memref<9x128x128xbf16, #tpu.memory_space<vmem>>, vector<1x128x128xbf16>
    %99 = vector.shape_cast %98 : vector<1x128x128xbf16> to vector<128x128xbf16>
    %cst_100 = arith.constant dense<0.000000e+00> : vector<286x128xf32>
    %100 = tpu.matmul %97, %99, %cst_100 {dimension_numbers = #tpu.dot_dimension_numbers<[1], [0], [0], [1], [0, 0, 1, 1], [], []>} : vector<286x128xbf16>, vector<128x128xbf16>, vector<286x128xf32> -> vector<286x128xf32>
    %101 = arith.addf %96, %100 : vector<286x128xf32>
    %c0_101 = arith.constant 0 : index
    %c0_102 = arith.constant 0 : index
    %102 = vector.load %arg6[%c0_101, %c0_102] : memref<1x128xf32, #tpu.memory_space<vmem>>, vector<1x128xf32>
    %103 = vector.broadcast %102 : vector<1x128xf32> to vector<286x128xf32>
    %104 = arith.addf %101, %103 : vector<286x128xf32>
    %cst_103 = arith.constant 0.000000e+00 : f32
    %105 = vector.broadcast %cst_103 : f32 to vector<286x128xf32>
    %106 = arith.maximumf %104, %105 : vector<286x128xf32>
    %cst_104 = arith.constant 0.000000e+00 : bf16
    %107 = vector.broadcast %cst_104 : bf16 to vector<32x128xbf16>
    %c0_105 = arith.constant 0 : index
    %c0_106 = arith.constant 0 : index
    %108 = vector.load %arg13[%c0_105, %c0_106] : memref<352x128xbf16, #tpu.memory_space<vmem>>, vector<32x128xbf16>
    tpu.vector_store %arg13[%c0_105, %c0_106], %107 {strides = array<i32>} : memref<352x128xbf16, #tpu.memory_space<vmem>>, vector<32x128xbf16>,
    %cst_107 = arith.constant 0.000000e+00 : bf16
    %109 = vector.broadcast %cst_107 : bf16 to vector<34x128xbf16>
    %c318_108 = arith.constant 318 : index
    %c0_109 = arith.constant 0 : index
    %110 = vector.load %arg13[%c318_108, %c0_109] : memref<352x128xbf16, #tpu.memory_space<vmem>>, vector<34x128xbf16>
    tpu.vector_store %arg13[%c318_108, %c0_109], %109 {strides = array<i32>} : memref<352x128xbf16, #tpu.memory_space<vmem>>, vector<34x128xbf16>,
    %111 = vector.broadcast %0 : vector<286x1xf32> to vector<286x128xf32>
    %112 = arith.mulf %106, %111 : vector<286x128xf32>
    %113 = arith.truncf %112 : vector<286x128xf32> to vector<286x128xbf16>
    %c32_110 = arith.constant 32 : index
    %c0_111 = arith.constant 0 : index
    %114 = vector.load %arg13[%c32_110, %c0_111] : memref<352x128xbf16, #tpu.memory_space<vmem>>, vector<286x128xbf16>
    tpu.vector_store %arg13[%c32_110, %c0_111], %113 {strides = array<i32>} : memref<352x128xbf16, #tpu.memory_space<vmem>>, vector<286x128xbf16>,
    %c13_112 = arith.constant 13 : index
    %c0_113 = arith.constant 0 : index
    %115 = vector.load %arg13[%c13_112, %c0_113] : memref<352x128xbf16, #tpu.memory_space<vmem>>, vector<286x128xbf16>
    %c0_114 = arith.constant 0 : index
    %c0_115 = arith.constant 0 : index
    %c0_116 = arith.constant 0 : index
    %116 = vector.load %arg7[%c0_114, %c0_115, %c0_116] : memref<9x128x128xbf16, #tpu.memory_space<vmem>>, vector<1x128x128xbf16>
    %117 = vector.shape_cast %116 : vector<1x128x128xbf16> to vector<128x128xbf16>
    %cst_117 = arith.constant dense<0.000000e+00> : vector<286x128xf32>
    %118 = tpu.matmul %115, %117, %cst_117 {dimension_numbers = #tpu.dot_dimension_numbers<[1], [0], [0], [1], [0, 0, 1, 1], [], []>} : vector<286x128xbf16>, vector<128x128xbf16>, vector<286x128xf32> -> vector<286x128xf32>
    %c14_118 = arith.constant 14 : index
    %c0_119 = arith.constant 0 : index
    %119 = vector.load %arg13[%c14_118, %c0_119] : memref<352x128xbf16, #tpu.memory_space<vmem>>, vector<286x128xbf16>
    %c1_120 = arith.constant 1 : index
    %c0_121 = arith.constant 0 : index
    %c0_122 = arith.constant 0 : index
    %120 = vector.load %arg7[%c1_120, %c0_121, %c0_122] : memref<9x128x128xbf16, #tpu.memory_space<vmem>>, vector<1x128x128xbf16>
    %121 = vector.shape_cast %120 : vector<1x128x128xbf16> to vector<128x128xbf16>
    %cst_123 = arith.constant dense<0.000000e+00> : vector<286x128xf32>
    %122 = tpu.matmul %119, %121, %cst_123 {dimension_numbers = #tpu.dot_dimension_numbers<[1], [0], [0], [1], [0, 0, 1, 1], [], []>} : vector<286x128xbf16>, vector<128x128xbf16>, vector<286x128xf32> -> vector<286x128xf32>
    %123 = arith.addf %118, %122 : vector<286x128xf32>
    %c15_124 = arith.constant 15 : index
    %c0_125 = arith.constant 0 : index
    %124 = vector.load %arg13[%c15_124, %c0_125] : memref<352x128xbf16, #tpu.memory_space<vmem>>, vector<286x128xbf16>
    %c2_126 = arith.constant 2 : index
    %c0_127 = arith.constant 0 : index
    %c0_128 = arith.constant 0 : index
    %125 = vector.load %arg7[%c2_126, %c0_127, %c0_128] : memref<9x128x128xbf16, #tpu.memory_space<vmem>>, vector<1x128x128xbf16>
    %126 = vector.shape_cast %125 : vector<1x128x128xbf16> to vector<128x128xbf16>
    %cst_129 = arith.constant dense<0.000000e+00> : vector<286x128xf32>
    %127 = tpu.matmul %124, %126, %cst_129 {dimension_numbers = #tpu.dot_dimension_numbers<[1], [0], [0], [1], [0, 0, 1, 1], [], []>} : vector<286x128xbf16>, vector<128x128xbf16>, vector<286x128xf32> -> vector<286x128xf32>
    %128 = arith.addf %123, %127 : vector<286x128xf32>
    %c31_130 = arith.constant 31 : index
    %c0_131 = arith.constant 0 : index
    %129 = vector.load %arg13[%c31_130, %c0_131] : memref<352x128xbf16, #tpu.memory_space<vmem>>, vector<286x128xbf16>
    %c3_132 = arith.constant 3 : index
    %c0_133 = arith.constant 0 : index
    %c0_134 = arith.constant 0 : index
    %130 = vector.load %arg7[%c3_132, %c0_133, %c0_134] : memref<9x128x128xbf16, #tpu.memory_space<vmem>>, vector<1x128x128xbf16>
    %131 = vector.shape_cast %130 : vector<1x128x128xbf16> to vector<128x128xbf16>
    %cst_135 = arith.constant dense<0.000000e+00> : vector<286x128xf32>
    %132 = tpu.matmul %129, %131, %cst_135 {dimension_numbers = #tpu.dot_dimension_numbers<[1], [0], [0], [1], [0, 0, 1, 1], [], []>} : vector<286x128xbf16>, vector<128x128xbf16>, vector<286x128xf32> -> vector<286x128xf32>
    %133 = arith.addf %128, %132 : vector<286x128xf32>
    %c32_136 = arith.constant 32 : index
    %c0_137 = arith.constant 0 : index
    %134 = vector.load %arg13[%c32_136, %c0_137] : memref<352x128xbf16, #tpu.memory_space<vmem>>, vector<286x128xbf16>
    %c4_138 = arith.constant 4 : index
    %c0_139 = arith.constant 0 : index
    %c0_140 = arith.constant 0 : index
    %135 = vector.load %arg7[%c4_138, %c0_139, %c0_140] : memref<9x128x128xbf16, #tpu.memory_space<vmem>>, vector<1x128x128xbf16>
    %136 = vector.shape_cast %135 : vector<1x128x128xbf16> to vector<128x128xbf16>
    %cst_141 = arith.constant dense<0.000000e+00> : vector<286x128xf32>
    %137 = tpu.matmul %134, %136, %cst_141 {dimension_numbers = #tpu.dot_dimension_numbers<[1], [0], [0], [1], [0, 0, 1, 1], [], []>} : vector<286x128xbf16>, vector<128x128xbf16>, vector<286x128xf32> -> vector<286x128xf32>
    %138 = arith.addf %133, %137 : vector<286x128xf32>
    %c33_142 = arith.constant 33 : index
    %c0_143 = arith.constant 0 : index
    %139 = vector.load %arg13[%c33_142, %c0_143] : memref<352x128xbf16, #tpu.memory_space<vmem>>, vector<286x128xbf16>
    %c5_144 = arith.constant 5 : index
    %c0_145 = arith.constant 0 : index
    %c0_146 = arith.constant 0 : index
    %140 = vector.load %arg7[%c5_144, %c0_145, %c0_146] : memref<9x128x128xbf16, #tpu.memory_space<vmem>>, vector<1x128x128xbf16>
    %141 = vector.shape_cast %140 : vector<1x128x128xbf16> to vector<128x128xbf16>
    %cst_147 = arith.constant dense<0.000000e+00> : vector<286x128xf32>
    %142 = tpu.matmul %139, %141, %cst_147 {dimension_numbers = #tpu.dot_dimension_numbers<[1], [0], [0], [1], [0, 0, 1, 1], [], []>} : vector<286x128xbf16>, vector<128x128xbf16>, vector<286x128xf32> -> vector<286x128xf32>
    %143 = arith.addf %138, %142 : vector<286x128xf32>
    %c49_148 = arith.constant 49 : index
    %c0_149 = arith.constant 0 : index
    %144 = vector.load %arg13[%c49_148, %c0_149] : memref<352x128xbf16, #tpu.memory_space<vmem>>, vector<286x128xbf16>
    %c6_150 = arith.constant 6 : index
    %c0_151 = arith.constant 0 : index
    %c0_152 = arith.constant 0 : index
    %145 = vector.load %arg7[%c6_150, %c0_151, %c0_152] : memref<9x128x128xbf16, #tpu.memory_space<vmem>>, vector<1x128x128xbf16>
    %146 = vector.shape_cast %145 : vector<1x128x128xbf16> to vector<128x128xbf16>
    %cst_153 = arith.constant dense<0.000000e+00> : vector<286x128xf32>
    %147 = tpu.matmul %144, %146, %cst_153 {dimension_numbers = #tpu.dot_dimension_numbers<[1], [0], [0], [1], [0, 0, 1, 1], [], []>} : vector<286x128xbf16>, vector<128x128xbf16>, vector<286x128xf32> -> vector<286x128xf32>
    %148 = arith.addf %143, %147 : vector<286x128xf32>
    %c50_154 = arith.constant 50 : index
    %c0_155 = arith.constant 0 : index
    %149 = vector.load %arg13[%c50_154, %c0_155] : memref<352x128xbf16, #tpu.memory_space<vmem>>, vector<286x128xbf16>
    %c7_156 = arith.constant 7 : index
    %c0_157 = arith.constant 0 : index
    %c0_158 = arith.constant 0 : index
    %150 = vector.load %arg7[%c7_156, %c0_157, %c0_158] : memref<9x128x128xbf16, #tpu.memory_space<vmem>>, vector<1x128x128xbf16>
    %151 = vector.shape_cast %150 : vector<1x128x128xbf16> to vector<128x128xbf16>
    %cst_159 = arith.constant dense<0.000000e+00> : vector<286x128xf32>
    %152 = tpu.matmul %149, %151, %cst_159 {dimension_numbers = #tpu.dot_dimension_numbers<[1], [0], [0], [1], [0, 0, 1, 1], [], []>} : vector<286x128xbf16>, vector<128x128xbf16>, vector<286x128xf32> -> vector<286x128xf32>
    %153 = arith.addf %148, %152 : vector<286x128xf32>
    %c51_160 = arith.constant 51 : index
    %c0_161 = arith.constant 0 : index
    %154 = vector.load %arg13[%c51_160, %c0_161] : memref<352x128xbf16, #tpu.memory_space<vmem>>, vector<286x128xbf16>
    %c8_162 = arith.constant 8 : index
    %c0_163 = arith.constant 0 : index
    %c0_164 = arith.constant 0 : index
    %155 = vector.load %arg7[%c8_162, %c0_163, %c0_164] : memref<9x128x128xbf16, #tpu.memory_space<vmem>>, vector<1x128x128xbf16>
    %156 = vector.shape_cast %155 : vector<1x128x128xbf16> to vector<128x128xbf16>
    %cst_165 = arith.constant dense<0.000000e+00> : vector<286x128xf32>
    %157 = tpu.matmul %154, %156, %cst_165 {dimension_numbers = #tpu.dot_dimension_numbers<[1], [0], [0], [1], [0, 0, 1, 1], [], []>} : vector<286x128xbf16>, vector<128x128xbf16>, vector<286x128xf32> -> vector<286x128xf32>
    %158 = arith.addf %153, %157 : vector<286x128xf32>
    %c0_166 = arith.constant 0 : index
    %c0_167 = arith.constant 0 : index
    %159 = vector.load %arg8[%c0_166, %c0_167] : memref<1x128xf32, #tpu.memory_space<vmem>>, vector<1x128xf32>
    %160 = vector.broadcast %159 : vector<1x128xf32> to vector<286x128xf32>
    %161 = arith.addf %158, %160 : vector<286x128xf32>
    %162 = arith.addf %161, %49 : vector<286x128xf32>
    %cst_168 = arith.constant 0.000000e+00 : f32
    %163 = vector.broadcast %cst_168 : f32 to vector<286x128xf32>
    %164 = arith.maximumf %162, %163 : vector<286x128xf32>
    %165 = vector.broadcast %0 : vector<286x1xf32> to vector<286x128xf32>
    %166 = arith.mulf %164, %165 : vector<286x128xf32>
    %cst_169 = arith.constant dense<0.000000e+00> : vector<128xf32>
    %167 = vector.multi_reduction <add>, %166, %cst_169 [0] : vector<286x128xf32> to vector<128xf32>
    %168 = vector.shape_cast %167 : vector<128xf32> to vector<1x128xf32>
    %cst_170 = arith.constant 0.000000e+00 : f32
    %169 = vector.broadcast %cst_170 : f32 to vector<7x128xf32>
    %170 = tpu.concatenate %168, %169 in 0 : vector<1x128xf32>, vector<7x128xf32> -> vector<8x128xf32>
    %cst_171 = arith.constant 3.906250e-03 : f32
    %171 = vector.broadcast %cst_171 : f32 to vector<8x128xf32>
    %172 = arith.mulf %170, %171 : vector<8x128xf32>
    %173 = arith.truncf %172 : vector<8x128xf32> to vector<8x128xbf16>
    %c0_172 = arith.constant 0 : index
    %c0_173 = arith.constant 0 : index
    %174 = vector.load %arg9[%c0_172, %c0_173] : memref<128x128xbf16, #tpu.memory_space<vmem>>, vector<128x128xbf16>
    %cst_174 = arith.constant dense<0.000000e+00> : vector<8x128xf32>
    %175 = tpu.matmul %173, %174, %cst_174 {dimension_numbers = #tpu.dot_dimension_numbers<[1], [0], [0], [1], [0, 0, 1, 1], [], []>} : vector<8x128xbf16>, vector<128x128xbf16>, vector<8x128xf32> -> vector<8x128xf32>
    %c0_175 = arith.constant 0 : index
    %c0_176 = arith.constant 0 : index
    %176 = vector.load %arg10[%c0_175, %c0_176] : memref<1x128xf32, #tpu.memory_space<vmem>>, vector<1x128xf32>
    %177 = vector.broadcast %176 : vector<1x128xf32> to vector<8x128xf32>
    %178 = arith.addf %175, %177 : vector<8x128xf32>
    %c0_177 = arith.constant 0 : index
    %c0_178 = arith.constant 0 : index
    %179 = vector.load %arg11[%c0_177, %c0_178] : memref<8x128xf32, #tpu.memory_space<vmem>>, vector<8x128xf32>
    tpu.vector_store %arg11[%c0_177, %c0_178], %178 {strides = array<i32>} : memref<8x128xf32, #tpu.memory_space<vmem>>, vector<8x128xf32>,
    return
  }
  func.func @transform_0(%arg0: i32) -> (i32, i32) {
    %c0_i32 = arith.constant 0 : i32
    %c0_i32_0 = arith.constant 0 : i32
    return %arg0, %c0_i32 : i32, i32
  }
  func.func @transform_1(%arg0: i32) -> (i32, i32) {
    %c0_i32 = arith.constant 0 : i32
    %c0_i32_0 = arith.constant 0 : i32
    %c0_i32_1 = arith.constant 0 : i32
    return %c0_i32, %c0_i32_0 : i32, i32
  }
  func.func @transform_2(%arg0: i32) -> (i32, i32, i32) {
    %c0_i32 = arith.constant 0 : i32
    %c0_i32_0 = arith.constant 0 : i32
    %c0_i32_1 = arith.constant 0 : i32
    %c0_i32_2 = arith.constant 0 : i32
    return %c0_i32, %c0_i32_0, %c0_i32_1 : i32, i32, i32
  }
  func.func @transform_3(%arg0: i32) -> (i32, i32) {
    %c0_i32 = arith.constant 0 : i32
    %c0_i32_0 = arith.constant 0 : i32
    %c0_i32_1 = arith.constant 0 : i32
    return %c0_i32, %c0_i32_0 : i32, i32
  }
  func.func @transform_4(%arg0: i32) -> (i32, i32, i32) {
    %c0_i32 = arith.constant 0 : i32
    %c0_i32_0 = arith.constant 0 : i32
    %c0_i32_1 = arith.constant 0 : i32
    %c0_i32_2 = arith.constant 0 : i32
    return %c0_i32, %c0_i32_0, %c0_i32_1 : i32, i32, i32
  }
  func.func @transform_5(%arg0: i32) -> (i32, i32) {
    %c0_i32 = arith.constant 0 : i32
    %c0_i32_0 = arith.constant 0 : i32
    %c0_i32_1 = arith.constant 0 : i32
    return %c0_i32, %c0_i32_0 : i32, i32
  }
  func.func @transform_6(%arg0: i32) -> (i32, i32, i32) {
    %c0_i32 = arith.constant 0 : i32
    %c0_i32_0 = arith.constant 0 : i32
    %c0_i32_1 = arith.constant 0 : i32
    %c0_i32_2 = arith.constant 0 : i32
    return %c0_i32, %c0_i32_0, %c0_i32_1 : i32, i32, i32
  }
  func.func @transform_7(%arg0: i32) -> (i32, i32) {
    %c0_i32 = arith.constant 0 : i32
    %c0_i32_0 = arith.constant 0 : i32
    %c0_i32_1 = arith.constant 0 : i32
    return %c0_i32, %c0_i32_0 : i32, i32
  }
  func.func @transform_8(%arg0: i32) -> (i32, i32) {
    %c0_i32 = arith.constant 0 : i32
    %c0_i32_0 = arith.constant 0 : i32
    %c0_i32_1 = arith.constant 0 : i32
    return %c0_i32, %c0_i32_0 : i32, i32
  }
  func.func @transform_9(%arg0: i32) -> (i32, i32) {
    %c0_i32 = arith.constant 0 : i32
    %c0_i32_0 = arith.constant 0 : i32
    %c0_i32_1 = arith.constant 0 : i32
    return %c0_i32, %c0_i32_0 : i32, i32
  }
  func.func @transform_10(%arg0: i32) -> (i32, i32) {
    %c0_i32 = arith.constant 0 : i32
    %c0_i32_0 = arith.constant 0 : i32
    return %arg0, %c0_i32 : i32, i32
  }
}

</mosaic_0001>

<bundles_post_ra>
// kernel: siamese_forward.1
= control target key start
LH: loop header
LB: loop body
LE: loop exit
PB: predicated region body
PF: predicated region fallthrough
CT: control target
= control target key end

     0   :  { %15 = vsyncpa [#allocation5], 0  ;;  %s17905_s13 = smov 0   ;;  %s24228_s0 = inlined_call_operand.vmem [shape: bf16[704,128], index: 0, kind: input, shape index: {}]   ;;  %s24229_s1 = inlined_call_operand.vmem [shape: f32[286,1], index: 1, kind: input, shape index: {}]   ;;  %s24230_s2 = inlined_call_operand.vmem [shape: bf16[9,128,128], index: 2, kind: input, shape index: {}]   ;;  %s24231_s3 = inlined_call_operand.vmem [shape: f32[1,128], index: 3, kind: input, shape index: {}]   ;;  %s24232_s4 = inlined_call_operand.vmem [shape: bf16[9,128,128], index: 4, kind: input, shape index: {}]   ;;  %s24233_s5 = inlined_call_operand.vmem [shape: f32[1,128], index: 5, kind: input, shape index: {}]   ;;  %s24234_s6 = inlined_call_operand.vmem [shape: bf16[9,128,128], index: 6, kind: input, shape index: {}]   ;;  %s24235_s7 = inlined_call_operand.vmem [shape: f32[1,128], index: 7, kind: input, shape index: {}]   ;;  %s24236_s8 = inlined_call_operand.hbm [shape: bf16[128,128], index: 8, kind: input, shape index: {}]   ;;  %s24237_s9 = inlined_call_operand.vmem [shape: f32[1,128], index: 9, kind: input, shape index: {}]   ;;  %s24238_s10 = inlined_call_operand.vmem [shape: f32[16,128], index: 10, kind: output, shape index: {}]  }
   0x1 LB: > { %s17911_s14 = sadd.s32 4294967295, %s17842_s13   ;;  %p13853_p0 = scmp.ge.s32.totalorder %s17842_s13, 1  ;;  %s17842_s13 = sphi %s17905_s13, %s21_s13  }
   0x2   : > { %p267_p1 = scmp.lt.s32.totalorder %s17842_s13, 3  ;;  %s17844_s15 = smov [#allocation4]  }
   0x3   : > { %s300_s16 = sshll.u32 %s17844_s15, 4  ;;  %p17272_p3 = scmp.eq.s32.totalorder %s17911_s14, 0  ;;  %s301_s16 = int_to_ptr.vmem [resolvable:$true] %s300_s16 }
   0x4   : > { %p17915_p2 = pnand %p13853_p0, %p267_p1  ;;  %s17817_s18 = scalar_lea.vmem %s301_s16, 1024 }
   0x5   : > { %p17818_p7 = scmp.ne.s32.totalorder %s301_s16, %s17817_s18  ;;  %p17825_p10 = scmp.lt.s32.totalorder %s301_s16, %s301_s16 }
   0x6   : > { %p17268_p4 = pneg %p17915_p2  ;;  %p17826_p11 = scmp.lt.s32.totalorder %s17817_s18, %s17817_s18 }
   0x8   : > { %p17269_p5 = pnand %p17272_p3, %p17268_p4  ;;  %p17827_p12 = por %p17826_p11, %p17825_p10 }
   0xa   : > { %p17808_p6 = pneg %p17269_p5 }
   0xc   : > { %p17820_p8 = pnand %p17818_p7, %p17808_p6 }
   0xe   : > { %p17821_p9 = pneg %p17820_p8 }
  0x10   : > { %p17828_p13 = pnand %p17827_p12, %p17821_p9 }
  0x12   : > { %17831 = shalt.err (!%p17828_p13)
}
  0x13   : > { %s17845_s19 = smov 64   ;;  %s17846_s20 = smov 4  }
  0x14   : > { %17271 = dma.hbm_to_vmem [thread:$0]  (!%p17269_p5), %s24236_s8, 1024, %s301_s16, [#allocation5], %s17845_s19, %s17845_s19, %s17846_s20  }
  0x15   : > { %328 = sbr.rel (%p17915_p2) target bundleno = 1857 (0x741), region = 60 }
  0x1a   : > { %17837 = dma.done.wait (%p17272_p3), [#allocation5], 1024  }
  0x1b   : > { %17839 = vsyncadd (%p17272_p3), [#allocation5], 4294966272  ;;  %s365_s23 = smul.u32 44, %s17911_s14  ;;  %v17290_v0 = vld [vmem:[%s24230_s2 + $0x78] sm:$0xff]   ;;  %v17291_v1 = vld [vmem:[%s24230_s2 + $0x70] sm:$0xff]   ;;  %vm576_vm0 = vcmask 1044480  }
  0x1c   : > { %15824 = vmatprep.subr.bf16.mxu0 %v17290_v0  ;;  %17248 = vmatprep.subr.bf16.mxu1 %v17290_v0  ;;  %v17292_v2 = vld [vmem:[%s24230_s2 + $0x68] sm:$0xff]   ;;  %v17293_v3 = vld [vmem:[%s24230_s2 + $0x60] sm:$0xff]   ;;  %v17294_v11 = vld [vmem:[%s24230_s2 + $0x58] sm:$0xff]   ;;  %vm860_vm1 = vsmask.f32 5376  ;;  %vm3600_vm3 = vcmask 1046528  }
  0x1d   : > { %p366_p0 = scmp.lt.s32.totalorder %s365_s23, 87  ;;  %15825 = vmatpush3.bf16.msra.mxu0 %v17290_v0  ;;  %17256 = vmatpush3.bf16.msra.mxu1 %v17290_v0  ;;  %v17295_v16 = vld [vmem:[%s24230_s2 + $0x50] sm:$0xff]   ;;  %v17296_v18 = vld [vmem:[%s24230_s2 + $0x48] sm:$0xff]   ;;  %v17297_v21 = vld [vmem:[%s24230_s2 + $0x40] sm:$0xff]   ;;  %vm1295_vm2 = vsmask.f32 4352 }
  0x1e   : > { %15826 = vmatprep.subr.bf16.mxu0 %v17291_v1  ;;  %17249 = vmatprep.subr.bf16.mxu1 %v17291_v1  ;;  %v17304_v24 = vld [vmem:[%s24230_s2 + $0x38] sm:$0xff]   ;;  %v17306_v32 = vld [vmem:[%s24230_s2 + $0x30] sm:$0xff]   ;;  %v17312_v47 = vld [vmem:[%s24230_s2 + $0x28] sm:$0xff]   ;;  %vm2591_vm4 = vsmask.f32 7424  ;;  %vm17849_vm6 = vmmov 0  }
  0x1f   : > { %s25219_s23 = smov (!%p366_p0, %s365_s23), 87  ;;  %v17305_v28 = vld [vmem:[%s24230_s2 + $0xb8] sm:$0xff]   ;;  %v17307_v33 = vld [vmem:[%s24230_s2 + $0xb0] sm:$0xff]   ;;  %v17313_v48 = vld [vmem:[%s24230_s2 + $0xa8] sm:$0xff]   ;;  %vm4062_vm5 = vsmask.f32 6400 }
  0x20   : > { %s13858_s28 = sshll.u32 %s25219_s23, 2  ;;  %v17314_v58 = vld [vmem:[%s24230_s2 + $0x20] sm:$0xff]   ;;  %vm13661_vm7 = vcmask 1045504   ;;  %vm13670_vm8 = vcmask 1040384   ;;  %p371_p1 = scmp.lt.s32.totalorder %s17911_s14, 1 }
  0x21   : > { %s17946_s15 = scalar_lea.vmem %s24228_s0, %s13858_s28  ;;  %15827 = vmatpush3.bf16.msra.mxu0 %v17291_v1  ;;  %17257 = vmatpush3.bf16.msra.mxu1 %v17291_v1  ;;  %v17317_v63 = vld [vmem:[%s24230_s2 + $0xa0] sm:$0xff]  }
  0x22   : > { %15828 = vmatprep.subr.bf16.mxu0 %v17292_v2  ;;  %17250 = vmatprep.subr.bf16.mxu1 %v17292_v2  ;;  %v17952_v4 = vld [vmem:[%s17946_s15 + $0x8] sm:$0xf]  ;;  %v465_v5 = vld [vmem:[%s17946_s15 + $0x4] sm:$0x8]  ;;  %v17956_v6 = vld [vmem:[%s17946_s15 + $0xc] sm:$0xff]   ;;  %s25221_s14 = smov (!%p371_p1, %s17911_s14), 1 }
  0x23   : > { %v17959_v7 = vcombine.low %v465_v5, %v17952_v4  ;;  %v578_v8 = vrot.slane %v17956_v6, 3  ;;  %v17963_v9 = vld [vmem:[%s17946_s15 + $0x54] sm:$0xff]   ;;  %v17966_v10 = vld [vmem:[%s17946_s15 + $0x5c] sm:$0xff]   ;;  %v17988_v20 = vld [vmem:[%s17946_s15 + $0x64] sm:$0xff]   ;;  %v870_v22 = vshrl.u32 %v17956_v6, 16  ;;  %v873_v39 = vshll.u32 %v17956_v6, 16 }
  0x24   : > { %v596_v13 = vrot.slane %v17963_v9, 3  ;;  %v598_v14 = vrot.slane %v17966_v10, 3  ;;  %v17985_v19 = vld [vmem:[%s17946_s15 + $0x14] sm:$0xff]   ;;  %v17995_v23 = vld [vmem:[%s17946_s15 + $0x1c] sm:$0xff]   ;;  %v18001_v25 = vld [vmem:[%s17946_s15 + $0x6c] sm:$0xff]   ;;  %v600_v27 = vrot.slane %v17988_v20, 3 }
  0x25   : > { %15829 = vmatpush3.bf16.msra.mxu0 %v17292_v2  ;;  %17258 = vmatpush3.bf16.msra.mxu1 %v17292_v2  ;;  %v577_v12 = vrot.slane %v17959_v7, 3  ;;  %v580_v26 = vrot.slane %v17985_v19, 3  ;;  %v18010_v29 = vrot.slane %v870_v22, 2  ;;  %v582_v30 = vrot.slane %v17995_v23, 3  ;;  %v18014_v31 = vld [vmem:[%s17946_s15 + $0x24] sm:$0xff]   ;;  %v18024_v35 = vld [vmem:[%s17946_s15 + $0x74] sm:$0xff]  }
  0x26   : > { %15830 = vmatprep.subr.bf16.mxu0 %v17293_v3  ;;  %17251 = vmatprep.subr.bf16.mxu1 %v17293_v3  ;;  %v599_v17 = vsel %vm576_vm0, %v596_v13, %v598_v14  ;;  %v602_v34 = vrot.slane %v18001_v25, 3  ;;  %v601_v37 = vsel %vm576_vm0, %v598_v14, %v600_v27  ;;  %v18029_v38 = vld [vmem:[%s17946_s15 + $0x2c] sm:$0xff]   ;;  %v18033_v40 = vld [vmem:[%s17946_s15 + $0x7c] sm:$0xff]   ;;  %v879_v41 = vshrl.u32 %v17985_v19, 16  ;;  %v18048_v49 = vld [vmem:[%s17946_s15 + $0x34] sm:$0xff]  }
  0x27   : > { %v579_v15 = vsel %vm576_vm0, %v577_v12, %v578_v8  ;;  %15860 = vmatprep.mubr.bf16.mxu1 %v599_v17  ;;  %v581_v36 = vsel %vm576_vm0, %v578_v8, %v580_v26  ;;  %v584_v42 = vrot.slane %v18014_v31, 3  ;;  %v882_v43 = vshll.u32 %v17985_v19, 16  ;;  %v18051_v50 = vld [vmem:[%s17946_s15 + $0x84] sm:$0xff]   ;;  %v18068_v60 = vld [vmem:[%s17946_s15 + $0x3c] sm:$0xff]   ;;  %v18077_v1 = vld [vmem:[%s17946_s15 + $0x8c] sm:$0xff]  }
  0x28   : > { %15840 = vmatprep.mubr.bf16.mxu0 %v579_v15  ;;  %v583_v44 = vsel %vm576_vm0, %v580_v26, %v582_v30  ;;  %v603_v45 = vsel %vm576_vm0, %v600_v27, %v602_v34  ;;  %v604_v46 = vrot.slane %v18024_v35, 3  ;;  %v875_v51 = vrot.slane %v873_v39, 3  ;;  %v18080_v2 = vld [vmem:[%s17946_s15 + $0x94] ss:$0 sps:$4 sm:$0x33]   ;;  %v18097_v17 = vld [vmem:[%s17946_s15 + $0x4c] sm:$0xff]  }
  0x29   : > { %15831 = vmatpush3.bf16.msra.mxu0 %v17293_v3  ;;  %17259 = vmatpush3.bf16.msra.mxu1 %v17293_v3  ;;  %v586_v52 = vrot.slane %v18029_v38, 3  ;;  %v606_v53 = vrot.slane %v18033_v40, 3  ;;  %v881_v54 = vrot.slane %v879_v41, 2  ;;  %v888_v55 = vshrl.u32 %v17995_v23, 16  ;;  %v18083_v3 = vld [vmem:[%s17946_s15 + $0x44] sm:$0xff]  }
  0x2a   : > { %15832 = vmatprep.subr.bf16.mxu0 %v17294_v11  ;;  %17252 = vmatprep.subr.bf16.mxu1 %v17294_v11  ;;  %v884_v56 = vrot.slane %v882_v43, 3  ;;  %v891_v57 = vshll.u32 %v17995_v23, 16  ;;  %v588_v59 = vrot.slane %v18048_v49, 3  ;;  %v585_v61 = vsel %vm576_vm0, %v582_v30, %v584_v42  ;;  %v17330_v23 = vld [vmem:[%s24230_s2 + $0x88] sm:$0xff]  }
  0x2b   : > { %v605_v62 = vsel %vm576_vm0, %v602_v34, %v604_v46  ;;  %v608_v0 = vrot.slane %v18051_v50, 3  ;;  %v890_v5 = vrot.slane %v888_v55, 2  ;;  %v587_v8 = vsel %vm576_vm0, %v584_v42, %v586_v52  ;;  %v17321_v42 = vld [vmem:[%s24230_s2 + $0x10] sm:$0xff]  }
  0x2c   : > { %v893_v12 = vrot.slane %v891_v57, 3  ;;  %v1297_v14 = vshrl.u32 %v17959_v7, 16  ;;  %v607_v15 = vsel %vm576_vm0, %v604_v46, %v606_v53  ;;  %v589_v26 = vsel %vm576_vm0, %v586_v52, %v588_v59 }
  0x2d   : > { %15833 = vmatpush3.bf16.msra.mxu0 %v17294_v11  ;;  %17260 = vmatpush3.bf16.msra.mxu1 %v17294_v11  ;;  %v412_v11 = vld [vmem:[%s17946_s15 + $0x4] sm:$0xc]  ;;  %v609_v27 = vsel %vm576_vm0, %v606_v53, %v608_v0  ;;  %v885_v30 = vor.u32 %v884_v56, %v881_v54  ;;  %v612_v34 = vrot.slane %v18080_v2, 3  ;;  %v1304_v53 = vrot.slane %v870_v22, 3 }
  0x2e   : > { %15834 = vmatprep.subr.bf16.mxu0 %v17295_v16  ;;  %17253 = vmatprep.subr.bf16.mxu1 %v17295_v16  ;;  %v1305_v54 = vrot.slane %v873_v39, 4  ;;  %v1309_v39 = vrot.slane %v882_v43, 4  ;;  %v915_v43 = vshrl.u32 %v18048_v49, 16 }
  0x31   : > { %15835 = vmatpush3.bf16.msra.mxu0 %v17295_v16  ;;  %17261 = vmatpush3.bf16.msra.mxu1 %v17295_v16  ;;  %v17320_v16 = vld [vmem:[%s24230_s2 + $0x18] sm:$0xff]  }
  0x32   : > { %15836 = vmatprep.subr.bf16.mxu0 %v17296_v18  ;;  %17254 = vmatprep.subr.bf16.mxu1 %v17296_v18 }
  0x35   : > { %15837 = vmatpush3.bf16.msra.mxu0 %v17296_v18  ;;  %17262 = vmatpush3.bf16.msra.mxu1 %v17296_v18  ;;  %v13903_v18 = vcombine.low %v412_v11, %v17952_v4  ;;  %v590_v4 = vrot.slane %v18068_v60, 3 }
  0x36   : > { %15838 = vmatprep.subr.bf16.mxu0 %v17297_v21  ;;  %17255 = vmatprep.subr.bf16.mxu1 %v17297_v21 }
  0x39   : > { %15839 = vmatpush3.bf16.msra.mxu0 %v17297_v21  ;;  %17263 = vmatpush3.bf16.msra.mxu1 %v17297_v21  ;;  %v18101_v21 = vor.u32 %v875_v51, %v18010_v29  ;;  %v610_v29 = vrot.slane %v18077_v1, 3 }
  0x3a   : > { %15876 = vmatprep.subr.bf16.mxu1 %v17304_v24  ;;  %15928 = vmatprep.subr.bf16.mxu0 %v17305_v28 }
  0x3b   : > { %v18143_v22 = vsel %vm860_vm1, %v18101_v21, %v885_v30 }
  0x3c   : > { %15841 = vmatmul.mubr.bf16.vlgmr.msra.gmra.mxu0 %v581_v36  ;;  %15861 = vmatmul.mubr.bf16.vlgmr.msra.gmra.mxu1 %v601_v37  ;;  %v18115_v36 = vor.u32 %v893_v12, %v890_v5  ;;  %v897_v37 = vshrl.u32 %v18014_v31, 16  ;;  %v613_v5 = vsel %vm576_vm0, %v610_v29, %v612_v34 }
  0x3d   : > { %15877 = vmatpush3.bf16.msra.mxu1 %v17304_v24  ;;  %15929 = vmatpush3.bf16.msra.mxu0 %v17305_v28  ;;  %v1300_v24 = vshll.u32 %v17959_v7, 16  ;;  %v17322_v28 = vld [vmem:[%s24230_s2 + $0x98] sm:$0xff]   ;;  %v862_v7 = vshrl.u32 %v13903_v18, 16 }
  0x3e   : > { %15878 = vmatprep.subr.bf16.mxu1 %v17306_v32  ;;  %15930 = vmatprep.subr.bf16.mxu0 %v17307_v33  ;;  %v899_v56 = vrot.slane %v897_v37, 2  ;;  %v18156_v19 = vsel %vm860_vm1, %v885_v30, %v18115_v36 }
  0x3f   : > { %15844 = vmatprep.mubr.bf16.mxu0 %v583_v44  ;;  %15864 = vmatprep.mubr.bf16.mxu1 %v603_v45  ;;  %v594_v44 = vrot.slane %v18097_v17, 3  ;;  %v18122_v45 = vrot.slane %v1297_v14, 3  ;;  %v18124_v46 = vrot.slane %v1300_v24, 4  ;;  %v864_v51 = vrot.slane %v862_v7, 2 }
  0x40   : > { %v1316_v14 = vrot.slane %v897_v37, 3  ;;  %v1306_v24 = vor.u32 %v1305_v54, %v1304_v53 }
  0x41   : > { %15879 = vmatpush3.bf16.msra.mxu1 %v17306_v32  ;;  %15931 = vmatpush3.bf16.msra.mxu0 %v17307_v33  ;;  %v865_v32 = vshll.u32 %v13903_v18, 16  ;;  %v592_v33 = vrot.slane %v18083_v3, 3  ;;  %v1303_v18 = vor.u32 %v18124_v46, %v18122_v45  ;;  %v933_v45 = vshrl.u32 %v18083_v3, 16  ;;  %v17333_v46 = vld [vmem:[%s24230_s2 + $0x80] sm:$0xff]  }
  0x42   : > { %15880 = vmatprep.subr.bf16.mxu1 %v17312_v47  ;;  %15932 = vmatprep.subr.bf16.mxu0 %v17313_v48 }
  0x43   : > { %v867_v52 = vrot.slane %v865_v32, 3 }
  0x44   : > { %15845 = vmatmul.mubr.bf16.gmra.mxu0 %v585_v61  ;;  %15865 = vmatmul.mubr.bf16.gmra.mxu1 %v605_v62  ;;  %v909_v61 = vshll.u32 %v18029_v38, 16  ;;  %v591_v62 = vsel %vm576_vm0, %v588_v59, %v590_v4  ;;  %v1313_v59 = vrot.slane %v891_v57, 4  ;;  %v595_v57 = vsel %vm576_vm0, %v592_v33, %v594_v44 }
  0x45   : > { %15881 = vmatpush3.bf16.msra.mxu1 %v17312_v47  ;;  %15933 = vmatpush3.bf16.msra.mxu0 %v17313_v48  ;;  %v900_v47 = vshll.u32 %v18014_v31, 16  ;;  %v17328_v48 = vld [vmem:[%s24230_s2 + $0x90] sm:$0xff]   ;;  %v1308_v31 = vrot.slane %v879_v41, 3  ;;  %v611_v41 = vsel %vm576_vm0, %v608_v0, %v610_v29  ;;  %v918_v0 = vshll.u32 %v18048_v49, 16  ;;  %v17329_v29 = vld [vmem:[%s24230_s2] sm:$0xff]  }
  0x46   : > { %15882 = vmatprep.subr.bf16.mxu1 %v17314_v58  ;;  %15848 = vmatprep.mubr.bf16.mxu0 %v587_v8  ;;  %v868_v8 = vor.u32 %v867_v52, %v864_v51  ;;  %v911_v12 = vrot.slane %v909_v61, 3  ;;  %v917_v49 = vrot.slane %v915_v43, 2  ;;  %v1321_v34 = vrot.slane %v909_v61, 4 }
  0x47   : > { %15868 = vmatprep.mubr.bf16.mxu1 %v607_v15  ;;  %15934 = vmatprep.subr.bf16.mxu0 %v17317_v63  ;;  %v902_v6 = vrot.slane %v900_v47, 3  ;;  %v1317_v15 = vrot.slane %v900_v47, 4  ;;  %v1310_v30 = vor.u32 %v1309_v39, %v1308_v31  ;;  %v1307_v47 = vsel %vm1295_vm2, %v1303_v18, %v1306_v24 }
  0x48   : > { %v877_v37 = vsel %vm860_vm1, %v868_v8, %v18101_v21  ;;  %v936_v21 = vshll.u32 %v18083_v3, 16  ;;  %v1324_v31 = vrot.slane %v915_v43, 3  ;;  %v963_v8 = vshll.u32 %v17966_v10, 16 }
  0x49   : > { %15883 = vmatpush3.bf16.msra.mxu1 %v17314_v58  ;;  %15935 = vmatpush3.bf16.msra.mxu0 %v17317_v63  ;;  %v906_v58 = vshrl.u32 %v18029_v38, 16  ;;  %v593_v63 = vsel %vm576_vm0, %v590_v4, %v592_v33  ;;  %v1312_v38 = vrot.slane %v888_v55, 3  ;;  %v17327_v55 = vld [vmem:[%s24230_s2 + $0x8] sm:$0xff]   ;;  %v1318_v51 = vor.u32 %v1317_v15, %v1316_v14 }
  0x4a   : > { %15884 = vmatprep.subr.bf16.mxu1 %v17320_v16  ;;  %15936 = vmatprep.subr.bf16.mxu0 %v17322_v28  ;;  %v18197_v52 = vsel %vm1295_vm2, %v1306_v24, %v1310_v30  ;;  %v969_v15 = vshrl.u32 %v17988_v20, 16  ;;  %v972_v18 = vshll.u32 %v17988_v20, 16  ;;  %v17338_v20 = vld [vmem:[%s24230_s2 + $0xe8] sm:$0xff]  }
  0x4b   : > { %v908_v11 = vrot.slane %v906_v58, 2  ;;  %v1314_v4 = vor.u32 %v1313_v59, %v1312_v38  ;;  %v1320_v33 = vrot.slane %v906_v58, 3  ;;  %v1325_v58 = vrot.slane %v918_v0, 4 }
  0x4c   : > { %15849 = vmatmul.mubr.bf16.gmra.mxu0 %v589_v26  ;;  %15869 = vmatmul.mubr.bf16.gmra.mxu1 %v609_v27  ;;  %v920_v26 = vrot.slane %v918_v0, 3  ;;  %v927_v27 = vshll.u32 %v18068_v60, 16  ;;  %v942_v38 = vshrl.u32 %v18097_v17, 16  ;;  %v945_v59 = vshll.u32 %v18097_v17, 16  ;;  %v17348_v17 = vld [vmem:[%s24230_s2 + $0xc0] sm:$0xff]  }
  0x4d   : > { %15885 = vmatpush3.bf16.msra.mxu1 %v17320_v16  ;;  %15937 = vmatpush3.bf16.msra.mxu0 %v17322_v28  ;;  %v924_v16 = vshrl.u32 %v18068_v60, 16  ;;  %v903_v28 = vor.u32 %v902_v6, %v899_v56  ;;  %v912_v7 = vor.u32 %v911_v12, %v908_v11  ;;  %v597_v60 = vsel %vm576_vm0, %v594_v44, %v596_v13  ;;  %v17334_v13 = vld [vmem:[%s24230_s2 + $0xf8] sm:$0xff]   ;;  %v17336_v11 = vld [vmem:[%s24230_s2 + $0xf0] sm:$0xff]  }
  0x4e   : > { %15886 = vmatprep.subr.bf16.mxu1 %v17321_v42  ;;  %15852 = vmatprep.mubr.bf16.mxu0 %v591_v62  ;;  %v18200_v53 = vsel %vm1295_vm2, %v1310_v30, %v1314_v4  ;;  %v18205_v56 = vor.u32 %v1321_v34, %v1320_v33  ;;  %v951_v62 = vshrl.u32 %v17963_v9, 16  ;;  %v954_v6 = vshll.u32 %v17963_v9, 16  ;;  %v17335_v9 = vld [vmem:[%s24230_s2 + $0x138] sm:$0xff]  }
  0x4f   : > { %15872 = vmatprep.mubr.bf16.mxu1 %v611_v41  ;;  %15938 = vmatprep.subr.bf16.mxu0 %v17328_v48  ;;  %v926_v32 = vrot.slane %v924_v16, 2  ;;  %v18194_v44 = vsel %vm860_vm1, %v18115_v36, %v903_v28  ;;  %v18203_v54 = vsel %vm860_vm1, %v903_v28, %v912_v7  ;;  %v935_v36 = vrot.slane %v933_v45, 2 }
  0x50   : > { %v18217_v41 = vsel %vm1295_vm2, %v1314_v4, %v1318_v51  ;;  %v956_v43 = vrot.slane %v954_v6, 3  ;;  %v960_v0 = vshrl.u32 %v17966_v10, 16  ;;  %v965_v10 = vrot.slane %v963_v8, 3 }
  0x51   : > { %15887 = vmatpush3.bf16.msra.mxu1 %v17321_v42  ;;  %15939 = vmatpush3.bf16.msra.mxu0 %v17328_v48  ;;  %v929_v42 = vrot.slane %v927_v27, 3  ;;  %v921_v48 = vor.u32 %v920_v26, %v917_v49  ;;  %v1329_v49 = vrot.slane %v927_v27, 4  ;;  %v1340_v24 = vrot.slane %v951_v62, 3 }
  0x52   : > { %15888 = vmatprep.subr.bf16.mxu1 %v17327_v55  ;;  %15940 = vmatprep.subr.bf16.mxu0 %v17330_v23  ;;  %v962_v14 = vrot.slane %v960_v0, 2  ;;  %v971_v28 = vrot.slane %v969_v15, 2  ;;  %v1341_v30 = vrot.slane %v954_v6, 4  ;;  %v974_v4 = vrot.slane %v972_v18, 3 }
  0x53   : > { %v18207_v61 = vor.u32 %v929_v42, %v926_v32  ;;  %v18214_v39 = vsel %vm860_vm1, %v912_v7, %v921_v48  ;;  %v981_v7 = vshll.u32 %v18001_v25, 16  ;;  %v1344_v33 = vrot.slane %v960_v0, 3 }
  0x54   : > { %15853 = vmatmul.mubr.bf16.gmra.mxu0 %v593_v63  ;;  %15873 = vmatmul.mubr.bf16.gmra.mxu1 %v613_v5  ;;  %v938_v63 = vrot.slane %v936_v21, 3  ;;  %v953_v5 = vrot.slane %v951_v62, 2  ;;  %v1345_v34 = vrot.slane %v963_v8, 4  ;;  %v1349_v62 = vrot.slane %v972_v18, 4 }
  0x55   : > { %15889 = vmatpush3.bf16.msra.mxu1 %v17327_v55  ;;  %15856 = vmatprep.mubr.bf16.mxu0 %v595_v57  ;;  %v18229_v55 = vsel %vm1295_vm2, %v1318_v51, %v18205_v56  ;;  %v1328_v57 = vrot.slane %v924_v16, 3  ;;  %v18239_v12 = vsel %vm860_vm1, %v921_v48, %v18207_v61  ;;  %v18245_v16 = vrot.slane %v942_v38, 2 }
  0x56   : > { %15890 = vmatprep.subr.bf16.mxu1 %v17329_v29  ;;  %15892 = vmatprep.mubr.bf16.mxu1 %v877_v37  ;;  %v18249_v26 = vor.u32 %v938_v63, %v935_v36  ;;  %v18251_v27 = vor.u32 %v956_v43, %v953_v5  ;;  %v987_v48 = vshrl.u32 %v18024_v35, 16  ;;  %v990_v51 = vshll.u32 %v18024_v35, 16  ;;  %v17340_v43 = vld [vmem:[%s24230_s2 + $0xe0] sm:$0xff]  }
  0x57   : > { %15941 = vmatpush3.bf16.msra.mxu0 %v17330_v23  ;;  %v18231_v23 = vor.u32 %v1325_v58, %v1324_v31  ;;  %v18262_v32 = vor.u32 %v1329_v49, %v1328_v57  ;;  %v1348_v36 = vrot.slane %v969_v15, 3  ;;  %v996_v35 = vshrl.u32 %v18033_v40, 16 }
  0x58   : > { %15942 = vmatprep.subr.bf16.mxu0 %v17333_v46  ;;  %v989_v63 = vrot.slane %v987_v48, 2  ;;  %v992_v5 = vrot.slane %v990_v51, 3  ;;  %v999_v8 = vshll.u32 %v18033_v40, 16  ;;  %v1353_v15 = vrot.slane %v981_v7, 4 }
  0x59   : > { %15891 = vmatpush3.bf16.msra.mxu1 %v17329_v29  ;;  %v978_v29 = vshrl.u32 %v18001_v25, 16  ;;  %v983_v25 = vrot.slane %v981_v7, 3  ;;  %v1350_v57 = vor.u32 %v1349_v62, %v1348_v36  ;;  %v1356_v18 = vrot.slane %v987_v48, 3  ;;  %v17344_v36 = vld [vmem:[%s24230_s2 + $0xd0] sm:$0xff]  }
  0x5a   : > { %15980 = vmatprep.subr.bf16.mxu1 %v17334_v13  ;;  %v993_v49 = vor.u32 %v992_v5, %v989_v63  ;;  %v1001_v40 = vrot.slane %v999_v8, 3 }
  0x5b   : > { %15943 = vmatpush3.bf16.msra.mxu0 %v17333_v46  ;;  %v980_v42 = vrot.slane %v978_v29, 2  ;;  %v18268_v46 = vor.u32 %v1341_v30, %v1340_v24  ;;  %v1357_v30 = vrot.slane %v990_v51, 4 }
  0x5c   : > { %15857 = vmatmul.mubr.bf16.gmra.mxu0 %v597_v60  ;;  %15893 = vmatmul.mubr.bf16.vlgmr.msra.gmra.mxu1 %v18143_v22  ;;  %v966_v22 = vor.u32 %v965_v10, %v962_v14  ;;  %v975_v60 = vor.u32 %v974_v4, %v971_v28  ;;  %v998_v14 = vrot.slane %v996_v35, 2  ;;  %v1014_v4 = vshrl.u32 %v18077_v1, 16 }
  0x5d   : > { %15896 = vmatprep.mubr.bf16.mxu1 %v18156_v19  ;;  %15944 = vmatprep.mubr.bf16.mxu0 %v1307_v47  ;;  %v18260_v19 = vrot.slane %v945_v59, 3  ;;  %v1346_v47 = vor.u32 %v1345_v34, %v1344_v33  ;;  %v984_v58 = vor.u32 %v983_v25, %v980_v42  ;;  %v1360_v33 = vrot.slane %v996_v35, 3 }
  0x5e   : > { %15981 = vmatpush3.bf16.msra.mxu1 %v17334_v13  ;;  %16032 = vmatprep.subr.bf16.mxu0 %v17335_v9  ;;  %v18266_v37 = vsel %vm860_vm1, %v18251_v27, %v966_v22  ;;  %v17337_v13 = vld [vmem:[%s24230_s2 + $0x130] sm:$0xff]   ;;  %v18276_v31 = vsel %vm860_vm1, %v966_v22, %v975_v60  ;;  %v1361_v34 = vrot.slane %v999_v8, 4  ;;  %v1016_v25 = vrot.slane %v1014_v4, 2 }
  0x5f   : > { %15982 = vmatprep.subr.bf16.mxu1 %v17336_v11  ;;  %v18280_v6 = vsel %vm1295_vm2, %v18268_v46, %v1346_v47  ;;  %v18289_v0 = vsel %vm860_vm1, %v975_v60, %v984_v58  ;;  %v18299_v10 = vsel %vm1295_vm2, %v1346_v47, %v1350_v57 }
  0x60   : > { %v1362_v51 = vor.u32 %v1361_v34, %v1360_v33 }
  0x62   : > { %15983 = vmatpush3.bf16.msra.mxu1 %v17336_v11  ;;  %v1352_v11 = vrot.slane %v978_v29, 3  ;;  %v1017_v29 = vshll.u32 %v18077_v1, 16  ;;  %v17341_v1 = vld [vmem:[%s24230_s2 + $0x120] sm:$0xff]  }
  0x63   : > { %15984 = vmatprep.subr.bf16.mxu1 %v17338_v20 }
  0x64   : > { %15897 = vmatmul.mubr.bf16.gmra.mxu1 %v18194_v44  ;;  %15945 = vmatmul.mubr.bf16.vlgmr.msra.gmra.mxu0 %v18197_v52  ;;  %v1005_v44 = vshrl.u32 %v18051_v50, 16  ;;  %v17339_v52 = vld [vmem:[%s24230_s2 + $0x128] sm:$0xff]   ;;  %v1354_v24 = vor.u32 %v1353_v15, %v1352_v11  ;;  %v1019_v47 = vrot.slane %v1017_v29, 3 }
  0x65   : > { %16033 = vmatpush3.bf16.msra.mxu0 %v17335_v9  ;;  %15900 = vmatprep.mubr.bf16.mxu1 %v18203_v54  ;;  %v1008_v9 = vshll.u32 %v18051_v50, 16  ;;  %v18303_v54 = vsel %vm860_vm1, %v984_v58, %v993_v49  ;;  %v17342_v50 = vld [vmem:[%s24230_s2 + $0xd8] sm:$0xff]   ;;  %v1026_v58 = vshll.u32 %v18080_v2, 16 }
  0x66   : > { %15948 = vmatprep.mubr.bf16.mxu0 %v18200_v53  ;;  %16034 = vmatprep.subr.bf16.mxu0 %v17337_v13  ;;  %v1007_v28 = vrot.slane %v1005_v44, 2  ;;  %v1002_v53 = vor.u32 %v1001_v40, %v998_v14  ;;  %v18311_v7 = vsel %vm1295_vm2, %v1350_v57, %v1354_v24  ;;  %v1020_v63 = vor.u32 %v1019_v47, %v1016_v25  ;;  %v1666_v25 = vld [vmem:[%s17946_s15 + $0x24] sm:$0xf]  ;;  %v18438_v47 = vld [vmem:[%s17946_s15 + $0x28] sm:$0xf] }
  0x67   : > { %15985 = vmatpush3.bf16.msra.mxu1 %v17338_v20  ;;  %v1010_v22 = vrot.slane %v1008_v9, 3  ;;  %v1358_v20 = vor.u32 %v1357_v30, %v1356_v18  ;;  %v1364_v5 = vrot.slane %v1005_v44, 3  ;;  %v1365_v35 = vrot.slane %v1008_v9, 4  ;;  %v18396_v30 = vld [vmem:[%s24230_s2 + $0x178] sm:$0xff]  }
  0x68   : > { %15986 = vmatprep.subr.bf16.mxu1 %v17340_v43  ;;  %v18314_v60 = vsel %vm860_vm1, %v993_v49, %v1002_v53  ;;  %v948_v57 = vor.u32 %v18260_v19, %v18245_v16  ;;  %v1369_v49 = vrot.slane %v1017_v29, 4  ;;  %v940_v14 = vsel %vm860_vm1, %v18207_v61, %v18249_v26 }
  0x69   : > { %16035 = vmatpush3.bf16.msra.mxu0 %v17337_v13  ;;  %v1011_v42 = vor.u32 %v1010_v22, %v1007_v28  ;;  %v18320_v48 = vsel %vm1295_vm2, %v1354_v24, %v1358_v20  ;;  %v1023_v13 = vshrl.u32 %v18080_v2, 16  ;;  %v18335_v2 = vsel %vm1295_vm2, %v1358_v20, %v1362_v51  ;;  %v18416_v22 = vld [vmem:[%s17946_s15 + $0x10] sm:$0xf] }
  0x6a   : > { %16036 = vmatprep.subr.bf16.mxu0 %v17339_v52  ;;  %v1366_v11 = vor.u32 %v1365_v35, %v1364_v5  ;;  %v1327_v16 = vsel %vm1295_vm2, %v18205_v56, %v18231_v23  ;;  %v1331_v44 = vsel %vm1295_vm2, %v18231_v23, %v18262_v32  ;;  %v1333_v61 = vrot.slane %v936_v21, 4  ;;  %v17345_v21 = vld [vmem:[%s24230_s2 + $0x110] sm:$0xff]   ;;  %v17347_v23 = vld [vmem:[%s24230_s2 + $0x108] sm:$0xff]  }
  0x6b   : > { %15987 = vmatpush3.bf16.msra.mxu1 %v17340_v43  ;;  %v18330_v62 = vsel %vm860_vm1, %v1002_v53, %v1011_v42  ;;  %v1028_v43 = vrot.slane %v1026_v58, 3  ;;  %v18340_v8 = vsel %vm860_vm1, %v1011_v42, %v1020_v63  ;;  %v949_v56 = vsel %vm860_vm1, %v18249_v26, %v948_v57  ;;  %v17351_v53 = vld [vmem:[%s24230_s2 + $0x100] sm:$0xff]   ;;  %v17352_v42 = vld [vmem:[%s17946_s15 + $0x94] ss:$0 sps:$4 sm:$0x77]  }
  0x6c   : > { %15901 = vmatmul.mubr.bf16.gmra.mxu1 %v18214_v39  ;;  %15949 = vmatmul.mubr.bf16.gmra.mxu0 %v18217_v41  ;;  %v1025_v39 = vrot.slane %v1023_v13, 2  ;;  %v1368_v41 = vrot.slane %v1014_v4, 3  ;;  %v18352_v19 = vsel %vm1295_vm2, %v1362_v51, %v1366_v11  ;;  %v1336_v9 = vrot.slane %v942_v38, 3  ;;  %v18419_v4 = vld [vmem:[%s17946_s15 + $0x14] sm:$0xf] }
  0x6d   : > { %15904 = vmatprep.mubr.bf16.mxu1 %v18239_v12  ;;  %15952 = vmatprep.mubr.bf16.mxu0 %v18229_v55  ;;  %v17343_v55 = vld [vmem:[%s24230_s2 + $0x118] sm:$0xff]   ;;  %v1337_v18 = vrot.slane %v945_v59, 4  ;;  %v958_v26 = vsel %vm860_vm1, %v948_v57, %v18251_v27  ;;  %v18443_v58 = vld [vmem:[%s17946_s15 + $0x2c] sm:$0xf] }
  0x6e   : > { %16037 = vmatpush3.bf16.msra.mxu0 %v17339_v52  ;;  %15988 = vmatprep.subr.bf16.mxu1 %v17342_v50  ;;  %v1029_v12 = vor.u32 %v1028_v43, %v1025_v39  ;;  %v18354_v15 = vor.u32 %v1369_v49, %v1368_v41  ;;  %v1332_v52 = vrot.slane %v933_v45, 3  ;;  %v17346_v45 = vld [vmem:[%s24230_s2 + $0xc8] sm:$0xff]   ;;  %v18406_v27 = vld [vmem:[%s24230_s2 + $0x1b8] sm:$0xff]   ;;  %v18453_v39 = vld [vmem:[%s17946_s15 + $0x34] sm:$0xf] }
  0x6f   : > { %16038 = vmatprep.subr.bf16.mxu0 %v17341_v1  ;;  %15989 = vmatpush3.bf16.msra.mxu1 %v17342_v50  ;;  %v1338_v59 = vor.u32 %v1337_v18, %v1336_v9  ;;  %v18461_v49 = vld [vmem:[%s17946_s15 + $0x3c] sm:$0xf] }
  0x70   : > { %15990 = vmatprep.subr.bf16.mxu1 %v17344_v36  ;;  %v18364_v40 = vsel %vm860_vm1, %v1020_v63, %v1029_v12  ;;  %v18377_v3 = vsel %vm1295_vm2, %v1366_v11, %v18354_v15  ;;  %v1334_v38 = vor.u32 %v1333_v61, %v1332_v52  ;;  %v1376_v63 = vshll.u32 %v17352_v42, 16  ;;  %v18472_v52 = vld [vmem:[%s17946_s15 + $0x48] sm:$0xf] }
  0x72   : > { %16039 = vmatpush3.bf16.msra.mxu0 %v17341_v1  ;;  %v1335_v24 = vsel %vm1295_vm2, %v18262_v32, %v1334_v38  ;;  %v1339_v28 = vsel %vm1295_vm2, %v1334_v38, %v1338_v59  ;;  %v1343_v32 = vsel %vm1295_vm2, %v1338_v59, %v18268_v46  ;;  %v18422_v46 = vld [vmem:[%s17946_s15 + $0x18] sm:$0xf] }
  0x73   : > { %16040 = vmatprep.subr.bf16.mxu0 %v17343_v55  ;;  %15991 = vmatpush3.bf16.msra.mxu1 %v17344_v36  ;;  %v1373_v36 = vshrl.u32 %v17352_v42, 16  ;;  %v18508_v42 = vld [vmem:[%s17946_s15 + $0x5c] sm:$0xf] }
  0x74   : > { %15905 = vmatmul.mubr.bf16.gmra.mxu1 %v940_v14  ;;  %15953 = vmatmul.mubr.bf16.gmra.mxu0 %v1327_v16 }
  0x75   : > { %15908 = vmatprep.mubr.bf16.mxu1 %v949_v56  ;;  %15956 = vmatprep.mubr.bf16.mxu0 %v1331_v44  ;;  %v18469_v44 = vld [vmem:[%s17946_s15 + $0x44] sm:$0xf] }
  0x76   : > { %16041 = vmatpush3.bf16.msra.mxu0 %v17343_v55  ;;  %15992 = vmatprep.subr.bf16.mxu1 %v17346_v45  ;;  %v1378_v55 = vrot.slane %v1376_v63, 4 }
  0x77   : > { %16042 = vmatprep.subr.bf16.mxu0 %v17345_v21  ;;  %15993 = vmatpush3.bf16.msra.mxu1 %v17346_v45 }
  0x78   : > { %15994 = vmatprep.subr.bf16.mxu1 %v17348_v17 }
  0x7a   : > { %16043 = vmatpush3.bf16.msra.mxu0 %v17345_v21 }
  0x7b   : > { %16044 = vmatprep.subr.bf16.mxu0 %v17347_v23  ;;  %15995 = vmatpush3.bf16.msra.mxu1 %v17348_v17 }
  0x7c   : > { %15909 = vmatmul.mubr.bf16.gmra.mxu1 %v958_v26  ;;  %15957 = vmatmul.mubr.bf16.gmra.mxu0 %v1335_v24 }
  0x7d   : > { %15912 = vmatprep.mubr.bf16.mxu1 %v18266_v37  ;;  %15960 = vmatprep.mubr.bf16.mxu0 %v1339_v28  ;;  %v1660_v37 = vld [vmem:[%s17946_s15 + $0xc] sm:$0x8]  ;;  %v18488_v28 = vld [vmem:[%s17946_s15 + $0x50] sm:$0xf] }
  0x7e   : > { %16045 = vmatpush3.bf16.msra.mxu0 %v17347_v23  ;;  %16084 = vmatprep.subr.bf16.mxu1 %v18396_v30  ;;  %v13953_v29 = vcombine.low %v1660_v37, %v18416_v22  ;;  %v18498_v37 = vld [vmem:[%s17946_s15 + $0x58] sm:$0xf] }
  0x7f   : > { %16046 = vmatprep.subr.bf16.mxu0 %v17351_v53 }
  0x80   : > { %v1808_v50 = vshrl.u32 %v13953_v29, 16  ;;  %v1811_v20 = vshll.u32 %v13953_v29, 16 }
  0x82   : > { %16047 = vmatpush3.bf16.msra.mxu0 %v17351_v53  ;;  %v18492_v53 = vcombine.low %v18416_v22, %v18419_v4 }
  0x83   : > { %16136 = vmatprep.subr.bf16.mxu0 %v18406_v27 }
  0x84   : > { %15913 = vmatmul.mubr.bf16.gmra.mxu1 %v18276_v31  ;;  %15961 = vmatmul.mubr.bf16.gmra.mxu0 %v1343_v32  ;;  %v13954_v31 = vcombine.low %v18419_v4, %v18422_v46  ;;  %v18495_v32 = vld [vmem:[%s17946_s15 + $0x54] sm:$0xf] }
  0x85   : > { %15916 = vmatprep.mubr.bf16.mxu1 %v18289_v0  ;;  %15964 = vmatprep.mubr.bf16.mxu0 %v18280_v6  ;;  %v18430_v6 = vld [vmem:[%s17946_s15 + $0x1c] sm:$0xf]  ;;  %v1665_v0 = vld [vmem:[%s17946_s15 + $0x20] sm:$0xf] }
  0x86   : > { %v1816_v33 = vshrl.u32 %v13954_v31, 16  ;;  %v1819_v34 = vshll.u32 %v13954_v31, 16  ;;  %v13955_v1 = vcombine.low %v18430_v6, %v1665_v0  ;;  %v18480_v24 = vcombine.low %v1665_v0, %v1666_v25 }
  0x88   : > { %v1818_v51 = vrot.slane %v1816_v33, 3  ;;  %v1821_v13 = vrot.slane %v1819_v34, 4  ;;  %v1825_v5 = vshrl.u32 %v13955_v1, 16  ;;  %v1828_v35 = vshll.u32 %v13955_v1, 16  ;;  %v17362_v34 = vld [vmem:[%s24230_s2 + $0x170] sm:$0xff]  }
  0x89   : > { %v2608_v31 = vshll.u32 %v18480_v24, 16 }
  0x8a   : > { %v1822_v41 = vor.u32 %v1821_v13, %v1818_v51  ;;  %v1827_v12 = vrot.slane %v1825_v5, 3  ;;  %v1830_v14 = vrot.slane %v1828_v35, 4  ;;  %v13962_v13 = vcombine.low %v18495_v32, %v18498_v37 }
  0x8b   : > { %v18526_v5 = vrot.slane %v2608_v31, 1 }
  0x8c   : > { %15917 = vmatmul.mubr.bf16.gmra.mxu1 %v18303_v54  ;;  %15965 = vmatmul.mubr.bf16.gmra.mxu0 %v18299_v10  ;;  %v1810_v54 = vrot.slane %v1808_v50, 3  ;;  %v1813_v10 = vrot.slane %v1811_v20, 4  ;;  %v1831_v38 = vor.u32 %v1830_v14, %v1827_v12  ;;  %v18543_v14 = vld [vmem:[%s17946_s15 + $0x74] sm:$0xf] }
  0x8d   : > { %15920 = vmatprep.mubr.bf16.mxu1 %v18314_v60  ;;  %15968 = vmatprep.mubr.bf16.mxu0 %v18311_v7  ;;  %v13956_v60 = vcombine.low %v1666_v25, %v18438_v47  ;;  %v18446_v7 = vld [vmem:[%s17946_s15 + $0x30] sm:$0xf]  ;;  %24492 = vst [vmem:[#allocation7_spill] sm:$0xff] %v18526_v5 }
  0x8e   : > { %v1814_v43 = vor.u32 %v1813_v10, %v1810_v54  ;;  %v1832_v33 = vsel %vm1295_vm2, %v1822_v41, %v1831_v38 }
  0x8f   : > { %v1834_v57 = vshrl.u32 %v13956_v60, 16  ;;  %v1837_v11 = vshll.u32 %v13956_v60, 16  ;;  %v18520_v60 = vld [vmem:[%s17946_s15 + $0x64] sm:$0xf] }
  0x90   : > { %v1823_v61 = vsel %vm1295_vm2, %v1814_v43, %v1822_v41  ;;  %v17370_v41 = vld [vmem:[%s24230_s2 + $0x168] sm:$0xff]  }
  0x91   : > { %v1836_v56 = vrot.slane %v1834_v57, 3  ;;  %v1839_v9 = vrot.slane %v1837_v11, 4  ;;  %v18532_v57 = vld [vmem:[%s17946_s15 + $0x6c] sm:$0xf]  ;;  %v18535_v11 = vld [vmem:[%s17946_s15 + $0x70] sm:$0xf] }
  0x93   : > { %v1840_v26 = vor.u32 %v1839_v9, %v1836_v56  ;;  %v18549_v9 = vld [vmem:[%s17946_s15 + $0x7c] sm:$0xf] }
  0x94   : > { %15921 = vmatmul.mubr.bf16.gmra.mxu1 %v18330_v62  ;;  %15969 = vmatmul.mubr.bf16.gmra.mxu0 %v18320_v48  ;;  %v18456_v62 = vld [vmem:[%s17946_s15 + $0x38] sm:$0xf]  ;;  %v13957_v48 = vcombine.low %v18443_v58, %v18446_v7 }
  0x95   : > { %15924 = vmatprep.mubr.bf16.mxu1 %v18340_v8  ;;  %15972 = vmatprep.mubr.bf16.mxu0 %v18335_v2  ;;  %v1375_v8 = vrot.slane %v1373_v36, 3  ;;  %v18464_v2 = vld [vmem:[%s17946_s15 + $0x40] sm:$0xf]  ;;  %v13958_v16 = vcombine.low %v18453_v39, %v18456_v62  ;;  %v1841_v25 = vsel %vm1295_vm2, %v1831_v38, %v1840_v26  ;;  %v18523_v36 = vld [vmem:[%s17946_s15 + $0x68] sm:$0xf] }
  0x96   : > { %v1843_v18 = vshrl.u32 %v13957_v48, 16  ;;  %v1846_v45 = vshll.u32 %v13957_v48, 16  ;;  %v13959_v21 = vcombine.low %v18461_v49, %v18464_v2 }
  0x97   : > { %v1379_v17 = vor.u32 %v1378_v55, %v1375_v8  ;;  %v1852_v59 = vshrl.u32 %v13958_v16, 16  ;;  %v1855_v23 = vshll.u32 %v13958_v16, 16  ;;  %v18546_v16 = vld [vmem:[%s17946_s15 + $0x78] sm:$0xf] }
  0x98   : > { %v1848_v29 = vrot.slane %v1846_v45, 4  ;;  %v1861_v0 = vshrl.u32 %v13959_v21, 16  ;;  %v1864_v50 = vshll.u32 %v13959_v21, 16  ;;  %v17365_v45 = vld [vmem:[%s24230_s2 + $0x1b0] sm:$0xff]   ;;  %v1888_v21 = vshrl.u32 %v13962_v13, 16 }
  0x99   : > { %v1380_v20 = vsel %vm1295_vm2, %v18354_v15, %v1379_v17  ;;  %v1854_v22 = vrot.slane %v1852_v59, 3  ;;  %v1857_v4 = vrot.slane %v1855_v23, 4  ;;  %v18514_v15 = vld [vmem:[%s17946_s15 + $0x60] sm:$0xf]  ;;  %v1891_v17 = vshll.u32 %v13962_v13, 16  ;;  %v17371_v13 = vld [vmem:[%s24230_s2 + $0x1a8] sm:$0xff]  }
  0x9a   : > { %v1863_v35 = vrot.slane %v1861_v0, 3  ;;  %v1866_v43 = vrot.slane %v1864_v50, 4  ;;  %v18540_v12 = vcombine.low %v18508_v42, %v18514_v15  ;;  %v18564_v23 = vcombine.low %v18438_v47, %v18443_v58  ;;  %v17376_v47 = vld [vmem:[%s24230_s2 + $0x160] sm:$0xff]  }
  0x9b   : > { %v1858_v48 = vor.u32 %v1857_v4, %v1854_v22  ;;  %v13965_v58 = vcombine.low %v18532_v57, %v18535_v11  ;;  %v1890_v22 = vrot.slane %v1888_v21, 3  ;;  %v1893_v4 = vrot.slane %v1891_v17, 4 }
  0x9c   : > { %15925 = vmatmul.mubr.bf16.gmra.mxu1 %v18364_v40  ;;  %15973 = vmatmul.mubr.bf16.gmra.mxu0 %v18352_v19  ;;  %v13960_v40 = vcombine.low %v18469_v44, %v18472_v52  ;;  %v18485_v19 = vld [vmem:[%s17946_s15 + $0x4c] sm:$0xf]  ;;  %v1867_v59 = vor.u32 %v1866_v43, %v1863_v35 }
  0x9d   : > { %15976 = vmatprep.mubr.bf16.mxu0 %v18377_v3  ;;  %15996 = vmatprep.mubr.bf16.mxu1 %v1823_v61  ;;  %v1845_v3 = vrot.slane %v1843_v18, 3  ;;  %v13961_v1 = vcombine.low %v18485_v19, %v18488_v28  ;;  %v18552_v18 = vld [vmem:[%s17946_s15 + $0x80] sm:$0xf]  ;;  %v18628_v17 = vor.u32 %v1893_v4, %v1890_v22 }
  0x9e   : > { %v1870_v54 = vshrl.u32 %v13960_v40, 16  ;;  %v1873_v10 = vshll.u32 %v13960_v40, 16  ;;  %v13964_v40 = vcombine.low %v18520_v60, %v18523_v36 }
  0x9f   : > { %v1849_v63 = vor.u32 %v1848_v29, %v1845_v3  ;;  %v1879_v61 = vshrl.u32 %v13961_v1, 16  ;;  %v1882_v56 = vshll.u32 %v13961_v1, 16  ;;  %v1897_v29 = vshrl.u32 %v18540_v12, 16 }
  0xa0   : > { %v1872_v8 = vrot.slane %v1870_v54, 3  ;;  %v1875_v55 = vrot.slane %v1873_v10, 4  ;;  %v18606_v54 = vld [vmem:[%s17946_s15 + $0x98] sm:$0xf]  ;;  %v1868_v10 = vsel %vm1295_vm2, %v1858_v48, %v1867_v59  ;;  %v18612_v1 = vcombine.low %v18464_v2, %v18469_v44 }
  0xa1   : > { %v1850_v38 = vsel %vm1295_vm2, %v1840_v26, %v1849_v63  ;;  %v1859_v3 = vsel %vm1295_vm2, %v1849_v63, %v1858_v48  ;;  %v18577_v26 = vcombine.low %v18446_v7, %v18453_v39  ;;  %v1881_v0 = vrot.slane %v1879_v61, 3  ;;  %v18590_v39 = vld [vmem:[%s17946_s15 + $0x8c] sm:$0xf]  ;;  %v18622_v48 = vld [vmem:[%s17946_s15 + $0x9c] sm:$0x7] }
  0xa2   : > { %v18585_v31 = vor.u32 %v1875_v55, %v1872_v8  ;;  %v1884_v50 = vrot.slane %v1882_v56, 4  ;;  %v13966_v7 = vcombine.low %v18543_v14, %v18546_v16  ;;  %24494 = vst [vmem:[#allocation9_spill] sm:$0xff] %v18612_v1  ;;  %v1899_v63 = vrot.slane %v1897_v29, 3  ;;  %24495 = vst [vmem:[#allocation10_spill] sm:$0xff] %v18622_v48 }
  0xa3   : > { %v1909_v35 = vshll.u32 %v13964_v40, 16  ;;  %v1918_v8 = vshll.u32 %v13965_v58, 16 }
  0xa4   : > { %15977 = vmatmul.mubr.bf16.gmra.mxu0 %v1380_v20  ;;  %15997 = vmatmul.mubr.bf16.vlgmr.msra.gmra.mxu1 %v1832_v33  ;;  %v18593_v20 = vld [vmem:[%s17946_s15 + $0x90] sm:$0xf]  ;;  %v18598_v33 = vcombine.low %v18456_v62, %v18461_v49  ;;  %v1900_v62 = vshll.u32 %v18540_v12, 16  ;;  %v1906_v49 = vshrl.u32 %v13964_v40, 16  ;;  %v1877_v2 = vsel %vm1295_vm2, %v1867_v59, %v18585_v31  ;;  %v17377_v40 = vld [vmem:[%s24230_s2 + $0x1a0] sm:$0xff]  }
  0xa5   : > { %16000 = vmatprep.mubr.bf16.mxu1 %v1841_v25  ;;  %16048 = vmatprep.mubr.bf16.mxu0 %v18492_v53  ;;  %v18603_v25 = vld [vmem:[%s17946_s15 + $0x94] sm:$0xf]  ;;  %v1885_v44 = vor.u32 %v1884_v50, %v1881_v0  ;;  %v1924_v55 = vshrl.u32 %v13966_v7, 16  ;;  %v1927_v12 = vshll.u32 %v13966_v7, 16  ;;  %v13969_v21 = vcombine.low %v18590_v39, %v18593_v20 }
  0xa6   : > { %16085 = vmatpush3.bf16.msra.mxu1 %v18396_v30  ;;  %v18556_v30 = vcombine.low %v18422_v46, %v18430_v6  ;;  %v18569_v46 = vld [vmem:[%s17946_s15 + $0x84] sm:$0xf]  ;;  %v18572_v6 = vld [vmem:[%s17946_s15 + $0x88] sm:$0xf]  ;;  %24493 = vst [vmem:[#allocation8_spill] sm:$0xff] %v18598_v33  ;;  %v1908_v59 = vrot.slane %v1906_v49, 3  ;;  %v18643_v7 = vcombine.low %v18472_v52, %v18485_v19 }
  0xa7   : > { %16086 = vmatprep.subr.bf16.mxu1 %v17362_v34  ;;  %v13968_v43 = vcombine.low %v18569_v46, %v18572_v6  ;;  %v1920_v22 = vrot.slane %v1918_v8, 4  ;;  %v18645_v4 = vrot.slane %v1924_v55, 3  ;;  %v18658_v52 = vld [vmem:[%s17946_s15 + $0x1c] sm:$0xf]  ;;  %v1886_v19 = vsel %vm1295_vm2, %v18585_v31, %v1885_v44 }
  0xa8   : > { %24496 = vst [vmem:[#allocation11_spill] sm:$0xff] %v18643_v7  ;;  %v17383_v55 = vld [vmem:[%s24230_s2 + $0x198] sm:$0xff]   ;;  %v18674_v31 = vcombine.low %v18546_v16, %v18549_v9  ;;  %v18684_v16 = vcombine.low %v18572_v6, %v18590_v39  ;;  %v2616_v39 = vshll.u32 %v18564_v23, 16 }
  0xa9   : > { %v1942_v0 = vshrl.u32 %v13968_v43, 16  ;;  %v1945_v50 = vshll.u32 %v13968_v43, 16  ;;  %v3014_v43 = vld [vmem:[%s17946_s15 + $0x18] sm:$0xf] }
  0xaa   : > { %16087 = vmatpush3.bf16.msra.mxu1 %v17362_v34  ;;  %v13967_v34 = vcombine.low %v18549_v9, %v18552_v18  ;;  %v2600_v9 = vshll.u32 %v18556_v30, 16 }
  0xab   : > { %16088 = vmatprep.subr.bf16.mxu1 %v17370_v41 }
  0xac   : > { %16001 = vmatmul.mubr.bf16.gmra.mxu1 %v1850_v38  ;;  %16049 = vmatmul.mubr.bf16.vlgmr.msra.gmra.mxu0 %v18556_v30  ;;  %v1933_v61 = vshrl.u32 %v13967_v34, 16  ;;  %v1936_v56 = vshll.u32 %v13967_v34, 16  ;;  %v1902_v38 = vrot.slane %v1900_v62, 4  ;;  %v13971_v34 = vcombine.low %v18622_v48, %v18622_v48 }
  0xad   : > { %16137 = vmatpush3.bf16.msra.mxu0 %v18406_v27  ;;  %16004 = vmatprep.mubr.bf16.mxu1 %v1859_v3  ;;  %v1915_v27 = vshrl.u32 %v13965_v58, 16  ;;  %v1911_v3 = vrot.slane %v1909_v35, 4  ;;  %v17382_v58 = vld [vmem:[%s24230_s2 + $0x158] sm:$0xff]   ;;  %v18650_v62 = vrot.slane %v1927_v12, 4  ;;  %v18668_v12 = vrot.slane %v1942_v0, 3 }
  0xae   : > { %16052 = vmatprep.mubr.bf16.mxu0 %v18480_v24  ;;  %16138 = vmatprep.subr.bf16.mxu0 %v17365_v45  ;;  %v18652_v49 = vrot.slane %v1933_v61, 3  ;;  %v18654_v35 = vrot.slane %v1936_v56, 4  ;;  %v18728_v0 = vcombine.low %v18488_v28, %v18495_v32  ;;  %v18742_v28 = vcombine.low %v18514_v15, %v18520_v60  ;;  %v17395_v32 = vld [vmem:[%s24230_s2 + $0x188] sm:$0xff]  }
  0xaf   : > { %16089 = vmatpush3.bf16.msra.mxu1 %v17370_v41  ;;  %v13970_v41 = vcombine.low %v18603_v25, %v18606_v54  ;;  %v1917_v29 = vrot.slane %v1915_v27, 3  ;;  %v1951_v27 = vshrl.u32 %v13969_v21, 16  ;;  %v1912_v56 = vor.u32 %v1911_v3, %v1908_v59 }
  0xb0   : > { %16090 = vmatprep.subr.bf16.mxu1 %v17376_v47  ;;  %24501 = vst [vmem:[#allocation15_spill] sm:$0xff] %v18742_v28  ;;  %v2632_v60 = vshll.u32 %v18598_v33, 16  ;;  %v18770_v48 = vor.u32 %v18650_v62, %v18645_v4  ;;  %v18774_v5 = vor.u32 %v18654_v35, %v18652_v49  ;;  %v18792_v35 = vld [vmem:[%s17946_s15 + $0x48] sm:$0xff]   ;;  %v2640_v49 = vshll.u32 %v18612_v1, 16 }
  0xb1   : > { %16139 = vmatpush3.bf16.msra.mxu0 %v17365_v45  ;;  %v17388_v45 = vld [vmem:[%s24230_s2 + $0x150] sm:$0xff]   ;;  %v1960_v8 = vshrl.u32 %v13970_v41, 16  ;;  %v1963_v61 = vshll.u32 %v13970_v41, 16  ;;  %v18676_v51 = vrot.slane %v1951_v27, 3  ;;  %v18693_v59 = vor.u32 %v1920_v22, %v1917_v29  ;;  %v17400_v29 = vld [vmem:[%s24230_s2 + $0x140] sm:$0xff]   ;;  %24504 = vst [vmem:[#allocation18_spill] sm:$0xff] %v18792_v35 }
  0xb2   : > { %16140 = vmatprep.subr.bf16.mxu0 %v17371_v13  ;;  %v17389_v41 = vld [vmem:[%s24230_s2 + $0x190] sm:$0xff]   ;;  %v24498_v27 = vshll.u32 %v18492_v53, 16  ;;  %v18761_v22 = vrot.slane %v2616_v39, 1 }
  0xb3   : > { %16091 = vmatpush3.bf16.msra.mxu1 %v17376_v47  ;;  %v1895_v47 = vsel %vm1295_vm2, %v1885_v44, %v18628_v17  ;;  %v1903_v44 = vor.u32 %v1902_v38, %v1899_v63  ;;  %v18688_v63 = vld [vmem:[%s17946_s15 + $0x20] sm:$0xff]   ;;  %v18691_v38 = vld [vmem:[%s17946_s15 + $0x28] sm:$0xff]   ;;  %v18705_v6 = vrot.slane %v1963_v61, 4 }
  0xb4   : > { %16005 = vmatmul.mubr.bf16.gmra.mxu1 %v1868_v10  ;;  %16053 = vmatmul.mubr.bf16.gmra.mxu0 %v18564_v23  ;;  %v1954_v10 = vshll.u32 %v13969_v21, 16  ;;  %v1972_v21 = vshll.u32 %v13971_v34, 16  ;;  %v3173_v15 = vshll.u32 %v18691_v38, 16  ;;  %24502 = vst [vmem:[#allocation16_spill] sm:$0xff] %v18761_v22 }
  0xb5   : > { %16008 = vmatprep.mubr.bf16.mxu1 %v1877_v2  ;;  %16056 = vmatprep.mubr.bf16.mxu0 %v18577_v26  ;;  %v18670_v2 = vrot.slane %v1945_v50, 4  ;;  %v17394_v50 = vld [vmem:[%s24230_s2 + $0x148] sm:$0xff]  }
  0xb6   : > { %16141 = vmatpush3.bf16.msra.mxu0 %v17371_v13  ;;  %16092 = vmatprep.subr.bf16.mxu1 %v17382_v58  ;;  %v1969_v13 = vshrl.u32 %v13971_v34, 16  ;;  %v18698_v3 = vrot.slane %v1954_v10, 4  ;;  %v18703_v34 = vcombine.low %v3014_v43, %v18658_v52  ;;  %v18714_v10 = vrot.slane %v24498_v27, 1 }
  0xb7   : > { %16142 = vmatprep.subr.bf16.mxu0 %v17377_v40  ;;  %16093 = vmatpush3.bf16.msra.mxu1 %v17382_v58  ;;  %v18700_v58 = vrot.slane %v1960_v8, 3  ;;  %v18717_v8 = vld [vmem:[%s17946_s15 + $0x30] sm:$0xff]   ;;  %v18732_v27 = vcombine.low %v18498_v37, %v18508_v42  ;;  %v2624_v42 = vshll.u32 %v18577_v26, 16 }
  0xb8   : > { %16094 = vmatprep.subr.bf16.mxu1 %v17388_v45  ;;  %24497 = vst [vmem:[#allocation12_spill] sm:$0xff] %v18703_v34  ;;  %24499 = vst [vmem:[#allocation13_spill] sm:$0xff] %v18717_v8  ;;  %v18719_v43 = vrot.slane %v1969_v13, 3  ;;  %v3165_v13 = vshll.u32 %v18688_v63, 16  ;;  %v3160_v37 = vshll.u32 %v18703_v34, 16 }
  0xb9   : > { %24500 = vst [vmem:[#allocation14_spill] sm:$0xff] %v18732_v27  ;;  %v18795_v22 = vrot.slane %v2624_v42, 1  ;;  %v2648_v42 = vshll.u32 %v18643_v7, 16 }
  0xba   : > { %16143 = vmatpush3.bf16.msra.mxu0 %v17377_v40  ;;  %v18721_v40 = vrot.slane %v1972_v21, 4  ;;  %v18752_v21 = vsel %vm1295_vm2, %v1912_v56, %v18693_v59  ;;  %v18781_v39 = vrot.slane %v3165_v13, 1  ;;  %v18787_v4 = vrot.slane %v3160_v37, 1 }
  0xbb   : > { %16144 = vmatprep.subr.bf16.mxu0 %v17383_v55  ;;  %16095 = vmatpush3.bf16.msra.mxu1 %v17388_v45  ;;  %v18734_v45 = vrot.slane %v2600_v9, 1  ;;  %v3579_v9 = vld [vmem:[%s17946_s15 + $0x18] sm:$0xe]  ;;  %v18797_v13 = vrot.slane %v3173_v15, 1  ;;  %v3602_v15 = vrot.slane %v18688_v63, 1  ;;  %v18843_v37 = vrot.slane %v2648_v42, 1 }
  0xbc   : > { %16009 = vmatmul.mubr.bf16.gmra.mxu1 %v1886_v19  ;;  %16057 = vmatmul.mubr.bf16.gmra.mxu0 %v18598_v33  ;;  %v1904_v19 = vsel %vm1295_vm2, %v18628_v17, %v1903_v44  ;;  %v18757_v17 = vld [vmem:[%s17946_s15 + $0x38] sm:$0xff]   ;;  %24503 = vst [vmem:[#allocation17_spill] sm:$0xff] %v18781_v39  ;;  %v14105_v61 = vcombine.low %v3579_v9, %v18658_v52  ;;  %v18799_v39 = vrot.slane %v2632_v60, 1  ;;  %v18819_v60 = vld [vmem:[%s17946_s15 + $0x50] sm:$0xff]   ;;  %v3604_v9 = vrot.slane %v18691_v38, 1 }
  0xbd   : > { %16012 = vmatprep.mubr.bf16.mxu1 %v1895_v47  ;;  %16060 = vmatprep.mubr.bf16.mxu0 %v18612_v1  ;;  %v1913_v47 = vsel %vm1295_vm2, %v1903_v44, %v1912_v56  ;;  %v3181_v56 = vshll.u32 %v18717_v8, 16  ;;  %v17402_v44 = vld [vmem:[%s24230_s2 + $0x180] sm:$0xff]   ;;  %24506 = vst [vmem:[#allocation20_spill] sm:$0xff] %v18819_v60  ;;  %v18832_v33 = vrot.slane %v2640_v49, 1  ;;  %v3612_v1 = vrot.slane %v18792_v35, 1 }
  0xbe   : > { %16145 = vmatpush3.bf16.msra.mxu0 %v17383_v55  ;;  %16096 = vmatprep.subr.bf16.mxu1 %v17394_v50  ;;  %v18766_v55 = vld [vmem:[%s17946_s15 + $0x40] sm:$0xff]   ;;  %v3601_v62 = vrot.slane %v14105_v61, 1  ;;  %v2656_v61 = vshll.u32 %v18728_v0, 16 }
  0xbf   : > { %16146 = vmatprep.subr.bf16.mxu0 %v17389_v41  ;;  %16097 = vmatpush3.bf16.msra.mxu1 %v17394_v50  ;;  %v18779_v50 = vld [vmem:[%s24230_s2 + $0x1f8] sm:$0xff]   ;;  %v18805_v52 = vrot.slane %v3181_v56, 1  ;;  %v3606_v56 = vrot.slane %v18717_v8, 1  ;;  %24508 = vst [vmem:[#allocation22_spill] sm:$0xff] %v18832_v33  ;;  %v3205_v8 = vshll.u32 %v18792_v35, 16  ;;  %v2664_v33 = vshll.u32 %v18732_v27, 16 }
  0xc0   : > { %16098 = vmatprep.subr.bf16.mxu1 %v17400_v29  ;;  %v18830_v34 = vsel %vm3600_vm3, %v3601_v62, %v3602_v15  ;;  %v3608_v62 = vrot.slane %v18757_v17, 1  ;;  %v18956_v35 = vld [vmem:[%s17946_s15 + $0x80] sm:$0xff]  }
  0xc1   : > { %24505 = vst [vmem:[#allocation19_spill] sm:$0xff] %v18805_v52  ;;  %24507 = vst [vmem:[#allocation21_spill] sm:$0xff] %v18830_v34  ;;  %v18836_v52 = vsel %vm3600_vm3, %v3602_v15, %v3604_v9  ;;  %v18852_v15 = vld [vmem:[%s17946_s15 + $0x58] sm:$0xff]   ;;  %v18866_v34 = vrot.slane %v3205_v8, 1  ;;  %v18884_v8 = vor.u32 %v18670_v2, %v18668_v12  ;;  %v3614_v12 = vrot.slane %v18819_v60, 1 }
  0xc2   : > { %16147 = vmatpush3.bf16.msra.mxu0 %v17389_v41  ;;  %v3189_v41 = vshll.u32 %v18757_v17, 16  ;;  %24509 = vst [vmem:[#allocation23_spill] sm:$0xff] %v18836_v52  ;;  %v18901_v2 = vcombine.low %v18535_v11, %v18543_v14  ;;  %v3221_v42 = vshll.u32 %v18852_v15, 16  ;;  %v1940_v11 = vsel %vm1295_vm2, %v18770_v48, %v18774_v5  ;;  %24520 = vst [vmem:[#allocation34_spill] sm:$0xff] %v18956_v35 }
  0xc3   : > { %16148 = vmatprep.subr.bf16.mxu0 %v17395_v32  ;;  %16099 = vmatpush3.bf16.msra.mxu1 %v17400_v29  ;;  %v18814_v29 = vld [vmem:[%s24230_s2 + $0x238] sm:$0xff]   ;;  %v1949_v52 = vsel %vm1295_vm2, %v18774_v5, %v18884_v8 }
  0xc4   : > { %16013 = vmatmul.mubr.bf16.gmra.mxu1 %v1904_v19  ;;  %16061 = vmatmul.mubr.bf16.gmra.mxu0 %v18643_v7  ;;  %v3197_v19 = vshll.u32 %v18766_v55, 16  ;;  %v3213_v7 = vshll.u32 %v18819_v60, 16  ;;  %24515 = vst [vmem:[#allocation29_spill] sm:$0xff] %v18901_v2 }
  0xc5   : > { %16016 = vmatprep.mubr.bf16.mxu1 %v1913_v47  ;;  %16064 = vmatprep.mubr.bf16.mxu0 %v18728_v0  ;;  %v1931_v47 = vsel %vm1295_vm2, %v18693_v59, %v18770_v48  ;;  %v18839_v59 = vsel %vm3600_vm3, %v3604_v9, %v3606_v56  ;;  %v3610_v9 = vrot.slane %v18766_v55, 1  ;;  %v18926_v48 = vld [vmem:[%s17946_s15 + $0x70] sm:$0xff]  }
  0xc6   : > { %16149 = vmatpush3.bf16.msra.mxu0 %v17395_v32  ;;  %16188 = vmatprep.subr.bf16.mxu1 %v18779_v50  ;;  %24510 = vst [vmem:[#allocation24_spill] sm:$0xff] %v18839_v59  ;;  %v18841_v32 = vrot.slane %v3189_v41, 1  ;;  %v18847_v49 = vrot.slane %v3197_v19, 1  ;;  %v18855_v41 = vrot.slane %v2656_v61, 1  ;;  %v18860_v59 = vld [vmem:[%s17946_s15 + $0x60] sm:$0xff]   ;;  %v18863_v19 = vsel %vm3600_vm3, %v3606_v56, %v3608_v62 }
  0xc7   : > { %16150 = vmatprep.subr.bf16.mxu0 %v17402_v44  ;;  %24511 = vst [vmem:[#allocation25_spill] sm:$0xff] %v18863_v19  ;;  %v18874_v61 = vsel %vm3600_vm3, %v3608_v62, %v3610_v9  ;;  %v18880_v56 = vcombine.low %v18523_v36, %v18532_v57  ;;  %v376_v62 = vld [vmem:[%s24229_s1] sm:$0xff]  ;;  %v18895_v36 = vrot.slane %v2664_v33, 1  ;;  %v2672_v57 = vshll.u32 %v18742_v28, 16 }
  0xc8   : > { %24513 = vst [vmem:[#allocation27_spill] sm:$0xff] %v18874_v61  ;;  %v18906_v61 = vsel %vm3600_vm3, %v3610_v9, %v3612_v1  ;;  %v3229_v33 = vshll.u32 %v18860_v59, 16  ;;  %v18914_v9 = vsel %vm3600_vm3, %v3612_v1, %v3614_v12  ;;  %v379_v1 = vld [vmem:[%s24229_s1 + $0x18] sm:$0xff]  ;;  %v18941_v19 = vrot.slane %v3221_v42, 1 }
  0xc9   : > { %24514 = vst [vmem:[#allocation28_spill] sm:$0xff] %v18895_v36  ;;  %24516 = vst [vmem:[#allocation30_spill] sm:$0xff] %v18906_v61  ;;  %v2680_v14 = vshll.u32 %v18880_v56, 16  ;;  %v18923_v61 = vrot.slane %v3213_v7, 1  ;;  %v3618_v7 = vrot.slane %v18860_v59, 1 }
  0xca   : > { %16151 = vmatpush3.bf16.msra.mxu0 %v17402_v44  ;;  %v18871_v44 = vld [vmem:[%s17946_s15 + $0x68] sm:$0xff]   ;;  %24517 = vst [vmem:[#allocation31_spill] sm:$0xff] %v18914_v9  ;;  %v18939_v9 = vrot.slane %v2672_v57, 1  ;;  %v18952_v5 = vrot.slane %v3229_v33, 1  ;;  %v1957_v57 = vor.u32 %v18698_v3, %v18676_v51  ;;  %v380_v33 = vld [vmem:[%s24229_s1 + $0x20] sm:$0xff] }
  0xcb   : > { %16240 = vmatprep.subr.bf16.mxu0 %v18814_v29  ;;  %24512 = vst [vmem:[#allocation26_spill] sm:$0xff] %v18871_v44  ;;  %24518 = vst [vmem:[#allocation32_spill] sm:$0xff] %v18923_v61  ;;  %v18950_v36 = vrot.slane %v2680_v14, 1  ;;  %v2570_v14 = vld [vmem:[%s17946_s15 + $0x9c] sm:$0xf] }
  0xcc   : > { %16017 = vmatmul.mubr.bf16.gmra.mxu1 %v18752_v21  ;;  %16065 = vmatmul.mubr.bf16.gmra.mxu0 %v18732_v27  ;;  %v378_v21 = vld [vmem:[%s24229_s1 + $0x10] sm:$0xff]  ;;  %v18945_v27 = vld [vmem:[%s17946_s15 + $0x78] sm:$0xff]   ;;  %v1958_v60 = vsel %vm1295_vm2, %v18884_v8, %v1957_v57 }
  0xcd   : > { %16020 = vmatprep.mubr.bf16.mxu1 %v1931_v47  ;;  %16068 = vmatprep.mubr.bf16.mxu0 %v18742_v28  ;;  %v17847_v47 = vmov 0  }
  0xce   : > { %17288 = vset.pattern.permute.xlu0 %v17847_v47  ;;  %4588 = vst [vmem:[#allocation2 + $0x4] sm:$0xf] %v17847_v47  ;;  %4589 = vst [vmem:[#allocation2 + $0x8] sm:$0xf] %v17847_v47  ;;  %17289 = vset.pattern.permute.xlu1 %v17847_v47 }
  0xcf   : > { %4590 = vst [vmem:[#allocation2 + $0xc] sm:$0xf] %v17847_v47  ;;  %4591 = vst [vmem:[#allocation2 + $0x9c] sm:$0x8] %v17847_v47  ;;  %4598 = vperm.xlu0 %17288, %v376_v62   ;;  %4608 = vperm.xlu1 %17289, %v378_v21   ;;  %v377_v62 = vld [vmem:[%s24229_s1 + $0x8] sm:$0xff]  ;;  %v3616_v21 = vrot.slane %v18852_v15, 1 }
  0xd0   : > { %4592 = vst [vmem:[#allocation2 + $0xa0] sm:$0xf] %v17847_v47  ;;  %4593 = vst [vmem:[#allocation2 + $0xa4] sm:$0xf] %v17847_v47 }
  0xd1   : > { %4594 = vst [vmem:[#allocation2 + $0xa8] sm:$0xf] %v17847_v47  ;;  %9162 = vst [vmem:[#allocation3 + $0x4] sm:$0xf] %v17847_v47  ;;  %v18948_v61 = vsel %vm3600_vm3, %v3614_v12, %v3616_v21  ;;  %v18959_v42 = vsel %vm3600_vm3, %v3616_v21, %v3618_v7  ;;  %v18966_v12 = vor.u32 %v18705_v6, %v18700_v58  ;;  %v2696_v6 = vshll.u32 %v18674_v31, 16  ;;  %v18996_v58 = vld [vmem:[%s17946_s15 + $0x88] sm:$0xff]  }
  0xd2   : > { %9163 = vst [vmem:[#allocation3 + $0x8] sm:$0xf] %v17847_v47  ;;  %9164 = vst [vmem:[#allocation3 + $0xc] sm:$0xf] %v17847_v47 }
  0xd3   : > { %9165 = vst [vmem:[#allocation3 + $0x9c] sm:$0x8] %v17847_v47  ;;  %9166 = vst [vmem:[#allocation3 + $0xa0] sm:$0xf] %v17847_v47  ;;  %4603 = vperm.xlu0 %17288, %v377_v62   ;;  %4613 = vperm.xlu1 %17289, %v379_v1   ;;  %v3620_v62 = vrot.slane %v18871_v44, 1  ;;  %v3245_v1 = vshll.u32 %v18926_v48, 16 }
  0xd4   : > { %9167 = vst [vmem:[#allocation3 + $0xa4] sm:$0xf] %v17847_v47  ;;  %9168 = vst [vmem:[#allocation3 + $0xa8] sm:$0xf] %v17847_v47  ;;  %v18921_v47 = vcombine.low %v18552_v18, %v18569_v46  ;;  %v2688_v18 = vshll.u32 %v18901_v2, 16  ;;  %v3237_v46 = vshll.u32 %v18871_v44, 16  ;;  %16021 = vmatmul.mubr.bf16.gmra.mxu1 %v1940_v11  ;;  %16069 = vmatmul.mubr.bf16.gmra.mxu0 %v18880_v56 }
  0xd5   : > { %24519 = vst [vmem:[#allocation33_spill] sm:$0xff] %v18948_v61  ;;  %24521 = vst [vmem:[#allocation35_spill] sm:$0xff] %v18959_v42  ;;  %v381_v11 = vld [vmem:[%s24229_s1 + $0x28] sm:$0xff]  ;;  %16024 = vmatprep.mubr.bf16.mxu1 %v1949_v52  ;;  %16072 = vmatprep.mubr.bf16.mxu0 %v18901_v2  ;;  %v18987_v28 = vsel %vm3600_vm3, %v3618_v7, %v3620_v62  ;;  %v18991_v52 = vcombine.low %v18593_v20, %v18603_v25  ;;  %v382_v20 = vld [vmem:[%s24229_s1 + $0x30] sm:$0xff]  ;;  %v19015_v42 = vrot.slane %v3245_v1, 1 }
  0xd6   : > { %v18977_v51 = vrot.slane %v2688_v18, 1  ;;  %v18979_v3 = vrot.slane %v3237_v46, 1  ;;  %v2704_v21 = vshll.u32 %v18921_v47, 16  ;;  %24524 = vst [vmem:[#allocation38_spill] sm:$0xff] %v18987_v28  ;;  %v3253_v46 = vshll.u32 %v18945_v27, 16  ;;  %24525 = vst [vmem:[#allocation39_spill] sm:$0xff] %v18996_v58 }
  0xd7   : > { %4618 = vperm.xlu0 %17288, %v380_v33   ;;  %4623 = vperm.xlu1 %17289, %v381_v11   ;;  %v1967_v7 = vsel %vm1295_vm2, %v1957_v57, %v18966_v12  ;;  %v2712_v28 = vshll.u32 %v18684_v16, 16  ;;  %v383_v25 = vld [vmem:[%s24229_s1 + $0x38] sm:$0xff]  ;;  %v3622_v18 = vrot.slane %v18926_v48, 1  ;;  %v19010_v33 = vrot.slane %v2696_v6, 1  ;;  %v19064_v44 = vld [vmem:[%s17946_s15 + $0xa0] sm:$0xff]  }
  0xd8   : > { %24522 = vst [vmem:[#allocation36_spill] sm:$0xff] %v18977_v51  ;;  %24523 = vst [vmem:[#allocation37_spill] sm:$0xff] %v18979_v3  ;;  %v3261_v11 = vshll.u32 %v18956_v35, 16  ;;  %v2720_v8 = vshll.u32 %v18991_v52, 16  ;;  %v3624_v57 = vrot.slane %v18945_v27, 1  ;;  %v19017_v61 = vrot.slane %v2704_v21, 1 }
  0xd9   : > { %24526 = vst [vmem:[#allocation40_spill] sm:$0xff] %v19010_v33  ;;  %v19021_v3 = vld [vmem:[%s17946_s15 + $0x90] sm:$0xff]   ;;  %v19024_v2 = vsel %vm3600_vm3, %v3620_v62, %v3622_v18  ;;  %v19029_v51 = vcombine.low %v18606_v54, %v2570_v14  ;;  %v1975_v62 = vor.u32 %v18721_v40, %v18719_v43  ;;  %v19037_v21 = vrot.slane %v3253_v46, 1  ;;  %v384_v14 = vld [vmem:[%s24229_s1 + $0x40] sm:$0xff]  ;;  %v19060_v6 = vld [vmem:[%s17946_s15 + $0x98] sm:$0xff]  }
  0xda   : > { %24527 = vst [vmem:[#allocation41_spill] sm:$0xff] %v19021_v3  ;;  %24528 = vst [vmem:[#allocation42_spill] sm:$0xff] %v19024_v2  ;;  %v19032_v1 = vsel %vm3600_vm3, %v3622_v18, %v3624_v57  ;;  %v19039_v33 = vrot.slane %v2712_v28, 1  ;;  %v19048_v18 = vrot.slane %v3261_v11, 1  ;;  %v19050_v43 = vrot.slane %v2720_v8, 1  ;;  %v19073_v40 = vld [vmem:[%s17946_s15 + $0x20] sm:$0xff]  }
  0xdb   : > { %24529 = vst [vmem:[#allocation43_spill] sm:$0xff] %v19029_v51  ;;  %4628 = vperm.xlu0 %17288, %v382_v20   ;;  %4633 = vperm.xlu1 %17289, %v383_v25   ;;  %24530 = vst [vmem:[#allocation44_spill] sm:$0xff] %v19032_v1  ;;  %v3269_v28 = vshll.u32 %v18996_v58, 16  ;;  %v24534_v46 = vshrl.u32 %v18492_v53, 16  ;;  %v2728_v11 = vshll.u32 %v19029_v51, 16  ;;  %v386_v53 = vld [vmem:[%s24229_s1 + $0x50] sm:$0xff]  ;;  %v1976_v25 = vsel %vm1295_vm2, %v18966_v12, %v1975_v62 }
  0xdc   : > { %16025 = vmatmul.mubr.bf16.gmra.mxu1 %v1958_v60  ;;  %16073 = vmatmul.mubr.bf16.gmra.mxu0 %v18674_v31  ;;  %24531 = vst [vmem:[#allocation45_spill] sm:$0xff] %v19039_v33  ;;  %v385_v60 = vld [vmem:[%s24229_s1 + $0x48] sm:$0xff]  ;;  %24532 = vst [vmem:[#allocation46_spill] sm:$0xff] %v19048_v18  ;;  %v19067_v8 = vld [vmem:[%s17946_s15 + $0x18] sm:$0xfe]   ;;  %v3285_v12 = vshll.u32 %v19060_v6, 16 }
  0xdd   : > { %16028 = vmatprep.mubr.bf16.mxu1 %v1967_v7  ;;  %16076 = vmatprep.mubr.bf16.mxu0 %v18921_v47  ;;  %24533 = vst [vmem:[#allocation47_spill] sm:$0xff] %v19050_v43  ;;  %v2598_v20 = vor.u32 %v18714_v10, %v24534_v46  ;;  %v3277_v7 = vshll.u32 %v19021_v3, 16  ;;  %24535 = vst [vmem:[#allocation48_spill] sm:$0xff] %v19060_v6  ;;  %v387_v10 = vld [vmem:[%s24229_s1 + $0x58] sm:$0xff]  ;;  %v3626_v46 = vrot.slane %v18956_v35, 1  ;;  %v19081_v1 = vrot.slane %v3269_v28, 1 }
  0xde   : > { %v19084_v2 = vld [vmem:[%s17946_s15 + $0x28] sm:$0xff]   ;;  %v24540_v28 = vshrl.u32 %v18556_v30, 16  ;;  %v24541_v18 = vld [vmem:[#allocation7_spill] sm:$0xff]  ;;  %v3293_v30 = vshll.u32 %v19064_v44, 16 }
  0xdf   : > { %4638 = vperm.xlu0 %17288, %v384_v14   ;;  %4643 = vperm.xlu1 %17289, %v385_v60   ;;  %24536 = vst [vmem:[#allocation49_spill] sm:$0xff] %v19081_v1  ;;  %v3628_v14 = vrot.slane %v18996_v58, 1  ;;  %v2603_v60 = vsel %vm2591_vm4, %v2598_v20, %v18734_v45  ;;  %v19092_v33 = vsel %vm3600_vm3, %v3624_v57, %v3626_v46  ;;  %v19094_v35 = vrot.slane %v3277_v7, 1  ;;  %v17446_v1 = vld [vmem:[%s17946_s15 + $0x48] sm:$0xff]  }
  0xe0   : > { %24537 = vst [vmem:[#allocation50_spill] sm:$0xff] %v19092_v33  ;;  %v2606_v20 = vor.u32 %v24540_v28, %v18734_v45  ;;  %v24542_v57 = vshrl.u32 %v18480_v24, 16  ;;  %v19107_v7 = vrot.slane %v2728_v11, 1  ;;  %v4064_v45 = vshrl.u32 %v19067_v8, 16  ;;  %v24546_v24 = vld [vmem:[#allocation10_spill] sm:$0xff] }
  0xe1   : > { %24538 = vst [vmem:[#allocation51_spill] sm:$0xff] %v19094_v35  ;;  %v19098_v62 = vsel %vm3600_vm3, %v3626_v46, %v3628_v14  ;;  %v4067_v11 = vshll.u32 %v19067_v8, 16  ;;  %v24544_v46 = vld [vmem:[#allocation12_spill] sm:$0xff]  ;;  %v4075_v33 = vshll.u32 %v19073_v40, 16  ;;  %v4081_v51 = vshrl.u32 %v19084_v2, 16 }
  0xe2   : > { %24539 = vst [vmem:[#allocation52_spill] sm:$0xff] %v19098_v62  ;;  %v2614_v43 = vor.u32 %v24542_v57, %v24541_v18  ;;  %24543 = vst [vmem:[#allocation7_spill] sm:$0xff] %v19107_v7  ;;  %v24545_v28 = vshrl.u32 %v24544_v46, 16  ;;  %v4072_v62 = vshrl.u32 %v19073_v40, 16  ;;  %v14013_v8 = vcombine.low %v18606_v54, %v24546_v24  ;;  %v19148_v7 = vld [vmem:[%s17946_s15 + $0x38] sm:$0xff]   ;;  %v24548_v24 = vld [vmem:[#allocation17_spill] sm:$0xff] }
  0xe3   : > { %4648 = vperm.xlu0 %17288, %v386_v53   ;;  %4653 = vperm.xlu1 %17289, %v387_v10   ;;  %v19111_v53 = vld [vmem:[%s17946_s15 + $0x30] sm:$0xff]   ;;  %v389_v10 = vld [vmem:[%s24229_s1 + $0x68] sm:$0xff]  ;;  %v3630_v46 = vrot.slane %v19021_v3, 1  ;;  %v2611_v40 = vsel %vm2591_vm4, %v2606_v20, %v24541_v18  ;;  %v4084_v35 = vshll.u32 %v19084_v2, 16  ;;  %v3632_v54 = vrot.slane %v19060_v6, 1  ;;  %v19163_v2 = vld [vmem:[%s17946_s15 + $0x40] sm:$0xff]  }
  0xe4   : > { %16029 = vmatmul.mubr.bf16.gmra.mxu1 %v1976_v25  ;;  %16077 = vmatmul.mubr.bf16.gmra.mxu0 %v18684_v16  ;;  %v388_v25 = vld [vmem:[%s24229_s1 + $0x60] sm:$0xff]  ;;  %v3163_v57 = vor.u32 %v18787_v4, %v24545_v28  ;;  %v391_v4 = vld [vmem:[%s24229_s1 + $0x78] sm:$0xff]  ;;  %v24547_v28 = vld [vmem:[#allocation16_spill] sm:$0xff]  ;;  %v19153_v3 = vrot.slane %v3285_v12, 1  ;;  %v4090_v18 = vshrl.u32 %v19111_v53, 16  ;;  %v19159_v20 = vrot.slane %v3293_v30, 1 }
  0xe5   : > { %16080 = vmatprep.mubr.bf16.mxu0 %v18991_v52  ;;  %16100 = vmatprep.mubr.bf16.mxu1 %v2603_v60  ;;  %v390_v60 = vld [vmem:[%s24229_s1 + $0x70] sm:$0xff]  ;;  %v19166_v6 = vsel %vm3600_vm3, %v3630_v46, %v3632_v54  ;;  %v24552_v12 = vshrl.u32 %v18688_v63, 16  ;;  %v19175_v30 = vrot.slane %v4072_v62, 1  ;;  %v17415_v63 = vld [vmem:[%s24230_s2 + $0x1e8] sm:$0xff]   ;;  %v19189_v62 = vrot.slane %v4081_v51, 1 }
  0xe6   : > { %v3168_v58 = vsel %vm2591_vm4, %v3163_v57, %v24548_v24  ;;  %24549 = vst [vmem:[#allocation12_spill] sm:$0xff] %v19153_v3  ;;  %24551 = vst [vmem:[#allocation16_spill] sm:$0xff] %v19166_v6  ;;  %v19171_v3 = vrot.slane %v4064_v45, 1  ;;  %v19187_v45 = vrot.slane %v4075_v33, 2  ;;  %v24555_v51 = vshrl.u32 %v18691_v38, 16  ;;  %v19278_v6 = vld [vmem:[%s17946_s15 + $0x60] sm:$0xff]  }
  0xe7   : > { %4658 = vperm.xlu0 %17288, %v388_v25   ;;  %4663 = vperm.xlu1 %17289, %v389_v10   ;;  %v2619_v25 = vsel %vm2591_vm4, %v2614_v43, %v24547_v28  ;;  %v17410_v10 = vld [vmem:[%s24230_s2 + $0x1f0] sm:$0xff]   ;;  %v19157_v43 = vsel %vm3600_vm3, %v3628_v14, %v3630_v46  ;;  %v3171_v57 = vor.u32 %v24552_v12, %v24548_v24  ;;  %v19173_v14 = vrot.slane %v4067_v11, 2  ;;  %v393_v46 = vld [vmem:[%s24229_s1 + $0x88] sm:$0xff] }
  0xe8   : > { %24550 = vst [vmem:[#allocation10_spill] sm:$0xff] %v19157_v43  ;;  %v19191_v11 = vrot.slane %v4084_v35, 2  ;;  %v3179_v33 = vor.u32 %v24555_v51, %v18797_v13  ;;  %v4099_v35 = vshrl.u32 %v19148_v7, 16  ;;  %v19209_v24 = vld [vmem:[%s17946_s15 + $0x50] sm:$0xff]   ;;  %v24273_v38 = vrot.slane %v19064_v44, 1 }
  0xe9   : > { %v4111_v12 = vshll.u32 %v19163_v2, 16  ;;  %v4147_v43 = vshll.u32 %v19278_v6, 16 }
  0xea   : > { %v19244_v51 = vrot.slane %v4099_v35, 1  ;;  %v4126_v35 = vshrl.u32 %v19209_v24, 16 }
  0xeb   : > { %4668 = vperm.xlu0 %17288, %v390_v60   ;;  %4673 = vperm.xlu1 %17289, %v391_v4   ;;  %v392_v60 = vld [vmem:[%s24229_s1 + $0x80] sm:$0xff] }
  0xec   : > { %16081 = vmatmul.mubr.bf16.gmra.mxu0 %v14013_v8  ;;  %16101 = vmatmul.mubr.bf16.vlgmr.msra.gmra.mxu1 %v2611_v40  ;;  %v24553_v8 = vshrl.u32 %v18564_v23, 16  ;;  %v24554_v23 = vshrl.u32 %v18577_v26, 16  ;;  %v19200_v40 = vrot.slane %v4090_v18, 1  ;;  %v17412_v26 = vld [vmem:[%s24230_s2 + $0x230] sm:$0xff]   ;;  %v4108_v18 = vshrl.u32 %v19163_v2, 16 }
  0xed   : > { %16104 = vmatprep.mubr.bf16.mxu1 %v2619_v25  ;;  %16152 = vmatprep.mubr.bf16.mxu0 %v3168_v58  ;;  %v4102_v25 = vshll.u32 %v19148_v7, 16  ;;  %v3176_v7 = vsel %vm2591_vm4, %v3171_v57, %v18797_v13  ;;  %v24557_v13 = vld [vmem:[#allocation19_spill] sm:$0xff] }
  0xee   : > { %v2622_v4 = vor.u32 %v24553_v8, %v24547_v28  ;;  %16189 = vmatpush3.bf16.msra.mxu1 %v18779_v50  ;;  %v2630_v58 = vor.u32 %v24554_v23, %v18795_v22  ;;  %v4093_v28 = vshll.u32 %v19111_v53, 16  ;;  %v394_v50 = vld [vmem:[%s24229_s1 + $0x90] sm:$0xff]  ;;  %v17419_v8 = vld [vmem:[%s24230_s2 + $0x1e0] sm:$0xff]   ;;  %v4120_v23 = vshll.u32 %v17446_v1, 16 }
  0xef   : > { %16190 = vmatprep.subr.bf16.mxu1 %v17410_v10  ;;  %4678 = vperm.xlu0 %17288, %v392_v60   ;;  %v3184_v57 = vsel %vm2591_vm4, %v3179_v33, %v24557_v13  ;;  %v395_v33 = vld [vmem:[%s24229_s1 + $0x98] sm:$0xff] }
  0xf0   : > { %4683 = vperm.xlu1 %17289, %v393_v46   ;;  %v2627_v53 = vsel %vm2591_vm4, %v2622_v4, %v18795_v22  ;;  %v2635_v60 = vsel %vm2591_vm4, %v2630_v58, %v18799_v39  ;;  %v4117_v46 = vshrl.u32 %v17446_v1, 16  ;;  %v19232_v22 = vsel %vm3600_vm3, %v3632_v54, %v24273_v38  ;;  %v17416_v1 = vld [vmem:[%s24230_s2 + $0x228] sm:$0xff]   ;;  %v19247_v54 = vld [vmem:[%s17946_s15 + $0x58] sm:$0xff]  }
  0xf1   : > { %24556 = vst [vmem:[#allocation17_spill] sm:$0xff] %v19232_v22  ;;  %v19242_v58 = vrot.slane %v4093_v28, 2  ;;  %v19258_v28 = vrot.slane %v4108_v18, 1  ;;  %v4129_v22 = vshll.u32 %v19209_v24, 16 }
  0xf2   : > { %16191 = vmatpush3.bf16.msra.mxu1 %v17410_v10  ;;  %v24558_v10 = vld [vmem:[#allocation8_spill] sm:$0xff]  ;;  %v19272_v18 = vrot.slane %v4117_v46, 1  ;;  %v17420_v46 = vld [vmem:[%s24230_s2 + $0x220] sm:$0xff]  }
  0xf3   : > { %16192 = vmatprep.subr.bf16.mxu1 %v17415_v63  ;;  %4688 = vperm.xlu0 %17288, %v394_v50   ;;  %v24559_v2 = vshrl.u32 %v24558_v10, 16  ;;  %v396_v10 = vld [vmem:[%s24229_s1 + $0xa0] sm:$0xff] }
  0xf4   : > { %16105 = vmatmul.mubr.bf16.gmra.mxu1 %v2627_v53  ;;  %16153 = vmatmul.mubr.bf16.vlgmr.msra.gmra.mxu0 %v3176_v7  ;;  %v19256_v7 = vrot.slane %v4102_v25, 2  ;;  %v19270_v25 = vrot.slane %v4111_v12, 2  ;;  %v397_v12 = vld [vmem:[%s24229_s1 + $0xa8] sm:$0xff] }
  0xf5   : > { %v2638_v4 = vor.u32 %v24559_v2, %v18799_v39  ;;  %16241 = vmatpush3.bf16.msra.mxu0 %v18814_v29  ;;  %16108 = vmatprep.mubr.bf16.mxu1 %v2635_v60  ;;  %v24560_v39 = vld [vmem:[#allocation13_spill] sm:$0xff]  ;;  %v24562_v2 = vld [vmem:[#allocation22_spill] sm:$0xff] }
  0xf6   : > { %v24561_v50 = vshrl.u32 %v24560_v39, 16  ;;  %16156 = vmatprep.mubr.bf16.mxu0 %v3184_v57  ;;  %16242 = vmatprep.subr.bf16.mxu0 %v17412_v26  ;;  %v24563_v29 = vld [vmem:[#allocation9_spill] sm:$0xff]  ;;  %v24565_v39 = vshrl.u32 %v18757_v17, 16  ;;  %v4135_v17 = vshrl.u32 %v19247_v54, 16  ;;  %v4138_v57 = vshll.u32 %v19247_v54, 16 }
  0xf7   : > { %v24564_v38 = vshrl.u32 %v24563_v29, 16  ;;  %16193 = vmatpush3.bf16.msra.mxu1 %v17415_v63  ;;  %4693 = vperm.xlu1 %17289, %v395_v33   ;;  %v2643_v63 = vsel %vm2591_vm4, %v2638_v4, %v24562_v2  ;;  %v19308_v54 = vrot.slane %v4129_v22, 2  ;;  %v24568_v29 = vshrl.u32 %v18766_v55, 16 }
  0xf8   : > { %v3187_v53 = vor.u32 %v24561_v50, %v24557_v13  ;;  %v3195_v13 = vor.u32 %v24565_v39, %v18841_v32  ;;  %v19274_v50 = vrot.slane %v4120_v23, 2  ;;  %16194 = vmatprep.subr.bf16.mxu1 %v17419_v8  ;;  %4698 = vperm.xlu0 %17288, %v396_v10   ;;  %v19294_v23 = vrot.slane %v4126_v35, 1  ;;  %v24566_v35 = vld [vmem:[#allocation11_spill] sm:$0xff]  ;;  %v17424_v39 = vld [vmem:[%s24230_s2 + $0x218] sm:$0xff]  }
  0xf9   : > { %v2646_v60 = vor.u32 %v24564_v38, %v24562_v2  ;;  %v17423_v38 = vld [vmem:[%s24230_s2 + $0x1d8] sm:$0xff]   ;;  %16243 = vmatpush3.bf16.msra.mxu0 %v17412_v26  ;;  %v24567_v2 = vshrl.u32 %v24566_v35, 16  ;;  %v4144_v22 = vshrl.u32 %v19278_v6, 16 }
  0xfa   : > { %v3192_v24 = vsel %vm2591_vm4, %v3187_v53, %v18841_v32  ;;  %v3200_v10 = vsel %vm2591_vm4, %v3195_v13, %v18847_v49  ;;  %16244 = vmatprep.subr.bf16.mxu0 %v17416_v1  ;;  %v17427_v32 = vld [vmem:[%s24230_s2 + $0x1d0] sm:$0xff]   ;;  %v399_v13 = vld [vmem:[%s24229_s1 + $0xb8] sm:$0xff] }
  0xfb   : > { %v2651_v33 = vsel %vm2591_vm4, %v2646_v60, %v18843_v37  ;;  %16195 = vmatpush3.bf16.msra.mxu1 %v17419_v8  ;;  %4703 = vperm.xlu1 %17289, %v397_v12   ;;  %v398_v53 = vld [vmem:[%s24229_s1 + $0xb0] sm:$0xff]  ;;  %v2654_v8 = vor.u32 %v24567_v2, %v18843_v37  ;;  %v3203_v60 = vor.u32 %v24568_v29, %v18847_v49  ;;  %v24569_v37 = vshrl.u32 %v18728_v0, 16  ;;  %v24570_v49 = vld [vmem:[#allocation18_spill] sm:$0xff] }
  0xfc   : > { %v19304_v26 = vpop.f32.mrf.mxu0  ;;  %v19306_v4 = vpop.f32.mrf.mxu1  ;;  %16109 = vmatmul.mubr.bf16.gmra.mxu1 %v2643_v63  ;;  %16157 = vmatmul.mubr.bf16.gmra.mxu0 %v3192_v24  ;;  %v24571_v24 = vshrl.u32 %v24570_v49, 16  ;;  %v19346_v0 = vrot.slane %v4135_v17, 1  ;;  %v19348_v29 = vrot.slane %v4138_v57, 2  ;;  %v17428_v49 = vld [vmem:[%s24230_s2 + $0x210] sm:$0xff]  }
  0xfd   : > { %16112 = vmatprep.mubr.bf16.mxu1 %v2651_v33  ;;  %16160 = vmatprep.mubr.bf16.mxu0 %v3200_v10  ;;  %v2662_v55 = vor.u32 %v24569_v37, %v18855_v41  ;;  %v19337_v10 = vld [vmem:[%s17946_s15 + $0x68] sm:$0xff]   ;;  %v2659_v37 = vsel %vm2591_vm4, %v2654_v8, %v18855_v41 }
  0xfe   : > { %v19326_v12 = vpop.f32.mrf.mxu0  ;;  %v19328_v63 = vpop.f32.mrf.mxu1  ;;  %16245 = vmatpush3.bf16.msra.mxu0 %v17416_v1  ;;  %v3211_v33 = vor.u32 %v24571_v24, %v18866_v34  ;;  %16196 = vmatprep.subr.bf16.mxu1 %v17423_v38  ;;  %v17431_v1 = vld [vmem:[%s24230_s2 + $0x1c8] sm:$0xff]   ;;  %24573 = vst [vmem:[#allocation8_spill] sm:$0xff] %v19348_v29  ;;  %v19357_v24 = vrot.slane %v4144_v22, 1 }
  0xff   : > { %16246 = vmatprep.subr.bf16.mxu0 %v17420_v46  ;;  %16197 = vmatpush3.bf16.msra.mxu1 %v17423_v38  ;;  %v3208_v38 = vsel %vm2591_vm4, %v3203_v60, %v18866_v34  ;;  %v24577_v41 = vld [vmem:[#allocation32_spill] sm:$0xff]  ;;  %v17436_v34 = vld [vmem:[%s24230_s2 + $0x1c0] sm:$0xff]   ;;  %v19372_v60 = vld [vmem:[%s17946_s15 + $0x70] sm:$0xff]  }
 0x100   : > { %v19339_v35 = vpop.f32.mrf.mxu0  ;;  %v19341_v2 = vpop.f32.mrf.mxu1  ;;  %16198 = vmatprep.subr.bf16.mxu1 %v17427_v32  ;;  %4708 = vperm.xlu0 %17288, %v398_v53   ;;  %24574 = vst [vmem:[#allocation13_spill] sm:$0xff] %v19357_v24  ;;  %v24576_v53 = vld [vmem:[#allocation28_spill] sm:$0xff]  ;;  %v3216_v8 = vsel %vm2591_vm4, %v3211_v33, %v24577_v41 }
 0x101   : > { %24572 = vst [vmem:[#allocation19_spill] sm:$0xff] %v19341_v2  ;;  %4713 = vperm.xlu1 %17289, %v399_v13   ;;  %v2667_v2 = vsel %vm2591_vm4, %v2662_v55, %v24576_v53  ;;  %v24579_v55 = vld [vmem:[#allocation14_spill] sm:$0xff]  ;;  %v401_v13 = vld [vmem:[%s24229_s1 + $0xc8] sm:$0xff] }
 0x102   : > { %v19360_v17 = vpop.f32.mrf.mxu0  ;;  %v19362_v57 = vpop.f32.mrf.mxu1  ;;  %16247 = vmatpush3.bf16.msra.mxu0 %v17420_v46  ;;  %v400_v46 = vld [vmem:[%s24229_s1 + $0xc0] sm:$0xff]  ;;  %v24580_v33 = vshrl.u32 %v24579_v55, 16 }
 0x103   : > { %24575 = vst [vmem:[#allocation22_spill] sm:$0xff] %v19362_v57  ;;  %16248 = vmatprep.subr.bf16.mxu0 %v17424_v39  ;;  %16199 = vmatpush3.bf16.msra.mxu1 %v17427_v32  ;;  %v24581_v32 = vld [vmem:[#allocation20_spill] sm:$0xff] }
 0x104   : > { %v19374_v6 = vpop.f32.mrf.mxu0  ;;  %v19376_v22 = vpop.f32.mrf.mxu1  ;;  %16113 = vmatmul.mubr.bf16.gmra.mxu1 %v2659_v37  ;;  %16161 = vmatmul.mubr.bf16.gmra.mxu0 %v3208_v38  ;;  %v2670_v57 = vor.u32 %v24580_v33, %v24576_v53  ;;  %v24582_v24 = vshrl.u32 %v24581_v32, 16  ;;  %v17432_v37 = vld [vmem:[%s24230_s2 + $0x208] sm:$0xff]   ;;  %v24584_v53 = vld [vmem:[#allocation15_spill] sm:$0xff] }
 0x105   : > { %24578 = vst [vmem:[#allocation9_spill] sm:$0xff] %v19376_v22  ;;  %16116 = vmatprep.mubr.bf16.mxu1 %v2667_v2  ;;  %16164 = vmatprep.mubr.bf16.mxu0 %v3216_v8  ;;  %v24585_v55 = vshrl.u32 %v24584_v53, 16  ;;  %v19409_v22 = vrot.slane %v4147_v43, 2  ;;  %v402_v43 = vld [vmem:[%s24229_s1 + $0xd0] sm:$0xff] }
 0x106   : > { %v3219_v29 = vor.u32 %v24582_v24, %v24577_v41  ;;  %v19395_v2 = vpop.f32.mrf.mxu0  ;;  %v19397_v8 = vpop.f32.mrf.mxu1  ;;  %v24586_v24 = vshrl.u32 %v18852_v15, 16  ;;  %16249 = vmatpush3.bf16.msra.mxu0 %v17424_v39  ;;  %16200 = vmatprep.subr.bf16.mxu1 %v17431_v1  ;;  %v2675_v53 = vsel %vm2591_vm4, %v2670_v57, %v18939_v9  ;;  %v17439_v39 = vld [vmem:[%s24230_s2 + $0x200] sm:$0xff]  }
 0x107   : > { %24583 = vst [vmem:[#allocation11_spill] sm:$0xff] %v19397_v8  ;;  %v2678_v33 = vor.u32 %v24585_v55, %v18939_v9  ;;  %16250 = vmatprep.subr.bf16.mxu0 %v17428_v49  ;;  %16201 = vmatpush3.bf16.msra.mxu1 %v17431_v1 }
 0x108   : > { %v3227_v41 = vor.u32 %v24586_v24, %v18941_v19  ;;  %v19405_v32 = vpop.f32.mrf.mxu0  ;;  %v19407_v38 = vpop.f32.mrf.mxu1  ;;  %16202 = vmatprep.subr.bf16.mxu1 %v17436_v34  ;;  %4718 = vperm.xlu0 %17288, %v400_v46   ;;  %v3224_v15 = vsel %vm2591_vm4, %v3219_v29, %v18941_v19  ;;  %v403_v29 = vld [vmem:[%s24229_s1 + $0xd8] sm:$0xff] }
 0x109   : > { %24587 = vst [vmem:[#allocation18_spill] sm:$0xff] %v19407_v38  ;;  %4723 = vperm.xlu1 %17289, %v401_v13   ;;  %v2683_v9 = vsel %vm2591_vm4, %v2678_v33, %v18950_v36  ;;  %v24590_v33 = vshrl.u32 %v18880_v56, 16 }
 0x10a   : > { %v19423_v55 = vpop.f32.mrf.mxu0  ;;  %v19425_v46 = vpop.f32.mrf.mxu1  ;;  %v3232_v19 = vsel %vm2591_vm4, %v3227_v41, %v18952_v5  ;;  %16251 = vmatpush3.bf16.msra.mxu0 %v17428_v49  ;;  %v24591_v49 = vshrl.u32 %v18860_v59, 16  ;;  %v405_v59 = vld [vmem:[%s24229_s1 + $0xe8] sm:$0xff] }
 0x10b   : > { %24588 = vst [vmem:[#allocation28_spill] sm:$0xff] %v19425_v46  ;;  %16252 = vmatprep.subr.bf16.mxu0 %v17432_v37  ;;  %16203 = vmatpush3.bf16.msra.mxu1 %v17436_v34  ;;  %v2686_v24 = vor.u32 %v24590_v33, %v18950_v36  ;;  %v404_v34 = vld [vmem:[%s24229_s1 + $0xe0] sm:$0xff]  ;;  %v24597_v46 = vld [vmem:[#allocation26_spill] sm:$0xff] }
 0x10c   : > { %v19434_v57 = vpop.f32.mrf.mxu0  ;;  %v19436_v13 = vpop.f32.mrf.mxu1  ;;  %16117 = vmatmul.mubr.bf16.gmra.mxu1 %v2675_v53  ;;  %16165 = vmatmul.mubr.bf16.gmra.mxu0 %v3224_v15  ;;  %v3235_v41 = vor.u32 %v24591_v49, %v18952_v5  ;;  %v24593_v53 = vld [vmem:[#allocation36_spill] sm:$0xff]  ;;  %v24594_v15 = vld [vmem:[#allocation29_spill] sm:$0xff]  ;;  %v24598_v56 = vshrl.u32 %v24597_v46, 16 }
 0x10d   : > { %24589 = vst [vmem:[#allocation32_spill] sm:$0xff] %v19436_v13  ;;  %16120 = vmatprep.mubr.bf16.mxu1 %v2683_v9  ;;  %16168 = vmatprep.mubr.bf16.mxu0 %v3232_v19  ;;  %v24595_v9 = vshrl.u32 %v24594_v15, 16  ;;  %v24596_v13 = vld [vmem:[#allocation37_spill] sm:$0xff]  ;;  %v2691_v49 = vsel %vm2591_vm4, %v2686_v24, %v24593_v53 }
 0x10e   : > { %v19447_v1 = vpop.f32.mrf.mxu0  ;;  %v19449_v8 = vpop.f32.mrf.mxu1  ;;  %v3243_v36 = vor.u32 %v24598_v56, %v24596_v13  ;;  %16253 = vmatpush3.bf16.msra.mxu0 %v17432_v37  ;;  %4728 = vperm.xlu0 %17288, %v402_v43   ;;  %v3240_v15 = vsel %vm2591_vm4, %v3235_v41, %v24596_v13  ;;  %v406_v37 = vld [vmem:[%s24229_s1 + $0xf0] sm:$0xff]  ;;  %v407_v13 = vld [vmem:[%s24229_s1 + $0xf8] sm:$0xff] }
 0x10f   : > { %24592 = vst [vmem:[#allocation14_spill] sm:$0xff] %v19449_v8  ;;  %v2694_v19 = vor.u32 %v24595_v9, %v24593_v53  ;;  %16254 = vmatprep.subr.bf16.mxu0 %v17439_v39  ;;  %4733 = vperm.xlu1 %17289, %v403_v29   ;;  %v24601_v9 = vld [vmem:[#allocation40_spill] sm:$0xff]  ;;  %v24603_v53 = vshrl.u32 %v18674_v31, 16  ;;  %v24607_v31 = vshrl.u32 %v18945_v27, 16  ;;  %v410_v27 = vld [vmem:[%s24229_s1 + $0x110] sm:$0xff]  ;;  %v24618_v8 = vld [vmem:[#allocation39_spill] sm:$0xff] }
 0x110   : > { %v19460_v5 = vpop.f32.mrf.mxu0  ;;  %v19462_v33 = vpop.f32.mrf.mxu1  ;;  %v3248_v56 = vsel %vm2591_vm4, %v3243_v36, %v19015_v42  ;;  %v408_v36 = vld [vmem:[%s24229_s1 + $0x100] sm:$0xff] }
 0x111   : > { %24599 = vst [vmem:[#allocation20_spill] sm:$0xff] %v19462_v33  ;;  %v2699_v29 = vsel %vm2591_vm4, %v2694_v19, %v24601_v9  ;;  %v2702_v19 = vor.u32 %v24603_v53, %v24601_v9  ;;  %v3259_v9 = vor.u32 %v24607_v31, %v19037_v21  ;;  %v24616_v33 = vshrl.u32 %v18991_v52, 16 }
 0x112   : > { %v19471_v43 = vpop.f32.mrf.mxu0  ;;  %v19473_v46 = vpop.f32.mrf.mxu1  ;;  %16255 = vmatpush3.bf16.msra.mxu0 %v17439_v39  ;;  %4738 = vperm.xlu0 %17288, %v404_v34   ;;  %v24604_v39 = vshrl.u32 %v18926_v48, 16  ;;  %v409_v48 = vld [vmem:[%s24229_s1 + $0x108] sm:$0xff] }
 0x113   : > { %24600 = vst [vmem:[#allocation15_spill] sm:$0xff] %v19473_v46  ;;  %4743 = vperm.xlu1 %17289, %v405_v59  }
 0x114   : > { %v19482_v24 = vpop.f32.mrf.mxu0  ;;  %v19484_v41 = vpop.f32.mrf.mxu1  ;;  %16121 = vmatmul.mubr.bf16.gmra.mxu1 %v2691_v49  ;;  %16169 = vmatmul.mubr.bf16.gmra.mxu0 %v3240_v15  ;;  %v3251_v34 = vor.u32 %v24604_v39, %v19015_v42  ;;  %v24606_v49 = vshrl.u32 %v18921_v47, 16  ;;  %v24610_v39 = vld [vmem:[#allocation45_spill] sm:$0xff] }
 0x115   : > { %24602 = vst [vmem:[#allocation36_spill] sm:$0xff] %v19484_v41  ;;  %16124 = vmatprep.mubr.bf16.mxu1 %v2699_v29  ;;  %16172 = vmatprep.mubr.bf16.mxu0 %v3248_v56  ;;  %v2707_v56 = vsel %vm2591_vm4, %v2702_v19, %v19017_v61  ;;  %v24615_v41 = vld [vmem:[#allocation47_spill] sm:$0xff] }
 0x116   : > { %v19495_v59 = vpop.f32.mrf.mxu0  ;;  %v19497_v46 = vpop.f32.mrf.mxu1  ;;  %v2710_v15 = vor.u32 %v24606_v49, %v19017_v61  ;;  %4748 = vperm.xlu0 %17288, %v406_v37   ;;  %v3256_v47 = vsel %vm2591_vm4, %v3251_v34, %v19037_v21  ;;  %v24611_v49 = vld [vmem:[#allocation46_spill] sm:$0xff] }
 0x117   : > { %24605 = vst [vmem:[#allocation29_spill] sm:$0xff] %v19497_v46  ;;  %4753 = vperm.xlu1 %17289, %v407_v13   ;;  %v3264_v31 = vsel %vm2591_vm4, %v3259_v9, %v24611_v49  ;;  %v411_v61 = vld [vmem:[%s24229_s1 + $0x118] sm:$0x3f] }
 0x118   : > { %v19508_v42 = vpop.f32.mrf.mxu0  ;;  %v19510_v29 = vpop.f32.mrf.mxu1  ;;  %v2715_v13 = vsel %vm2591_vm4, %v2710_v15, %v24610_v39  ;;  %v24612_v15 = vshrl.u32 %v18684_v16, 16 }
 0x119   : > { %24608 = vst [vmem:[#allocation37_spill] sm:$0xff] %v19510_v29 }
 0x11a   : > { %v19519_v37 = vpop.f32.mrf.mxu0  ;;  %v19521_v53 = vpop.f32.mrf.mxu1  ;;  %4758 = vperm.xlu0 %17288, %v408_v36   ;;  %v24613_v36 = vld [vmem:[#allocation34_spill] sm:$0xff] }
 0x11b   : > { %24609 = vst [vmem:[#allocation26_spill] sm:$0xff] %v19521_v53  ;;  %4763 = vperm.xlu1 %17289, %v409_v48   ;;  %v2718_v53 = vor.u32 %v24612_v15, %v24610_v39  ;;  %v24614_v9 = vshrl.u32 %v24613_v36, 16  ;;  %v24621_v36 = vld [vmem:[#allocation51_spill] sm:$0xff] }
 0x11c   : > { %v19530_v21 = vpop.f32.mrf.mxu0  ;;  %v15894_v19 = vpop.f32.mrf.mxu1  ;;  %16125 = vmatmul.mubr.bf16.gmra.mxu1 %v2707_v56  ;;  %16173 = vmatmul.mubr.bf16.gmra.mxu0 %v3256_v47  ;;  %v2726_v56 = vor.u32 %v24616_v33, %v24615_v41  ;;  %v24617_v47 = vld [vmem:[#allocation49_spill] sm:$0xff] }
 0x11d   : > { %v1140_v34 = vadd.f32 %v15894_v19, %v19304_v26  ;;  %16128 = vmatprep.mubr.bf16.mxu1 %v2715_v13  ;;  %16176 = vmatprep.mubr.bf16.mxu0 %v3264_v31  ;;  %v3267_v29 = vor.u32 %v24614_v9, %v24611_v49  ;;  %v24619_v26 = vshrl.u32 %v24618_v8, 16  ;;  %v2723_v19 = vsel %vm2591_vm4, %v2718_v53, %v24615_v41  ;;  %v24620_v8 = vld [vmem:[#allocation7_spill] sm:$0xff] }
 0x11e   : > { %v19539_v46 = vpop.f32.mrf.mxu0  ;;  %v1131_v48 = vpop.f32.mrf.mxu1  ;;  %4768 = vperm.xlu0 %17288, %v410_v27   ;;  %v2731_v27 = vsel %vm2591_vm4, %v2726_v56, %v24620_v8 }
 0x11f   : > { %v3275_v13 = vor.u32 %v24619_v26, %v24617_v47  ;;  %v1132_v31 = vadd.f32 %v1131_v48, %v19326_v12  ;;  %4773 = vperm.xlu1 %17289, %v411_v61   ;;  %v3272_v52 = vsel %vm2591_vm4, %v3267_v29, %v24617_v47  ;;  %v24622_v29 = vld [vmem:[#allocation41_spill] sm:$0xff] }
 0x120   : > { %v19548_v16 = vpop.f32.mrf.mxu0  ;;  %v15895_v39 = vpop.f32.mrf.mxu1  ;;  %v24623_v53 = vshrl.u32 %v24622_v29, 16 }
 0x121   : > { %v1143_v49 = vadd.f32 %v15895_v39, %v19339_v35  ;;  %v3280_v12 = vsel %vm2591_vm4, %v3275_v13, %v24621_v36  ;;  %v24624_v39 = vld [vmem:[#allocation12_spill] sm:$0xff] }
 0x122   : > { %v19555_v33 = vpop.f32.mrf.mxu0  ;;  %v1134_v15 = vpop.f32.mrf.mxu1  ;;  %v3283_v47 = vor.u32 %v24623_v53, %v24621_v36  ;;  %v24625_v13 = vld [vmem:[#allocation48_spill] sm:$0xff] }
 0x123   : > { %v1135_v61 = vadd.f32 %v1134_v15, %v19360_v17  ;;  %v24626_v38 = vshrl.u32 %v24625_v13, 16  ;;  %v4070_v13 = vor.u32 %v19173_v14, %v19171_v3 }
 0x124   : > { %v15898_v9 = vpop.f32.mrf.mxu1  ;;  %v15946_v48 = vpop.f32.mrf.mxu0  ;;  %16129 = vmatmul.mubr.bf16.gmra.mxu1 %v2723_v19  ;;  %16177 = vmatmul.mubr.bf16.gmra.mxu0 %v3272_v52  ;;  %v24627_v52 = vld [vmem:[#allocation43_spill] sm:$0xff] }
 0x125   : > { %v1156_v35 = vadd.f32 %v15898_v9, %v19374_v6  ;;  %v19563_v41 = vadd.f32 %v15946_v48, %v1140_v34  ;;  %16132 = vmatprep.mubr.bf16.mxu1 %v2731_v27  ;;  %16180 = vmatprep.mubr.bf16.mxu0 %v3280_v12  ;;  %v3291_v17 = vor.u32 %v24626_v38, %v24624_v39  ;;  %v24628_v27 = vshrl.u32 %v24627_v52, 16 }
 0x126   : > { %v1147_v56 = vpop.f32.mrf.mxu1  ;;  %v1481_v26 = vpop.f32.mrf.mxu0  ;;  %v3288_v48 = vsel %vm2591_vm4, %v3283_v47, %v24624_v39 }
 0x127   : > { %v1148_v15 = vadd.f32 %v1147_v56, %v19395_v2  ;;  %v19572_v19 = vadd.f32 %v1481_v26, %v1132_v31  ;;  %v2734_v12 = vor.u32 %v24628_v27, %v24620_v8  ;;  %v3296_v2 = vsel %vm2591_vm4, %v3291_v17, %v19159_v20  ;;  %v24629_v8 = vld [vmem:[#allocation21_spill] sm:$0xff] }
 0x128   : > { %v15899_v6 = vpop.f32.mrf.mxu1  ;;  %v15947_v34 = vpop.f32.mrf.mxu0 }
 0x129   : > { %v1159_v9 = vadd.f32 %v15899_v6, %v19405_v32  ;;  %v19578_v36 = vadd.f32 %v15947_v34, %v1143_v49 }
 0x12a   : > { %v1150_v29 = vpop.f32.mrf.mxu1  ;;  %v1484_v38 = vpop.f32.mrf.mxu0 }
 0x12b   : > { %v1151_v31 = vadd.f32 %v1150_v29, %v19423_v55  ;;  %v19585_v53 = vadd.f32 %v1484_v38, %v1135_v61  ;;  %v4078_v55 = vor.u32 %v19187_v45, %v19175_v30 }
 0x12c   : > { %v15902_v56 = vpop.f32.mrf.mxu1  ;;  %v15950_v26 = vpop.f32.mrf.mxu0  ;;  %16133 = vmatmul.mubr.bf16.gmra.mxu1 %v2734_v12  ;;  %16181 = vmatmul.mubr.bf16.gmra.mxu0 %v3288_v48 }
 0x12d   : > { %v1172_v32 = vadd.f32 %v15902_v56, %v19434_v57  ;;  %v19588_v49 = vadd.f32 %v15950_v26, %v1156_v35  ;;  %16184 = vmatprep.mubr.bf16.mxu0 %v3296_v2  ;;  %16204 = vmatprep.mubr.bf16.mxu1 %v24629_v8  ;;  %v24630_v57 = vshrl.u32 %v19064_v44, 16  ;;  %v4079_v3 = vsel %vm4062_vm5, %v4070_v13, %v4078_v55 }
 0x12e   : > { %v1163_v47 = vpop.f32.mrf.mxu1  ;;  %v1497_v39 = vpop.f32.mrf.mxu0 }
 0x12f   : > { %v1164_v61 = vadd.f32 %v1163_v47, %v19447_v1  ;;  %v19596_v17 = vadd.f32 %v1497_v39, %v1148_v15  ;;  %v3299_v35 = vor.u32 %v24630_v57, %v19159_v20  ;;  %v24631_v15 = vld [vmem:[#allocation23_spill] sm:$0xff] }
 0x130   : > { %v15903_v6 = vpop.f32.mrf.mxu1  ;;  %v15951_v34 = vpop.f32.mrf.mxu0 }
 0x131   : > { %v1175_v52 = vadd.f32 %v15903_v6, %v19460_v5  ;;  %v19602_v27 = vadd.f32 %v15951_v34, %v1159_v9  ;;  %v24632_v5 = vld [vmem:[#allocation24_spill] sm:$0xff]  ;;  %v4087_v9 = vor.u32 %v19191_v11, %v19189_v62  ;;  %v24634_v34 = vld [vmem:[#allocation27_spill] sm:$0xff] }
 0x132   : > { %v1166_v12 = vpop.f32.mrf.mxu1  ;;  %v1500_v48 = vpop.f32.mrf.mxu0 }
 0x133   : > { %v1167_v14 = vadd.f32 %v1166_v12, %v19471_v43  ;;  %v19606_v30 = vadd.f32 %v1500_v48, %v1151_v31  ;;  %v4096_v43 = vor.u32 %v19242_v58, %v19200_v40  ;;  %v4088_v47 = vsel %vm4062_vm5, %v4078_v55, %v4087_v9 }
 0x134   : > { %v15906_v45 = vpop.f32.mrf.mxu1  ;;  %v15954_v1 = vpop.f32.mrf.mxu0  ;;  %16185 = vmatmul.mubr.bf16.gmra.mxu0 %v3299_v35  ;;  %16205 = vmatmul.mubr.bf16.vlgmr.msra.gmra.mxu1 %v24631_v15  ;;  %v4105_v55 = vor.u32 %v19256_v7, %v19244_v51 }
 0x135   : > { %v1188_v29 = vadd.f32 %v15906_v45, %v19482_v24  ;;  %v19610_v20 = vadd.f32 %v15954_v1, %v1172_v32  ;;  %16208 = vmatprep.mubr.bf16.mxu1 %v24632_v5  ;;  %16256 = vmatprep.mubr.bf16.mxu0 %v4079_v3  ;;  %v4097_v62 = vsel %vm4062_vm5, %v4087_v9, %v4096_v43 }
 0x136   : > { %v1179_v38 = vpop.f32.mrf.mxu1  ;;  %v1513_v2 = vpop.f32.mrf.mxu0  ;;  %v4106_v45 = vsel %vm4062_vm5, %v4096_v43, %v4105_v55  ;;  %v4123_v9 = vor.u32 %v19274_v50, %v19272_v18 }
 0x137   : > { %v1180_v31 = vadd.f32 %v1179_v38, %v19495_v59  ;;  %v19618_v56 = vadd.f32 %v1513_v2, %v1164_v61  ;;  %v24633_v59 = vld [vmem:[#allocation25_spill] sm:$0xff] }
 0x138   : > { %v15907_v26 = vpop.f32.mrf.mxu1  ;;  %v15955_v8 = vpop.f32.mrf.mxu0 }
 0x139   : > { %v1191_v24 = vadd.f32 %v15907_v26, %v19508_v42  ;;  %v19621_v32 = vadd.f32 %v15955_v8, %v1175_v52 }
 0x13a   : > { %v1182_v39 = vpop.f32.mrf.mxu1  ;;  %v1516_v13 = vpop.f32.mrf.mxu0 }
 0x13b   : > { %v1183_v11 = vadd.f32 %v1182_v39, %v19519_v37  ;;  %v19626_v6 = vadd.f32 %v1516_v13, %v1167_v14  ;;  %v4114_v37 = vor.u32 %v19270_v25, %v19258_v28 }
 0x13c   : > { %v15910_v40 = vpop.f32.mrf.mxu1  ;;  %v15958_v58 = vpop.f32.mrf.mxu0  ;;  %16209 = vmatmul.mubr.bf16.gmra.mxu1 %v24633_v59  ;;  %16257 = vmatmul.mubr.bf16.vlgmr.msra.gmra.mxu0 %v4088_v47  ;;  %v24639_v59 = vld [vmem:[#allocation8_spill] sm:$0xff] }
 0x13d   : > { %v1204_v61 = vadd.f32 %v15910_v40, %v19530_v21  ;;  %v19630_v42 = vadd.f32 %v15958_v58, %v1188_v29  ;;  %16212 = vmatprep.mubr.bf16.mxu1 %v24634_v34  ;;  %16260 = vmatprep.mubr.bf16.mxu0 %v4097_v62  ;;  %v4115_v51 = vsel %vm4062_vm5, %v4105_v55, %v4114_v37  ;;  %v24637_v40 = vld [vmem:[#allocation33_spill] sm:$0xff]  ;;  %v24638_v58 = vld [vmem:[#allocation35_spill] sm:$0xff] }
 0x13e   : > { %v1195_v57 = vpop.f32.mrf.mxu1  ;;  %v1529_v35 = vpop.f32.mrf.mxu0  ;;  %v24640_v55 = vld [vmem:[#allocation13_spill] sm:$0xff] }
 0x13f   : > { %v1196_v52 = vadd.f32 %v1195_v57, %v19539_v46  ;;  %v19638_v12 = vadd.f32 %v1529_v35, %v1180_v31  ;;  %v24635_v46 = vld [vmem:[#allocation30_spill] sm:$0xff]  ;;  %v4150_v57 = vor.u32 %v19409_v22, %v24640_v55  ;;  %v24641_v35 = vld [vmem:[#allocation19_spill] sm:$0xff] }
 0x140   : > { %v15911_v48 = vpop.f32.mrf.mxu1  ;;  %v15959_v3 = vpop.f32.mrf.mxu0  ;;  %v17452_v22 = vld [vmem:[%s17946_s15 + $0x78] sm:$0xff]  }
 0x141   : > { %v1207_v21 = vadd.f32 %v15911_v48, %v19548_v16  ;;  %v19641_v14 = vadd.f32 %v15959_v3, %v1191_v24  ;;  %v24636_v16 = vld [vmem:[#allocation31_spill] sm:$0xff]  ;;  %v4124_v24 = vsel %vm4062_vm5, %v4114_v37, %v4123_v9  ;;  %v24642_v3 = vshrl.u32 %v19337_v10, 16 }
 0x142   : > { %v1198_v1 = vpop.f32.mrf.mxu1  ;;  %v1532_v15 = vpop.f32.mrf.mxu0 }
 0x143   : > { %v1199_v7 = vadd.f32 %v1198_v1, %v19555_v33  ;;  %v19646_v29 = vadd.f32 %v1532_v15, %v1183_v11  ;;  %v4132_v33 = vor.u32 %v19308_v54, %v19294_v23  ;;  %v24644_v15 = vld [vmem:[#allocation22_spill] sm:$0xff] }
 0x144   : > { %v15914_v28 = vpop.f32.mrf.mxu1  ;;  %v15962_v25 = vpop.f32.mrf.mxu0  ;;  %16213 = vmatmul.mubr.bf16.gmra.mxu1 %v24635_v46  ;;  %16261 = vmatmul.mubr.bf16.gmra.mxu0 %v4106_v45  ;;  %v24643_v45 = vshll.u32 %v19337_v10, 16  ;;  %v24647_v10 = vld [vmem:[#allocation9_spill] sm:$0xff] }
 0x145   : > { %v19649_v5 = vadd.f32 %v15962_v25, %v1204_v61  ;;  %16216 = vmatprep.mubr.bf16.mxu1 %v24636_v16  ;;  %16264 = vmatprep.mubr.bf16.mxu0 %v4115_v51  ;;  %v4133_v13 = vsel %vm4062_vm5, %v4123_v9, %v4132_v33  ;;  %v1220_v62 = vadd.f32 %v15914_v28, %v19306_v4  ;;  %v24645_v16 = vshrl.u32 %v19372_v60, 16 }
 0x146   : > { %v1211_v38 = vpop.f32.mrf.mxu1  ;;  %v1545_v2 = vpop.f32.mrf.mxu0  ;;  %v4141_v61 = vor.u32 %v24639_v59, %v19346_v0  ;;  %v4158_v1 = vrot.slane %v24643_v45, 2 }
 0x147   : > { %v19656_v43 = vadd.f32 %v1545_v2, %v1196_v52  ;;  %v1212_v23 = vadd.f32 %v1211_v38, %v19328_v63  ;;  %v4164_v9 = vrot.slane %v24645_v16, 1  ;;  %v24646_v38 = vshll.u32 %v19372_v60, 16  ;;  %v24650_v60 = vld [vmem:[#allocation42_spill] sm:$0xff] }
 0x148   : > { %v15915_v31 = vpop.f32.mrf.mxu1  ;;  %v15963_v26 = vpop.f32.mrf.mxu0  ;;  %v4151_v46 = vsel %vm4062_vm5, %v4141_v61, %v4150_v57 }
 0x149   : > { %v19658_v8 = vadd.f32 %v15963_v26, %v1207_v21  ;;  %v1223_v37 = vadd.f32 %v15915_v31, %v24641_v35  ;;  %v4155_v21 = vrot.slane %v24642_v3, 1  ;;  %v4167_v2 = vrot.slane %v24646_v38, 2  ;;  %v17453_v31 = vld [vmem:[%s17946_s15 + $0x80] sm:$0xff]  }
 0x14a   : > { %v1214_v47 = vpop.f32.mrf.mxu1  ;;  %v1548_v39 = vpop.f32.mrf.mxu0  ;;  %v4180_v55 = vshrl.u32 %v17453_v31, 16  ;;  %v4183_v35 = vshll.u32 %v17453_v31, 16  ;;  %v24653_v31 = vld [vmem:[#allocation32_spill] sm:$0xff] }
 0x14b   : > { %v19663_v18 = vadd.f32 %v1548_v39, %v1199_v7  ;;  %v1215_v0 = vadd.f32 %v1214_v47, %v24644_v15  ;;  %v4142_v7 = vsel %vm4062_vm5, %v4132_v33, %v4141_v61  ;;  %v17459_v33 = vld [vmem:[%s24232_s4 + $0x78] sm:$0xff]   ;;  %v24652_v15 = vld [vmem:[#allocation28_spill] sm:$0xff] }
 0x14c   : > { %v15918_v50 = vpop.f32.mrf.mxu1  ;;  %v15966_v11 = vpop.f32.mrf.mxu0  ;;  %16217 = vmatmul.mubr.bf16.gmra.mxu1 %v24637_v40  ;;  %16265 = vmatmul.mubr.bf16.gmra.mxu0 %v4124_v24  ;;  %v4185_v38 = vrot.slane %v4183_v35, 2 }
 0x14d   : > { %v19667_v54 = vadd.f32 %v15966_v11, %v1220_v62  ;;  %16220 = vmatprep.mubr.bf16.mxu1 %v24638_v58  ;;  %16268 = vmatprep.mubr.bf16.mxu0 %v4133_v13  ;;  %v1236_v26 = vadd.f32 %v15918_v50, %v24647_v10  ;;  %v24648_v13 = vld [vmem:[#allocation38_spill] sm:$0xff]  ;;  %v4159_v62 = vor.u32 %v4158_v1, %v4155_v21  ;;  %v24649_v11 = vld [vmem:[#allocation11_spill] sm:$0xff]  ;;  %v4171_v50 = vshrl.u32 %v17452_v22, 16  ;;  %v17454_v1 = vld [vmem:[%s17946_s15 + $0x88] sm:$0xff]  }
 0x14e   : > { %v1227_v34 = vpop.f32.mrf.mxu1  ;;  %v1561_v4 = vpop.f32.mrf.mxu0  ;;  %v4174_v58 = vshll.u32 %v17452_v22, 16  ;;  %16292 = vmatprep.subr.bf16.mxu1 %v17459_v33 }
 0x14f   : > { %v19675_v52 = vadd.f32 %v1561_v4, %v1212_v23  ;;  %v1228_v40 = vadd.f32 %v1227_v34, %v24649_v11  ;;  %v4168_v4 = vor.u32 %v4167_v2, %v4164_v9  ;;  %16293 = vmatpush3.bf16.msra.mxu1 %v17459_v33  ;;  %v4160_v45 = vsel %vm4062_vm5, %v4150_v57, %v4159_v62  ;;  %v17455_v2 = vld [vmem:[%s17946_s15 + $0x90] sm:$0xff]   ;;  %v24655_v11 = vld [vmem:[#allocation14_spill] sm:$0xff] }
 0x150   : > { %v15919_v63 = vpop.f32.mrf.mxu1  ;;  %v15967_v48 = vpop.f32.mrf.mxu0  ;;  %v4173_v22 = vrot.slane %v4171_v50, 1  ;;  %v24656_v50 = vld [vmem:[#allocation50_spill] sm:$0xff]  ;;  %v4198_v35 = vshrl.u32 %v17455_v2, 16 }
 0x151   : > { %v19682_v51 = vadd.f32 %v15967_v48, %v1223_v37  ;;  %v24651_v37 = vld [vmem:[#allocation18_spill] sm:$0xff]  ;;  %v4169_v9 = vsel %vm4062_vm5, %v4159_v62, %v4168_v4 }
 0x152   : > { %v1230_v28 = vpop.f32.mrf.mxu1  ;;  %v1564_v25 = vpop.f32.mrf.mxu0  ;;  %v1239_v48 = vadd.f32 %v15919_v63, %v24651_v37  ;;  %v4182_v63 = vrot.slane %v4180_v55, 1  ;;  %v4201_v37 = vshll.u32 %v17455_v2, 16 }
 0x153   : > { %v19693_v24 = vadd.f32 %v1564_v25, %v1215_v0  ;;  %v1231_v0 = vadd.f32 %v1230_v28, %v24652_v15  ;;  %v4176_v25 = vrot.slane %v4174_v58, 2  ;;  %v4189_v28 = vshrl.u32 %v17454_v1, 16 }
 0x154   : > { %v15922_v47 = vpop.f32.mrf.mxu1  ;;  %v15970_v39 = vpop.f32.mrf.mxu0  ;;  %16221 = vmatmul.mubr.bf16.gmra.mxu1 %v24648_v13  ;;  %16269 = vmatmul.mubr.bf16.gmra.mxu0 %v4142_v7  ;;  %v4192_v13 = vshll.u32 %v17454_v1, 16  ;;  %v4186_v55 = vor.u32 %v4185_v38, %v4182_v63 }
 0x155   : > { %v19700_v23 = vadd.f32 %v15970_v39, %v1236_v26  ;;  %16224 = vmatprep.mubr.bf16.mxu1 %v24650_v60  ;;  %16272 = vmatprep.mubr.bf16.mxu0 %v4151_v46  ;;  %v1252_v10 = vadd.f32 %v15922_v47, %v24653_v31  ;;  %v24654_v39 = vld [vmem:[#allocation44_spill] sm:$0xff]  ;;  %v4177_v62 = vor.u32 %v4176_v25, %v4173_v22  ;;  %v17460_v47 = vld [vmem:[%s24232_s4 + $0x70] sm:$0xff]   ;;  %v4191_v15 = vrot.slane %v4189_v28, 1  ;;  %v17456_v22 = vld [vmem:[%s17946_s15 + $0x98] sm:$0xff]  }
 0x156   : > { %v1243_v59 = vpop.f32.mrf.mxu1  ;;  %v1577_v61 = vpop.f32.mrf.mxu0  ;;  %16294 = vmatprep.subr.bf16.mxu1 %v17460_v47  ;;  %v24658_v25 = vld [vmem:[#allocation15_spill] sm:$0xff]  ;;  %v4200_v31 = vrot.slane %v4198_v35, 1  ;;  %v24663_v35 = vld [vmem:[#allocation10_spill] sm:$0xff] }
 0x157   : > { %v19704_v3 = vadd.f32 %v1577_v61, %v1228_v40  ;;  %v1244_v40 = vadd.f32 %v1243_v59, %v24655_v11  ;;  %16295 = vmatpush3.bf16.msra.mxu1 %v17460_v47  ;;  %v4178_v63 = vsel %vm4062_vm5, %v4168_v4, %v4177_v62  ;;  %v4207_v47 = vshrl.u32 %v17456_v22, 16  ;;  %v24662_v4 = vld [vmem:[#allocation29_spill] sm:$0xff] }
 0x158   : > { %v15923_v34 = vpop.f32.mrf.mxu1  ;;  %v15971_v21 = vpop.f32.mrf.mxu0 }
 0x159   : > { %v19709_v7 = vadd.f32 %v15971_v21, %v1239_v48  ;;  %v24657_v48 = vld [vmem:[#allocation20_spill] sm:$0xff] }
 0x15a   : > { %v1246_v46 = vpop.f32.mrf.mxu1  ;;  %v1580_v16 = vpop.f32.mrf.mxu0  ;;  %v1255_v21 = vadd.f32 %v15923_v34, %v24657_v48  ;;  %v4187_v34 = vsel %vm4062_vm5, %v4177_v62, %v4186_v55 }
 0x15b   : > { %v19714_v26 = vadd.f32 %v1580_v16, %v1231_v0  ;;  %v4194_v0 = vrot.slane %v4192_v13, 2  ;;  %v1247_v16 = vadd.f32 %v1246_v46, %v24658_v25 }
 0x15c   : > { %v15926_v33 = vpop.f32.mrf.mxu1  ;;  %v15974_v57 = vpop.f32.mrf.mxu0  ;;  %16225 = vmatmul.mubr.bf16.gmra.mxu1 %v24654_v39  ;;  %16273 = vmatmul.mubr.bf16.gmra.mxu0 %v4160_v45  ;;  %v24659_v39 = vld [vmem:[#allocation36_spill] sm:$0xff] }
 0x15d   : > { %v19718_v60 = vadd.f32 %v15974_v57, %v1252_v10  ;;  %16228 = vmatprep.mubr.bf16.mxu1 %v24656_v50  ;;  %16276 = vmatprep.mubr.bf16.mxu0 %v4169_v9  ;;  %v4203_v10 = vrot.slane %v4201_v37, 2  ;;  %v17457_v57 = vld [vmem:[%s17946_s15 + $0xa0] sm:$0xff]   ;;  %v1268_v11 = vadd.f32 %v15926_v33, %v24659_v39  ;;  %v24661_v50 = vld [vmem:[#allocation52_spill] sm:$0xff]  ;;  %v4195_v46 = vor.u32 %v4194_v0, %v4191_v15  ;;  %v24664_v0 = vld [vmem:[#allocation37_spill] sm:$0xff] }
 0x15e   : > { %v1259_v58 = vpop.f32.mrf.mxu1  ;;  %v1593_v61 = vpop.f32.mrf.mxu0  ;;  %v4210_v37 = vshll.u32 %v17456_v22, 16  ;;  %v17461_v33 = vld [vmem:[%s24232_s4 + $0x68] sm:$0xff]   ;;  %v4219_v15 = vshll.u32 %v17457_v57, 16 }
 0x15f   : > { %v19725_v45 = vadd.f32 %v1593_v61, %v1244_v40  ;;  %v1260_v61 = vadd.f32 %v1259_v58, %v24662_v4  ;;  %v4204_v25 = vor.u32 %v4203_v10, %v4200_v31  ;;  %16296 = vmatprep.subr.bf16.mxu1 %v17461_v33  ;;  %v4196_v22 = vsel %vm4062_vm5, %v4186_v55, %v4195_v46 }
 0x160   : > { %v15927_v59 = vpop.f32.mrf.mxu1  ;;  %v15975_v1 = vpop.f32.mrf.mxu0  ;;  %16297 = vmatpush3.bf16.msra.mxu1 %v17461_v33  ;;  %v4212_v31 = vrot.slane %v4210_v37, 2  ;;  %v17458_v37 = vld [vmem:[%s17946_s15 + $0xa8] ss:$0 sps:$4 sm:$0x11]   ;;  %s13859_s15 = sshll.u32 %s25221_s14, 3 }
 0x161   : > { %v19729_v9 = vadd.f32 %v15975_v1, %v1255_v21  ;;  %s374_s17 = scalar_lea.vmem %s24238_s10, %s13859_s15 }
 0x162   : > { %v19732_v38 = vpop.f32.mrf.mxu1  ;;  %v1596_v2 = vpop.f32.mrf.mxu0 }
 0x163   : > { %v19737_v28 = vadd.f32 %v1596_v2, %v1247_v16  ;;  %v4216_v16 = vshrl.u32 %v17457_v57, 16  ;;  %v4205_v57 = vsel %vm4062_vm5, %v4195_v46, %v4204_v25 }
 0x164   : > { %v15978_v13 = vpop.f32.mrf.mxu0  ;;  %v15998_v40 = vpop.f32.mrf.mxu1  ;;  %16229 = vmatmul.mubr.bf16.gmra.mxu1 %v24661_v50  ;;  %16277 = vmatmul.mubr.bf16.gmra.mxu0 %v4178_v63  ;;  %v1271_v63 = vadd.f32 %v15927_v59, %v24664_v0 }
 0x165   : > { %24660 = vst [vmem:[#allocation40_spill] sm:$0xff] %v19737_v28  ;;  %v19741_v48 = vadd.f32 %v15978_v13, %v1268_v11  ;;  %v2222_v62 = vadd.f32 %v15998_v40, %v19563_v41  ;;  %16232 = vmatprep.mubr.bf16.mxu1 %v24663_v35  ;;  %16280 = vmatprep.mubr.bf16.mxu0 %v4187_v34  ;;  %v4209_v13 = vrot.slane %v4207_v47, 1  ;;  %v4221_v40 = vrot.slane %v4219_v15, 2  ;;  %v17462_v15 = vld [vmem:[%s24232_s4 + $0x60] sm:$0xff]  }
 0x166   : > { %v1609_v21 = vpop.f32.mrf.mxu0  ;;  %v2077_v1 = vpop.f32.mrf.mxu1  ;;  %16298 = vmatprep.subr.bf16.mxu1 %v17462_v15 }
 0x167   : > { %v19749_v58 = vadd.f32 %v1609_v21, %v1260_v61  ;;  %v2220_v2 = vadd.f32 %v2077_v1, %v19572_v19  ;;  %v4218_v19 = vrot.slane %v4216_v16, 1  ;;  %v24665_v61 = vld [vmem:[#allocation16_spill] sm:$0xff]  ;;  %v4213_v47 = vor.u32 %v4212_v31, %v4209_v13  ;;  %16299 = vmatpush3.bf16.msra.mxu1 %v17462_v15 }
 0x168   : > { %v15979_v41 = vpop.f32.mrf.mxu0  ;;  %v15999_v39 = vpop.f32.mrf.mxu1 }
 0x169   : > { %v19753_v34 = vadd.f32 %v15979_v41, %v1271_v63  ;;  %v2223_v11 = vadd.f32 %v15999_v39, %v19578_v36  ;;  %v24666_v36 = vld [vmem:[#allocation17_spill] sm:$0xff]  ;;  %v4222_v1 = vor.u32 %v4221_v40, %v4218_v19  ;;  %v4214_v41 = vsel %vm4062_vm5, %v4204_v25, %v4213_v47 }
 0x16a   : > { %v19756_v10 = vpop.f32.mrf.mxu0  ;;  %v19758_v59 = vpop.f32.mrf.mxu1  ;;  %v4225_v39 = vshll.u32 %v17458_v37, 16 }
 0x16c   : > { %v16002_v50 = vpop.f32.mrf.mxu1  ;;  %v16050_v4 = vpop.f32.mrf.mxu0  ;;  %16233 = vmatmul.mubr.bf16.gmra.mxu1 %v24665_v61  ;;  %16281 = vmatmul.mubr.bf16.gmra.mxu0 %v4196_v22  ;;  %v4227_v25 = vrot.slane %v4225_v39, 2  ;;  %v17463_v61 = vld [vmem:[%s24232_s4 + $0x58] sm:$0xff]  }
 0x16d   : > { %v2226_v55 = vadd.f32 %v16002_v50, %v19588_v49  ;;  %v19763_v35 = vadd.f32 %v16050_v4, %v2222_v62  ;;  %16236 = vmatprep.mubr.bf16.mxu1 %v24666_v36  ;;  %16284 = vmatprep.mubr.bf16.mxu0 %v4205_v57  ;;  %v24667_v57 = vrot.slane %v19064_v44, 1 }
 0x16e   : > { %v2093_v33 = vpop.f32.mrf.mxu1  ;;  %v2391_v21 = vpop.f32.mrf.mxu0  ;;  %16300 = vmatprep.subr.bf16.mxu1 %v17463_v61 }
 0x16f   : > { %v2224_v46 = vadd.f32 %v2093_v33, %v19596_v17  ;;  %v19768_v16 = vadd.f32 %v2391_v21, %v2220_v2  ;;  %v4223_v17 = vsel %vm4062_vm5, %v4213_v47, %v4222_v1  ;;  %16301 = vmatpush3.bf16.msra.mxu1 %v17463_v61 }
 0x170   : > { %v16003_v0 = vpop.f32.mrf.mxu1  ;;  %v16051_v49 = vpop.f32.mrf.mxu0 }
 0x171   : > { %v2227_v62 = vadd.f32 %v16003_v0, %v19602_v27  ;;  %v19774_v63 = vadd.f32 %v16051_v49, %v2223_v11 }
 0x172   : > { %v19777_v22 = vpop.f32.mrf.mxu1  ;;  %v19779_v13 = vpop.f32.mrf.mxu0 }
 0x174   : > { %v16006_v2 = vpop.f32.mrf.mxu1  ;;  %v16054_v31 = vpop.f32.mrf.mxu0  ;;  %16237 = vmatmul.mubr.bf16.gmra.mxu1 %v24667_v57  ;;  %16285 = vmatmul.mubr.bf16.gmra.mxu0 %v4214_v41 }
 0x175   : > { %v2230_v27 = vadd.f32 %v16006_v2, %v19610_v20  ;;  %v19785_v11 = vadd.f32 %v16054_v31, %v2226_v55  ;;  %16288 = vmatprep.mubr.bf16.mxu0 %v4223_v17  ;;  %v4228_v20 = vsel %vm4062_vm5, %v4222_v1, %v4227_v25 }
 0x176   : > { %v2109_v19 = vpop.f32.mrf.mxu1  ;;  %v2407_v40 = vpop.f32.mrf.mxu0 }
 0x177   : > { %v2228_v50 = vadd.f32 %v2109_v19, %v19618_v56  ;;  %v19788_v4 = vadd.f32 %v2407_v40, %v2224_v46  ;;  %v17464_v46 = vld [vmem:[%s24232_s4 + $0x38] sm:$0xff]  }
 0x178   : > { %v16007_v36 = vpop.f32.mrf.mxu1  ;;  %v16055_v44 = vpop.f32.mrf.mxu0  ;;  %16344 = vmatprep.subr.bf16.mxu0 %v17464_v46 }
 0x179   : > { %v2231_v47 = vadd.f32 %v16007_v36, %v19621_v32  ;;  %v19794_v37 = vadd.f32 %v16055_v44, %v2227_v62  ;;  %16345 = vmatpush3.bf16.msra.mxu0 %v17464_v46 }
 0x17a   : > { %v19797_v55 = vpop.f32.mrf.mxu1  ;;  %v19799_v33 = vpop.f32.mrf.mxu0 }
 0x17c   : > { %v16010_v56 = vpop.f32.mrf.mxu1  ;;  %v16058_v21 = vpop.f32.mrf.mxu0  ;;  %16289 = vmatmul.mubr.bf16.gmra.mxu0 %v4228_v20 }
 0x17d   : > { %v2234_v15 = vadd.f32 %v16010_v56, %v19630_v42  ;;  %v19805_v32 = vadd.f32 %v16058_v21, %v2230_v27  ;;  %v17466_v42 = vld [vmem:[%s24232_s4 + $0x30] sm:$0xff]  }
 0x17e   : > { %v2125_v0 = vpop.f32.mrf.mxu1  ;;  %v2423_v49 = vpop.f32.mrf.mxu0  ;;  %16346 = vmatprep.subr.bf16.mxu0 %v17466_v42 }
 0x17f   : > { %v2232_v1 = vadd.f32 %v2125_v0, %v19638_v12  ;;  %v19808_v62 = vadd.f32 %v2423_v49, %v2228_v50  ;;  %16347 = vmatpush3.bf16.msra.mxu0 %v17466_v42 }
 0x180   : > { %v16011_v41 = vpop.f32.mrf.mxu1  ;;  %v16059_v39 = vpop.f32.mrf.mxu0 }
 0x181   : > { %v2235_v17 = vadd.f32 %v16011_v41, %v19641_v14  ;;  %v19811_v2 = vadd.f32 %v16059_v39, %v2231_v47  ;;  %v17467_v14 = vld [vmem:[%s24232_s4 + $0x28] sm:$0xff]  }
 0x182   : > { %v19816_v31 = vpop.f32.mrf.mxu1  ;;  %v19818_v57 = vpop.f32.mrf.mxu0  ;;  %16348 = vmatprep.subr.bf16.mxu0 %v17467_v14 }
 0x183   : > { %16349 = vmatpush3.bf16.msra.mxu0 %v17467_v14  ;;  %v17468_v14 = vld [vmem:[%s24232_s4 + $0x48] sm:$0xff]  }
 0x184   : > { %v16014_v27 = vpop.f32.mrf.mxu1  ;;  %v16062_v12 = vpop.f32.mrf.mxu0 }
 0x185   : > { %v2238_v25 = vadd.f32 %v16014_v27, %v19649_v5  ;;  %v19821_v19 = vadd.f32 %v16062_v12, %v2234_v15  ;;  %v17469_v5 = vld [vmem:[%s24232_s4 + $0x20] sm:$0xff]  }
 0x186   : > { %v2141_v40 = vpop.f32.mrf.mxu1  ;;  %v2439_v50 = vpop.f32.mrf.mxu0  ;;  %16350 = vmatprep.subr.bf16.mxu0 %v17469_v5 }
 0x187   : > { %v2236_v61 = vadd.f32 %v2141_v40, %v19656_v43  ;;  %v19827_v36 = vadd.f32 %v2439_v50, %v2232_v1  ;;  %v17465_v43 = vld [vmem:[%s24232_s4 + $0x50] sm:$0xff]   ;;  %16351 = vmatpush3.bf16.msra.mxu0 %v17469_v5  ;;  %v17470_v1 = vld [vmem:[%s24232_s4 + $0x18] sm:$0xff]   ;;  %v17473_v5 = vld [vmem:[%s24232_s4 + $0x8] sm:$0xff]  }
 0x188   : > { %v16015_v44 = vpop.f32.mrf.mxu1  ;;  %v16063_v47 = vpop.f32.mrf.mxu0  ;;  %16302 = vmatprep.subr.bf16.mxu1 %v17465_v43  ;;  %16352 = vmatprep.subr.bf16.mxu0 %v17470_v1  ;;  %v17472_v40 = vld [vmem:[%s24232_s4 + $0x10] sm:$0xff]  }
 0x189   : > { %v2239_v20 = vadd.f32 %v16015_v44, %v19658_v8  ;;  %v19830_v56 = vadd.f32 %v16063_v47, %v2235_v17  ;;  %16303 = vmatpush3.bf16.msra.mxu1 %v17465_v43 }
 0x18a   : > { %v19835_v21 = vpop.f32.mrf.mxu1  ;;  %v19837_v46 = vpop.f32.mrf.mxu0  ;;  %16304 = vmatprep.subr.bf16.mxu1 %v17468_v14 }
 0x18b   : > { %16353 = vmatpush3.bf16.msra.mxu0 %v17470_v1 }
 0x18c   : > { %v16018_v15 = vpop.f32.mrf.mxu1  ;;  %v16066_v0 = vpop.f32.mrf.mxu0  ;;  %16354 = vmatprep.subr.bf16.mxu0 %v17472_v40 }
 0x18d   : > { %v2242_v8 = vadd.f32 %v16018_v15, %v19667_v54  ;;  %v19843_v49 = vadd.f32 %v16066_v0, %v2238_v25  ;;  %16305 = vmatpush3.bf16.msra.mxu1 %v17468_v14 }
 0x18e   : > { %v2157_v41 = vpop.f32.mrf.mxu1  ;;  %v2455_v39 = vpop.f32.mrf.mxu0 }
 0x18f   : > { %v2240_v17 = vadd.f32 %v2157_v41, %v19675_v52  ;;  %v19849_v42 = vadd.f32 %v2455_v39, %v2236_v61  ;;  %16355 = vmatpush3.bf16.msra.mxu0 %v17472_v40 }
 0x190   : > { %v16019_v27 = vpop.f32.mrf.mxu1  ;;  %v16067_v12 = vpop.f32.mrf.mxu0  ;;  %16356 = vmatprep.subr.bf16.mxu0 %v17473_v5 }
 0x191   : > { %v2243_v54 = vadd.f32 %v16019_v27, %v19682_v51  ;;  %v19852_v25 = vadd.f32 %v16067_v12, %v2239_v20  ;;  %v17471_v20 = vld [vmem:[%s24232_s4 + $0x40] sm:$0xff]  }
 0x192   : > { %v19860_v50 = vpop.f32.mrf.mxu1  ;;  %v19862_v52 = vpop.f32.mrf.mxu0  ;;  %16306 = vmatprep.subr.bf16.mxu1 %v17471_v20 }
 0x193   : > { %16307 = vmatpush3.bf16.msra.mxu1 %v17471_v20  ;;  %16357 = vmatpush3.bf16.msra.mxu0 %v17473_v5 }
 0x194   : > { %v16022_v61 = vpop.f32.mrf.mxu1  ;;  %v16070_v44 = vpop.f32.mrf.mxu0 }
 0x195   : > { %v2246_v51 = vadd.f32 %v16022_v61, %v19700_v23  ;;  %v19865_v47 = vadd.f32 %v16070_v44, %v2242_v8 }
 0x196   : > { %v2173_v43 = vpop.f32.mrf.mxu1  ;;  %v2471_v15 = vpop.f32.mrf.mxu0 }
 0x197   : > { %v2244_v0 = vadd.f32 %v2173_v43, %v19704_v3  ;;  %v19874_v1 = vadd.f32 %v2471_v15, %v2240_v17  ;;  %v17477_v3 = vld [vmem:[%s24232_s4] sm:$0xff]  }
 0x198   : > { %v16023_v41 = vpop.f32.mrf.mxu1  ;;  %v16071_v23 = vpop.f32.mrf.mxu0  ;;  %16358 = vmatprep.subr.bf16.mxu0 %v17477_v3 }
 0x199   : > { %v2247_v8 = vadd.f32 %v16023_v41, %v19709_v7  ;;  %v19877_v39 = vadd.f32 %v16071_v23, %v2243_v54  ;;  %16359 = vmatpush3.bf16.msra.mxu0 %v17477_v3 }
 0x19a   : > { %v19879_v27 = vpop.f32.mrf.mxu1  ;;  %v19881_v12 = vpop.f32.mrf.mxu0 }
 0x19b   : > { %24668 = vst [vmem:[#allocation45_spill] sm:$0xff] %v19879_v27  ;;  %24669 = vst [vmem:[#allocation46_spill] sm:$0xff] %v19881_v12 }
 0x19c   : > { %v16026_v17 = vpop.f32.mrf.mxu1  ;;  %v16074_v14 = vpop.f32.mrf.mxu0 }
 0x19d   : > { %v2250_v40 = vadd.f32 %v16026_v17, %v19718_v60  ;;  %v19887_v61 = vadd.f32 %v16074_v14, %v2246_v51 }
 0x19e   : > { %v2189_v44 = vpop.f32.mrf.mxu1  ;;  %v2487_v7 = vpop.f32.mrf.mxu0 }
 0x19f   : > { %v2248_v54 = vadd.f32 %v2189_v44, %v19725_v45  ;;  %v19890_v20 = vadd.f32 %v2487_v7, %v2244_v0  ;;  %v19905_v0 = vld [vmem:[%s24232_s4 + $0xb8] sm:$0xff]  }
 0x1a0   : > { %v16027_v5 = vpop.f32.mrf.mxu1  ;;  %v16075_v43 = vpop.f32.mrf.mxu0  ;;  %24672 = vst [vmem:[#allocation49_spill] sm:$0xff] %v19905_v0  ;;  %16396 = vmatprep.subr.bf16.mxu1 %v19905_v0 }
 0x1a1   : > { %v2251_v15 = vadd.f32 %v16027_v5, %v19729_v9  ;;  %v19893_v41 = vadd.f32 %v16075_v43, %v2247_v8 }
 0x1a2   : > { %v19895_v23 = vpop.f32.mrf.mxu1  ;;  %v19897_v28 = vpop.f32.mrf.mxu0 }
 0x1a3   : > { %24670 = vst [vmem:[#allocation34_spill] sm:$0xff] %v19895_v23  ;;  %24671 = vst [vmem:[#allocation47_spill] sm:$0xff] %v19897_v28 }
 0x1a4   : > { %v16030_v60 = vpop.f32.mrf.mxu1  ;;  %v16078_v51 = vpop.f32.mrf.mxu0 }
 0x1a5   : > { %v2254_v3 = vadd.f32 %v16030_v60, %v19741_v48  ;;  %v19900_v17 = vadd.f32 %v16078_v51, %v2250_v40 }
 0x1a6   : > { %v2205_v14 = vpop.f32.mrf.mxu1  ;;  %v2503_v45 = vpop.f32.mrf.mxu0 }
 0x1a7   : > { %v2252_v9 = vadd.f32 %v2205_v14, %v19749_v58  ;;  %v19908_v8 = vadd.f32 %v2503_v45, %v2248_v54 }
 0x1a8   : > { %v16031_v44 = vpop.f32.mrf.mxu1  ;;  %v16079_v7 = vpop.f32.mrf.mxu0 }
 0x1a9   : > { %v2255_v5 = vadd.f32 %v16031_v44, %v19753_v34  ;;  %v19912_v48 = vadd.f32 %v16079_v7, %v2251_v15 }
 0x1aa   : > { %v19914_v40 = vpop.f32.mrf.mxu1  ;;  %v19916_v43 = vpop.f32.mrf.mxu0 }
 0x1ab   : > { %24673 = vst [vmem:[#allocation39_spill] sm:$0xff] %v19914_v40  ;;  %24674 = vst [vmem:[#allocation7_spill] sm:$0xff] %v19916_v43 }
 0x1ac   : > { %v16082_v60 = vpop.f32.mrf.mxu0  ;;  %v16102_v51 = vpop.f32.mrf.mxu1 }
 0x1ad   : > { %v19918_v28 = vadd.f32 %v16082_v60, %v2254_v3  ;;  %v2980_v58 = vadd.f32 %v16102_v51, %v19763_v35 }
 0x1ae   : > { %v2519_v54 = vpop.f32.mrf.mxu0  ;;  %v2835_v14 = vpop.f32.mrf.mxu1 }
 0x1af   : > { %v19921_v45 = vadd.f32 %v2519_v54, %v2252_v9  ;;  %v2978_v0 = vadd.f32 %v2835_v14, %v19768_v16 }
 0x1b0   : > { %v16083_v23 = vpop.f32.mrf.mxu0  ;;  %v16103_v34 = vpop.f32.mrf.mxu1 }
 0x1b1   : > { %v19924_v15 = vadd.f32 %v16083_v23, %v2255_v5  ;;  %v2981_v44 = vadd.f32 %v16103_v34, %v19774_v63 }
 0x1b2   : > { %v19927_v7 = vpop.f32.mrf.mxu0  ;;  %v19929_v43 = vpop.f32.mrf.mxu1 }
 0x1b3   : > { %24675 = vst [vmem:[#allocation51_spill] sm:$0xff] %v19927_v7 }
 0x1b4   : > { %v16106_v3 = vpop.f32.mrf.mxu1  ;;  %v16154_v60 = vpop.f32.mrf.mxu0 }
 0x1b5   : > { %v2984_v35 = vadd.f32 %v16106_v3, %v19785_v11  ;;  %v19932_v51 = vadd.f32 %v16154_v60, %v2980_v58 }
 0x1b6   : > { %v2851_v9 = vpop.f32.mrf.mxu1  ;;  %v3400_v54 = vpop.f32.mrf.mxu0 }
 0x1b7   : > { %v2982_v16 = vadd.f32 %v2851_v9, %v19788_v4  ;;  %v19935_v14 = vadd.f32 %v3400_v54, %v2978_v0 }
 0x1b8   : > { %v16107_v23 = vpop.f32.mrf.mxu1  ;;  %v16155_v5 = vpop.f32.mrf.mxu0 }
 0x1b9   : > { %v2985_v63 = vadd.f32 %v16107_v23, %v19794_v37  ;;  %v19938_v34 = vadd.f32 %v16155_v5, %v2981_v44 }
 0x1ba   : > { %v19940_v7 = vpop.f32.mrf.mxu1  ;;  %v19942_v40 = vpop.f32.mrf.mxu0 }
 0x1bb   : > { %24676 = vst [vmem:[#allocation41_spill] sm:$0xff] %v19940_v7 }
 0x1bc   : > { %v16110_v12 = vpop.f32.mrf.mxu1  ;;  %v16158_v11 = vpop.f32.mrf.mxu0 }
 0x1bd   : > { %v2988_v58 = vadd.f32 %v16110_v12, %v19805_v32  ;;  %v19945_v3 = vadd.f32 %v16158_v11, %v2984_v35 }
 0x1be   : > { %v2867_v60 = vpop.f32.mrf.mxu1  ;;  %v3416_v4 = vpop.f32.mrf.mxu0 }
 0x1bf   : > { %v2986_v0 = vadd.f32 %v2867_v60, %v19808_v62  ;;  %v19948_v9 = vadd.f32 %v3416_v4, %v2982_v16 }
 0x1c0   : > { %v16111_v54 = vpop.f32.mrf.mxu1  ;;  %v16159_v37 = vpop.f32.mrf.mxu0 }
 0x1c1   : > { %v2989_v44 = vadd.f32 %v16111_v54, %v19811_v2  ;;  %v19951_v23 = vadd.f32 %v16159_v37, %v2985_v63 }
 0x1c2   : > { %v19953_v5 = vpop.f32.mrf.mxu1  ;;  %v19955_v7 = vpop.f32.mrf.mxu0 }
 0x1c3   : > { %24677 = vst [vmem:[#allocation12_spill] sm:$0xff] %v19951_v23  ;;  %24678 = vst [vmem:[#allocation48_spill] sm:$0xff] %v19953_v5 }
 0x1c4   : > { %v16114_v27 = vpop.f32.mrf.mxu1  ;;  %v16162_v32 = vpop.f32.mrf.mxu0 }
 0x1c5   : > { %v2992_v12 = vadd.f32 %v16114_v27, %v19821_v19  ;;  %v19958_v35 = vadd.f32 %v16162_v32, %v2988_v58 }
 0x1c6   : > { %v2883_v11 = vpop.f32.mrf.mxu1  ;;  %v3432_v62 = vpop.f32.mrf.mxu0 }
 0x1c7   : > { %v2990_v16 = vadd.f32 %v2883_v11, %v19827_v36  ;;  %v19961_v60 = vadd.f32 %v3432_v62, %v2986_v0 }
 0x1c8   : > { %v16115_v4 = vpop.f32.mrf.mxu1  ;;  %v16163_v2 = vpop.f32.mrf.mxu0 }
 0x1c9   : > { %v2993_v63 = vadd.f32 %v16115_v4, %v19830_v56  ;;  %v19964_v54 = vadd.f32 %v16163_v2, %v2989_v44 }
 0x1ca   : > { %v19966_v37 = vpop.f32.mrf.mxu1  ;;  %v19968_v23 = vpop.f32.mrf.mxu0 }
 0x1cb   : > { %24679 = vst [vmem:[#allocation43_spill] sm:$0xff] %v19964_v54 }
 0x1cc   : > { %v16118_v5 = vpop.f32.mrf.mxu1  ;;  %v16166_v19 = vpop.f32.mrf.mxu0 }
 0x1cd   : > { %v2996_v27 = vadd.f32 %v16118_v5, %v19843_v49  ;;  %v19971_v58 = vadd.f32 %v16166_v19, %v2992_v12  ;;  %v19986_v49 = vld [vmem:[%s24232_s4 + $0xf8] sm:$0xff]  }
 0x1ce   : > { %v2899_v32 = vpop.f32.mrf.mxu1  ;;  %v3448_v36 = vpop.f32.mrf.mxu0  ;;  %24683 = vst [vmem:[#allocation25_spill] sm:$0xff] %v19986_v49  ;;  %16448 = vmatprep.subr.bf16.mxu0 %v19986_v49 }
 0x1cf   : > { %24680 = vst [vmem:[#allocation21_spill] sm:$0xff] %v19971_v58  ;;  %v2994_v0 = vadd.f32 %v2899_v32, %v19849_v42  ;;  %v19974_v11 = vadd.f32 %v3448_v36, %v2990_v16 }
 0x1d0   : > { %v16119_v62 = vpop.f32.mrf.mxu1  ;;  %v16167_v56 = vpop.f32.mrf.mxu0 }
 0x1d1   : > { %24681 = vst [vmem:[#allocation23_spill] sm:$0xff] %v19974_v11  ;;  %v2997_v44 = vadd.f32 %v16119_v62, %v19852_v25  ;;  %v19977_v4 = vadd.f32 %v16167_v56, %v2993_v63 }
 0x1d2   : > { %v19979_v2 = vpop.f32.mrf.mxu1  ;;  %v19981_v54 = vpop.f32.mrf.mxu0 }
 0x1d3   : > { %24682 = vst [vmem:[#allocation24_spill] sm:$0xff] %v19977_v4 }
 0x1d4   : > { %v16122_v5 = vpop.f32.mrf.mxu1  ;;  %v16170_v12 = vpop.f32.mrf.mxu0 }
 0x1d5   : > { %v3000_v42 = vadd.f32 %v16122_v5, %v19865_v47  ;;  %v19989_v16 = vadd.f32 %v16170_v12, %v2996_v27 }
 0x1d6   : > { %v2915_v25 = vpop.f32.mrf.mxu1  ;;  %v3464_v63 = vpop.f32.mrf.mxu0 }
 0x1d7   : > { %24684 = vst [vmem:[#allocation27_spill] sm:$0xff] %v19989_v16  ;;  %v2998_v19 = vadd.f32 %v2915_v25, %v19874_v1  ;;  %v19993_v32 = vadd.f32 %v3464_v63, %v2994_v0 }
 0x1d8   : > { %v16123_v36 = vpop.f32.mrf.mxu1  ;;  %v16171_v62 = vpop.f32.mrf.mxu0 }
 0x1d9   : > { %24685 = vst [vmem:[#allocation30_spill] sm:$0xff] %v19993_v32  ;;  %v3001_v56 = vadd.f32 %v16123_v36, %v19877_v39  ;;  %v19996_v4 = vadd.f32 %v16171_v62, %v2997_v44  ;;  %v20008_v44 = vpop.permute.xlu0 %4598 }
 0x1da   : > { %v19998_v11 = vpop.f32.mrf.mxu1  ;;  %v20000_v58 = vpop.f32.mrf.mxu0  ;;  %24689 = vst [vmem:[#allocation8_spill] sm:$0xff] %v20008_v44 }
 0x1db   : > { %24686 = vst [vmem:[#allocation31_spill] sm:$0xff] %v19996_v4 }
 0x1dc   : > { %v16126_v47 = vpop.f32.mrf.mxu1  ;;  %v16174_v27 = vpop.f32.mrf.mxu0 }
 0x1dd   : > { %v3004_v5 = vadd.f32 %v16126_v47, %v19887_v61  ;;  %v20003_v12 = vadd.f32 %v16174_v27, %v3000_v42  ;;  %v20017_v47 = vpop.permute.xlu1 %4608 }
 0x1de   : > { %v2931_v49 = vpop.f32.mrf.mxu1  ;;  %v3480_v1 = vpop.f32.mrf.mxu0  ;;  %24691 = vst [vmem:[#allocation19_spill] sm:$0xff] %v20017_v47 }
 0x1df   : > { %24687 = vst [vmem:[#allocation33_spill] sm:$0xff] %v20003_v12  ;;  %v3002_v0 = vadd.f32 %v2931_v49, %v19890_v20  ;;  %v20006_v25 = vadd.f32 %v3480_v1, %v2998_v19  ;;  %v20022_v1 = vpop.permute.xlu0 %4603 }
 0x1e0   : > { %v16127_v63 = vpop.f32.mrf.mxu1  ;;  %v16175_v39 = vpop.f32.mrf.mxu0  ;;  %24693 = vst [vmem:[#allocation9_spill] sm:$0xff] %v20022_v1 }
 0x1e1   : > { %24688 = vst [vmem:[#allocation35_spill] sm:$0xff] %v20006_v25  ;;  %v3005_v36 = vadd.f32 %v16127_v63, %v19893_v41  ;;  %v20011_v62 = vadd.f32 %v16175_v39, %v3001_v56 }
 0x1e2   : > { %v20013_v4 = vpop.f32.mrf.mxu1  ;;  %v20015_v32 = vpop.f32.mrf.mxu0 }
 0x1e3   : > { %24690 = vst [vmem:[#allocation13_spill] sm:$0xff] %v20011_v62 }
 0x1e4   : > { %v16130_v61 = vpop.f32.mrf.mxu1  ;;  %v16178_v42 = vpop.f32.mrf.mxu0 }
 0x1e5   : > { %v3008_v20 = vadd.f32 %v16130_v61, %v19900_v17  ;;  %v20020_v49 = vadd.f32 %v16178_v42, %v3004_v5  ;;  %v20034_v17 = vpop.permute.xlu1 %4613  ;;  %v20036_v42 = vpop.permute.xlu0 %4618 }
 0x1e6   : > { %v2947_v19 = vpop.f32.mrf.mxu1  ;;  %v3496_v27 = vpop.f32.mrf.mxu0  ;;  %24697 = vst [vmem:[#allocation18_spill] sm:$0xff] %v20034_v17  ;;  %24698 = vst [vmem:[#allocation28_spill] sm:$0xff] %v20036_v42 }
 0x1e7   : > { %24692 = vst [vmem:[#allocation22_spill] sm:$0xff] %v20020_v49  ;;  %v3006_v41 = vadd.f32 %v2947_v19, %v19908_v8  ;;  %v20025_v56 = vadd.f32 %v3496_v27, %v3002_v0 }
 0x1e8   : > { %v16131_v63 = vpop.f32.mrf.mxu1  ;;  %v16179_v39 = vpop.f32.mrf.mxu0 }
 0x1e9   : > { %24694 = vst [vmem:[#allocation38_spill] sm:$0xff] %v20025_v56  ;;  %v3009_v62 = vadd.f32 %v16131_v63, %v19912_v48  ;;  %v20028_v25 = vadd.f32 %v16179_v39, %v3005_v36 }
 0x1ea   : > { %v20030_v12 = vpop.f32.mrf.mxu1  ;;  %v20032_v16 = vpop.f32.mrf.mxu0 }
 0x1eb   : > { %24695 = vst [vmem:[#allocation11_spill] sm:$0xff] %v20028_v25  ;;  %24696 = vst [vmem:[#allocation42_spill] sm:$0xff] %v20032_v16  ;;  %v20044_v25 = vpop.permute.xlu1 %4623 }
 0x1ec   : > { %v16134_v5 = vpop.f32.mrf.mxu1  ;;  %v16182_v61 = vpop.f32.mrf.mxu0  ;;  %24701 = vst [vmem:[#allocation14_spill] sm:$0xff] %v20044_v25  ;;  %v5045_v25 = vld [vmem:[#allocation2 + $0x4] sm:$0x8] }
 0x1ed   : > { %v3012_v8 = vadd.f32 %v16134_v5, %v19918_v28  ;;  %v20039_v0 = vadd.f32 %v16182_v61, %v3008_v20  ;;  %v20053_v28 = vpop.permute.xlu0 %4628  ;;  %v4993_v20 = vld [vmem:[#allocation2 + $0x8] sm:$0xf]  ;;  %v4992_v5 = vld [vmem:[#allocation2 + $0x4] sm:$0xc] }
 0x1ee   : > { %v2963_v19 = vpop.f32.mrf.mxu1  ;;  %v3512_v27 = vpop.f32.mrf.mxu0  ;;  %24705 = vst [vmem:[#allocation36_spill] sm:$0xff] %v20053_v28 }
 0x1ef   : > { %24699 = vst [vmem:[#allocation32_spill] sm:$0xff] %v20039_v0  ;;  %v3010_v48 = vadd.f32 %v2963_v19, %v19921_v45  ;;  %v20042_v36 = vadd.f32 %v3512_v27, %v3006_v41  ;;  %v20057_v0 = vpop.permute.xlu1 %4633 }
 0x1f0   : > { %v16135_v63 = vpop.f32.mrf.mxu1  ;;  %v16183_v39 = vpop.f32.mrf.mxu0  ;;  %24707 = vst [vmem:[#allocation29_spill] sm:$0xff] %v20057_v0 }
 0x1f1   : > { %24700 = vst [vmem:[#allocation44_spill] sm:$0xff] %v20042_v36  ;;  %v3013_v56 = vadd.f32 %v16135_v63, %v19924_v15  ;;  %v20047_v49 = vadd.f32 %v16183_v39, %v3009_v62  ;;  %v14237_v36 = vcombine.low %v4992_v5, %v4993_v20  ;;  %v24709_v39 = vld [vmem:[#allocation26_spill] sm:$0xff]  ;;  %v2225_v5 = vadd.f32 %v19777_v22, %v19606_v30  ;;  %v20084_v22 = vld [vmem:[%s24231_s3] ss:$0 sm:$0xff] }
 0x1f2   : > { %v20049_v16 = vpop.f32.mrf.mxu1  ;;  %v20051_v42 = vpop.f32.mrf.mxu0 }
 0x1f3   : > { %24702 = vst [vmem:[#allocation50_spill] sm:$0xff] %v20047_v49  ;;  %24703 = vst [vmem:[#allocation20_spill] sm:$0xff] %v20049_v16  ;;  %v1263_v49 = vadd.f32 %v19732_v38, %v24709_v39  ;;  %v2229_v38 = vadd.f32 %v19797_v55, %v19626_v6  ;;  %v2539_v39 = vadd.f32 %v19799_v33, %v2225_v5 }
 0x1f4   : > { %24704 = vst [vmem:[#allocation15_spill] sm:$0xff] %v20051_v42  ;;  %v16186_v61 = vpop.f32.mrf.mxu0  ;;  %v16206_v45 = vpop.f32.mrf.mxu1  ;;  %v2237_v55 = vadd.f32 %v19835_v21, %v19663_v18 }
 0x1f5   : > { %v20055_v41 = vadd.f32 %v16186_v61, %v3012_v8  ;;  %v20063_v42 = vpop.permute.xlu0 %4638  ;;  %v2221_v8 = vadd.f32 %v19758_v59, %v19585_v53  ;;  %v2233_v53 = vadd.f32 %v19816_v31, %v19646_v29  ;;  %v2543_v6 = vadd.f32 %v19818_v57, %v2229_v38 }
 0x1f6   : > { %v3528_v19 = vpop.f32.mrf.mxu0  ;;  %v3736_v27 = vpop.f32.mrf.mxu1  ;;  %24710 = vst [vmem:[#allocation37_spill] sm:$0xff] %v20063_v42  ;;  %v2241_v57 = vadd.f32 %v19860_v50, %v19693_v24  ;;  %v24714_v24 = vld [vmem:[#allocation45_spill] sm:$0xff] }
 0x1f7   : > { %24706 = vst [vmem:[#allocation52_spill] sm:$0xff] %v20055_v41  ;;  %v20059_v15 = vadd.f32 %v3528_v19, %v3010_v48  ;;  %v5440_v19 = vshrl.u32 %v14237_v36, 16  ;;  %v1657_v41 = vadd.f32 %v19756_v10, %v1263_v49  ;;  %v20086_v10 = vcombine.low %v5045_v25, %v4993_v20 }
 0x1f8   : > { %v16187_v62 = vpop.f32.mrf.mxu0  ;;  %v16207_v63 = vpop.f32.mrf.mxu1  ;;  %v3879_v33 = vadd.f32 %v3736_v27, %v19935_v14  ;;  %v2547_v29 = vadd.f32 %v19837_v46, %v2233_v53  ;;  %v2551_v46 = vadd.f32 %v19862_v52, %v2237_v55  ;;  %v2245_v50 = vadd.f32 %v24714_v24, %v19714_v26 }
 0x1f9   : > { %24708 = vst [vmem:[#allocation10_spill] sm:$0xff] %v20059_v15  ;;  %v20065_v16 = vadd.f32 %v16187_v62, %v3013_v56  ;;  %v5443_v15 = vshll.u32 %v14237_v36, 16  ;;  %v3881_v56 = vadd.f32 %v16206_v45, %v19932_v51  ;;  %v2535_v62 = vadd.f32 %v19779_v13, %v2221_v8  ;;  %v20091_v13 = vpop.permute.xlu1 %4643  ;;  %v20102_v20 = vpop.permute.xlu0 %4648 }
 0x1fa   : > { %v20071_v61 = vpop.f32.mrf.mxu0  ;;  %v3739_v48 = vpop.f32.mrf.mxu1  ;;  %24711 = vst [vmem:[#allocation16_spill] sm:$0xff] %v20091_v13  ;;  %v20096_v45 = vrot.slane %v5440_v19, 2  ;;  %24712 = vst [vmem:[#allocation17_spill] sm:$0xff] %v20102_v20  ;;  %v3882_v18 = vadd.f32 %v16207_v63, %v19938_v34  ;;  %v5877_v5 = vshll.u32 %v20086_v10, 16  ;;  %v24715_v19 = vld [vmem:[#allocation46_spill] sm:$0xff] }
 0x1fb   : > { %v2979_v31 = vadd.f32 %v19929_v43, %v2535_v62  ;;  %v20098_v25 = vrot.slane %v5443_v15, 3  ;;  %v5874_v15 = vshrl.u32 %v20086_v10, 16  ;;  %v2555_v38 = vadd.f32 %v24715_v19, %v2241_v57  ;;  %v24717_v62 = vld [vmem:[#allocation34_spill] sm:$0xff]  ;;  %v24726_v57 = vld [vmem:[#allocation51_spill] sm:$0xff] }
 0x1fc   : > { %v16210_v30 = vpop.f32.mrf.mxu1  ;;  %v16258_v59 = vpop.f32.mrf.mxu0 }
 0x1fd   : > { %v4474_v51 = vadd.f32 %v16258_v59, %v3881_v56  ;;  %v3544_v43 = vadd.f32 %v19942_v40, %v2979_v31  ;;  %v24716_v56 = vld [vmem:[#allocation40_spill] sm:$0xff]  ;;  %v20124_v26 = vpop.permute.xlu1 %4653  ;;  %v20132_v19 = vrot.slane %v5874_v15, 3 }
 0x1fe   : > { %v3752_v49 = vpop.f32.mrf.mxu1  ;;  %v4329_v36 = vpop.f32.mrf.mxu0  ;;  %v2249_v53 = vadd.f32 %v24717_v62, %v24716_v56  ;;  %24720 = vst [vmem:[#allocation46_spill] sm:$0xff] %v20124_v26  ;;  %v20134_v56 = vrot.slane %v5877_v5, 4  ;;  %v24723_v62 = vld [vmem:[#allocation41_spill] sm:$0xff] }
 0x1ff   : > { %v20106_v21 = vadd.f32 %v20084_v22, %v4474_v51  ;;  %v4472_v14 = vadd.f32 %v4329_v36, %v3879_v33  ;;  %v3880_v52 = vadd.f32 %v3739_v48, %v3544_v43  ;;  %v24719_v51 = vld [vmem:[#allocation47_spill] sm:$0xff]  ;;  %v3885_v36 = vadd.f32 %v16210_v30, %v19945_v3 }
 0x200   : > { %v16211_v27 = vpop.f32.mrf.mxu1  ;;  %v16259_v8 = vpop.f32.mrf.mxu0  ;;  %v2559_v31 = vadd.f32 %v24719_v51, %v2245_v50  ;;  %v24722_v48 = vld [vmem:[#allocation39_spill] sm:$0xff]  ;;  %v2983_v50 = vadd.f32 %v24723_v62, %v2539_v39  ;;  %v3883_v3 = vadd.f32 %v3752_v49, %v19948_v9 }
 0x201   : > { %24713 = vst [vmem:[#allocation26_spill] sm:$0xff] %v20106_v21  ;;  %v4475_v34 = vadd.f32 %v16259_v8, %v3882_v18  ;;  %v20119_v40 = vadd.f32 %v20084_v22, %v4472_v14  ;;  %v2253_v43 = vadd.f32 %v24722_v48, %v1657_v41  ;;  %v20137_v51 = vpop.permute.xlu0 %4658  ;;  %v24728_v48 = vmax.f32 %v20106_v21, 0.0 }
 0x202   : > { %v3755_v59 = vpop.f32.mrf.mxu1  ;;  %v4332_v55 = vpop.f32.mrf.mxu0  ;;  %24724 = vst [vmem:[#allocation34_spill] sm:$0xff] %v20137_v51  ;;  %v3548_v39 = vadd.f32 %v19955_v7, %v2983_v50  ;;  %v2991_v50 = vadd.f32 %v19966_v37, %v2547_v29  ;;  %v2995_v29 = vadd.f32 %v19979_v2, %v2551_v46 }
 0x203   : > { %24718 = vst [vmem:[#allocation45_spill] sm:$0xff] %v20119_v40  ;;  %v20129_v18 = vadd.f32 %v20084_v22, %v4475_v34  ;;  %v4473_v14 = vadd.f32 %v4332_v55, %v3880_v52  ;;  %v24725_v34 = vld [vmem:[#allocation7_spill] sm:$0xff]  ;;  %v20143_v41 = vadd.f32 %v24726_v57, %v2253_v43  ;;  %v4778_v9 = vmul.f32 %v20017_v47, %v24728_v48  ;;  %v24730_v43 = vld [vmem:[#allocation12_spill] sm:$0xff]  ;;  %v20163_v52 = vpop.permute.xlu1 %4663 }
 0x204   : > { %v16214_v8 = vpop.f32.mrf.mxu1  ;;  %v16262_v24 = vpop.f32.mrf.mxu0  ;;  %v2563_v63 = vadd.f32 %v24725_v34, %v2249_v53  ;;  %24732 = vst [vmem:[#allocation41_spill] sm:$0xff] %v20163_v52  ;;  %v17537_v47 = vld [vmem:[%s24232_s4 + $0x160] sm:$0xff]  }
 0x205   : > { %24721 = vst [vmem:[#allocation40_spill] sm:$0xff] %v20129_v18  ;;  %v24279_v30 = vmax.f32 %v20129_v18, 0.0  ;;  %v4478_v33 = vadd.f32 %v16262_v24, %v3885_v36  ;;  %v20147_v15 = vadd.f32 %v20084_v22, %v4473_v14  ;;  %v24729_v36 = vld [vmem:[#allocation48_spill] sm:$0xff]  ;;  %v3886_v24 = vadd.f32 %v16211_v27, %v24730_v43 }
 0x206   : > { %v3768_v5 = vpop.f32.mrf.mxu1  ;;  %v4345_v55 = vpop.f32.mrf.mxu0  ;;  %v2987_v57 = vadd.f32 %v24729_v36, %v2543_v6  ;;  %v3884_v18 = vadd.f32 %v3755_v59, %v3548_v39  ;;  %v24734_v27 = vmax.f32 %v20119_v40, 0.0  ;;  %v3556_v59 = vadd.f32 %v19981_v54, %v2991_v50 }
 0x207   : > { %24727 = vst [vmem:[#allocation47_spill] sm:$0xff] %v20147_v15  ;;  %v4779_v49 = vmul.f32 %v20034_v17, %v24279_v30  ;;  %v4476_v53 = vadd.f32 %v4345_v55, %v3883_v3  ;;  %v24282_v14 = vmax.f32 %v20147_v15, 0.0  ;;  %v20160_v62 = vadd.f32 %v20084_v22, %v4478_v33  ;;  %v20177_v39 = vpop.permute.xlu0 %4668 }
 0x208   : > { %v16215_v34 = vpop.f32.mrf.mxu1  ;;  %v16263_v7 = vpop.f32.mrf.mxu0  ;;  %v3552_v6 = vadd.f32 %v19968_v23, %v2987_v57  ;;  %v4776_v3 = vmul.f32 %v20008_v44, %v24734_v27  ;;  %24735 = vst [vmem:[#allocation51_spill] sm:$0xff] %v20177_v39  ;;  %v3889_v23 = vadd.f32 %v16214_v8, %v19958_v35  ;;  %v3887_v2 = vadd.f32 %v3768_v5, %v19961_v60 }
 0x209   : > { %24731 = vst [vmem:[#allocation39_spill] sm:$0xff] %v20160_v62  ;;  %v14917_v48 = vpack.c.bf16 %v4779_v49, %v4778_v9  ;;  %v20166_v30 = vadd.f32 %v20084_v22, %v4476_v53  ;;  %v4777_v33 = vmul.f32 %v20022_v1, %v24282_v14  ;;  %v4479_v55 = vadd.f32 %v16263_v7, %v3886_v24  ;;  %v20198_v60 = vpop.permute.xlu1 %4673 }
 0x20a   : > { %v3771_v36 = vpop.f32.mrf.mxu1  ;;  %v4348_v37 = vpop.f32.mrf.mxu0  ;;  %v2999_v49 = vadd.f32 %v19998_v11, %v2555_v38  ;;  %v24281_v57 = vmax.f32 %v20160_v62, 0.0  ;;  %v20191_v35 = vadd.f32 %v20000_v58, %v2995_v29  ;;  %v3003_v11 = vadd.f32 %v20013_v4, %v2559_v31  ;;  %24738 = vst [vmem:[#allocation53_spill] sm:$0xff] %v20198_v60  ;;  %v24741_v31 = vld [vmem:[#allocation43_spill] sm:$0xff] }
 0x20b   : > { %24733 = vst [vmem:[#allocation7_spill] sm:$0xff] %v20166_v30  ;;  %15080 = vst [vmem:[#allocation2 + $0x18] sm:$0xff] %v14917_v48   ;;  %v4477_v9 = vadd.f32 %v4348_v37, %v3884_v18  ;;  %v14912_v53 = vpack.c.bf16 %v4777_v33, %v4776_v3  ;;  %v20183_v43 = vadd.f32 %v20084_v22, %v4479_v55  ;;  %v24283_v54 = vmax.f32 %v20166_v30, 0.0  ;;  %v24740_v33 = vld [vmem:[#allocation42_spill] sm:$0xff]  ;;  %v20215_v29 = vpop.permute.xlu0 %4678 }
 0x20c   : > { %v16218_v24 = vpop.f32.mrf.mxu1  ;;  %v16266_v7 = vpop.f32.mrf.mxu0  ;;  %v20195_v38 = vadd.f32 %v20015_v32, %v2999_v49  ;;  %v3007_v5 = vadd.f32 %v20030_v12, %v2563_v63  ;;  %v20206_v4 = vadd.f32 %v24740_v33, %v3003_v11  ;;  %v4782_v32 = vmul.f32 %v20053_v28, %v24281_v57  ;;  %24742 = vst [vmem:[#allocation42_spill] sm:$0xff] %v20215_v29  ;;  %v24744_v49 = vld [vmem:[#allocation14_spill] sm:$0xff]  ;;  %v24747_v57 = vld [vmem:[#allocation15_spill] sm:$0xff] }
 0x20d   : > { %24736 = vst [vmem:[#allocation48_spill] sm:$0xff] %v20183_v43  ;;  %v20188_v46 = vadd.f32 %v20084_v22, %v4477_v9  ;;  %v4482_v50 = vadd.f32 %v16266_v7, %v3889_v23  ;;  %15079 = vst [vmem:[#allocation2 + $0x10] sm:$0xff] %v14912_v53   ;;  %v24280_v18 = vmax.f32 %v20183_v43, 0.0  ;;  %v3890_v55 = vadd.f32 %v16215_v34, %v24741_v31  ;;  %v24743_v23 = vld [vmem:[#allocation28_spill] sm:$0xff] }
 0x20e   : > { %v3784_v8 = vpop.f32.mrf.mxu1  ;;  %v4361_v48 = vpop.f32.mrf.mxu0  ;;  %v4780_v9 = vmul.f32 %v24743_v23, %v24283_v54  ;;  %v20230_v14 = vadd.f32 %v24747_v57, %v3007_v5 }
 0x20f   : > { %24737 = vst [vmem:[#allocation12_spill] sm:$0xff] %v20188_v46  ;;  %v24286_v27 = vmax.f32 %v20188_v46, 0.0  ;;  %v20203_v3 = vadd.f32 %v20084_v22, %v4482_v50  ;;  %v4480_v58 = vadd.f32 %v4361_v48, %v3887_v2  ;;  %v4783_v37 = vmul.f32 %v20057_v0, %v24280_v18  ;;  %v24746_v2 = vld [vmem:[#allocation20_spill] sm:$0xff]  ;;  %v24748_v46 = vld [vmem:[#allocation21_spill] sm:$0xff] }
 0x210   : > { %v16219_v12 = vpop.f32.mrf.mxu1  ;;  %v16267_v63 = vpop.f32.mrf.mxu0  ;;  %v3011_v50 = vadd.f32 %v24746_v2, %v20143_v41  ;;  %v3888_v48 = vadd.f32 %v3771_v36, %v3552_v6  ;;  %v3893_v43 = vadd.f32 %v16218_v24, %v24748_v46  ;;  %v24753_v46 = vld [vmem:[#allocation24_spill] sm:$0xff] }
 0x211   : > { %24739 = vst [vmem:[#allocation54_spill] sm:$0xff] %v20203_v3  ;;  %v4781_v53 = vmul.f32 %v24744_v49, %v24286_v27  ;;  %v20225_v34 = vadd.f32 %v20084_v22, %v4480_v58  ;;  %v14927_v11 = vpack.c.bf16 %v4783_v37, %v4782_v32  ;;  %v4483_v33 = vadd.f32 %v16267_v63, %v3890_v55  ;;  %v24749_v58 = vld [vmem:[#allocation23_spill] sm:$0xff]  ;;  %v20241_v55 = vpop.permute.xlu1 %4683 }
 0x212   : > { %v3787_v31 = vpop.f32.mrf.mxu1  ;;  %v4364_v18 = vpop.f32.mrf.mxu0  ;;  %v20235_v7 = vadd.f32 %v20071_v61, %v3011_v50  ;;  %v3891_v62 = vadd.f32 %v3784_v8, %v24749_v58  ;;  %24751 = vst [vmem:[#allocation15_spill] sm:$0xff] %v20241_v55  ;;  %v24752_v57 = vmax.f32 %v20203_v3, 0.0  ;;  %v3894_v5 = vadd.f32 %v16219_v12, %v24753_v46 }
 0x213   : > { %24745 = vst [vmem:[#allocation43_spill] sm:$0xff] %v20225_v34  ;;  %v14922_v54 = vpack.c.bf16 %v4781_v53, %v4780_v9  ;;  %v24289_v27 = vmax.f32 %v20225_v34, 0.0  ;;  %15082 = vst [vmem:[#allocation2 + $0x28] sm:$0xff] %v14927_v11   ;;  %v20239_v41 = vadd.f32 %v20084_v22, %v4483_v33  ;;  %v4481_v6 = vadd.f32 %v4364_v18, %v3888_v48  ;;  %v20259_v12 = vpop.permute.xlu0 %4688 }
 0x214   : > { %v16222_v36 = vpop.f32.mrf.mxu1  ;;  %v16270_v32 = vpop.f32.mrf.mxu0  ;;  %v4786_v24 = vmul.f32 %v20102_v20, %v24752_v57  ;;  %v3892_v61 = vadd.f32 %v3787_v31, %v3556_v59  ;;  %v20247_v63 = vld [vmem:[#allocation2 + $0xc] sm:$0xff]   ;;  %v20257_v11 = vld [vmem:[#allocation2 + $0x14] sm:$0xff]   ;;  %24756 = vst [vmem:[#allocation23_spill] sm:$0xff] %v20259_v12  ;;  %v24761_v3 = vrot.slane %v20086_v10, 3 }
 0x215   : > { %24750 = vst [vmem:[#allocation20_spill] sm:$0xff] %v20239_v41  ;;  %15081 = vst [vmem:[#allocation2 + $0x20] sm:$0xff] %v14922_v54   ;;  %v4486_v37 = vadd.f32 %v16270_v32, %v3893_v43  ;;  %v4784_v8 = vmul.f32 %v20063_v42, %v24289_v27  ;;  %v24288_v18 = vmax.f32 %v20239_v41, 0.0  ;;  %v20254_v9 = vadd.f32 %v20084_v22, %v4481_v6  ;;  %v24755_v54 = vld [vmem:[#allocation27_spill] sm:$0xff]  ;;  %v24758_v43 = vld [vmem:[#allocation30_spill] sm:$0xff] }
 0x216   : > { %v3897_v53 = vadd.f32 %v16222_v36, %v24755_v54  ;;  %v3800_v2 = vpop.f32.mrf.mxu1  ;;  %v4377_v50 = vpop.f32.mrf.mxu0  ;;  %v5157_v31 = vrot.slane %v20247_v63, 3  ;;  %v24762_v46 = vrot.slane %v20257_v11, 3 }
 0x217   : > { %24754 = vst [vmem:[#allocation21_spill] sm:$0xff] %v20254_v9  ;;  %v20262_v59 = vadd.f32 %v20084_v22, %v4486_v37  ;;  %v3895_v48 = vadd.f32 %v3800_v2, %v24758_v43  ;;  %v4484_v33 = vadd.f32 %v4377_v50, %v3891_v62  ;;  %v4787_v58 = vmul.f32 %v20124_v26, %v24288_v18  ;;  %v24760_v62 = vld [vmem:[#allocation31_spill] sm:$0xff] }
 0x218   : > { %v24292_v6 = vmax.f32 %v20254_v9, 0.0  ;;  %v16223_v36 = vpop.f32.mrf.mxu1  ;;  %v16271_v32 = vpop.f32.mrf.mxu0  ;;  %v5158_v57 = vsel %vm576_vm0, %v24761_v3, %v5157_v31  ;;  %v5160_v37 = vsel %vm576_vm0, %v5157_v31, %v24762_v46 }
 0x219   : > { %24757 = vst [vmem:[#allocation24_spill] sm:$0xff] %v20262_v59  ;;  %v20274_v54 = vadd.f32 %v20084_v22, %v4484_v33  ;;  %v3898_v2 = vadd.f32 %v16223_v36, %v24760_v62  ;;  %v4487_v50 = vadd.f32 %v16271_v32, %v3894_v5  ;;  %v14937_v43 = vpack.c.bf16 %v4787_v58, %v4786_v24  ;;  %v17482_v33 = vld [vmem:[%s24232_s4 + $0xb0] sm:$0xff]   ;;  %v20289_v5 = vpop.permute.xlu1 %4693 }
 0x21a   : > { %v4785_v18 = vmul.f32 %v20091_v13, %v24292_v6  ;;  %v3803_v27 = vpop.f32.mrf.mxu1  ;;  %v4380_v41 = vpop.f32.mrf.mxu0  ;;  %24763 = vst [vmem:[#allocation30_spill] sm:$0xff] %v20289_v5  ;;  %v24764_v24 = vmax.f32 %v20262_v59, 0.0  ;;  %16308 = vmatprep.mubr.bf16.mxu1 %v5158_v57  ;;  %v24766_v6 = vshrl.u32 %v20247_v63, 16  ;;  %v24296_v59 = vshll.u32 %v20247_v63, 16 }
 0x21b   : > { %24759 = vst [vmem:[#allocation27_spill] sm:$0xff] %v20274_v54  ;;  %v24295_v36 = vmax.f32 %v20274_v54, 0.0  ;;  %v20296_v10 = vadd.f32 %v20084_v22, %v4487_v50  ;;  %v3896_v3 = vadd.f32 %v3803_v27, %v20191_v35  ;;  %15084 = vst [vmem:[#allocation2 + $0x38] sm:$0xff] %v14937_v43   ;;  %v4485_v32 = vadd.f32 %v4380_v41, %v3892_v61  ;;  %v24768_v27 = vld [vmem:[#allocation33_spill] sm:$0xff] }
 0x21c   : > { %v4790_v58 = vmul.f32 %v20177_v39, %v24764_v24  ;;  %v14932_v31 = vpack.c.bf16 %v4785_v18, %v4784_v8  ;;  %16309 = vmatmul.mubr.bf16.vlgmr.msra.gmra.mxu1 %v5160_v37  ;;  %v16226_v46 = vpop.f32.mrf.mxu1  ;;  %v16274_v62 = vpop.f32.mrf.mxu0  ;;  %v5450_v9 = vrot.slane %v24766_v6, 2  ;;  %v24769_v41 = vld [vmem:[#allocation49_spill] sm:$0xff]  ;;  %v5453_v37 = vrot.slane %v24296_v59, 3 }
 0x21d   : > { %24765 = vst [vmem:[#allocation31_spill] sm:$0xff] %v20296_v10  ;;  %v20302_v24 = vpop.permute.xlu0 %4698  ;;  %v4788_v50 = vmul.f32 %v20137_v51, %v24295_v36  ;;  %v24302_v35 = vmax.f32 %v20296_v10, 0.0  ;;  %v3901_v57 = vadd.f32 %v16226_v46, %v24768_v27  ;;  %v4490_v8 = vadd.f32 %v16274_v62, %v3897_v53  ;;  %16397 = vmatpush3.bf16.msra.mxu1 %v24769_v41  ;;  %v17485_v53 = vld [vmem:[%s24232_s4 + $0xa8] sm:$0xff]   ;;  %v24772_v46 = vld [vmem:[#allocation35_spill] sm:$0xff] }
 0x21e   : > { %24767 = vst [vmem:[#allocation55_spill] sm:$0xff] %v20302_v24  ;;  %15083 = vst [vmem:[#allocation2 + $0x30] sm:$0xff] %v14932_v31   ;;  %v20311_v61 = vadd.f32 %v20084_v22, %v4485_v32  ;;  %v3816_v18 = vpop.f32.mrf.mxu1  ;;  %v4393_v6 = vpop.f32.mrf.mxu0  ;;  %v24303_v43 = vshrl.u32 %v20257_v11, 16  ;;  %16398 = vmatprep.subr.bf16.mxu1 %v17482_v33  ;;  %v5454_v59 = vor.u32 %v5453_v37, %v5450_v9  ;;  %v24773_v54 = vshll.u32 %v20257_v11, 16  ;;  %v20332_v10 = vld [vmem:[#allocation2 + $0x1c] sm:$0xff]   ;;  %v24776_v37 = vld [vmem:[#allocation13_spill] sm:$0xff] }
 0x21f   : > { %v4791_v31 = vmul.f32 %v20198_v60, %v24302_v35  ;;  %v20324_v32 = vadd.f32 %v20084_v22, %v4490_v8  ;;  %v3899_v62 = vadd.f32 %v3816_v18, %v24772_v46  ;;  %v4488_v27 = vadd.f32 %v4393_v6, %v3895_v48  ;;  %v20337_v8 = vld [vmem:[%s24232_s4 + $0xa0] sm:$0xff]   ;;  %v20339_v18 = vpop.permute.xlu1 %4703 }
 0x220   : > { %24770 = vst [vmem:[#allocation33_spill] sm:$0xff] %v20311_v61  ;;  %v24305_v41 = vmax.f32 %v20311_v61, 0.0  ;;  %v5459_v36 = vrot.slane %v24303_v43, 2  ;;  %v5462_v34 = vrot.slane %v24773_v54, 3  ;;  %v16227_v30 = vpop.f32.mrf.mxu1  ;;  %v16275_v15 = vpop.f32.mrf.mxu0  ;;  %24774 = vst [vmem:[#allocation35_spill] sm:$0xff] %v20339_v18  ;;  %v20348_v54 = vld [vmem:[#allocation2 + $0x24] sm:$0xff]   ;;  %v24777_v43 = vor.u32 %v20098_v25, %v20096_v45 }
 0x221   : > { %24771 = vst [vmem:[#allocation49_spill] sm:$0xff] %v20324_v32  ;;  %v14947_v48 = vpack.c.bf16 %v4791_v31, %v4790_v58  ;;  %v20343_v6 = vadd.f32 %v20084_v22, %v4488_v27  ;;  %v20346_v46 = vadd.f32 %v16227_v30, %v24776_v37  ;;  %16399 = vmatpush3.bf16.msra.mxu1 %v17482_v33  ;;  %v20359_v30 = vpop.permute.xlu0 %4708  ;;  %v24779_v33 = vmax.f32 %v20324_v32, 0.0 }
 0x222   : > { %v4789_v35 = vmul.f32 %v20163_v52, %v24305_v41  ;;  %v5455_v58 = vsel %vm860_vm1, %v24777_v43, %v5454_v59  ;;  %v20357_v31 = vor.u32 %v5462_v34, %v5459_v36  ;;  %v4491_v9 = vadd.f32 %v16275_v15, %v3898_v2  ;;  %v3819_v27 = vpop.f32.mrf.mxu1  ;;  %v4396_v21 = vpop.f32.mrf.mxu0  ;;  %16400 = vmatprep.subr.bf16.mxu1 %v17485_v53  ;;  %v17498_v15 = vld [vmem:[%s24232_s4 + $0xf0] sm:$0xff]  }
 0x223   : > { %24775 = vst [vmem:[#allocation56_spill] sm:$0xff] %v20343_v6  ;;  %24778 = vst [vmem:[#allocation13_spill] sm:$0xff] %v20359_v30  ;;  %v20364_v37 = vmul.f32 %v20259_v12, %v24779_v33  ;;  %v24307_v41 = vmax.f32 %v20343_v6, 0.0  ;;  %16360 = vmatprep.mubr.bf16.mxu0 %v5455_v58  ;;  %v20368_v45 = vadd.f32 %v3819_v27, %v20195_v38  ;;  %v5161_v43 = vrot.slane %v20332_v10, 3  ;;  %v20427_v6 = vld [vmem:[%s24232_s4 + $0x90] sm:$0xff]   ;;  %v24793_v12 = vld [vmem:[#allocation11_spill] sm:$0xff] }
 0x224   : > { %15086 = vst [vmem:[#allocation2 + $0x48] sm:$0xff] %v14947_v48   ;;  %v4489_v25 = vadd.f32 %v4396_v21, %v3896_v3  ;;  %v14942_v34 = vpack.c.bf16 %v4789_v35, %v4788_v50  ;;  %v5464_v2 = vsel %vm860_vm1, %v5454_v59, %v20357_v31  ;;  %v20376_v36 = vadd.f32 %v20084_v22, %v4491_v9  ;;  %v16230_v48 = vpop.f32.mrf.mxu1  ;;  %v16278_v33 = vpop.f32.mrf.mxu0  ;;  %v24782_v50 = vld [vmem:[#allocation22_spill] sm:$0xff] }
 0x225   : > { %v4792_v38 = vmul.f32 %v20215_v29, %v24307_v41  ;;  %16361 = vmatmul.mubr.bf16.vlgmr.msra.gmra.mxu0 %v5464_v2  ;;  %v24308_v3 = vrot.slane %v20348_v54, 3  ;;  %v20387_v35 = vadd.f32 %v16230_v48, %v24782_v50  ;;  %16401 = vmatpush3.bf16.msra.mxu1 %v17485_v53  ;;  %v24783_v9 = vrot.slane %v20257_v11, 3  ;;  %v24784_v48 = vld [vmem:[#allocation25_spill] sm:$0xff]  ;;  %v20399_v53 = vpop.permute.xlu1 %4713 }
 0x226   : > { %24780 = vst [vmem:[#allocation57_spill] sm:$0xff] %v20376_v36  ;;  %v20383_v21 = vadd.f32 %v20084_v22, %v4489_v25  ;;  %15085 = vst [vmem:[#allocation2 + $0x40] sm:$0xff] %v14942_v34   ;;  %v24311_v59 = vmax.f32 %v20376_v36, 0.0  ;;  %v4494_v27 = vadd.f32 %v16278_v33, %v3901_v57  ;;  %v3832_v32 = vpop.f32.mrf.mxu1  ;;  %v4409_v41 = vpop.f32.mrf.mxu0  ;;  %16402 = vmatprep.subr.bf16.mxu1 %v20337_v8  ;;  %v17491_v25 = vld [vmem:[%s24232_s4 + $0x98] sm:$0xff]   ;;  %16449 = vmatpush3.bf16.msra.mxu0 %v24784_v48  ;;  %v20408_v2 = vld [vmem:[#allocation2 + $0x2c] sm:$0xff]  }
 0x227   : > { %v5162_v58 = vsel %vm576_vm0, %v24783_v9, %v5161_v43  ;;  %24785 = vst [vmem:[#allocation22_spill] sm:$0xff] %v20399_v53  ;;  %v5164_v57 = vsel %vm576_vm0, %v5161_v43, %v24308_v3  ;;  %v24786_v33 = vld [vmem:[#allocation38_spill] sm:$0xff]  ;;  %v4492_v9 = vadd.f32 %v4409_v41, %v3899_v62  ;;  %16450 = vmatprep.subr.bf16.mxu0 %v17498_v15  ;;  %v17499_v48 = vld [vmem:[%s24232_s4 + $0xe8] sm:$0xff]   ;;  %v24788_v43 = vshrl.u32 %v20332_v10, 16  ;;  %v20429_v36 = vpop.permute.xlu0 %4718 }
 0x228   : > { %24781 = vst [vmem:[#allocation58_spill] sm:$0xff] %v20383_v21  ;;  %16312 = vmatprep.mubr.bf16.mxu1 %v5162_v58  ;;  %v20406_v50 = vadd.f32 %v3832_v32, %v24786_v33  ;;  %v4795_v34 = vmul.f32 %v20289_v5, %v24311_v59  ;;  %v20417_v58 = vadd.f32 %v20084_v22, %v4494_v27  ;;  %v16231_v41 = vpop.f32.mrf.mxu1  ;;  %v16279_v33 = vpop.f32.mrf.mxu0  ;;  %v20422_v3 = vld [vmem:[#allocation2 + $0x34] sm:$0xff]   ;;  %24789 = vst [vmem:[#allocation38_spill] sm:$0xff] %v20429_v36 }
 0x229   : > { %16313 = vmatmul.mubr.bf16.gmra.mxu1 %v5164_v57  ;;  %v5468_v32 = vrot.slane %v24788_v43, 2  ;;  %v24790_v57 = vmax.f32 %v20383_v21, 0.0  ;;  %v20435_v59 = vadd.f32 %v20084_v22, %v4492_v9  ;;  %v24792_v5 = vshll.u32 %v20332_v10, 16  ;;  %v20461_v43 = vpop.permute.xlu1 %4723 }
 0x22a   : > { %24787 = vst [vmem:[#allocation25_spill] sm:$0xff] %v20417_v58  ;;  %16403 = vmatpush3.bf16.msra.mxu1 %v20337_v8  ;;  %v14957_v61 = vpack.c.bf16 %v4795_v34, %v20364_v37  ;;  %v24323_v40 = vmax.f32 %v20417_v58, 0.0  ;;  %v20445_v21 = vadd.f32 %v16231_v41, %v24793_v12  ;;  %16451 = vmatpush3.bf16.msra.mxu0 %v17498_v15  ;;  %v24794_v62 = vshrl.u32 %v20348_v54, 16 }
 0x22b   : > { %v4793_v27 = vmul.f32 %v20241_v55, %v24790_v57  ;;  %24791 = vst [vmem:[#allocation59_spill] sm:$0xff] %v20435_v59  ;;  %v5471_v29 = vrot.slane %v24792_v5, 3  ;;  %v3835_v57 = vpop.f32.mrf.mxu1  ;;  %v4412_v55 = vpop.f32.mrf.mxu0  ;;  %16404 = vmatprep.subr.bf16.mxu1 %v17491_v25  ;;  %v24795_v37 = vshll.u32 %v20348_v54, 16  ;;  %16452 = vmatprep.subr.bf16.mxu0 %v17499_v48  ;;  %v4495_v41 = vadd.f32 %v16279_v33, %v20346_v46 }
 0x22c   : > { %v5477_v8 = vrot.slane %v24794_v62, 2  ;;  %15088 = vst [vmem:[#allocation2 + $0x58] sm:$0xff] %v14957_v61   ;;  %v20455_v12 = vmul.f32 %v20359_v30, %v24323_v40  ;;  %v20459_v15 = vadd.f32 %v3835_v57, %v20206_v4  ;;  %24796 = vst [vmem:[#allocation11_spill] sm:$0xff] %v20461_v43  ;;  %v24797_v62 = vmax.f32 %v20435_v59, 0.0  ;;  %v17503_v4 = vld [vmem:[%s24232_s4 + $0xe0] sm:$0xff]   ;;  %v24799_v57 = vld [vmem:[#allocation32_spill] sm:$0xff] }
 0x22d   : > { %v14952_v9 = vpack.c.bf16 %v4793_v27, %v4792_v38  ;;  %v5480_v34 = vrot.slane %v24795_v37, 3  ;;  %v5472_v5 = vor.u32 %v5471_v29, %v5468_v32  ;;  %v16234_v38 = vpop.f32.mrf.mxu1  ;;  %v16282_v27 = vpop.f32.mrf.mxu0  ;;  %v4493_v40 = vadd.f32 %v4412_v55, %v20368_v45 }
 0x22e   : > { %v20466_v61 = vmul.f32 %v20302_v24, %v24797_v62  ;;  %v5165_v29 = vrot.slane %v20408_v2, 3  ;;  %16405 = vmatpush3.bf16.msra.mxu1 %v17491_v25  ;;  %v20478_v32 = vadd.f32 %v20084_v22, %v4495_v41  ;;  %v24326_v33 = vrot.slane %v20422_v3, 3  ;;  %16453 = vmatpush3.bf16.msra.mxu0 %v17499_v48  ;;  %v20485_v45 = vpop.permute.xlu0 %4728  ;;  %v17500_v62 = vld [vmem:[%s24232_s4 + $0x88] sm:$0xff]   ;;  %v17504_v48 = vld [vmem:[%s24232_s4 + $0xd8] sm:$0xff]  }
 0x22f   : > { %15087 = vst [vmem:[#allocation2 + $0x50] sm:$0xff] %v14952_v9   ;;  %v20468_v37 = vor.u32 %v5480_v34, %v5477_v8  ;;  %v5473_v46 = vsel %vm860_vm1, %v20357_v31, %v5472_v5  ;;  %v20482_v9 = vadd.f32 %v16234_v38, %v24799_v57  ;;  %v3848_v8 = vpop.f32.mrf.mxu1  ;;  %v4425_v55 = vpop.f32.mrf.mxu0  ;;  %16406 = vmatprep.subr.bf16.mxu1 %v20427_v6  ;;  %24800 = vst [vmem:[#allocation32_spill] sm:$0xff] %v20485_v45 }
 0x230   : > { %24798 = vst [vmem:[#allocation60_spill] sm:$0xff] %v20478_v32  ;;  %16364 = vmatprep.mubr.bf16.mxu0 %v5473_v46  ;;  %v20490_v31 = vadd.f32 %v20084_v22, %v4493_v40  ;;  %v24802_v34 = vrot.slane %v20348_v54, 3  ;;  %v4498_v38 = vadd.f32 %v16282_v27, %v20387_v35  ;;  %v5168_v40 = vsel %vm576_vm0, %v5165_v29, %v24326_v33  ;;  %v24803_v46 = vld [vmem:[#allocation44_spill] sm:$0xff] }
 0x231   : > { %v5482_v25 = vsel %vm860_vm1, %v5472_v5, %v20468_v37  ;;  %v20507_v57 = vadd.f32 %v3848_v8, %v24803_v46  ;;  %v4496_v35 = vadd.f32 %v4425_v55, %v20406_v50  ;;  %v16235_v27 = vpop.f32.mrf.mxu1  ;;  %v20516_v5 = vld [vmem:[#allocation2 + $0x3c] sm:$0xff]   ;;  %16454 = vmatprep.subr.bf16.mxu0 %v17503_v4  ;;  %v24805_v50 = vmax.f32 %v20478_v32, 0.0 }
 0x232   : > { %24801 = vst [vmem:[#allocation61_spill] sm:$0xff] %v20490_v31  ;;  %v5166_v41 = vsel %vm576_vm0, %v24802_v34, %v5165_v29  ;;  %16365 = vmatmul.mubr.bf16.gmra.mxu0 %v5482_v25  ;;  %v16283_v34 = vpop.f32.mrf.mxu0  ;;  %v24333_v58 = vmax.f32 %v20490_v31, 0.0  ;;  %v20512_v59 = vadd.f32 %v20084_v22, %v4498_v38  ;;  %v20521_v29 = vld [vmem:[%s24232_s4 + $0x80] sm:$0xff]   ;;  %16407 = vmatpush3.bf16.msra.mxu1 %v20427_v6  ;;  %v24809_v38 = vshll.u32 %v20408_v2, 16 }
 0x233   : > { %16316 = vmatprep.mubr.bf16.mxu1 %v5166_v41  ;;  %v4799_v8 = vmul.f32 %v20399_v53, %v24805_v50  ;;  %v20527_v55 = vadd.f32 %v20084_v22, %v4496_v35  ;;  %v3851_v46 = vpop.f32.mrf.mxu1  ;;  %16455 = vmatpush3.bf16.msra.mxu0 %v17503_v4  ;;  %v20532_v41 = vpop.permute.xlu1 %4733  ;;  %v24808_v35 = vshrl.u32 %v20408_v2, 16  ;;  %v24810_v31 = vshrl.u32 %v20422_v3, 16 }
 0x234   : > { %16317 = vmatmul.mubr.bf16.gmra.mxu1 %v5168_v40  ;;  %24804 = vst [vmem:[#allocation44_spill] sm:$0xff] %v20512_v59  ;;  %v4428_v33 = vpop.f32.mrf.mxu0  ;;  %24807 = vst [vmem:[#allocation63_spill] sm:$0xff] %v20532_v41  ;;  %v4797_v25 = vmul.f32 %v20339_v18, %v24333_v58  ;;  %v5489_v53 = vrot.slane %v24809_v38, 3  ;;  %v20542_v40 = vld [vmem:[#allocation2 + $0x44] sm:$0xff]   ;;  %16408 = vmatprep.subr.bf16.mxu1 %v17500_v62  ;;  %v24811_v58 = vshll.u32 %v20422_v3, 16  ;;  %v24813_v52 = vmax.f32 %v20512_v59, 0.0 }
 0x235   : > { %24806 = vst [vmem:[#allocation62_spill] sm:$0xff] %v20527_v55  ;;  %v5486_v32 = vrot.slane %v24808_v35, 2  ;;  %16456 = vmatprep.subr.bf16.mxu0 %v17504_v48  ;;  %v14967_v6 = vpack.c.bf16 %v4799_v8, %v20455_v12  ;;  %v5495_v24 = vrot.slane %v24810_v31, 2  ;;  %v16238_v18 = vpop.f32.mrf.mxu1  ;;  %v20550_v35 = vpop.permute.xlu0 %4738  ;;  %v24814_v8 = vld [vmem:[#allocation50_spill] sm:$0xff]  ;;  %v24815_v31 = vmax.f32 %v20527_v55, 0.0 }
 0x236   : > { %v5498_v50 = vrot.slane %v24811_v58, 3  ;;  %v16286_v30 = vpop.f32.mrf.mxu0  ;;  %24812 = vst [vmem:[#allocation64_spill] sm:$0xff] %v20550_v35  ;;  %v14962_v38 = vpack.c.bf16 %v4797_v25, %v20466_v61  ;;  %v20556_v60 = vmul.f32 %v20485_v45, %v24813_v52  ;;  %v20559_v4 = vadd.f32 %v16235_v27, %v24814_v8  ;;  %16409 = vmatpush3.bf16.msra.mxu1 %v17500_v62  ;;  %v20649_v55 = vld [vmem:[#allocation2 + $0x54] sm:$0xff]  }
 0x237   : > { %v5490_v12 = vor.u32 %v5489_v53, %v5486_v32  ;;  %15090 = vst [vmem:[#allocation2 + $0x68] sm:$0xff] %v14967_v6   ;;  %v20564_v58 = vmul.f32 %v20429_v36, %v24815_v31  ;;  %v4499_v39 = vadd.f32 %v16283_v34, %v20445_v21  ;;  %v20570_v61 = vadd.f32 %v3851_v46, %v20230_v14  ;;  %v3864_v25 = vpop.f32.mrf.mxu1  ;;  %v17508_v14 = vld [vmem:[%s24232_s4 + $0xd0] sm:$0xff]  }
 0x238   : > { %v20566_v51 = vor.u32 %v5498_v50, %v5495_v24  ;;  %v4441_v52 = vpop.f32.mrf.mxu0  ;;  %15089 = vst [vmem:[#allocation2 + $0x60] sm:$0xff] %v14962_v38   ;;  %v4497_v32 = vadd.f32 %v4428_v33, %v20459_v15  ;;  %v5169_v27 = vrot.slane %v20516_v5, 3  ;;  %v24346_v6 = vrot.slane %v20542_v40, 3  ;;  %16457 = vmatpush3.bf16.msra.mxu0 %v17504_v48  ;;  %16410 = vmatprep.subr.bf16.mxu1 %v20521_v29  ;;  %v20593_v48 = vld [vmem:[%s24232_s4 + $0x138] sm:$0xff]   ;;  %v17509_v38 = vld [vmem:[%s24232_s4 + $0xc8] sm:$0xff]  }
 0x239   : > { %v5491_v53 = vsel %vm860_vm1, %v20468_v37, %v5490_v12  ;;  %v20584_v21 = vadd.f32 %v20084_v22, %v4499_v39  ;;  %v24817_v37 = vld [vmem:[#allocation52_spill] sm:$0xff]  ;;  %v4502_v33 = vadd.f32 %v16286_v30, %v20482_v9  ;;  %v24819_v46 = vrot.slane %v20422_v3, 3  ;;  %v24820_v50 = vld [vmem:[#allocation10_spill] sm:$0xff]  ;;  %v16239_v9 = vpop.f32.mrf.mxu1  ;;  %16458 = vmatprep.subr.bf16.mxu0 %v17508_v14  ;;  %v20920_v0 = vld [vmem:[#allocation2 + $0x54] sm:$0xf] }
 0x23a   : > { %16368 = vmatprep.mubr.bf16.mxu0 %v5491_v53  ;;  %v5500_v24 = vsel %vm860_vm1, %v5490_v12, %v20566_v51  ;;  %v20587_v15 = vadd.f32 %v16238_v18, %v24817_v37  ;;  %v16287_v62 = vpop.f32.mrf.mxu0  ;;  %v20596_v34 = vadd.f32 %v20084_v22, %v4497_v32  ;;  %v5172_v18 = vsel %vm576_vm0, %v5169_v27, %v24346_v6  ;;  %v20610_v12 = vpop.permute.xlu1 %4743 }
 0x23b   : > { %24816 = vst [vmem:[#allocation50_spill] sm:$0xff] %v20584_v21  ;;  %16369 = vmatmul.mubr.bf16.gmra.mxu0 %v5500_v24  ;;  %v5170_v39 = vsel %vm576_vm0, %v24819_v46, %v5169_v27  ;;  %v20605_v30 = vadd.f32 %v3864_v25, %v24820_v50  ;;  %24821 = vst [vmem:[#allocation10_spill] sm:$0xff] %v20610_v12  ;;  %v24347_v8 = vmax.f32 %v20584_v21, 0.0  ;;  %v24351_v32 = vshrl.u32 %v20516_v5, 16  ;;  %v20619_v25 = vpop.permute.xlu0 %4748  ;;  %v3867_v59 = vpop.f32.mrf.mxu1 }
 0x23c   : > { %24818 = vst [vmem:[#allocation52_spill] sm:$0xff] %v20596_v34  ;;  %16320 = vmatprep.mubr.bf16.mxu1 %v5170_v39  ;;  %v20614_v31 = vadd.f32 %v20084_v22, %v4502_v33  ;;  %v4500_v53 = vadd.f32 %v4441_v52, %v20507_v57  ;;  %v4444_v27 = vpop.f32.mrf.mxu0  ;;  %16411 = vmatpush3.bf16.msra.mxu1 %v20521_v29  ;;  %24823 = vst [vmem:[#allocation66_spill] sm:$0xff] %v20619_v25  ;;  %v24353_v24 = vmax.f32 %v20596_v34, 0.0  ;;  %v20625_v33 = vld [vmem:[#allocation2 + $0x4c] sm:$0xff]   ;;  %v17512_v57 = vld [vmem:[%s24232_s4 + $0xc0] sm:$0xff]  }
 0x23d   : > { %16321 = vmatmul.mubr.bf16.gmra.mxu1 %v5172_v18  ;;  %v24354_v37 = vshll.u32 %v20516_v5, 16  ;;  %v4803_v29 = vmul.f32 %v20532_v41, %v24347_v8  ;;  %v5504_v50 = vrot.slane %v24351_v32, 2  ;;  %16459 = vmatpush3.bf16.msra.mxu0 %v17508_v14  ;;  %v24825_v8 = vshrl.u32 %v20542_v40, 16 }
 0x23e   : > { %24822 = vst [vmem:[#allocation65_spill] sm:$0xff] %v20614_v31  ;;  %v20635_v18 = vadd.f32 %v20084_v22, %v4500_v53  ;;  %v16290_v6 = vpop.f32.mrf.mxu0  ;;  %16500 = vmatprep.subr.bf16.mxu1 %v20593_v48  ;;  %v4801_v39 = vmul.f32 %v20461_v43, %v24353_v24  ;;  %v24826_v53 = vshll.u32 %v20542_v40, 16  ;;  %16460 = vmatprep.subr.bf16.mxu0 %v17509_v38  ;;  %v24827_v32 = vmax.f32 %v20614_v31, 0.0  ;;  %v20661_v45 = vpop.permute.xlu1 %4753 }
 0x23f   : > { %v5507_v46 = vrot.slane %v24354_v37, 3  ;;  %v5513_v52 = vrot.slane %v24825_v8, 2  ;;  %v14977_v14 = vpack.c.bf16 %v4803_v29, %v20556_v60  ;;  %v3914_v37 = vadd.f32 %v16239_v9, %v20065_v16  ;;  %24828 = vst [vmem:[#allocation68_spill] sm:$0xff] %v20661_v45  ;;  %v20669_v9 = vpop.permute.xlu0 %4758 }
 0x240   : > { %24824 = vst [vmem:[#allocation67_spill] sm:$0xff] %v20635_v18  ;;  %v5516_v21 = vrot.slane %v24826_v53, 3  ;;  %v20655_v34 = vmul.f32 %v20619_v25, %v24827_v32  ;;  %v24364_v24 = vmax.f32 %v20635_v18, 0.0  ;;  %v4457_v43 = vpop.f32.mrf.mxu0  ;;  %v14972_v8 = vpack.c.bf16 %v4801_v39, %v20564_v58  ;;  %24829 = vst [vmem:[#allocation69_spill] sm:$0xff] %v20669_v9 }
 0x241   : > { %v5508_v41 = vor.u32 %v5507_v46, %v5504_v50  ;;  %v4503_v36 = vadd.f32 %v16287_v62, %v20559_v4  ;;  %15092 = vst [vmem:[#allocation2 + $0x78] sm:$0xff] %v14977_v14   ;;  %v3912_v32 = vadd.f32 %v3867_v59, %v20235_v7  ;;  %v4501_v29 = vadd.f32 %v4444_v27, %v20570_v61  ;;  %v20681_v7 = vld [vmem:[%s24232_s4 + $0x178] sm:$0xff]   ;;  %v17805_v50 = vld [vmem:[%s24231_s3] ss:$0 sm:$0xff] }
 0x242   : > { %v5517_v53 = vor.u32 %v5516_v21, %v5513_v52  ;;  %v4804_v60 = vmul.f32 %v20550_v35, %v24364_v24  ;;  %v5173_v16 = vrot.slane %v20625_v33, 3  ;;  %16461 = vmatpush3.bf16.msra.mxu0 %v17509_v38  ;;  %15091 = vst [vmem:[#allocation2 + $0x70] sm:$0xff] %v14972_v8   ;;  %v5175_v62 = vrot.slane %v20649_v55, 3  ;;  %v16291_v46 = vpop.f32.mrf.mxu0 }
 0x243   : > { %v5509_v4 = vsel %vm860_vm1, %v20566_v51, %v5508_v41  ;;  %v20675_v21 = vadd.f32 %v20084_v22, %v4503_v36  ;;  %16462 = vmatprep.subr.bf16.mxu0 %v17512_v57  ;;  %v20684_v59 = vadd.f32 %v20084_v22, %v4501_v29  ;;  %v24832_v51 = vrot.slane %v20542_v40, 3 }
 0x244   : > { %v5518_v58 = vsel %vm860_vm1, %v5508_v41, %v5517_v53  ;;  %16372 = vmatprep.mubr.bf16.mxu0 %v5509_v4  ;;  %v4506_v36 = vadd.f32 %v16290_v6, %v20587_v15  ;;  %v4504_v61 = vadd.f32 %v4457_v43, %v20605_v30  ;;  %v5176_v27 = vsel %vm576_vm0, %v5173_v16, %v5175_v62  ;;  %v20712_v4 = vld [vmem:[#allocation2 + $0x5c] sm:$0xff]  }
 0x245   : > { %24830 = vst [vmem:[#allocation70_spill] sm:$0xff] %v20675_v21  ;;  %24831 = vst [vmem:[#allocation71_spill] sm:$0xff] %v20684_v59  ;;  %v5174_v41 = vsel %vm576_vm0, %v24832_v51, %v5173_v16  ;;  %16373 = vmatmul.mubr.bf16.gmra.mxu0 %v5518_v58  ;;  %v24363_v38 = vmax.f32 %v20675_v21, 0.0  ;;  %v24366_v39 = vshrl.u32 %v20625_v33, 16  ;;  %v24365_v52 = vshll.u32 %v20625_v33, 16  ;;  %v4460_v16 = vpop.f32.mrf.mxu0  ;;  %v20715_v58 = vpop.permute.xlu1 %4763 }
 0x246   : > { %16324 = vmatprep.mubr.bf16.mxu1 %v5174_v41  ;;  %v24368_v22 = vmax.f32 %v20684_v59, 0.0  ;;  %v20699_v6 = vadd.f32 %v17805_v50, %v4506_v36  ;;  %v20701_v43 = vadd.f32 %v17805_v50, %v4504_v61  ;;  %v24369_v15 = vshrl.u32 %v20649_v55, 16  ;;  %16463 = vmatpush3.bf16.msra.mxu0 %v17512_v57  ;;  %24835 = vst [vmem:[#allocation74_spill] sm:$0xff] %v20715_v58  ;;  %v20724_v61 = vld [vmem:[#allocation2 + $0x64] sm:$0xff]  }
 0x247   : > { %16325 = vmatmul.mubr.bf16.gmra.mxu1 %v5176_v27  ;;  %v4807_v30 = vmul.f32 %v20661_v45, %v24363_v38  ;;  %v5522_v14 = vrot.slane %v24366_v39, 2  ;;  %v5525_v8 = vrot.slane %v24365_v52, 3  ;;  %v24380_v29 = vshll.u32 %v20649_v55, 16  ;;  %16552 = vmatprep.subr.bf16.mxu0 %v20681_v7  ;;  %v20726_v27 = vpop.permute.xlu0 %4768 }
 0x248   : > { %24833 = vst [vmem:[#allocation72_spill] sm:$0xff] %v20699_v6  ;;  %24834 = vst [vmem:[#allocation73_spill] sm:$0xff] %v20701_v43  ;;  %v4805_v57 = vmul.f32 %v20610_v12, %v24368_v22  ;;  %v24373_v51 = vmax.f32 %v20699_v6, 0.0  ;;  %v24375_v41 = vmax.f32 %v20701_v43, 0.0  ;;  %v5531_v36 = vrot.slane %v24369_v15, 2 }
 0x249   : > { %24836 = vst [vmem:[#allocation75_spill] sm:$0xff] %v20726_v27  ;;  %v14987_v38 = vpack.c.bf16 %v4807_v30, %v20655_v34  ;;  %v5526_v24 = vor.u32 %v5525_v8, %v5522_v14  ;;  %v5534_v52 = vrot.slane %v24380_v29, 3  ;;  %v4507_v39 = vadd.f32 %v16291_v46, %v3914_v37  ;;  %v20741_v14 = vld [vmem:[#allocation2 + $0x6c] sm:$0xff]   ;;  %v20835_v43 = vld [vmem:[#allocation2 + $0x20] sm:$0xf] }
 0x24a   : > { %v14982_v21 = vpack.c.bf16 %v4805_v57, %v4804_v60  ;;  %v4810_v22 = vmul.f32 %v20726_v27, %v24373_v51  ;;  %v4808_v15 = vmul.f32 %v20669_v9, %v24375_v41  ;;  %v4505_v59 = vadd.f32 %v4460_v16, %v3912_v32  ;;  %v20747_v32 = vld [vmem:[#allocation2 + $0x74] sm:$0xff]   ;;  %v20753_v16 = vpop.permute.xlu1 %4773 }
 0x24b   : > { %15094 = vst [vmem:[#allocation2 + $0x88] sm:$0xff] %v14987_v38   ;;  %v5527_v31 = vsel %vm860_vm1, %v5517_v53, %v5526_v24  ;;  %v5535_v18 = vor.u32 %v5534_v52, %v5531_v36  ;;  %v20738_v34 = vadd.f32 %v17805_v50, %v4507_v39  ;;  %v5177_v30 = vrot.slane %v20712_v4, 3  ;;  %24839 = vst [vmem:[#allocation78_spill] sm:$0xff] %v20753_v16 }
 0x24c   : > { %15093 = vst [vmem:[#allocation2 + $0x80] sm:$0xff] %v14982_v21   ;;  %v14871_v37 = vpack.c.bf16 %v4810_v22, %v4810_v22  ;;  %16376 = vmatprep.mubr.bf16.mxu0 %v5527_v31  ;;  %v20743_v60 = vadd.f32 %v17805_v50, %v4505_v59  ;;  %v5179_v46 = vrot.slane %v20724_v61, 3  ;;  %v24378_v8 = vshrl.u32 %v20712_v4, 16 }
 0x24d   : > { %24837 = vst [vmem:[#allocation76_spill] sm:$0xff] %v20738_v34  ;;  %v5536_v53 = vsel %vm860_vm1, %v5526_v24, %v5535_v18  ;;  %v24374_v38 = vmax.f32 %v20738_v34, 0.0  ;;  %v5178_v39 = vsel %vm576_vm0, %v5175_v62, %v5177_v30  ;;  %v24376_v52 = vshll.u32 %v20712_v4, 16 }
 0x24e   : > { %24838 = vst [vmem:[#allocation77_spill] sm:$0xff] %v20743_v60  ;;  %4990 = vst [vmem:[#allocation2 + $0x98] sm:$0xf] %v14871_v37  ;;  %16377 = vmatmul.mubr.bf16.gmra.mxu0 %v5536_v53  ;;  %v24377_v31 = vmax.f32 %v20743_v60, 0.0  ;;  %16328 = vmatprep.mubr.bf16.mxu1 %v5178_v39  ;;  %v5180_v21 = vsel %vm576_vm0, %v5177_v30, %v5179_v46  ;;  %v5540_v59 = vrot.slane %v24378_v8, 2  ;;  %v24379_v24 = vshrl.u32 %v20724_v61, 16 }
 0x24f   : > { %v4811_v62 = vmul.f32 %v20753_v16, %v24374_v38  ;;  %16329 = vmatmul.mubr.bf16.gmra.mxu1 %v5180_v21  ;;  %v5543_v22 = vrot.slane %v24376_v52, 3  ;;  %v24385_v50 = vshll.u32 %v20724_v61, 16  ;;  %v5181_v57 = vrot.slane %v20741_v14, 3 }
 0x250   : > { %v4809_v36 = vmul.f32 %v20715_v58, %v24377_v31  ;;  %v5549_v30 = vrot.slane %v24379_v24, 2  ;;  %v5183_v37 = vrot.slane %v20747_v32, 3  ;;  %v24382_v53 = vshrl.u32 %v20741_v14, 16 }
 0x251   : > { %v14872_v39 = vpack.c.bf16 %v4811_v62, %v4811_v62  ;;  %v5544_v21 = vor.u32 %v5543_v22, %v5540_v59  ;;  %v5552_v51 = vrot.slane %v24385_v50, 3  ;;  %v5182_v38 = vsel %vm576_vm0, %v5179_v46, %v5181_v57 }
 0x252   : > { %v14992_v41 = vpack.c.bf16 %v4809_v36, %v4808_v15  ;;  %16332 = vmatprep.mubr.bf16.mxu1 %v5182_v38  ;;  %v5558_v52 = vrot.slane %v24382_v53, 2  ;;  %v24381_v31 = vshll.u32 %v20741_v14, 16  ;;  %v24383_v29 = vshrl.u32 %v20747_v32, 16 }
 0x253   : > { %4991 = vst [vmem:[#allocation2 + $0x9c] sm:$0x7] %v14872_v39  ;;  %v5545_v8 = vsel %vm860_vm1, %v5535_v18, %v5544_v21  ;;  %v5553_v24 = vor.u32 %v5552_v51, %v5549_v30  ;;  %v24384_v59 = vshll.u32 %v20747_v32, 16  ;;  %v20783_v62 = vld [vmem:[#allocation2 + $0x7c] sm:$0xff]   ;;  %v20785_v22 = vld [vmem:[#allocation2 + $0x84] sm:$0xff]   ;;  %v5184_v15 = vsel %vm576_vm0, %v5181_v57, %v5183_v37 }
 0x254   : > { %15095 = vst [vmem:[#allocation2 + $0x90] sm:$0xff] %v14992_v41   ;;  %16380 = vmatprep.mubr.bf16.mxu0 %v5545_v8  ;;  %v5561_v46 = vrot.slane %v24381_v31, 3  ;;  %v24840_v38 = vshrl.u32 %v20247_v63, 16  ;;  %v24841_v18 = vshll.u32 %v20247_v63, 16  ;;  %v5567_v39 = vrot.slane %v24383_v29, 2 }
 0x255   : > { %v5554_v30 = vsel %vm860_vm1, %v5544_v21, %v5553_v24  ;;  %v5570_v41 = vrot.slane %v24384_v59, 3  ;;  %v5185_v8 = vrot.slane %v20783_v62, 3  ;;  %v24386_v31 = vshrl.u32 %v20783_v62, 16 }
 0x256   : > { %v5881_v36 = vrot.slane %v24840_v38, 3  ;;  %v5882_v51 = vrot.slane %v24841_v18, 4  ;;  %16381 = vmatmul.mubr.bf16.gmra.mxu0 %v5554_v30  ;;  %v5562_v57 = vor.u32 %v5561_v46, %v5558_v52  ;;  %v24390_v53 = vshll.u32 %v20783_v62, 16  ;;  %v6237_v38 = vld [vmem:[#allocation2 + $0xc] sm:$0x8] }
 0x257   : > { %v5880_v63 = vor.u32 %v20134_v56, %v20132_v19  ;;  %v20804_v18 = vld [vmem:[#allocation2 + $0x10] sm:$0xf]  ;;  %16333 = vmatmul.mubr.bf16.gmra.mxu1 %v5184_v15  ;;  %v5571_v21 = vor.u32 %v5570_v41, %v5567_v39  ;;  %v5186_v29 = vsel %vm576_vm0, %v5183_v37, %v5185_v8  ;;  %v24389_v59 = vshrl.u32 %v20785_v22, 16  ;;  %v20815_v15 = vld [vmem:[#allocation2 + $0x14] sm:$0xf] }
 0x258   : > { %v24388_v50 = vshll.u32 %v20785_v22, 16  ;;  %v5563_v52 = vsel %vm860_vm1, %v5553_v24, %v5562_v57  ;;  %16336 = vmatprep.mubr.bf16.mxu1 %v5186_v29  ;;  %v5187_v46 = vrot.slane %v20785_v22, 3  ;;  %v5576_v30 = vrot.slane %v24386_v31, 2  ;;  %v20822_v24 = vld [vmem:[#allocation2 + $0x18] sm:$0xf] }
 0x259   : > { %v5579_v19 = vrot.slane %v24390_v53, 3  ;;  %16384 = vmatprep.mubr.bf16.mxu0 %v5563_v52  ;;  %v5883_v56 = vor.u32 %v5882_v51, %v5881_v36  ;;  %v14287_v37 = vcombine.low %v6237_v38, %v20804_v18  ;;  %v5585_v41 = vrot.slane %v24389_v59, 2  ;;  %24842 = vst [vmem:[#allocation79_spill] sm:$0xff] %v20822_v24 }
 0x25a   : > { %v5588_v29 = vrot.slane %v24388_v50, 3  ;;  %v5572_v31 = vsel %vm860_vm1, %v5562_v57, %v5571_v21  ;;  %v5188_v36 = vsel %vm576_vm0, %v5185_v8, %v5187_v46  ;;  %v24843_v16 = vshrl.u32 %v20257_v11, 16 }
 0x25b   : > { %v5580_v39 = vor.u32 %v5579_v19, %v5576_v30  ;;  %v20825_v60 = vld [vmem:[#allocation2 + $0x8c] sm:$0xff]   ;;  %v5884_v52 = vsel %vm1295_vm2, %v5880_v63, %v5883_v56  ;;  %v17507_v38 = vld [vmem:[#allocation2 + $0x94] ss:$0 sps:$4 sm:$0x33]   ;;  %v14288_v30 = vcombine.low %v20815_v15, %v20822_v24  ;;  %v6385_v53 = vshrl.u32 %v14287_v37, 16 }
 0x25c   : > { %v5189_v19 = vrot.slane %v20825_v60, 3  ;;  %v24404_v50 = vshrl.u32 %v20825_v60, 16  ;;  %v24407_v59 = vshll.u32 %v20825_v60, 16  ;;  %v5589_v57 = vor.u32 %v5588_v29, %v5585_v41  ;;  %v21067_v24 = vld [vmem:[#allocation2 + $0x7c] sm:$0xf] }
 0x25d   : > { %v5581_v51 = vsel %vm860_vm1, %v5571_v21, %v5580_v39  ;;  %v5601_v6 = vshrl.u32 %v17507_v38, 16  ;;  %v5604_v34 = vshll.u32 %v17507_v38, 16  ;;  %v6388_v63 = vshll.u32 %v14287_v37, 16  ;;  %24878 = vst [vmem:[#allocation88_spill] sm:$0xff] %v21067_v24 }
 0x25e   : > { %16385 = vmatmul.mubr.bf16.gmra.mxu0 %v5572_v31  ;;  %v5190_v8 = vsel %vm576_vm0, %v5187_v46, %v5189_v19  ;;  %v5594_v21 = vrot.slane %v24404_v50, 2  ;;  %v5597_v58 = vrot.slane %v24407_v59, 3  ;;  %v5885_v9 = vrot.slane %v24843_v16, 3  ;;  %v20844_v31 = vld [vmem:[#allocation2 + $0x1c] sm:$0xf] }
 0x25f   : > { %16337 = vmatmul.mubr.bf16.gmra.mxu1 %v5188_v36  ;;  %16388 = vmatprep.mubr.bf16.mxu0 %v5581_v51  ;;  %24844 = vst [vmem:[#allocation80_spill] sm:$0xff] %v20844_v31  ;;  %v5191_v41 = vrot.slane %v17507_v38, 3  ;;  %v5603_v37 = vrot.slane %v5601_v6, 2  ;;  %v5606_v29 = vrot.slane %v5604_v34, 3  ;;  %v6393_v27 = vshrl.u32 %v14288_v30, 16 }
 0x260   : > { %16340 = vmatprep.mubr.bf16.mxu1 %v5190_v8  ;;  %v20846_v36 = vld [vmem:[#allocation2 + $0x24] sm:$0xf]  ;;  %v5598_v51 = vor.u32 %v5597_v58, %v5594_v21  ;;  %v24845_v46 = vshll.u32 %v20257_v11, 16  ;;  %v24846_v50 = vshrl.u32 %v20332_v10, 16  ;;  %v24847_v59 = vshll.u32 %v20332_v10, 16 }
 0x261   : > { %v6396_v16 = vshll.u32 %v14288_v30, 16  ;;  %v14289_v8 = vcombine.low %v20844_v31, %v20835_v43  ;;  %v20856_v38 = vld [vmem:[#allocation2 + $0x28] sm:$0xf]  ;;  %v5590_v6 = vsel %vm860_vm1, %v5580_v39, %v5589_v57  ;;  %v5192_v58 = vsel %vm576_vm0, %v5189_v19, %v5191_v41  ;;  %v20867_v39 = vld [vmem:[#allocation2 + $0x2c] sm:$0xf] }
 0x262   : > { %v5886_v12 = vrot.slane %v24845_v46, 4  ;;  %v5889_v45 = vrot.slane %v24846_v50, 3  ;;  %v5890_v35 = vrot.slane %v24847_v59, 4  ;;  %v14290_v11 = vcombine.low %v20846_v36, %v20856_v38  ;;  %v20863_v59 = vld [vmem:[#allocation2 + $0x30] sm:$0xf] }
 0x263   : > { %v5599_v50 = vsel %vm860_vm1, %v5589_v57, %v5598_v51  ;;  %v6387_v21 = vrot.slane %v6385_v53, 3  ;;  %v6390_v10 = vrot.slane %v6388_v63, 4  ;;  %v5607_v30 = vor.u32 %v5606_v29, %v5603_v37  ;;  %v20875_v41 = vld [vmem:[#allocation2 + $0x38] sm:$0xf] }
 0x264   : > { %v5887_v34 = vor.u32 %v5886_v12, %v5885_v9  ;;  %v5891_v25 = vor.u32 %v5890_v35, %v5889_v45  ;;  %v6395_v46 = vrot.slane %v6393_v27, 3  ;;  %v20869_v45 = vld [vmem:[#allocation2 + $0x34] sm:$0xf]  ;;  %v6398_v35 = vrot.slane %v6396_v16, 4 }
 0x265   : > { %v6402_v12 = vshrl.u32 %v14289_v8, 16  ;;  %v24848_v9 = vshrl.u32 %v20348_v54, 16  ;;  %v24849_v53 = vshll.u32 %v20348_v54, 16  ;;  %v6405_v27 = vshll.u32 %v14289_v8, 16 }
 0x266   : > { %v5888_v13 = vsel %vm1295_vm2, %v5883_v56, %v5887_v34  ;;  %v5892_v26 = vsel %vm1295_vm2, %v5887_v34, %v5891_v25  ;;  %16389 = vmatmul.mubr.bf16.gmra.mxu0 %v5590_v6  ;;  %v6411_v63 = vshrl.u32 %v14290_v11, 16  ;;  %v6414_v56 = vshll.u32 %v14290_v11, 16  ;;  %v20883_v6 = vld [vmem:[#allocation2 + $0x40] sm:$0xf] }
 0x267   : > { %v5893_v19 = vrot.slane %v24848_v9, 3  ;;  %v5894_v57 = vrot.slane %v24849_v53, 4  ;;  %16341 = vmatmul.mubr.bf16.gmra.mxu1 %v5192_v58  ;;  %16392 = vmatprep.mubr.bf16.mxu0 %v5599_v50  ;;  %v14291_v29 = vcombine.low %v20867_v39, %v20863_v59  ;;  %v14292_v16 = vcombine.low %v20869_v45, %v20875_v41  ;;  %v20894_v53 = vld [vmem:[#allocation2 + $0x3c] sm:$0xf] }
 0x268   : > { %16412 = vmatprep.mubr.bf16.mxu1 %v5884_v52  ;;  %v6391_v54 = vor.u32 %v6390_v10, %v6387_v21  ;;  %v24850_v34 = vshrl.u32 %v20422_v3, 16  ;;  %v24851_v8 = vshll.u32 %v20422_v3, 16  ;;  %v5608_v50 = vsel %vm860_vm1, %v5598_v51, %v5607_v30 }
 0x269   : > { %v20877_v37 = vor.u32 %v5894_v57, %v5893_v19  ;;  %v6399_v52 = vor.u32 %v6398_v35, %v6395_v46  ;;  %v6404_v9 = vrot.slane %v6402_v12, 3  ;;  %v20896_v57 = vld [vmem:[#allocation2 + $0x44] sm:$0xf]  ;;  %v6407_v42 = vrot.slane %v6405_v27, 4  ;;  %v17516_v12 = vld [vmem:[%s24232_s4 + $0x130] sm:$0xff]  }
 0x26a   : > { %v5901_v58 = vrot.slane %v24850_v34, 3  ;;  %v5902_v11 = vrot.slane %v24851_v8, 4  ;;  %v6413_v21 = vrot.slane %v6411_v63, 3  ;;  %v6416_v10 = vrot.slane %v6414_v56, 4  ;;  %v20900_v34 = vld [vmem:[#allocation2 + $0x48] sm:$0xf] }
 0x26b   : > { %v20892_v19 = vsel %vm1295_vm2, %v5891_v25, %v20877_v37  ;;  %v6420_v3 = vshrl.u32 %v14291_v29, 16  ;;  %v6423_v8 = vshll.u32 %v14291_v29, 16  ;;  %v6429_v51 = vshrl.u32 %v14292_v16, 16 }
 0x26c   : > { %v20898_v20 = vor.u32 %v5902_v11, %v5901_v58  ;;  %v24852_v30 = vshrl.u32 %v20408_v2, 16  ;;  %v24853_v25 = vshll.u32 %v20408_v2, 16  ;;  %v6432_v27 = vshll.u32 %v14292_v16, 16  ;;  %v20918_v16 = vld [vmem:[#allocation2 + $0x50] sm:$0xf] }
 0x26d   : > { %v14293_v63 = vcombine.low %v20894_v53, %v20883_v6  ;;  %v6400_v56 = vsel %vm1295_vm2, %v6391_v54, %v6399_v52  ;;  %v14294_v29 = vcombine.low %v20896_v57, %v20900_v34  ;;  %v24854_v58 = vshrl.u32 %v20542_v40, 16 }
 0x26e   : > { %v5897_v46 = vrot.slane %v24852_v30, 3  ;;  %v5898_v35 = vrot.slane %v24853_v25, 4  ;;  %16393 = vmatmul.mubr.bf16.gmra.mxu0 %v5608_v50  ;;  %v24855_v2 = vshll.u32 %v20542_v40, 16  ;;  %v6408_v25 = vor.u32 %v6407_v42, %v6404_v9 }
 0x26f   : > { %v5909_v11 = vrot.slane %v24854_v58, 3  ;;  %16464 = vmatprep.mubr.bf16.mxu0 %v6400_v56  ;;  %16413 = vmatmul.mubr.bf16.vlgmr.msra.gmra.mxu1 %v5888_v13  ;;  %v6417_v49 = vor.u32 %v6416_v10, %v6413_v21  ;;  %v6422_v54 = vrot.slane %v6420_v3, 3  ;;  %v6425_v50 = vrot.slane %v6423_v8, 4  ;;  %v17519_v58 = vld [vmem:[%s24232_s4 + $0x128] sm:$0xff]  }
 0x270   : > { %v5910_v30 = vrot.slane %v24855_v2, 4  ;;  %16416 = vmatprep.mubr.bf16.mxu1 %v5892_v26  ;;  %16501 = vmatpush3.bf16.msra.mxu1 %v20593_v48  ;;  %v6431_v23 = vrot.slane %v6429_v51, 3  ;;  %v20928_v56 = vld [vmem:[#allocation2 + $0x4c] sm:$0xf]  ;;  %v5899_v42 = vor.u32 %v5898_v35, %v5897_v46  ;;  %v6434_v13 = vrot.slane %v6432_v27, 4 }
 0x271   : > { %16502 = vmatprep.subr.bf16.mxu1 %v17516_v12  ;;  %v6438_v9 = vshrl.u32 %v14293_v63, 16  ;;  %v6441_v21 = vshll.u32 %v14293_v63, 16  ;;  %v6447_v10 = vshrl.u32 %v14294_v29, 16  ;;  %v6450_v26 = vshll.u32 %v14294_v29, 16 }
 0x272   : > { %v20926_v40 = vor.u32 %v5910_v30, %v5909_v11  ;;  %v6409_v48 = vsel %vm1295_vm2, %v6399_v52, %v6408_v25  ;;  %v24856_v3 = vshrl.u32 %v20516_v5, 16  ;;  %v24857_v51 = vshll.u32 %v20516_v5, 16  ;;  %v20937_v30 = vld [vmem:[#allocation2 + $0x58] sm:$0xf] }
 0x273   : > { %v14295_v11 = vcombine.low %v20928_v56, %v20918_v16  ;;  %v6418_v46 = vsel %vm1295_vm2, %v6408_v25, %v6417_v49  ;;  %v14296_v35 = vcombine.low %v20920_v0, %v20937_v30  ;;  %v24858_v27 = vshrl.u32 %v20649_v55, 16 }
 0x274   : > { %v5905_v8 = vrot.slane %v24856_v3, 3  ;;  %v5906_v2 = vrot.slane %v24857_v51, 4  ;;  %16503 = vmatpush3.bf16.msra.mxu1 %v17516_v12  ;;  %v24859_v63 = vshll.u32 %v20649_v55, 16  ;;  %v5900_v5 = vsel %vm1295_vm2, %v20877_v37, %v5899_v42  ;;  %v17522_v12 = vld [vmem:[%s24232_s4 + $0x120] sm:$0xff]   ;;  %v17532_v55 = vld [vmem:[%s24232_s4 + $0x170] sm:$0xff]  }
 0x275   : > { %v5917_v52 = vrot.slane %v24858_v27, 3  ;;  %v6426_v3 = vor.u32 %v6425_v50, %v6422_v54  ;;  %v6435_v51 = vor.u32 %v6434_v13, %v6431_v23  ;;  %16504 = vmatprep.subr.bf16.mxu1 %v17519_v58  ;;  %v6440_v28 = vrot.slane %v6438_v9, 3 }
 0x276   : > { %v5918_v29 = vrot.slane %v24859_v63, 4  ;;  %16465 = vmatmul.mubr.bf16.vlgmr.msra.gmra.mxu0 %v6409_v48  ;;  %v6443_v25 = vrot.slane %v6441_v21, 4  ;;  %v6449_v1 = vrot.slane %v6447_v10, 3  ;;  %v6452_v44 = vrot.slane %v6450_v26, 4  ;;  %v20961_v21 = vld [vmem:[#allocation2 + $0x60] sm:$0xf] }
 0x277   : > { %16468 = vmatprep.mubr.bf16.mxu0 %v6418_v46  ;;  %16417 = vmatmul.mubr.bf16.gmra.mxu1 %v20892_v19  ;;  %v5907_v23 = vor.u32 %v5906_v2, %v5905_v8  ;;  %v24860_v37 = vshrl.u32 %v20625_v33, 16  ;;  %v24861_v50 = vshll.u32 %v20625_v33, 16  ;;  %v6456_v9 = vshrl.u32 %v14295_v11, 16  ;;  %v20967_v8 = vld [vmem:[#allocation2 + $0x5c] sm:$0xf] }
 0x278   : > { %v20951_v17 = vor.u32 %v5918_v29, %v5917_v52  ;;  %16420 = vmatprep.mubr.bf16.mxu1 %v5900_v5  ;;  %16505 = vmatpush3.bf16.msra.mxu1 %v17519_v58  ;;  %v6459_v10 = vshll.u32 %v14295_v11, 16  ;;  %v6465_v26 = vshrl.u32 %v14296_v35, 16  ;;  %v6468_v48 = vshll.u32 %v14296_v35, 16  ;;  %v17526_v33 = vld [vmem:[%s24232_s4 + $0x118] sm:$0xff]  }
 0x279   : > { %v5913_v54 = vrot.slane %v24860_v37, 3  ;;  %v5914_v13 = vrot.slane %v24861_v50, 4  ;;  %v6427_v27 = vsel %vm1295_vm2, %v6417_v49, %v6426_v3  ;;  %v6436_v46 = vsel %vm1295_vm2, %v6426_v3, %v6435_v51  ;;  %16506 = vmatprep.subr.bf16.mxu1 %v17522_v12  ;;  %16553 = vmatpush3.bf16.msra.mxu0 %v20681_v7  ;;  %v20995_v7 = vld [vmem:[#allocation2 + $0x70] sm:$0xf]  ;;  %v20999_v50 = vld [vmem:[#allocation2 + $0x6c] sm:$0xf] }
 0x27a   : > { %v5904_v19 = vsel %vm1295_vm2, %v5899_v42, %v20898_v20  ;;  %v24862_v2 = vshrl.u32 %v20724_v61, 16  ;;  %v6444_v11 = vor.u32 %v6443_v25, %v6440_v28  ;;  %v20975_v35 = vor.u32 %v6452_v44, %v6449_v1  ;;  %v20981_v42 = vld [vmem:[#allocation2 + $0x64] sm:$0xf]  ;;  %16554 = vmatprep.subr.bf16.mxu0 %v17532_v55  ;;  %v20993_v1 = vld [vmem:[#allocation2 + $0x68] sm:$0xf]  ;;  %24865 = vst [vmem:[#allocation82_spill] sm:$0xff] %v20995_v7 }
 0x27b   : > { %v20979_v49 = vcombine.low %v20967_v8, %v20961_v21  ;;  %v24863_v52 = vshll.u32 %v20724_v61, 16  ;;  %v5908_v29 = vsel %vm1295_vm2, %v20898_v20, %v5907_v23  ;;  %v20989_v5 = vsel %vm1295_vm2, %v5907_v23, %v20926_v40  ;;  %24864 = vst [vmem:[#allocation81_spill] sm:$0xff] %v20993_v1  ;;  %24866 = vst [vmem:[#allocation83_spill] sm:$0xff] %v20999_v50  ;;  %v17531_v20 = vld [vmem:[%s24232_s4 + $0x110] sm:$0xff]  }
 0x27c   : > { %v5925_v58 = vrot.slane %v24862_v2, 3  ;;  %v20991_v28 = vor.u32 %v5914_v13, %v5913_v54  ;;  %v6458_v44 = vrot.slane %v6456_v9, 3  ;;  %v6461_v3 = vrot.slane %v6459_v10, 4  ;;  %16507 = vmatpush3.bf16.msra.mxu1 %v17522_v12  ;;  %v17534_v2 = vld [vmem:[%s24232_s4 + $0x168] sm:$0xff]  }
 0x27d   : > { %v5926_v63 = vrot.slane %v24863_v52, 4  ;;  %v6467_v25 = vrot.slane %v6465_v26, 3  ;;  %v6470_v61 = vrot.slane %v6468_v48, 4  ;;  %v24867_v23 = vshrl.u32 %v20712_v4, 16  ;;  %16508 = vmatprep.subr.bf16.mxu1 %v17526_v33  ;;  %v21016_v48 = vld [vmem:[#allocation2 + $0x74] sm:$0xf]  ;;  %16555 = vmatpush3.bf16.msra.mxu0 %v17532_v55 }
 0x27e   : > { %v21010_v13 = vcombine.low %v20981_v42, %v20993_v1  ;;  %v24868_v12 = vshrl.u32 %v20741_v14, 16  ;;  %v24869_v10 = vshll.u32 %v20741_v14, 16  ;;  %24870 = vst [vmem:[#allocation84_spill] sm:$0xff] %v21016_v48  ;;  %16469 = vmatmul.mubr.bf16.gmra.mxu0 %v6427_v27  ;;  %v6454_v52 = vsel %vm1295_vm2, %v6444_v11, %v20975_v35  ;;  %16556 = vmatprep.subr.bf16.mxu0 %v17534_v2 }
 0x27f   : > { %v20997_v37 = vor.u32 %v5926_v63, %v5925_v58  ;;  %v21006_v54 = vrot.slane %v24867_v23, 3  ;;  %v6445_v58 = vsel %vm1295_vm2, %v6435_v51, %v6444_v11  ;;  %v6474_v63 = vshrl.u32 %v20979_v49, 16  ;;  %16472 = vmatprep.mubr.bf16.mxu0 %v6436_v46  ;;  %16421 = vmatmul.mubr.bf16.gmra.mxu1 %v5904_v19 }
 0x280   : > { %v5929_v9 = vrot.slane %v24868_v12, 3  ;;  %v5930_v26 = vrot.slane %v24869_v10, 4  ;;  %v14299_v23 = vcombine.low %v20999_v50, %v20995_v7  ;;  %v5916_v14 = vsel %vm1295_vm2, %v20926_v40, %v20991_v28  ;;  %v21030_v12 = vld [vmem:[#allocation2 + $0x78] sm:$0xf]  ;;  %16424 = vmatprep.mubr.bf16.mxu1 %v5908_v29  ;;  %16509 = vmatpush3.bf16.msra.mxu1 %v17526_v33  ;;  %v17536_v33 = vld [vmem:[%s24232_s4 + $0x108] sm:$0xff]  }
 0x281   : > { %24871 = vst [vmem:[#allocation85_spill] sm:$0xff] %v21030_v12  ;;  %v24872_v27 = vshrl.u32 %v20747_v32, 16  ;;  %v24873_v10 = vshll.u32 %v20747_v32, 16  ;;  %v21039_v46 = vor.u32 %v6461_v3, %v6458_v44  ;;  %v21041_v19 = vor.u32 %v6470_v61, %v6467_v25  ;;  %16510 = vmatprep.subr.bf16.mxu1 %v17531_v20  ;;  %16557 = vmatpush3.bf16.msra.mxu0 %v17534_v2  ;;  %v21076_v7 = vld [vmem:[#allocation2 + $0x88] sm:$0xf] }
 0x282   : > { %v5931_v55 = vor.u32 %v5930_v26, %v5929_v9  ;;  %v24874_v40 = vshll.u32 %v20712_v4, 16  ;;  %v14300_v26 = vcombine.low %v21016_v48, %v21030_v12  ;;  %v6477_v32 = vshll.u32 %v20979_v49, 16  ;;  %v21057_v4 = vld [vmem:[#allocation2 + $0x84] sm:$0xf]  ;;  %24881 = vst [vmem:[#allocation90_spill] sm:$0xff] %v21076_v7  ;;  %16558 = vmatprep.subr.bf16.mxu0 %v17537_v47 }
 0x283   : > { %v5933_v51 = vrot.slane %v24872_v27, 3  ;;  %v5934_v11 = vrot.slane %v24873_v10, 4  ;;  %v21049_v27 = vld [vmem:[#allocation2 + $0x80] sm:$0xf]  ;;  %v6483_v10 = vshrl.u32 %v21010_v13, 16  ;;  %24876 = vst [vmem:[#allocation87_spill] sm:$0xff] %v21057_v4 }
 0x284   : > { %v21045_v9 = vrot.slane %v24874_v40, 4  ;;  %24875 = vst [vmem:[#allocation86_spill] sm:$0xff] %v21049_v27  ;;  %v21055_v29 = vsel %vm1295_vm2, %v20997_v37, %v5931_v55  ;;  %v21062_v3 = vrot.slane %v6474_v63, 3  ;;  %v6486_v25 = vshll.u32 %v21010_v13, 16  ;;  %16511 = vmatpush3.bf16.msra.mxu1 %v17531_v20 }
 0x285   : > { %v5935_v44 = vor.u32 %v5934_v11, %v5933_v51  ;;  %v6492_v49 = vshrl.u32 %v14299_v23, 16  ;;  %v24877_v61 = vshrl.u32 %v20783_v62, 16  ;;  %v6495_v31 = vshll.u32 %v14299_v23, 16  ;;  %16512 = vmatprep.subr.bf16.mxu1 %v17536_v33  ;;  %16559 = vmatpush3.bf16.msra.mxu0 %v17537_v47 }
 0x286   : > { %v24880_v11 = vshll.u32 %v20783_v62, 16  ;;  %v14301_v63 = vcombine.low %v21067_v24, %v21049_v27  ;;  %v6501_v13 = vshrl.u32 %v14300_v26, 16  ;;  %v24882_v2 = vshrl.u32 %v20785_v22, 16  ;;  %v17541_v27 = vld [vmem:[%s24232_s4 + $0x100] sm:$0xff]   ;;  %16473 = vmatmul.mubr.bf16.gmra.mxu0 %v6445_v58 }
 0x287   : > { %v5937_v40 = vrot.slane %v24877_v61, 3  ;;  %v21070_v51 = vsel %vm1295_vm2, %v5931_v55, %v5935_v44  ;;  %v14302_v61 = vcombine.low %v21057_v4, %v21076_v7  ;;  %v24883_v55 = vshll.u32 %v20785_v22, 16  ;;  %v21087_v4 = vld [vmem:[#allocation2 + $0x90] sm:$0xf]  ;;  %v17539_v22 = vld [vmem:[%s24232_s4 + $0x158] sm:$0xff]   ;;  %16476 = vmatprep.mubr.bf16.mxu0 %v6454_v52  ;;  %16425 = vmatmul.mubr.bf16.gmra.mxu1 %v20989_v5 }
 0x288   : > { %24879 = vst [vmem:[#allocation89_spill] sm:$0xff] %v21070_v51  ;;  %v5938_v12 = vrot.slane %v24880_v11, 4  ;;  %v5941_v23 = vrot.slane %v24882_v2, 3  ;;  %v6479_v48 = vrot.slane %v6477_v32, 4  ;;  %v6504_v62 = vshll.u32 %v14300_v26, 16  ;;  %16428 = vmatprep.mubr.bf16.mxu1 %v5916_v14  ;;  %16513 = vmatpush3.bf16.msra.mxu1 %v17536_v33  ;;  %v17543_v5 = vld [vmem:[%s24232_s4 + $0x150] sm:$0xff]  }
 0x289   : > { %v5942_v51 = vrot.slane %v24883_v55, 4  ;;  %v6510_v1 = vshrl.u32 %v14301_v63, 16  ;;  %v6513_v20 = vshll.u32 %v14301_v63, 16  ;;  %v6519_v24 = vshrl.u32 %v14302_v61, 16  ;;  %v21110_v33 = vld [vmem:[#allocation2 + $0x94] sm:$0xf]  ;;  %16514 = vmatprep.subr.bf16.mxu1 %v17541_v27  ;;  %16560 = vmatprep.subr.bf16.mxu0 %v17539_v22 }
 0x28a   : > { %v5939_v11 = vor.u32 %v5938_v12, %v5937_v40  ;;  %v6522_v50 = vshll.u32 %v14302_v61, 16  ;;  %v6485_v12 = vrot.slane %v6483_v10, 3  ;;  %v6488_v26 = vrot.slane %v6486_v25, 4  ;;  %v21115_v25 = vld [vmem:[%s24232_s4 + $0x1b8] sm:$0xff]   ;;  %16561 = vmatpush3.bf16.msra.mxu0 %v17539_v22 }
 0x28b   : > { %v5943_v7 = vor.u32 %v5942_v51, %v5941_v23  ;;  %v6494_v32 = vrot.slane %v6492_v49, 3  ;;  %v6497_v58 = vrot.slane %v6495_v31, 4  ;;  %v6503_v63 = vrot.slane %v6501_v13, 3  ;;  %v21101_v23 = vld [vmem:[#allocation2 + $0x8c] sm:$0xf]  ;;  %16562 = vmatprep.subr.bf16.mxu0 %v17543_v5 }
 0x28c   : > { %v21094_v40 = vsel %vm1295_vm2, %v5935_v44, %v5939_v11  ;;  %v24884_v61 = vshrl.u32 %v20825_v60, 16  ;;  %v6506_v52 = vrot.slane %v6504_v62, 4  ;;  %v6512_v10 = vrot.slane %v6510_v1, 3  ;;  %v17542_v1 = vld [vmem:[#allocation2 + $0x94] ss:$0 sps:$4 sm:$0x77]   ;;  %16515 = vmatpush3.bf16.msra.mxu1 %v17541_v27 }
 0x28d   : > { %v21097_v51 = vsel %vm1295_vm2, %v5939_v11, %v5943_v7  ;;  %v24885_v44 = vshll.u32 %v20825_v60, 16  ;;  %v14303_v31 = vcombine.low %v21101_v23, %v21087_v4  ;;  %v6515_v49 = vrot.slane %v6513_v20, 4  ;;  %16604 = vmatprep.subr.bf16.mxu1 %v21115_v25  ;;  %v17546_v27 = vld [vmem:[%s24232_s4 + $0x148] sm:$0xff]  }
 0x28e   : > { %v5945_v2 = vrot.slane %v24884_v61, 3  ;;  %v6521_v13 = vrot.slane %v6519_v24, 3  ;;  %v6524_v55 = vrot.slane %v6522_v50, 4  ;;  %v21119_v60 = vcombine.low %v20804_v18, %v20815_v15  ;;  %v21131_v24 = vld [vmem:[#allocation2 + $0x98] sm:$0xf]  ;;  %16563 = vmatpush3.bf16.msra.mxu0 %v17543_v5 }
 0x28f   : > { %v5946_v14 = vrot.slane %v24885_v44, 4  ;;  %v6463_v47 = vsel %vm1295_vm2, %v20975_v35, %v21039_v46  ;;  %v5920_v62 = vsel %vm1295_vm2, %v20991_v28, %v20951_v17  ;;  %v5923_v11 = vor.u32 %v21045_v9, %v21006_v54  ;;  %16564 = vmatprep.subr.bf16.mxu0 %v17546_v27 }
 0x290   : > { %v6472_v18 = vsel %vm1295_vm2, %v21039_v46, %v21041_v19  ;;  %v6480_v15 = vor.u32 %v6479_v48, %v21062_v3  ;;  %v6489_v50 = vor.u32 %v6488_v26, %v6485_v12  ;;  %v14304_v35 = vcombine.low %v21110_v33, %v21131_v24  ;;  %16477 = vmatmul.mubr.bf16.gmra.mxu0 %v6463_v47 }
 0x291   : > { %v21129_v20 = vor.u32 %v5946_v14, %v5945_v2  ;;  %v6498_v61 = vor.u32 %v6497_v58, %v6494_v32  ;;  %v6528_v54 = vshrl.u32 %v14303_v31, 16  ;;  %v6531_v9 = vshll.u32 %v14303_v31, 16  ;;  %16480 = vmatprep.mubr.bf16.mxu0 %v6472_v18  ;;  %16429 = vmatmul.mubr.bf16.gmra.mxu1 %v5920_v62  ;;  %v21171_v31 = vld [vmem:[#allocation2 + $0x9c] sm:$0x7] }
 0x292   : > { %v6507_v2 = vor.u32 %v6506_v52, %v6503_v63  ;;  %v6516_v46 = vor.u32 %v6515_v49, %v6512_v10  ;;  %v21144_v44 = vor.u32 %v6524_v55, %v6521_v13  ;;  %v5950_v48 = vshrl.u32 %v17542_v1, 16  ;;  %v17548_v49 = vld [vmem:[%s24232_s4 + $0x140] sm:$0xff]   ;;  %16565 = vmatpush3.bf16.msra.mxu0 %v17546_v27 }
 0x293   : > { %v21141_v28 = vsel %vm1295_vm2, %v5943_v7, %v21129_v20  ;;  %v5924_v7 = vsel %vm1295_vm2, %v20951_v17, %v5923_v11  ;;  %v5953_v3 = vshll.u32 %v17542_v1, 16  ;;  %v6481_v22 = vsel %vm1295_vm2, %v21041_v19, %v6480_v15  ;;  %16566 = vmatprep.subr.bf16.mxu0 %v17548_v49 }
 0x294   : > { %16432 = vmatprep.mubr.bf16.mxu1 %v5924_v7  ;;  %v5928_v12 = vsel %vm1295_vm2, %v5923_v11, %v20997_v37  ;;  %v6537_v26 = vshrl.u32 %v14304_v35, 16  ;;  %v6540_v32 = vshll.u32 %v14304_v35, 16  ;;  %v6490_v58 = vsel %vm1295_vm2, %v6480_v15, %v6489_v50 }
 0x295   : > { %v21157_v63 = vsel %vm1295_vm2, %v6489_v50, %v6498_v61  ;;  %v6530_v52 = vrot.slane %v6528_v54, 3  ;;  %v6533_v10 = vrot.slane %v6531_v9, 4  ;;  %v21160_v17 = vsel %vm1295_vm2, %v6498_v61, %v6507_v2 }
 0x296   : > { %v21163_v14 = vsel %vm1295_vm2, %v6507_v2, %v6516_v46  ;;  %v21167_v19 = vsel %vm1295_vm2, %v6516_v46, %v21144_v44  ;;  %v21169_v37 = vrot.slane %v5950_v48, 3  ;;  %v21176_v5 = vrot.slane %v5953_v3, 4  ;;  %16567 = vmatpush3.bf16.msra.mxu0 %v17548_v49 }
 0x297   : > { %v21180_v13 = vcombine.low %v20835_v43, %v20846_v36  ;;  %v21184_v55 = vcombine.low %v20856_v38, %v20867_v39  ;;  %v21188_v1 = vcombine.low %v20863_v59, %v20869_v45  ;;  %v21190_v47 = vrot.slane %v6537_v26, 3 }
 0x298   : > { %v21192_v62 = vrot.slane %v6540_v32, 4  ;;  %v21196_v11 = vcombine.low %v20875_v41, %v20894_v53  ;;  %v21200_v43 = vcombine.low %v20883_v6, %v20896_v57  ;;  %v21202_v36 = vor.u32 %v6533_v10, %v6530_v52  ;;  %16481 = vmatmul.mubr.bf16.gmra.mxu0 %v6481_v22  ;;  %v21217_v57 = vld [vmem:[%s24232_s4 + $0x1f8] sm:$0xff]  }
 0x299   : > { %v21206_v38 = vcombine.low %v21171_v31, %v21171_v31  ;;  %v7184_v59 = vshll.u32 %v21180_v13, 16  ;;  %v7192_v39 = vshll.u32 %v21184_v55, 16  ;;  %v7188_v45 = vshrl.u32 %v21180_v13, 16  ;;  %16484 = vmatprep.mubr.bf16.mxu0 %v6490_v58  ;;  %16433 = vmatmul.mubr.bf16.gmra.mxu1 %v5928_v12 }
 0x29a   : > { %v7196_v41 = vshrl.u32 %v21184_v55, 16  ;;  %v7200_v6 = vshll.u32 %v21188_v1, 16  ;;  %v7208_v53 = vshll.u32 %v21196_v11, 16  ;;  %v7204_v50 = vshrl.u32 %v21188_v1, 16  ;;  %16436 = vmatprep.mubr.bf16.mxu1 %v21055_v29  ;;  %16656 = vmatprep.subr.bf16.mxu0 %v21217_v57 }
 0x29b   : > { %v21219_v18 = vrot.slane %v7184_v59, 1  ;;  %v7194_v15 = vrot.slane %v7192_v39, 1  ;;  %v7216_v35 = vshll.u32 %v21200_v43, 16  ;;  %v7212_v9 = vshrl.u32 %v21196_v11, 16  ;;  %v24886_v39 = vld [vmem:[#allocation83_spill] sm:$0xff] }
 0x29c   : > { %v7202_v61 = vrot.slane %v7200_v6, 1  ;;  %v7210_v54 = vrot.slane %v7208_v53, 1  ;;  %v21227_v2 = vcombine.low %v20900_v34, %v20928_v56  ;;  %v7220_v7 = vshrl.u32 %v21200_v43, 16 }
 0x29d   : > { %v7190_v46 = vor.u32 %v7188_v45, %v21219_v18  ;;  %v7198_v48 = vor.u32 %v7196_v41, %v7194_v15  ;;  %v7218_v27 = vrot.slane %v7216_v35, 1  ;;  %v21234_v29 = vcombine.low %v20918_v16, %v20920_v0  ;;  %v24887_v45 = vld [vmem:[#allocation81_spill] sm:$0xff] }
 0x29e   : > { %v7206_v3 = vor.u32 %v7204_v50, %v7202_v61  ;;  %v7214_v22 = vor.u32 %v7212_v9, %v7210_v54  ;;  %v7224_v12 = vshll.u32 %v21227_v2, 16  ;;  %v7228_v32 = vshrl.u32 %v21227_v2, 16  ;;  %v24888_v50 = vld [vmem:[#allocation84_spill] sm:$0xff]  ;;  %v24890_v35 = vld [vmem:[#allocation89_spill] sm:$0xff] }
 0x29f   : > { %v21238_v34 = vsel %vm2591_vm4, %v7190_v46, %v7194_v15  ;;  %v21241_v56 = vsel %vm2591_vm4, %v7198_v48, %v7202_v61  ;;  %v7222_v26 = vor.u32 %v7220_v7, %v7218_v27  ;;  %v7232_v0 = vshll.u32 %v21234_v29, 16 }
 0x2a0   : > { %v21245_v58 = vsel %vm2591_vm4, %v7206_v3, %v7210_v54  ;;  %v21248_v52 = vsel %vm2591_vm4, %v7214_v22, %v7218_v27  ;;  %v7226_v10 = vrot.slane %v7224_v12, 1  ;;  %v21253_v16 = vcombine.low %v20937_v30, %v20967_v8  ;;  %16485 = vmatmul.mubr.bf16.gmra.mxu0 %v21157_v63  ;;  %v24889_v30 = vld [vmem:[#allocation82_spill] sm:$0xff]  ;;  %v24891_v3 = vld [vmem:[#allocation88_spill] sm:$0xff]  ;;  %v24892_v22 = vld [vmem:[#allocation85_spill] sm:$0xff] }
 0x2a1   : > { %v7236_v49 = vshrl.u32 %v21234_v29, 16  ;;  %v21258_v59 = vcombine.low %v20961_v21, %v20981_v42  ;;  %v21262_v41 = vcombine.low %v24887_v45, %v24886_v39  ;;  %v7234_v15 = vrot.slane %v7232_v0, 1  ;;  %16488 = vmatprep.mubr.bf16.mxu0 %v21160_v17  ;;  %16437 = vmatmul.mubr.bf16.gmra.mxu1 %v24890_v35 }
 0x2a2   : > { %v21266_v6 = vsel %vm2591_vm4, %v7222_v26, %v7226_v10  ;;  %v7230_v53 = vor.u32 %v7228_v32, %v7226_v10  ;;  %v21270_v8 = vcombine.low %v24889_v30, %v24888_v50  ;;  %v7240_v21 = vshll.u32 %v21253_v16, 16  ;;  %16440 = vmatprep.mubr.bf16.mxu1 %v21094_v40  ;;  %v24893_v40 = vld [vmem:[#allocation87_spill] sm:$0xff]  ;;  %v24894_v10 = vld [vmem:[#allocation86_spill] sm:$0xff] }
 0x2a3   : > { %v7244_v42 = vshrl.u32 %v21253_v16, 16  ;;  %v7248_v61 = vshll.u32 %v21258_v59, 16  ;;  %v7252_v63 = vshrl.u32 %v21258_v59, 16  ;;  %v7238_v9 = vor.u32 %v7236_v49, %v7234_v15  ;;  %v24895_v49 = vld [vmem:[#allocation90_spill] sm:$0xff] }
 0x2a4   : > { %v21280_v54 = vsel %vm2591_vm4, %v7230_v53, %v7234_v15  ;;  %v7256_v46 = vshll.u32 %v21262_v41, 16  ;;  %v7260_v17 = vshrl.u32 %v21262_v41, 16  ;;  %v7242_v48 = vrot.slane %v7240_v21, 1 }
 0x2a5   : > { %v7250_v27 = vrot.slane %v7248_v61, 1  ;;  %v7264_v7 = vshll.u32 %v21270_v8, 16  ;;  %v21287_v12 = vcombine.low %v24892_v22, %v24891_v3  ;;  %v7268_v32 = vshrl.u32 %v21270_v8, 16 }
 0x2a6   : > { %v7258_v26 = vrot.slane %v7256_v46, 1  ;;  %v21292_v0 = vcombine.low %v24894_v10, %v24893_v40  ;;  %v21296_v39 = vcombine.low %v24895_v49, %v21101_v23  ;;  %v21299_v45 = vsel %vm2591_vm4, %v7238_v9, %v7242_v48  ;;  %v7147_v46 = vld [vmem:[#allocation2 + $0x9c] sm:$0xf] }
 0x2a7   : > { %v7246_v53 = vor.u32 %v7244_v42, %v7242_v48  ;;  %v7254_v15 = vor.u32 %v7252_v63, %v7250_v27  ;;  %v7266_v50 = vrot.slane %v7264_v7, 1  ;;  %v7272_v35 = vshll.u32 %v21287_v12, 16 }
 0x2a8   : > { %v7262_v30 = vor.u32 %v7260_v17, %v7258_v26  ;;  %v7276_v21 = vshrl.u32 %v21287_v12, 16  ;;  %v7280_v61 = vshll.u32 %v21292_v0, 16  ;;  %v7284_v9 = vshrl.u32 %v21292_v0, 16  ;;  %16489 = vmatmul.mubr.bf16.gmra.mxu0 %v21163_v14 }
 0x2a9   : > { %v21305_v3 = vsel %vm2591_vm4, %v7246_v53, %v7250_v27  ;;  %v21308_v23 = vsel %vm2591_vm4, %v7254_v15, %v7258_v26  ;;  %v7270_v22 = vor.u32 %v7268_v32, %v7266_v50  ;;  %v7274_v63 = vrot.slane %v7272_v35, 1  ;;  %16492 = vmatprep.mubr.bf16.mxu0 %v21167_v19  ;;  %16441 = vmatmul.mubr.bf16.gmra.mxu1 %v21097_v51 }
 0x2aa   : > { %v21313_v42 = vsel %vm2591_vm4, %v7262_v30, %v7266_v50  ;;  %v7282_v17 = vrot.slane %v7280_v61, 1  ;;  %v7288_v48 = vshll.u32 %v21296_v39, 16  ;;  %v7171_v27 = vshll.u32 %v21119_v60, 16  ;;  %16444 = vmatprep.mubr.bf16.mxu1 %v21141_v28  ;;  %v24897_v61 = vld [vmem:[#allocation79_spill] sm:$0xff] }
 0x2ab   : > { %v21321_v7 = vcombine.low %v21087_v4, %v21110_v33  ;;  %v21324_v26 = vcombine.low %v21131_v24, %v7147_v46  ;;  %v14347_v14 = vcombine.low %v21131_v24, %v21171_v31  ;;  %v21330_v32 = vsel %vm2591_vm4, %v7270_v22, %v7274_v63 }
 0x2ac   : > { %v7278_v19 = vor.u32 %v7276_v21, %v7274_v63  ;;  %v7286_v40 = vor.u32 %v7284_v9, %v7282_v17  ;;  %v7290_v51 = vrot.slane %v7288_v48, 1  ;;  %v5956_v10 = vor.u32 %v21176_v5, %v21169_v37  ;;  %v24896_v21 = vld [vmem:[#allocation80_spill] sm:$0xff] }
 0x2ad   : > { %v7292_v4 = vshrl.u32 %v21296_v39, 16  ;;  %v7296_v33 = vshll.u32 %v21321_v7, 16  ;;  %v7304_v49 = vshll.u32 %v21324_v26, 16  ;;  %v6543_v53 = vor.u32 %v21192_v62, %v21190_v47 }
 0x2ae   : > { %v6546_v28 = vshrl.u32 %v21206_v38, 16  ;;  %v21341_v15 = vsel %vm2591_vm4, %v7278_v19, %v7282_v17  ;;  %v21344_v50 = vsel %vm2591_vm4, %v7286_v40, %v7290_v51  ;;  %v6549_v30 = vshll.u32 %v21206_v38, 16 }
 0x2af   : > { %v7294_v37 = vor.u32 %v7292_v4, %v7290_v51  ;;  %v7298_v5 = vrot.slane %v7296_v33, 1  ;;  %v7300_v35 = vshrl.u32 %v21321_v7, 16  ;;  %v14331_v46 = vcombine.low %v24897_v61, %v24896_v21 }
 0x2b0   : > { %v6535_v47 = vsel %vm1295_vm2, %v21144_v44, %v21202_v36  ;;  %v21356_v9 = vrot.slane %v7304_v49, 1  ;;  %v6544_v38 = vsel %vm1295_vm2, %v21202_v36, %v6543_v53  ;;  %v5957_v63 = vsel %vm1295_vm2, %v21129_v20, %v5956_v10  ;;  %v17553_v20 = vld [vmem:[%s24232_s4 + $0x1b0] sm:$0xff]   ;;  %v17556_v10 = vld [vmem:[%s24232_s4 + $0x1a8] sm:$0xff]  }
 0x2b1   : > { %v21354_v62 = vsel %vm2591_vm4, %v7294_v37, %v7298_v5  ;;  %v7302_v22 = vor.u32 %v7300_v35, %v7298_v5  ;;  %16493 = vmatmul.mubr.bf16.gmra.mxu0 %v6535_v47  ;;  %v7173_v17 = vrot.slane %v7171_v27, 1  ;;  %16445 = vmatmul.mubr.bf16.gmra.mxu1 %v5957_v63  ;;  %v6548_v48 = vrot.slane %v6546_v28, 3  ;;  %v21453_v5 = vld [vmem:[#allocation2 + $0x20] sm:$0xff]  }
 0x2b2   : > { %16496 = vmatprep.mubr.bf16.mxu0 %v6544_v38  ;;  %v6551_v19 = vrot.slane %v6549_v30, 4  ;;  %16516 = vmatprep.mubr.bf16.mxu1 %v21119_v60  ;;  %v7169_v40 = vshrl.u32 %v21119_v60, 16  ;;  %v7176_v51 = vshll.u32 %v14331_v46, 16  ;;  %v7180_v60 = vshrl.u32 %v14331_v46, 16  ;;  %v17559_v30 = vld [vmem:[%s24232_s4 + $0x1a0] sm:$0xff]   ;;  %v21464_v38 = vld [vmem:[#allocation2 + $0x28] sm:$0xff]  }
 0x2b3   : > { %v21364_v44 = vsel %vm2591_vm4, %v7302_v22, %v21356_v9  ;;  %v7308_v24 = vshrl.u32 %v21324_v26, 16  ;;  %v8177_v31 = vrot.slane %v21453_v5, 1  ;;  %v17590_v26 = vld [vmem:[%s24232_s4 + $0x230] sm:$0xff]  }
 0x2b4   : > { %v7174_v4 = vor.u32 %v7173_v17, %v7169_v40  ;;  %v6552_v33 = vor.u32 %v6551_v19, %v6548_v48  ;;  %v7178_v36 = vrot.slane %v7176_v51, 1  ;;  %v21468_v40 = vld [vmem:[#allocation2 + $0x30] sm:$0xff]  }
 0x2b6   : > { %v6553_v49 = vsel %vm1295_vm2, %v6543_v53, %v6552_v33  ;;  %v7179_v27 = vsel %vm2591_vm4, %v7174_v4, %v7178_v36  ;;  %v7182_v53 = vor.u32 %v7180_v60, %v7178_v36  ;;  %v8155_v33 = vld [vmem:[#allocation2 + $0x18] sm:$0xe]  ;;  %v7757_v60 = vshll.u32 %v21468_v40, 16 }
 0x2b8   : > { %v7187_v28 = vsel %vm2591_vm4, %v7182_v53, %v21219_v18  ;;  %v17570_v18 = vld [vmem:[%s24232_s4 + $0x1e8] sm:$0xff]  }
 0x2b9   : > { %16497 = vmatmul.mubr.bf16.gmra.mxu0 %v6553_v49  ;;  %16517 = vmatmul.mubr.bf16.vlgmr.msra.gmra.mxu1 %v14331_v46  ;;  %v7741_v46 = vshll.u32 %v21453_v5, 16 }
 0x2ba   : > { %16568 = vmatprep.mubr.bf16.mxu0 %v7179_v27  ;;  %16520 = vmatprep.mubr.bf16.mxu1 %v21180_v13  ;;  %v17562_v13 = vld [vmem:[%s24232_s4 + $0x198] sm:$0xff]  }
 0x2bb   : > { %16605 = vmatpush3.bf16.msra.mxu1 %v21115_v25  ;;  %v17568_v25 = vld [vmem:[%s24232_s4 + $0x1f0] sm:$0xff]   ;;  %v7743_v19 = vrot.slane %v7741_v46, 1 }
 0x2bc   : > { %16606 = vmatprep.subr.bf16.mxu1 %v17553_v20 }
 0x2bf   : > { %16607 = vmatpush3.bf16.msra.mxu1 %v17553_v20 }
 0x2c0   : > { %16608 = vmatprep.subr.bf16.mxu1 %v17556_v10 }
 0x2c1   : > { %16569 = vmatmul.mubr.bf16.vlgmr.msra.gmra.mxu0 %v7187_v28  ;;  %16521 = vmatmul.mubr.bf16.gmra.mxu1 %v21184_v55  ;;  %v17567_v55 = vld [vmem:[%s24232_s4 + $0x190] sm:$0xff]  }
 0x2c2   : > { %16572 = vmatprep.mubr.bf16.mxu0 %v21238_v34  ;;  %16524 = vmatprep.mubr.bf16.mxu1 %v21188_v1  ;;  %v17573_v1 = vld [vmem:[%s24232_s4 + $0x1e0] sm:$0xff]   ;;  %v17575_v34 = vld [vmem:[%s24232_s4 + $0x1d8] sm:$0xff]  }
 0x2c3   : > { %16609 = vmatpush3.bf16.msra.mxu1 %v17556_v10  ;;  %16657 = vmatpush3.bf16.msra.mxu0 %v21217_v57  ;;  %v17572_v57 = vld [vmem:[%s24232_s4 + $0x188] sm:$0xff]   ;;  %v7745_v10 = vshrl.u32 %v21453_v5, 16 }
 0x2c4   : > { %16610 = vmatprep.subr.bf16.mxu1 %v17559_v30  ;;  %16658 = vmatprep.subr.bf16.mxu0 %v17568_v25 }
 0x2c7   : > { %16611 = vmatpush3.bf16.msra.mxu1 %v17559_v30  ;;  %16659 = vmatpush3.bf16.msra.mxu0 %v17568_v25  ;;  %v21486_v25 = vld [vmem:[#allocation2 + $0x38] sm:$0xff]  }
 0x2c8   : > { %16612 = vmatprep.subr.bf16.mxu1 %v17562_v13  ;;  %16660 = vmatprep.subr.bf16.mxu0 %v17570_v18 }
 0x2c9   : > { %16573 = vmatmul.mubr.bf16.gmra.mxu0 %v21241_v56  ;;  %16525 = vmatmul.mubr.bf16.gmra.mxu1 %v21196_v11  ;;  %v17577_v11 = vld [vmem:[%s24232_s4 + $0x180] sm:$0xff]   ;;  %v21425_v56 = vld [vmem:[%s24232_s4 + $0x238] sm:$0xff]  }
 0x2ca   : > { %16576 = vmatprep.mubr.bf16.mxu0 %v21245_v58  ;;  %16528 = vmatprep.mubr.bf16.mxu1 %v21200_v43  ;;  %v17579_v43 = vld [vmem:[%s24232_s4 + $0x1d0] sm:$0xff]   ;;  %v17582_v58 = vld [vmem:[%s24232_s4 + $0x1c8] sm:$0xff]  }
 0x2cb   : > { %16613 = vmatpush3.bf16.msra.mxu1 %v17562_v13  ;;  %16661 = vmatpush3.bf16.msra.mxu0 %v17570_v18  ;;  %v7747_v13 = vor.u32 %v7745_v10, %v7743_v19  ;;  %v7753_v18 = vshrl.u32 %v21464_v38, 16 }
 0x2cc   : > { %16614 = vmatprep.subr.bf16.mxu1 %v17567_v55  ;;  %16662 = vmatprep.subr.bf16.mxu0 %v17573_v1 }
 0x2cf   : > { %16615 = vmatpush3.bf16.msra.mxu1 %v17567_v55  ;;  %16663 = vmatpush3.bf16.msra.mxu0 %v17573_v1  ;;  %v7759_v55 = vrot.slane %v7757_v60, 1  ;;  %v21491_v1 = vld [vmem:[#allocation2 + $0x40] sm:$0xff]  }
 0x2d0   : > { %16616 = vmatprep.subr.bf16.mxu1 %v17572_v57  ;;  %16664 = vmatprep.subr.bf16.mxu0 %v17575_v34 }
 0x2d1   : > { %16577 = vmatmul.mubr.bf16.gmra.mxu0 %v21248_v52  ;;  %16529 = vmatmul.mubr.bf16.gmra.mxu1 %v21227_v2  ;;  %v17585_v2 = vld [vmem:[%s24232_s4 + $0x1c0] sm:$0xff]  }
 0x2d2   : > { %16580 = vmatprep.mubr.bf16.mxu0 %v21266_v6  ;;  %16532 = vmatprep.mubr.bf16.mxu1 %v21234_v29 }
 0x2d3   : > { %16617 = vmatpush3.bf16.msra.mxu1 %v17572_v57  ;;  %16665 = vmatpush3.bf16.msra.mxu0 %v17575_v34  ;;  %v7310_v34 = vor.u32 %v7308_v24, %v21356_v9 }
 0x2d4   : > { %16618 = vmatprep.subr.bf16.mxu1 %v17577_v11  ;;  %16666 = vmatprep.subr.bf16.mxu0 %v17579_v43 }
 0x2d7   : > { %16619 = vmatpush3.bf16.msra.mxu1 %v17577_v11  ;;  %16667 = vmatpush3.bf16.msra.mxu0 %v17579_v43 }
 0x2d8   : > { %16708 = vmatprep.subr.bf16.mxu1 %v21425_v56  ;;  %16668 = vmatprep.subr.bf16.mxu0 %v17582_v58 }
 0x2d9   : > { %16581 = vmatmul.mubr.bf16.gmra.mxu0 %v21280_v54  ;;  %16533 = vmatmul.mubr.bf16.gmra.mxu1 %v21253_v16  ;;  %v7590_v16 = vld [vmem:[#allocation2 + $0x18] sm:$0xf] }
 0x2da   : > { %16584 = vmatprep.mubr.bf16.mxu0 %v21299_v45  ;;  %16536 = vmatprep.mubr.bf16.mxu1 %v21258_v59  ;;  %v21443_v45 = vld [vmem:[#allocation2 + $0x1c] sm:$0xf] }
 0x2db   : > { %16669 = vmatpush3.bf16.msra.mxu0 %v17582_v58 }
 0x2dc   : > { %16670 = vmatprep.subr.bf16.mxu0 %v17585_v2  ;;  %v16310_v29 = vpop.f32.mrf.mxu1 }
 0x2de   : > { %v5293_v52 = vpop.f32.mrf.mxu1 }
 0x2df   : > { %16671 = vmatpush3.bf16.msra.mxu0 %v17585_v2 }
 0x2e0   : > { %v16311_v6 = vpop.f32.mrf.mxu1 }
 0x2e1   : > { %16585 = vmatmul.mubr.bf16.gmra.mxu0 %v21305_v3  ;;  %16537 = vmatmul.mubr.bf16.gmra.mxu1 %v21262_v41 }
 0x2e2   : > { %16588 = vmatprep.mubr.bf16.mxu0 %v21308_v23  ;;  %16540 = vmatprep.mubr.bf16.mxu1 %v21270_v8  ;;  %v5296_v54 = vpop.f32.mrf.mxu1  ;;  %v14397_v8 = vcombine.low %v7590_v16, %v21443_v45 }
 0x2e4   : > { %v7736_v61 = vshll.u32 %v14397_v8, 16 }
 0x2e5   : > { %v16362_v59 = vpop.f32.mrf.mxu0 }
 0x2e6   : > { %v21448_v3 = vadd.f32 %v16362_v59, %v16310_v29  ;;  %v7738_v22 = vrot.slane %v7736_v61, 1  ;;  %v7765_v29 = vshll.u32 %v21486_v25, 16  ;;  %v7773_v59 = vshll.u32 %v21491_v1, 16 }
 0x2e7   : > { %v5709_v41 = vpop.f32.mrf.mxu0 }
 0x2e8   : > { %v21451_v23 = vadd.f32 %v5709_v41, %v5293_v52  ;;  %v7767_v5 = vrot.slane %v7765_v29, 1 }
 0x2e9   : > { %16589 = vmatmul.mubr.bf16.gmra.mxu0 %v21313_v42  ;;  %16541 = vmatmul.mubr.bf16.gmra.mxu1 %v21287_v12  ;;  %v16314_v37 = vpop.f32.mrf.mxu1  ;;  %v16363_v42 = vpop.f32.mrf.mxu0 }
 0x2ea   : > { %16592 = vmatprep.mubr.bf16.mxu0 %v21330_v32  ;;  %16544 = vmatprep.mubr.bf16.mxu1 %v21292_v0  ;;  %v21455_v35 = vadd.f32 %v16363_v42, %v16311_v6 }
 0x2eb   : > { %v5309_v21 = vpop.f32.mrf.mxu1  ;;  %v5712_v32 = vpop.f32.mrf.mxu0 }
 0x2ec   : > { %v21458_v12 = vadd.f32 %v5712_v32, %v5296_v54  ;;  %v17593_v32 = vld [vmem:[%s24232_s4 + $0x228] sm:$0xff]  }
 0x2ed   : > { %v16315_v0 = vpop.f32.mrf.mxu1 }
 0x2ef   : > { %v5312_v47 = vpop.f32.mrf.mxu1 }
 0x2f1   : > { %16593 = vmatmul.mubr.bf16.gmra.mxu0 %v21341_v15  ;;  %16545 = vmatmul.mubr.bf16.gmra.mxu1 %v21296_v39  ;;  %v7734_v15 = vshrl.u32 %v14397_v8, 16  ;;  %v7761_v8 = vshrl.u32 %v21468_v40, 16 }
 0x2f2   : > { %16596 = vmatprep.mubr.bf16.mxu0 %v21344_v50  ;;  %16548 = vmatprep.mubr.bf16.mxu1 %v21321_v7  ;;  %v16366_v63 = vpop.f32.mrf.mxu0  ;;  %v7749_v7 = vshll.u32 %v21464_v38, 16 }
 0x2f3   : > { %v21466_v17 = vadd.f32 %v16366_v63, %v16314_v37  ;;  %v7739_v39 = vor.u32 %v7738_v22, %v7734_v15  ;;  %v7763_v46 = vor.u32 %v7761_v8, %v7759_v55  ;;  %v7769_v22 = vshrl.u32 %v21486_v25, 16 }
 0x2f4   : > { %v16318_v48 = vpop.f32.mrf.mxu1  ;;  %v5725_v51 = vpop.f32.mrf.mxu0  ;;  %v7751_v30 = vrot.slane %v7749_v7, 1  ;;  %v7775_v63 = vrot.slane %v7773_v59, 1 }
 0x2f5   : > { %v21470_v50 = vadd.f32 %v5725_v51, %v5309_v21  ;;  %v7744_v20 = vsel %vm2591_vm4, %v7739_v39, %v7743_v19  ;;  %v21510_v21 = vld [vmem:[#allocation2 + $0x48] sm:$0xff]   ;;  %v7771_v51 = vor.u32 %v7769_v22, %v7767_v5  ;;  %v7768_v7 = vsel %vm2591_vm4, %v7763_v46, %v7767_v5 }
 0x2f6   : > { %v5325_v4 = vpop.f32.mrf.mxu1  ;;  %v16367_v36 = vpop.f32.mrf.mxu0  ;;  %v7755_v2 = vor.u32 %v7753_v18, %v7751_v30  ;;  %v7752_v54 = vsel %vm2591_vm4, %v7747_v13, %v7751_v30  ;;  %v7781_v39 = vshll.u32 %v21510_v21, 16  ;;  %v21536_v30 = vld [vmem:[#allocation2 + $0x58] sm:$0xff]  }
 0x2f7   : > { %v21475_v49 = vadd.f32 %v16367_v36, %v16315_v0  ;;  %v8181_v0 = vrot.slane %v21468_v40, 1  ;;  %v17596_v40 = vld [vmem:[%s24232_s4 + $0x220] sm:$0xff]   ;;  %v17599_v13 = vld [vmem:[%s24232_s4 + $0x218] sm:$0xff]  }
 0x2f8   : > { %v16319_v27 = vpop.f32.mrf.mxu1  ;;  %v5728_v53 = vpop.f32.mrf.mxu0  ;;  %v7760_v9 = vsel %vm2591_vm4, %v7755_v2, %v7759_v55 }
 0x2f9   : > { %16597 = vmatmul.mubr.bf16.gmra.mxu0 %v21354_v62  ;;  %16549 = vmatmul.mubr.bf16.gmra.mxu1 %v14347_v14  ;;  %v14439_v62 = vcombine.low %v8155_v33, %v21443_v45  ;;  %v21484_v28 = vadd.f32 %v5728_v53, %v5312_v47  ;;  %v8179_v47 = vrot.slane %v21464_v38, 1  ;;  %v7777_v53 = vshrl.u32 %v21491_v1, 16 }
 0x2fa   : > { %16600 = vmatprep.mubr.bf16.mxu0 %v21364_v44  ;;  %16620 = vmatprep.mubr.bf16.mxu1 %v7744_v20  ;;  %v5328_v44 = vpop.f32.mrf.mxu1  ;;  %v7776_v20 = vsel %vm2591_vm4, %v7771_v51, %v7775_v63 }
 0x2fb   : > { %v16370_v14 = vpop.f32.mrf.mxu0  ;;  %v8176_v11 = vrot.slane %v14439_v62, 1  ;;  %v8180_v19 = vsel %vm3600_vm3, %v8177_v31, %v8179_v47  ;;  %v8182_v38 = vsel %vm3600_vm3, %v8179_v47, %v8181_v0  ;;  %v7779_v18 = vor.u32 %v7777_v53, %v7775_v63  ;;  %v21564_v47 = vld [vmem:[#allocation2 + $0x68] sm:$0xff]  }
 0x2fc   : > { %v21493_v57 = vadd.f32 %v16370_v14, %v16318_v48  ;;  %v21520_v48 = vld [vmem:[#allocation2 + $0x50] sm:$0xff]   ;;  %v8185_v14 = vrot.slane %v21491_v1, 1 }
 0x2fd   : > { %v5741_v43 = vpop.f32.mrf.mxu0  ;;  %v16322_v58 = vpop.f32.mrf.mxu1  ;;  %v8178_v52 = vsel %vm3600_vm3, %v8176_v11, %v8177_v31  ;;  %v7785_v11 = vshrl.u32 %v21510_v21, 16  ;;  %v17602_v1 = vld [vmem:[%s24232_s4 + $0x210] sm:$0xff]   ;;  %v7793_v5 = vshrl.u32 %v21520_v48, 16  ;;  %v8189_v63 = vrot.slane %v21520_v48, 1 }
 0x2fe   : > { %v21501_v6 = vadd.f32 %v5741_v43, %v5325_v4 }
 0x2ff   : > { %v16371_v16 = vpop.f32.mrf.mxu0  ;;  %v5341_v45 = vpop.f32.mrf.mxu1 }
 0x300   : > { %v21506_v41 = vadd.f32 %v16371_v16, %v16319_v27  ;;  %v7789_v27 = vshll.u32 %v21520_v48, 16  ;;  %v7813_v48 = vshll.u32 %v21564_v47, 16 }
 0x301   : > { %16601 = vmatmul.mubr.bf16.gmra.mxu0 %v7310_v34  ;;  %16621 = vmatmul.mubr.bf16.vlgmr.msra.gmra.mxu1 %v7752_v54  ;;  %v5744_v37 = vpop.f32.mrf.mxu0  ;;  %v16323_v42 = vpop.f32.mrf.mxu1  ;;  %v8183_v34 = vrot.slane %v21486_v25, 1  ;;  %v7797_v54 = vshll.u32 %v21536_v30, 16 }
 0x302   : > { %16672 = vmatprep.mubr.bf16.mxu0 %v8178_v52  ;;  %16624 = vmatprep.mubr.bf16.mxu1 %v7760_v9  ;;  %v21515_v61 = vadd.f32 %v5744_v37, %v5328_v44  ;;  %v7783_v44 = vrot.slane %v7781_v39, 1  ;;  %v7791_v43 = vrot.slane %v7789_v27, 1  ;;  %v8187_v39 = vrot.slane %v21510_v21, 1  ;;  %v17608_v21 = vld [vmem:[%s24232_s4 + $0x200] sm:$0xff]  }
 0x303   : > { %16709 = vmatpush3.bf16.msra.mxu1 %v21425_v56  ;;  %v5344_v56 = vpop.f32.mrf.mxu1  ;;  %v8186_v16 = vsel %vm3600_vm3, %v8183_v34, %v8185_v14  ;;  %v7799_v46 = vrot.slane %v7797_v54, 1 }
 0x304   : > { %16710 = vmatprep.subr.bf16.mxu1 %v17590_v26  ;;  %v7787_v52 = vor.u32 %v7785_v11, %v7783_v44  ;;  %v7784_v9 = vsel %vm2591_vm4, %v7779_v18, %v7783_v44 }
 0x305   : > { %v16374_v15 = vpop.f32.mrf.mxu0 }
 0x306   : > { %v21527_v4 = vadd.f32 %v16374_v15, %v16322_v58  ;;  %v21546_v58 = vld [vmem:[#allocation2 + $0x60] sm:$0xff]   ;;  %v7792_v8 = vsel %vm2591_vm4, %v7787_v52, %v7791_v43  ;;  %v7795_v15 = vor.u32 %v7793_v5, %v7791_v43 }
 0x307   : > { %16711 = vmatpush3.bf16.msra.mxu1 %v17590_v26  ;;  %v16326_v33 = vpop.f32.mrf.mxu1  ;;  %v5757_v36 = vpop.f32.mrf.mxu0  ;;  %v8184_v26 = vsel %vm3600_vm3, %v8181_v0, %v8183_v34  ;;  %v7805_v37 = vshll.u32 %v21546_v58, 16  ;;  %v7809_v34 = vshrl.u32 %v21546_v58, 16  ;;  %v8193_v54 = vrot.slane %v21546_v58, 1 }
 0x308   : > { %16712 = vmatprep.subr.bf16.mxu1 %v17593_v32  ;;  %v21533_v60 = vadd.f32 %v5757_v36, %v5341_v45  ;;  %v7800_v44 = vsel %vm2591_vm4, %v7795_v15, %v7799_v46 }
 0x309   : > { %16673 = vmatmul.mubr.bf16.vlgmr.msra.gmra.mxu0 %v8180_v19  ;;  %16625 = vmatmul.mubr.bf16.gmra.mxu1 %v7768_v7  ;;  %v5357_v10 = vpop.f32.mrf.mxu1  ;;  %v16375_v62 = vpop.f32.mrf.mxu0 }
 0x30a   : > { %16676 = vmatprep.mubr.bf16.mxu0 %v8182_v38  ;;  %16628 = vmatprep.mubr.bf16.mxu1 %v7776_v20  ;;  %v21541_v24 = vadd.f32 %v16375_v62, %v16323_v42  ;;  %v7807_v38 = vrot.slane %v7805_v37, 1  ;;  %v8188_v20 = vsel %vm3600_vm3, %v8185_v14, %v8187_v39  ;;  %v8190_v62 = vsel %vm3600_vm3, %v8187_v39, %v8189_v63  ;;  %v21599_v37 = vld [vmem:[#allocation2 + $0x80] sm:$0xff]  }
 0x30b   : > { %16713 = vmatpush3.bf16.msra.mxu1 %v17593_v32  ;;  %v16327_v31 = vpop.f32.mrf.mxu1  ;;  %v5760_v55 = vpop.f32.mrf.mxu0 }
 0x30c   : > { %16714 = vmatprep.subr.bf16.mxu1 %v17596_v40  ;;  %v21548_v2 = vadd.f32 %v5760_v55, %v5344_v56  ;;  %v17605_v56 = vld [vmem:[%s24232_s4 + $0x208] sm:$0xff]  }
 0x30d   : > { %v5360_v29 = vpop.f32.mrf.mxu1 }
 0x30e   : > { %v16378_v25 = vpop.f32.mrf.mxu0 }
 0x30f   : > { %16715 = vmatpush3.bf16.msra.mxu1 %v17596_v40  ;;  %v21557_v45 = vadd.f32 %v16378_v25, %v16326_v33  ;;  %v16330_v59 = vpop.f32.mrf.mxu1  ;;  %v7801_v40 = vshrl.u32 %v21536_v30, 16  ;;  %v21574_v33 = vld [vmem:[#allocation2 + $0x70] sm:$0xff]  }
 0x310   : > { %16716 = vmatprep.subr.bf16.mxu1 %v17599_v13  ;;  %v5773_v42 = vpop.f32.mrf.mxu0  ;;  %v7821_v18 = vshll.u32 %v21574_v33, 16 }
 0x311   : > { %16677 = vmatmul.mubr.bf16.gmra.mxu0 %v8184_v26  ;;  %16629 = vmatmul.mubr.bf16.gmra.mxu1 %v7784_v9  ;;  %v21562_v32 = vadd.f32 %v5773_v42, %v5357_v10  ;;  %v5373_v0 = vpop.f32.mrf.mxu1  ;;  %v7803_v10 = vor.u32 %v7801_v40, %v7799_v46  ;;  %v21592_v26 = vld [vmem:[#allocation2 + $0x78] sm:$0xff]   ;;  %v8191_v9 = vrot.slane %v21536_v30, 1 }
 0x312   : > { %16680 = vmatprep.mubr.bf16.mxu0 %v8186_v16  ;;  %16632 = vmatprep.mubr.bf16.mxu1 %v7792_v8  ;;  %v16379_v22 = vpop.f32.mrf.mxu0  ;;  %v7823_v8 = vrot.slane %v7821_v18, 1  ;;  %v7829_v58 = vshll.u32 %v21592_v26, 16  ;;  %v7833_v18 = vshrl.u32 %v21592_v26, 16 }
 0x313   : > { %16717 = vmatpush3.bf16.msra.mxu1 %v17599_v13  ;;  %v21570_v19 = vadd.f32 %v16379_v22, %v16327_v31  ;;  %v16331_v51 = vpop.f32.mrf.mxu1  ;;  %v7808_v14 = vsel %vm2591_vm4, %v7803_v10, %v7807_v38  ;;  %v8194_v15 = vsel %vm3600_vm3, %v8191_v9, %v8193_v54 }
 0x314   : > { %16718 = vmatprep.subr.bf16.mxu1 %v17602_v1  ;;  %v5776_v7 = vpop.f32.mrf.mxu0  ;;  %v7831_v10 = vrot.slane %v7829_v58, 1  ;;  %v7841_v58 = vshrl.u32 %v21599_v37, 16 }
 0x315   : > { %v21576_v36 = vadd.f32 %v5776_v7, %v5360_v29  ;;  %v5376_v27 = vpop.f32.mrf.mxu1  ;;  %v7815_v29 = vrot.slane %v7813_v48, 1  ;;  %v7825_v7 = vshrl.u32 %v21574_v33, 16  ;;  %v21614_v48 = vld [vmem:[#allocation2 + $0x88] sm:$0xff]  }
 0x316   : > { %v16382_v53 = vpop.f32.mrf.mxu0 }
 0x317   : > { %16719 = vmatpush3.bf16.msra.mxu1 %v17602_v1  ;;  %v21585_v13 = vadd.f32 %v16382_v53, %v16330_v59  ;;  %v16334_v31 = vpop.f32.mrf.mxu1  ;;  %v7811_v1 = vor.u32 %v7809_v34, %v7807_v38  ;;  %v7817_v59 = vshrl.u32 %v21564_v47, 16  ;;  %v7837_v38 = vshll.u32 %v21599_v37, 16  ;;  %v21621_v34 = vld [vmem:[#allocation2 + $0x90] sm:$0xff]  }
 0x318   : > { %16720 = vmatprep.subr.bf16.mxu1 %v17605_v56  ;;  %v5789_v55 = vpop.f32.mrf.mxu0  ;;  %v8197_v53 = vrot.slane %v21574_v33, 1  ;;  %v7845_v33 = vshll.u32 %v21614_v48, 16 }
 0x319   : > { %16681 = vmatmul.mubr.bf16.gmra.mxu0 %v8188_v20  ;;  %16633 = vmatmul.mubr.bf16.gmra.mxu1 %v7800_v44  ;;  %v21590_v11 = vadd.f32 %v5789_v55, %v5373_v0  ;;  %v5389_v43 = vpop.f32.mrf.mxu1  ;;  %v8192_v0 = vsel %vm3600_vm3, %v8189_v63, %v8191_v9  ;;  %v7816_v30 = vsel %vm2591_vm4, %v7811_v1, %v7815_v29  ;;  %v7839_v55 = vrot.slane %v7837_v38, 1 }
 0x31a   : > { %16684 = vmatprep.mubr.bf16.mxu0 %v8190_v62  ;;  %16636 = vmatprep.mubr.bf16.mxu1 %v7808_v14  ;;  %v16383_v52 = vpop.f32.mrf.mxu0  ;;  %v7827_v62 = vor.u32 %v7825_v7, %v7823_v8  ;;  %v8195_v14 = vrot.slane %v21564_v47, 1  ;;  %v7835_v9 = vor.u32 %v7833_v18, %v7831_v10  ;;  %v8201_v38 = vrot.slane %v21599_v37, 1  ;;  %v21649_v37 = vld [vmem:[#allocation2 + $0xa0] sm:$0xff]  }
 0x31b   : > { %16721 = vmatpush3.bf16.msra.mxu1 %v17605_v56  ;;  %v21595_v25 = vadd.f32 %v16383_v52, %v16331_v51  ;;  %v16335_v16 = vpop.f32.mrf.mxu1  ;;  %v7819_v56 = vor.u32 %v7817_v59, %v7815_v29 }
 0x31c   : > { %16722 = vmatprep.subr.bf16.mxu1 %v17608_v21  ;;  %v5792_v42 = vpop.f32.mrf.mxu0  ;;  %v8196_v52 = vsel %vm3600_vm3, %v8193_v54, %v8195_v14  ;;  %v7832_v47 = vsel %vm2591_vm4, %v7827_v62, %v7831_v10  ;;  %v7853_v54 = vshll.u32 %v21621_v34, 16  ;;  %v7849_v62 = vshrl.u32 %v21614_v48, 16 }
 0x31d   : > { %v21601_v5 = vadd.f32 %v5792_v42, %v5376_v27  ;;  %v5392_v46 = vpop.f32.mrf.mxu1  ;;  %v7824_v40 = vsel %vm2591_vm4, %v7819_v56, %v7823_v8  ;;  %v21629_v8 = vld [vmem:[#allocation2 + $0x98] sm:$0xff]  }
 0x31e   : > { %v16386_v22 = vpop.f32.mrf.mxu0 }
 0x31f   : > { %16723 = vmatpush3.bf16.msra.mxu1 %v17608_v21  ;;  %v21607_v51 = vadd.f32 %v16386_v22, %v16334_v31  ;;  %v16338_v39 = vpop.f32.mrf.mxu1 }
 0x320   : > { %v5805_v63 = vpop.f32.mrf.mxu0 }
 0x321   : > { %16685 = vmatmul.mubr.bf16.gmra.mxu0 %v8192_v0  ;;  %16637 = vmatmul.mubr.bf16.gmra.mxu1 %v7816_v30  ;;  %v21612_v20 = vadd.f32 %v5805_v63, %v5389_v43  ;;  %v5405_v27 = vpop.f32.mrf.mxu1  ;;  %v7847_v30 = vrot.slane %v7845_v33, 1  ;;  %v7861_v63 = vshll.u32 %v21629_v8, 16 }
 0x322   : > { %16688 = vmatprep.mubr.bf16.mxu0 %v8194_v15  ;;  %16640 = vmatprep.mubr.bf16.mxu1 %v7824_v40  ;;  %v16387_v21 = vpop.f32.mrf.mxu0 }
 0x323   : > { %v21617_v44 = vadd.f32 %v16387_v21, %v16335_v16  ;;  %v16339_v31 = vpop.f32.mrf.mxu1  ;;  %v8198_v16 = vsel %vm3600_vm3, %v8195_v14, %v8197_v53  ;;  %v8199_v21 = vrot.slane %v21592_v26, 1  ;;  %v7855_v14 = vrot.slane %v7853_v54, 1 }
 0x324   : > { %v5808_v43 = vpop.f32.mrf.mxu0  ;;  %v7863_v26 = vrot.slane %v7861_v63, 1 }
 0x325   : > { %v21623_v29 = vadd.f32 %v5808_v43, %v5392_v46  ;;  %v5408_v1 = vpop.f32.mrf.mxu1  ;;  %v7840_v46 = vsel %vm2591_vm4, %v7835_v9, %v7839_v55  ;;  %v7851_v9 = vor.u32 %v7849_v62, %v7847_v30  ;;  %v8205_v62 = vrot.slane %v21621_v34, 1 }
 0x326   : > { %v16390_v59 = vpop.f32.mrf.mxu0 }
 0x327   : > { %v21631_v42 = vadd.f32 %v16390_v59, %v16338_v39  ;;  %v16342_v0 = vpop.f32.mrf.mxu1  ;;  %v7843_v39 = vor.u32 %v7841_v58, %v7839_v55  ;;  %v7865_v58 = vshrl.u32 %v21629_v8, 16 }
 0x328   : > { %v5821_v56 = vpop.f32.mrf.mxu0 }
 0x329   : > { %16689 = vmatmul.mubr.bf16.gmra.mxu0 %v8196_v52  ;;  %16641 = vmatmul.mubr.bf16.gmra.mxu1 %v7832_v47  ;;  %v21636_v22 = vadd.f32 %v5821_v56, %v5405_v27  ;;  %v5421_v15 = vpop.f32.mrf.mxu1  ;;  %v8200_v27 = vsel %vm3600_vm3, %v8197_v53, %v8199_v21  ;;  %v7848_v33 = vsel %vm2591_vm4, %v7843_v39, %v7847_v30  ;;  %v7869_v53 = vshll.u32 %v21649_v37, 16  ;;  %v17610_v47 = vld [vmem:[#allocation2 + $0x20] sm:$0xff]   ;;  %v17609_v39 = vld [vmem:[#allocation2 + $0x18] sm:$0xfe]  }
 0x32a   : > { %16692 = vmatprep.mubr.bf16.mxu0 %v8198_v16  ;;  %16644 = vmatprep.mubr.bf16.mxu1 %v7840_v46  ;;  %v16391_v40 = vpop.f32.mrf.mxu0  ;;  %v7857_v56 = vshrl.u32 %v21621_v34, 16 }
 0x32b   : > { %v21640_v7 = vadd.f32 %v16391_v40, %v16339_v31  ;;  %v16343_v10 = vpop.f32.mrf.mxu1  ;;  %v8202_v31 = vsel %vm3600_vm3, %v8199_v21, %v8201_v38  ;;  %v8203_v40 = vrot.slane %v21614_v48, 1 }
 0x32c   : > { %v5824_v18 = vpop.f32.mrf.mxu0 }
 0x32d   : > { %v21644_v43 = vadd.f32 %v5824_v18, %v5408_v1  ;;  %v21647_v52 = vpop.f32.mrf.mxu1  ;;  %v7856_v1 = vsel %vm2591_vm4, %v7851_v9, %v7855_v14  ;;  %v7859_v18 = vor.u32 %v7857_v56, %v7855_v14  ;;  %v8204_v48 = vsel %vm3600_vm3, %v8201_v38, %v8203_v40 }
 0x32e   : > { %24898 = vst [vmem:[#allocation83_spill] sm:$0xff] %v21647_v52  ;;  %v16394_v55 = vpop.f32.mrf.mxu0  ;;  %v8641_v52 = vshll.u32 %v17609_v39, 16  ;;  %v8206_v34 = vsel %vm3600_vm3, %v8203_v40, %v8205_v62 }
 0x32f   : > { %v21653_v59 = vadd.f32 %v16394_v55, %v16342_v0  ;;  %v16414_v16 = vpop.f32.mrf.mxu1  ;;  %v7871_v55 = vrot.slane %v7869_v53, 1  ;;  %v7864_v14 = vsel %vm2591_vm4, %v7859_v18, %v7863_v26  ;;  %v7873_v53 = vshrl.u32 %v21649_v37, 16 }
 0x330   : > { %v5837_v46 = vpop.f32.mrf.mxu0  ;;  %v6203_v54 = vadd.f32 %v16414_v16, %v21448_v3 }
 0x331   : > { %16693 = vmatmul.mubr.bf16.gmra.mxu0 %v8200_v27  ;;  %16645 = vmatmul.mubr.bf16.gmra.mxu1 %v7848_v33  ;;  %v21660_v30 = vadd.f32 %v5837_v46, %v5421_v15  ;;  %v6058_v0 = vpop.f32.mrf.mxu1  ;;  %v7867_v27 = vor.u32 %v7865_v58, %v7863_v26  ;;  %v8649_v33 = vshll.u32 %v17610_v47, 16  ;;  %v8638_v46 = vshrl.u32 %v17609_v39, 16 }
 0x332   : > { %16696 = vmatprep.mubr.bf16.mxu0 %v8202_v31  ;;  %16648 = vmatprep.mubr.bf16.mxu1 %v7856_v1  ;;  %v16395_v63 = vpop.f32.mrf.mxu0  ;;  %v6201_v21 = vadd.f32 %v6058_v0, %v21451_v23  ;;  %v8646_v31 = vshrl.u32 %v17610_v47, 16  ;;  %v17612_v0 = vld [vmem:[#allocation2 + $0x30] sm:$0xff]  }
 0x333   : > { %v21665_v9 = vadd.f32 %v16395_v63, %v16343_v10  ;;  %v16415_v3 = vpop.f32.mrf.mxu1  ;;  %v7872_v38 = vsel %vm2591_vm4, %v7867_v27, %v7871_v55  ;;  %v8651_v58 = vrot.slane %v8649_v33, 2  ;;  %v8640_v18 = vrot.slane %v8638_v46, 1 }
 0x334   : > { %v21667_v16 = vpop.f32.mrf.mxu0  ;;  %v6204_v15 = vadd.f32 %v16415_v3, %v21455_v35  ;;  %v8648_v56 = vrot.slane %v8646_v31, 1  ;;  %v8643_v3 = vrot.slane %v8641_v52, 2  ;;  %v8209_v27 = vrot.slane %v21649_v37, 1 }
 0x335   : > { %v6061_v1 = vpop.f32.mrf.mxu1  ;;  %v7875_v31 = vor.u32 %v7873_v53, %v7871_v55 }
 0x336   : > { %v16466_v23 = vpop.f32.mrf.mxu0  ;;  %v21673_v10 = vadd.f32 %v6061_v1, %v21458_v12  ;;  %v17611_v12 = vld [vmem:[#allocation2 + $0x28] sm:$0xff]   ;;  %v8207_v1 = vrot.slane %v21629_v8, 1 }
 0x337   : > { %v21677_v47 = vadd.f32 %v16466_v23, %v6203_v54  ;;  %v16418_v35 = vpop.f32.mrf.mxu1  ;;  %v8655_v46 = vshrl.u32 %v17611_v12, 16  ;;  %v8658_v52 = vshll.u32 %v17611_v12, 16 }
 0x338   : > { %v6654_v39 = vpop.f32.mrf.mxu0  ;;  %v6207_v40 = vadd.f32 %v16418_v35, %v21466_v17  ;;  %v8664_v17 = vshrl.u32 %v17612_v0, 16  ;;  %v8210_v37 = vsel %vm3600_vm3, %v8207_v1, %v8209_v27 }
 0x339   : > { %16697 = vmatmul.mubr.bf16.gmra.mxu0 %v8204_v48  ;;  %16649 = vmatmul.mubr.bf16.gmra.mxu1 %v7864_v14  ;;  %v21681_v63 = vadd.f32 %v6654_v39, %v6201_v21  ;;  %v6074_v26 = vpop.f32.mrf.mxu1  ;;  %v8667_v14 = vshll.u32 %v17612_v0, 16  ;;  %v8644_v39 = vor.u32 %v8643_v3, %v8640_v18  ;;  %v17614_v0 = vld [vmem:[#allocation2 + $0x40] sm:$0xff]   ;;  %v8660_v18 = vrot.slane %v8658_v52, 2  ;;  %v17613_v3 = vld [vmem:[#allocation2 + $0x38] sm:$0xff]  }
 0x33a   : > { %16700 = vmatprep.mubr.bf16.mxu0 %v8206_v34  ;;  %16652 = vmatprep.mubr.bf16.mxu1 %v7872_v38  ;;  %v16467_v54 = vpop.f32.mrf.mxu0  ;;  %v6205_v48 = vadd.f32 %v6074_v26, %v21470_v50  ;;  %v8652_v34 = vor.u32 %v8651_v58, %v8648_v56  ;;  %v8208_v38 = vsel %vm3600_vm3, %v8205_v62, %v8207_v1  ;;  %v8666_v56 = vrot.slane %v8664_v17, 1 }
 0x33b   : > { %v21686_v33 = vadd.f32 %v16467_v54, %v6204_v15  ;;  %v16419_v23 = vpop.f32.mrf.mxu1  ;;  %v8669_v58 = vrot.slane %v8667_v14, 2  ;;  %v8657_v26 = vrot.slane %v8655_v46, 1  ;;  %v8682_v17 = vshrl.u32 %v17614_v0, 16 }
 0x33c   : > { %v21688_v35 = vpop.f32.mrf.mxu0  ;;  %v6208_v21 = vadd.f32 %v16419_v23, %v21475_v49  ;;  %v8653_v49 = vsel %vm4062_vm5, %v8644_v39, %v8652_v34  ;;  %v8685_v14 = vshll.u32 %v17614_v0, 16  ;;  %v8673_v46 = vshrl.u32 %v17613_v3, 16 }
 0x33d   : > { %v6077_v50 = vpop.f32.mrf.mxu1  ;;  %v8661_v39 = vor.u32 %v8660_v18, %v8657_v26  ;;  %v8676_v52 = vshll.u32 %v17613_v3, 16  ;;  %v17615_v18 = vld [vmem:[#allocation2 + $0x48] sm:$0xff]  }
 0x33e   : > { %v16470_v8 = vpop.f32.mrf.mxu0  ;;  %v21694_v55 = vadd.f32 %v6077_v50, %v21484_v28  ;;  %v8675_v26 = vrot.slane %v8673_v46, 1  ;;  %v8691_v46 = vshrl.u32 %v17615_v18, 16 }
 0x33f   : > { %v21696_v15 = vadd.f32 %v16470_v8, %v6207_v40  ;;  %v16422_v53 = vpop.f32.mrf.mxu1 }
 0x340   : > { %v6670_v62 = vpop.f32.mrf.mxu0  ;;  %v6211_v12 = vadd.f32 %v16422_v53, %v21493_v57 }
 0x341   : > { %16701 = vmatmul.mubr.bf16.gmra.mxu0 %v8208_v38  ;;  %16653 = vmatmul.mubr.bf16.gmra.mxu1 %v7875_v31  ;;  %v21700_v54 = vadd.f32 %v6670_v62, %v6205_v48  ;;  %v6090_v28 = vpop.f32.mrf.mxu1  ;;  %v8670_v38 = vor.u32 %v8669_v58, %v8666_v56  ;;  %v8684_v56 = vrot.slane %v8682_v17, 1  ;;  %v8687_v58 = vrot.slane %v8685_v14, 2 }
 0x342   : > { %16704 = vmatprep.mubr.bf16.mxu0 %v8210_v37  ;;  %16724 = vmatprep.mubr.bf16.mxu1 %v8653_v49  ;;  %v16471_v40 = vpop.f32.mrf.mxu0  ;;  %v6209_v1 = vadd.f32 %v6090_v28, %v21501_v6  ;;  %v8662_v6 = vsel %vm4062_vm5, %v8652_v34, %v8661_v39 }
 0x343   : > { %v21703_v23 = vadd.f32 %v16471_v40, %v6208_v21  ;;  %v16423_v31 = vpop.f32.mrf.mxu1  ;;  %v8671_v49 = vsel %vm4062_vm5, %v8661_v39, %v8670_v38 }
 0x344   : > { %v21705_v50 = vpop.f32.mrf.mxu0  ;;  %v6212_v57 = vadd.f32 %v16423_v31, %v21506_v41  ;;  %v17616_v41 = vld [vmem:[#allocation2 + $0x50] sm:$0xff]   ;;  %v8688_v31 = vor.u32 %v8687_v58, %v8684_v56 }
 0x345   : > { %v6093_v8 = vpop.f32.mrf.mxu1  ;;  %v8700_v17 = vshrl.u32 %v17616_v41, 16  ;;  %v8703_v14 = vshll.u32 %v17616_v41, 16  ;;  %v17618_v41 = vld [vmem:[#allocation2 + $0x60] sm:$0xff]  }
 0x346   : > { %v16474_v48 = vpop.f32.mrf.mxu0  ;;  %v21709_v37 = vadd.f32 %v6093_v8, %v21515_v61 }
 0x347   : > { %v21712_v21 = vadd.f32 %v16474_v48, %v6211_v12  ;;  %v16426_v53 = vpop.f32.mrf.mxu1  ;;  %v8702_v56 = vrot.slane %v8700_v17, 1  ;;  %v8705_v58 = vrot.slane %v8703_v14, 2  ;;  %v8718_v17 = vshrl.u32 %v17618_v41, 16 }
 0x348   : > { %v6686_v0 = vpop.f32.mrf.mxu0  ;;  %v6215_v62 = vadd.f32 %v16426_v53, %v21527_v4  ;;  %v8721_v14 = vshll.u32 %v17618_v41, 16 }
 0x349   : > { %16705 = vmatmul.mubr.bf16.gmra.mxu0 %v8209_v27  ;;  %16725 = vmatmul.mubr.bf16.vlgmr.msra.gmra.mxu1 %v8662_v6  ;;  %v8678_v27 = vrot.slane %v8676_v52, 2  ;;  %v21716_v61 = vadd.f32 %v6686_v0, %v6209_v1  ;;  %v6106_v3 = vpop.f32.mrf.mxu1  ;;  %v8694_v52 = vshll.u32 %v17615_v18, 16  ;;  %v17617_v18 = vld [vmem:[#allocation2 + $0x58] sm:$0xff]  }
 0x34a   : > { %16728 = vmatprep.mubr.bf16.mxu1 %v8671_v49  ;;  %v16475_v34 = vpop.f32.mrf.mxu0  ;;  %v6213_v12 = vadd.f32 %v6106_v3, %v21533_v60  ;;  %v8723_v41 = vrot.slane %v8721_v14, 2 }
 0x34b   : > { %v21719_v28 = vadd.f32 %v16475_v34, %v6212_v57  ;;  %v16427_v40 = vpop.f32.mrf.mxu1  ;;  %v8679_v8 = vor.u32 %v8678_v27, %v8675_v26  ;;  %v8693_v26 = vrot.slane %v8691_v46, 1  ;;  %v8696_v27 = vrot.slane %v8694_v52, 2 }
 0x34c   : > { %v21721_v39 = vpop.f32.mrf.mxu0  ;;  %v6216_v4 = vadd.f32 %v16427_v40, %v21541_v24  ;;  %v8709_v46 = vshrl.u32 %v17617_v18, 16  ;;  %v8712_v52 = vshll.u32 %v17617_v18, 16 }
 0x34d   : > { %v6109_v48 = vpop.f32.mrf.mxu1  ;;  %v8680_v60 = vsel %vm4062_vm5, %v8670_v38, %v8679_v8  ;;  %v8689_v49 = vsel %vm4062_vm5, %v8679_v8, %v8688_v31  ;;  %v8706_v8 = vor.u32 %v8705_v58, %v8702_v56  ;;  %v8720_v58 = vrot.slane %v8718_v17, 1 }
 0x34e   : > { %v21725_v6 = vadd.f32 %v6109_v48, %v21548_v2  ;;  %v8714_v18 = vrot.slane %v8712_v52, 2 }
 0x350   : > { %v16478_v1 = vpop.f32.mrf.mxu0 }
 0x351   : > { %v21728_v57 = vadd.f32 %v16478_v1, %v6215_v62  ;;  %v16430_v53 = vpop.f32.mrf.mxu1  ;;  %16729 = vmatmul.mubr.bf16.gmra.mxu1 %v8680_v60  ;;  %v8697_v1 = vor.u32 %v8696_v27, %v8693_v26  ;;  %v8711_v27 = vrot.slane %v8709_v46, 1 }
 0x352   : > { %v6702_v24 = vpop.f32.mrf.mxu0  ;;  %v6219_v0 = vadd.f32 %v16430_v53, %v21557_v45  ;;  %16732 = vmatprep.mubr.bf16.mxu1 %v8689_v49 }
 0x353   : > { %v21732_v2 = vadd.f32 %v6702_v24, %v6213_v12  ;;  %v6122_v3 = vpop.f32.mrf.mxu1  ;;  %v8707_v56 = vsel %vm4062_vm5, %v8697_v1, %v8706_v8  ;;  %v17620_v24 = vld [vmem:[#allocation2 + $0x70] sm:$0xff]  }
 0x354   : > { %v16479_v38 = vpop.f32.mrf.mxu0  ;;  %v6217_v62 = vadd.f32 %v6122_v3, %v21562_v32  ;;  %v8698_v32 = vsel %vm4062_vm5, %v8688_v31, %v8697_v1  ;;  %v17619_v3 = vld [vmem:[#allocation2 + $0x68] sm:$0xff]   ;;  %v8724_v1 = vor.u32 %v8723_v41, %v8720_v58  ;;  %v8736_v17 = vshrl.u32 %v17620_v24, 16 }
 0x355   : > { %v21735_v34 = vadd.f32 %v16479_v38, %v6216_v4  ;;  %v16431_v40 = vpop.f32.mrf.mxu1  ;;  %v8739_v14 = vshll.u32 %v17620_v24, 16  ;;  %v8727_v46 = vshrl.u32 %v17619_v3, 16  ;;  %v8730_v52 = vshll.u32 %v17619_v3, 16 }
 0x356   : > { %v21737_v48 = vpop.f32.mrf.mxu0  ;;  %v6220_v45 = vadd.f32 %v16431_v40, %v21570_v19  ;;  %v8738_v41 = vrot.slane %v8736_v17, 1 }
 0x357   : > { %v6125_v60 = vpop.f32.mrf.mxu1  ;;  %v8741_v24 = vrot.slane %v8739_v14, 2  ;;  %v8732_v3 = vrot.slane %v8730_v52, 2 }
 0x358   : > { %v16482_v12 = vpop.f32.mrf.mxu0  ;;  %v21741_v53 = vadd.f32 %v6125_v60, %v21576_v36 }
 0x359   : > { %v21744_v4 = vadd.f32 %v16482_v12, %v6219_v0  ;;  %v16434_v49 = vpop.f32.mrf.mxu1  ;;  %16733 = vmatmul.mubr.bf16.gmra.mxu1 %v8698_v32  ;;  %v8715_v32 = vor.u32 %v8714_v18, %v8711_v27  ;;  %v8729_v18 = vrot.slane %v8727_v46, 1 }
 0x35a   : > { %v6718_v19 = vpop.f32.mrf.mxu0  ;;  %v6223_v26 = vadd.f32 %v16434_v49, %v21585_v13  ;;  %16736 = vmatprep.mubr.bf16.mxu1 %v8707_v56 }
 0x35b   : > { %v21748_v36 = vadd.f32 %v6718_v19, %v6217_v62  ;;  %v6138_v38 = vpop.f32.mrf.mxu1  ;;  %v8725_v58 = vsel %vm4062_vm5, %v8715_v32, %v8724_v1  ;;  %v8733_v52 = vor.u32 %v8732_v3, %v8729_v18 }
 0x35c   : > { %v16483_v31 = vpop.f32.mrf.mxu0  ;;  %v6221_v0 = vadd.f32 %v6138_v38, %v21590_v11  ;;  %v8716_v11 = vsel %vm4062_vm5, %v8706_v8, %v8715_v32  ;;  %v17622_v38 = vld [vmem:[#allocation2 + $0x80] sm:$0xff]   ;;  %v17628_v8 = vld [vmem:[%s24234_s6 + $0x78] sm:$0xff]  }
 0x35d   : > { %v21751_v40 = vadd.f32 %v16483_v31, %v6220_v45  ;;  %v16435_v60 = vpop.f32.mrf.mxu1  ;;  %v17621_v31 = vld [vmem:[#allocation2 + $0x78] sm:$0xff]   ;;  %16760 = vmatprep.subr.bf16.mxu0 %v17628_v8 }
 0x35e   : > { %v21753_v12 = vpop.f32.mrf.mxu0  ;;  %v6224_v13 = vadd.f32 %v16435_v60, %v21595_v25  ;;  %16761 = vmatpush3.bf16.msra.mxu0 %v17628_v8 }
 0x35f   : > { %v6141_v49 = vpop.f32.mrf.mxu1 }
 0x360   : > { %v16486_v62 = vpop.f32.mrf.mxu0  ;;  %v21757_v56 = vadd.f32 %v6141_v49, %v21601_v5  ;;  %v8742_v49 = vor.u32 %v8741_v24, %v8738_v41 }
 0x361   : > { %v21760_v45 = vadd.f32 %v16486_v62, %v6223_v26  ;;  %v16438_v19 = vpop.f32.mrf.mxu1  ;;  %16737 = vmatmul.mubr.bf16.gmra.mxu1 %v8716_v11  ;;  %v8754_v62 = vshrl.u32 %v17622_v38, 16  ;;  %v8745_v11 = vshrl.u32 %v17621_v31, 16 }
 0x362   : > { %24899 = vst [vmem:[#allocation81_spill] sm:$0xff] %v21757_v56  ;;  %v6734_v25 = vpop.f32.mrf.mxu0  ;;  %v6227_v27 = vadd.f32 %v16438_v19, %v21607_v51  ;;  %16740 = vmatprep.mubr.bf16.mxu1 %v8725_v58  ;;  %v8757_v51 = vshll.u32 %v17622_v38, 16  ;;  %v8748_v19 = vshll.u32 %v17621_v31, 16  ;;  %v8743_v24 = vsel %vm4062_vm5, %v8733_v52, %v8742_v49 }
 0x363   : > { %v21764_v5 = vadd.f32 %v6734_v25, %v6221_v0  ;;  %v6154_v60 = vpop.f32.mrf.mxu1  ;;  %v8756_v38 = vrot.slane %v8754_v62, 1  ;;  %v8747_v31 = vrot.slane %v8745_v11, 1 }
 0x364   : > { %v16487_v26 = vpop.f32.mrf.mxu0  ;;  %v6225_v32 = vadd.f32 %v6154_v60, %v21612_v20  ;;  %v8734_v20 = vsel %vm4062_vm5, %v8724_v1, %v8733_v52  ;;  %v8759_v60 = vrot.slane %v8757_v51, 2  ;;  %v8750_v8 = vrot.slane %v8748_v19, 2 }
 0x365   : > { %v21770_v17 = vadd.f32 %v16487_v26, %v6224_v13  ;;  %v16439_v14 = vpop.f32.mrf.mxu1  ;;  %v17623_v26 = vld [vmem:[#allocation2 + $0x88] sm:$0xff]  }
 0x366   : > { %v21772_v46 = vpop.f32.mrf.mxu0  ;;  %v6228_v0 = vadd.f32 %v16439_v14, %v21617_v44  ;;  %v17624_v44 = vld [vmem:[#allocation2 + $0x90] sm:$0xff]   ;;  %v8760_v52 = vor.u32 %v8759_v60, %v8756_v38  ;;  %v8763_v19 = vshrl.u32 %v17623_v26, 16  ;;  %v17625_v60 = vld [vmem:[#allocation2 + $0x98] sm:$0xff]  }
 0x367   : > { %v6157_v58 = vpop.f32.mrf.mxu1  ;;  %v8772_v62 = vshrl.u32 %v17624_v44, 16  ;;  %v8775_v51 = vshll.u32 %v17624_v44, 16 }
 0x368   : > { %v16490_v25 = vpop.f32.mrf.mxu0  ;;  %v21776_v56 = vadd.f32 %v6157_v58, %v21623_v29 }
 0x369   : > { %v21779_v13 = vadd.f32 %v16490_v25, %v6227_v27  ;;  %v16442_v41 = vpop.f32.mrf.mxu1  ;;  %16741 = vmatmul.mubr.bf16.gmra.mxu1 %v8734_v20 }
 0x36a   : > { %v6750_v18 = vpop.f32.mrf.mxu0  ;;  %v6231_v3 = vadd.f32 %v16442_v41, %v21631_v42  ;;  %16744 = vmatprep.mubr.bf16.mxu1 %v8743_v24  ;;  %v17629_v42 = vld [vmem:[%s24234_s6 + $0x70] sm:$0xff]   ;;  %v8766_v41 = vshll.u32 %v17623_v26, 16 }
 0x36b   : > { %v21783_v29 = vadd.f32 %v6750_v18, %v6225_v32  ;;  %v6170_v14 = vpop.f32.mrf.mxu1  ;;  %v8751_v32 = vor.u32 %v8750_v8, %v8747_v31  ;;  %16762 = vmatprep.subr.bf16.mxu0 %v17629_v42  ;;  %v8777_v31 = vrot.slane %v8775_v51, 2  ;;  %v17626_v8 = vld [vmem:[#allocation2 + $0xa0] sm:$0xff]  }
 0x36c   : > { %v16491_v1 = vpop.f32.mrf.mxu0  ;;  %v6229_v27 = vadd.f32 %v6170_v14, %v21636_v22  ;;  %16763 = vmatpush3.bf16.msra.mxu0 %v17629_v42  ;;  %v8781_v42 = vshrl.u32 %v17625_v60, 16  ;;  %v8790_v51 = vshrl.u32 %v17626_v8, 16 }
 0x36d   : > { %v21786_v58 = vadd.f32 %v16491_v1, %v6228_v0  ;;  %v16443_v25 = vpop.f32.mrf.mxu1  ;;  %v8752_v38 = vsel %vm4062_vm5, %v8742_v49, %v8751_v32  ;;  %v8761_v14 = vsel %vm4062_vm5, %v8751_v32, %v8760_v52 }
 0x36e   : > { %v21791_v20 = vpop.f32.mrf.mxu0  ;;  %v6232_v11 = vadd.f32 %v16443_v25, %v21640_v7  ;;  %v8774_v7 = vrot.slane %v8772_v62, 1  ;;  %v8765_v25 = vrot.slane %v8763_v19, 1 }
 0x36f   : > { %24900 = vst [vmem:[#allocation84_spill] sm:$0xff] %v21791_v20  ;;  %v6173_v24 = vpop.f32.mrf.mxu1  ;;  %v8793_v20 = vshll.u32 %v17626_v8, 16  ;;  %v8792_v8 = vrot.slane %v8790_v51, 1 }
 0x370   : > { %v21795_v0 = vadd.f32 %v6173_v24, %v21644_v43  ;;  %v8768_v43 = vrot.slane %v8766_v41, 2  ;;  %v8778_v62 = vor.u32 %v8777_v31, %v8774_v7 }
 0x371   : > { %v16494_v22 = vpop.f32.mrf.mxu0  ;;  %v16446_v18 = vpop.f32.mrf.mxu1  ;;  %16745 = vmatmul.mubr.bf16.gmra.mxu1 %v8752_v38 }
 0x372   : > { %24901 = vst [vmem:[#allocation82_spill] sm:$0xff] %v21795_v0  ;;  %v21798_v44 = vadd.f32 %v16494_v22, %v6231_v3  ;;  %v6235_v1 = vadd.f32 %v16446_v18, %v21653_v59  ;;  %16748 = vmatprep.mubr.bf16.mxu1 %v8761_v14  ;;  %v8784_v22 = vshll.u32 %v17625_v60, 16  ;;  %v17630_v59 = vld [vmem:[%s24234_s6 + $0x68] sm:$0xff]   ;;  %v8769_v41 = vor.u32 %v8768_v43, %v8765_v25 }
 0x373   : > { %v6766_v26 = vpop.f32.mrf.mxu0  ;;  %v6186_v49 = vpop.f32.mrf.mxu1  ;;  %16764 = vmatprep.subr.bf16.mxu0 %v17630_v59  ;;  %v17627_v25 = vld [vmem:[#allocation2 + $0xa8] ss:$0 sps:$4 sm:$0x11]  }
 0x374   : > { %v21802_v24 = vadd.f32 %v6766_v26, %v6229_v27  ;;  %v6233_v3 = vadd.f32 %v6186_v49, %v21660_v30  ;;  %v8786_v60 = vrot.slane %v8784_v22, 2  ;;  %16765 = vmatpush3.bf16.msra.mxu0 %v17630_v59  ;;  %v8779_v31 = vsel %vm4062_vm5, %v8769_v41, %v8778_v62 }
 0x375   : > { %v16495_v0 = vpop.f32.mrf.mxu0  ;;  %v16447_v32 = vpop.f32.mrf.mxu1  ;;  %v8795_v26 = vrot.slane %v8793_v20, 2  ;;  %v8799_v51 = vshll.u32 %v17627_v25, 16 }
 0x376   : > { %v21805_v38 = vadd.f32 %v16495_v0, %v6232_v11  ;;  %v6236_v27 = vadd.f32 %v16447_v32, %v21665_v9  ;;  %v8770_v11 = vsel %vm4062_vm5, %v8760_v52, %v8769_v41  ;;  %v8783_v0 = vrot.slane %v8781_v42, 1 }
 0x377   : > { %v21810_v19 = vpop.f32.mrf.mxu0  ;;  %v21813_v18 = vpop.f32.mrf.mxu1 }
 0x378   : > { %v8787_v59 = vor.u32 %v8786_v60, %v8783_v0 }
 0x379   : > { %v16498_v30 = vpop.f32.mrf.mxu0  ;;  %v16518_v7 = vpop.f32.mrf.mxu1  ;;  %16749 = vmatmul.mubr.bf16.gmra.mxu1 %v8770_v11 }
 0x37a   : > { %v21816_v14 = vadd.f32 %v16498_v30, %v6235_v1  ;;  %v7113_v9 = vadd.f32 %v16518_v7, %v21677_v47  ;;  %16752 = vmatprep.mubr.bf16.mxu1 %v8779_v31  ;;  %v8796_v30 = vor.u32 %v8795_v26, %v8792_v8  ;;  %v17631_v47 = vld [vmem:[%s24234_s6 + $0x60] sm:$0xff]   ;;  %v8788_v7 = vsel %vm4062_vm5, %v8778_v62, %v8787_v59 }
 0x37b   : > { %v6782_v49 = vpop.f32.mrf.mxu0  ;;  %v6968_v32 = vpop.f32.mrf.mxu1  ;;  %16766 = vmatprep.subr.bf16.mxu0 %v17631_v47  ;;  %v8801_v31 = vrot.slane %v8799_v51, 2 }
 0x37c   : > { %v21820_v43 = vadd.f32 %v6782_v49, %v6233_v3  ;;  %v7111_v42 = vadd.f32 %v6968_v32, %v21681_v63  ;;  %v8797_v0 = vsel %vm4062_vm5, %v8787_v59, %v8796_v30  ;;  %16767 = vmatpush3.bf16.msra.mxu0 %v17631_v47 }
 0x37d   : > { %v16499_v52 = vpop.f32.mrf.mxu0  ;;  %v16519_v1 = vpop.f32.mrf.mxu1 }
 0x37e   : > { %v21823_v22 = vadd.f32 %v16499_v52, %v6236_v27  ;;  %v7114_v20 = vadd.f32 %v16519_v1, %v21686_v33  ;;  %v8802_v1 = vsel %vm4062_vm5, %v8796_v30, %v8801_v31 }
 0x37f   : > { %v21825_v11 = vpop.f32.mrf.mxu0  ;;  %v21828_v41 = vpop.f32.mrf.mxu1 }
 0x381   : > { %v16570_v3 = vpop.f32.mrf.mxu0  ;;  %v16522_v27 = vpop.f32.mrf.mxu1  ;;  %16753 = vmatmul.mubr.bf16.gmra.mxu1 %v8788_v7 }
 0x382   : > { %v21834_v63 = vadd.f32 %v16570_v3, %v7113_v9  ;;  %v7117_v33 = vadd.f32 %v16522_v27, %v21696_v15  ;;  %16756 = vmatprep.mubr.bf16.mxu1 %v8797_v0  ;;  %v17632_v15 = vld [vmem:[%s24234_s6 + $0x58] sm:$0xff]  }
 0x383   : > { %v7411_v60 = vpop.f32.mrf.mxu0  ;;  %v6984_v26 = vpop.f32.mrf.mxu1  ;;  %16768 = vmatprep.subr.bf16.mxu0 %v17632_v15 }
 0x384   : > { %v21838_v8 = vadd.f32 %v7411_v60, %v7111_v42  ;;  %v7115_v25 = vadd.f32 %v6984_v26, %v21700_v54  ;;  %16769 = vmatpush3.bf16.msra.mxu0 %v17632_v15 }
 0x385   : > { %v16571_v49 = vpop.f32.mrf.mxu0  ;;  %v16523_v9 = vpop.f32.mrf.mxu1 }
 0x386   : > { %v21841_v62 = vadd.f32 %v16571_v49, %v7114_v20  ;;  %v7118_v52 = vadd.f32 %v16523_v9, %v21703_v23 }
 0x387   : > { %v21843_v32 = vpop.f32.mrf.mxu0  ;;  %v21847_v59 = vpop.f32.mrf.mxu1 }
 0x388   : > { %24902 = vst [vmem:[#allocation89_spill] sm:$0xff] %v21843_v32 }
 0x389   : > { %v16574_v42 = vpop.f32.mrf.mxu0  ;;  %v16526_v47 = vpop.f32.mrf.mxu1  ;;  %16757 = vmatmul.mubr.bf16.gmra.mxu1 %v8802_v1 }
 0x38a   : > { %v21852_v51 = vadd.f32 %v16574_v42, %v7117_v33  ;;  %v7121_v20 = vadd.f32 %v16526_v47, %v21712_v21 }
 0x38b   : > { %v7427_v54 = vpop.f32.mrf.mxu0  ;;  %v7000_v23 = vpop.f32.mrf.mxu1 }
 0x38c   : > { %v21855_v3 = vadd.f32 %v7427_v54, %v7115_v25  ;;  %v7119_v7 = vadd.f32 %v7000_v23, %v21716_v61  ;;  %v17633_v61 = vld [vmem:[%s24234_s6 + $0x38] sm:$0xff]  }
 0x38d   : > { %v16575_v30 = vpop.f32.mrf.mxu0  ;;  %v16527_v0 = vpop.f32.mrf.mxu1  ;;  %16812 = vmatprep.subr.bf16.mxu1 %v17633_v61 }
 0x38e   : > { %v21858_v27 = vadd.f32 %v16575_v30, %v7118_v52  ;;  %v7122_v33 = vadd.f32 %v16527_v0, %v21719_v28  ;;  %16813 = vmatpush3.bf16.msra.mxu1 %v17633_v61  ;;  %v17634_v30 = vld [vmem:[%s24234_s6 + $0x50] sm:$0xff]  }
 0x38f   : > { %v21860_v60 = vpop.f32.mrf.mxu0  ;;  %v21863_v31 = vpop.f32.mrf.mxu1  ;;  %16770 = vmatprep.subr.bf16.mxu0 %v17634_v30 }
 0x390   : > { %24903 = vst [vmem:[#allocation88_spill] sm:$0xff] %v21860_v60  ;;  %16771 = vmatpush3.bf16.msra.mxu0 %v17634_v30 }
 0x391   : > { %v16578_v26 = vpop.f32.mrf.mxu0  ;;  %v16530_v21 = vpop.f32.mrf.mxu1 }
 0x392   : > { %v21865_v49 = vadd.f32 %v16578_v26, %v7121_v20  ;;  %v7125_v25 = vadd.f32 %v16530_v21, %v21728_v57  ;;  %v17635_v26 = vld [vmem:[%s24234_s6 + $0x30] sm:$0xff]  }
 0x393   : > { %v7443_v9 = vpop.f32.mrf.mxu0  ;;  %v7016_v1 = vpop.f32.mrf.mxu1  ;;  %16814 = vmatprep.subr.bf16.mxu1 %v17635_v26 }
 0x394   : > { %v21871_v52 = vadd.f32 %v7443_v9, %v7119_v7  ;;  %v7123_v42 = vadd.f32 %v7016_v1, %v21732_v2  ;;  %16815 = vmatpush3.bf16.msra.mxu1 %v17635_v26  ;;  %v17638_v26 = vld [vmem:[%s24234_s6 + $0x20] sm:$0xff]  }
 0x395   : > { %v16579_v15 = vpop.f32.mrf.mxu0  ;;  %v16531_v47 = vpop.f32.mrf.mxu1 }
 0x396   : > { %v21874_v28 = vadd.f32 %v16579_v15, %v7122_v33  ;;  %v7126_v20 = vadd.f32 %v16531_v47, %v21735_v34  ;;  %v17636_v34 = vld [vmem:[%s24234_s6 + $0x28] sm:$0xff]  }
 0x397   : > { %v21876_v54 = vpop.f32.mrf.mxu0  ;;  %v21879_v57 = vpop.f32.mrf.mxu1  ;;  %16816 = vmatprep.subr.bf16.mxu1 %v17636_v34 }
 0x398   : > { %24904 = vst [vmem:[#allocation85_spill] sm:$0xff] %v21876_v54  ;;  %16817 = vmatpush3.bf16.msra.mxu1 %v17636_v34 }
 0x399   : > { %v16582_v23 = vpop.f32.mrf.mxu0  ;;  %v16534_v0 = vpop.f32.mrf.mxu1  ;;  %16818 = vmatprep.subr.bf16.mxu1 %v17638_v26 }
 0x39a   : > { %v21884_v7 = vadd.f32 %v16582_v23, %v7125_v25  ;;  %v7129_v33 = vadd.f32 %v16534_v0, %v21744_v4 }
 0x39b   : > { %v7459_v2 = vpop.f32.mrf.mxu0  ;;  %v7032_v9 = vpop.f32.mrf.mxu1 }
 0x39c   : > { %v21893_v21 = vadd.f32 %v7459_v2, %v7123_v42  ;;  %v7127_v25 = vadd.f32 %v7032_v9, %v21748_v36  ;;  %v17637_v36 = vld [vmem:[%s24234_s6 + $0x48] sm:$0xff]   ;;  %16819 = vmatpush3.bf16.msra.mxu1 %v17638_v26  ;;  %v17640_v26 = vld [vmem:[%s24234_s6 + $0x40] sm:$0xff]  }
 0x39d   : > { %v16583_v61 = vpop.f32.mrf.mxu0  ;;  %v16535_v4 = vpop.f32.mrf.mxu1  ;;  %16772 = vmatprep.subr.bf16.mxu0 %v17637_v36 }
 0x39e   : > { %v21896_v1 = vadd.f32 %v16583_v61, %v7126_v20  ;;  %v7130_v47 = vadd.f32 %v16535_v4, %v21751_v40  ;;  %v17639_v40 = vld [vmem:[%s24234_s6 + $0x18] sm:$0xff]   ;;  %16773 = vmatpush3.bf16.msra.mxu0 %v17637_v36 }
 0x39f   : > { %v21898_v15 = vpop.f32.mrf.mxu0  ;;  %v21901_v23 = vpop.f32.mrf.mxu1  ;;  %16820 = vmatprep.subr.bf16.mxu1 %v17639_v40  ;;  %16774 = vmatprep.subr.bf16.mxu0 %v17640_v26 }
 0x3a0   : > { %24905 = vst [vmem:[#allocation87_spill] sm:$0xff] %v21898_v15  ;;  %16821 = vmatpush3.bf16.msra.mxu1 %v17639_v40 }
 0x3a1   : > { %v16586_v0 = vpop.f32.mrf.mxu0  ;;  %v16538_v2 = vpop.f32.mrf.mxu1 }
 0x3a2   : > { %v21903_v42 = vadd.f32 %v16586_v0, %v7129_v33  ;;  %v7133_v30 = vadd.f32 %v16538_v2, %v21760_v45  ;;  %16775 = vmatpush3.bf16.msra.mxu0 %v17640_v26  ;;  %v21958_v26 = vld [vmem:[%s24234_s6 + $0xb8] sm:$0xff]  }
 0x3a3   : > { %v7475_v20 = vpop.f32.mrf.mxu0  ;;  %v7048_v33 = vpop.f32.mrf.mxu1  ;;  %24909 = vst [vmem:[#allocation79_spill] sm:$0xff] %v21958_v26  ;;  %16864 = vmatprep.subr.bf16.mxu0 %v21958_v26 }
 0x3a4   : > { %v21915_v9 = vadd.f32 %v7475_v20, %v7127_v25  ;;  %v7131_v61 = vadd.f32 %v7048_v33, %v21764_v5 }
 0x3a5   : > { %v16587_v34 = vpop.f32.mrf.mxu0  ;;  %v16539_v45 = vpop.f32.mrf.mxu1 }
 0x3a6   : > { %v21918_v4 = vadd.f32 %v16587_v34, %v7130_v47  ;;  %v7134_v2 = vadd.f32 %v16539_v45, %v21770_v17  ;;  %v17641_v17 = vld [vmem:[%s24234_s6 + $0x10] sm:$0xff]  }
 0x3a7   : > { %v21920_v0 = vpop.f32.mrf.mxu0  ;;  %v21923_v15 = vpop.f32.mrf.mxu1  ;;  %16822 = vmatprep.subr.bf16.mxu1 %v17641_v17 }
 0x3a8   : > { %24906 = vst [vmem:[#allocation86_spill] sm:$0xff] %v21920_v0  ;;  %16823 = vmatpush3.bf16.msra.mxu1 %v17641_v17 }
 0x3a9   : > { %v16590_v25 = vpop.f32.mrf.mxu0  ;;  %v16542_v54 = vpop.f32.mrf.mxu1 }
 0x3aa   : > { %v21925_v20 = vadd.f32 %v16590_v25, %v7133_v30  ;;  %v7137_v5 = vadd.f32 %v16542_v54, %v21779_v13  ;;  %v17642_v30 = vld [vmem:[%s24234_s6 + $0x8] sm:$0xff]  }
 0x3ab   : > { %v7491_v60 = vpop.f32.mrf.mxu0  ;;  %v7064_v47 = vpop.f32.mrf.mxu1  ;;  %16824 = vmatprep.subr.bf16.mxu1 %v17642_v30 }
 0x3ac   : > { %v21928_v36 = vadd.f32 %v7491_v60, %v7131_v61  ;;  %v7135_v40 = vadd.f32 %v7064_v47, %v21783_v29  ;;  %16825 = vmatpush3.bf16.msra.mxu1 %v17642_v30 }
 0x3ad   : > { %v16591_v33 = vpop.f32.mrf.mxu0  ;;  %v16543_v13 = vpop.f32.mrf.mxu1 }
 0x3ae   : > { %v21940_v34 = vadd.f32 %v16591_v33, %v7134_v2  ;;  %v7138_v54 = vadd.f32 %v16543_v13, %v21786_v58  ;;  %v17646_v2 = vld [vmem:[%s24234_s6] sm:$0xff]  }
 0x3af   : > { %v21942_v60 = vpop.f32.mrf.mxu0  ;;  %v21945_v61 = vpop.f32.mrf.mxu1  ;;  %16826 = vmatprep.subr.bf16.mxu1 %v17646_v2 }
 0x3b0   : > { %24907 = vst [vmem:[#allocation90_spill] sm:$0xff] %v21942_v60  ;;  %24908 = vst [vmem:[#allocation80_spill] sm:$0xff] %v21945_v61  ;;  %16827 = vmatpush3.bf16.msra.mxu1 %v17646_v2 }
 0x3b1   : > { %v16594_v45 = vpop.f32.mrf.mxu0  ;;  %v16546_v0 = vpop.f32.mrf.mxu1 }
 0x3b2   : > { %v21947_v25 = vadd.f32 %v16594_v45, %v7137_v5  ;;  %v7141_v29 = vadd.f32 %v16546_v0, %v21798_v44 }
 0x3b3   : > { %v7507_v32 = vpop.f32.mrf.mxu0  ;;  %v7080_v58 = vpop.f32.mrf.mxu1 }
 0x3b4   : > { %v21953_v47 = vadd.f32 %v7507_v32, %v7135_v40  ;;  %v7139_v5 = vadd.f32 %v7080_v58, %v21802_v24 }
 0x3b5   : > { %v16595_v17 = vpop.f32.mrf.mxu0  ;;  %v16547_v44 = vpop.f32.mrf.mxu1 }
 0x3b6   : > { %v21961_v33 = vadd.f32 %v16595_v17, %v7138_v54  ;;  %v7142_v32 = vadd.f32 %v16547_v44, %v21805_v38 }
 0x3b7   : > { %v21964_v0 = vpop.f32.mrf.mxu0  ;;  %v21967_v30 = vpop.f32.mrf.mxu1 }
 0x3b8   : > { %24910 = vst [vmem:[#allocation91_spill] sm:$0xff] %v21964_v0  ;;  %24911 = vst [vmem:[#allocation92_spill] sm:$0xff] %v21967_v30 }
 0x3b9   : > { %v16598_v40 = vpop.f32.mrf.mxu0  ;;  %v16550_v45 = vpop.f32.mrf.mxu1 }
 0x3ba   : > { %v21969_v13 = vadd.f32 %v16598_v40, %v7141_v29  ;;  %v7145_v24 = vadd.f32 %v16550_v45, %v21816_v14 }
 0x3bb   : > { %v7523_v60 = vpop.f32.mrf.mxu0  ;;  %v7096_v54 = vpop.f32.mrf.mxu1 }
 0x3bc   : > { %v21972_v58 = vadd.f32 %v7523_v60, %v7139_v5  ;;  %v7143_v26 = vadd.f32 %v7096_v54, %v21820_v43 }
 0x3bd   : > { %v16599_v17 = vpop.f32.mrf.mxu0  ;;  %v16551_v0 = vpop.f32.mrf.mxu1 }
 0x3be   : > { %v21975_v61 = vadd.f32 %v16599_v17, %v7142_v32  ;;  %v7146_v2 = vadd.f32 %v16551_v0, %v21823_v22 }
 0x3bf   : > { %v21977_v38 = vpop.f32.mrf.mxu0  ;;  %v21980_v44 = vpop.f32.mrf.mxu1 }
 0x3c0   : > { %24912 = vst [vmem:[#allocation93_spill] sm:$0xff] %v21977_v38 }
 0x3c1   : > { %v16602_v29 = vpop.f32.mrf.mxu0  ;;  %v16622_v30 = vpop.f32.mrf.mxu1 }
 0x3c2   : > { %v21982_v40 = vadd.f32 %v16602_v29, %v7145_v24  ;;  %v21985_v60 = vadd.f32 %v16622_v30, %v21834_v63 }
 0x3c3   : > { %v7539_v14 = vpop.f32.mrf.mxu0  ;;  %v7976_v43 = vpop.f32.mrf.mxu1 }
 0x3c4   : > { %v21987_v5 = vadd.f32 %v7539_v14, %v7143_v26  ;;  %v21990_v45 = vadd.f32 %v7976_v43, %v21838_v8 }
 0x3c5   : > { %v16603_v32 = vpop.f32.mrf.mxu0  ;;  %v16623_v22 = vpop.f32.mrf.mxu1 }
 0x3c6   : > { %v21992_v54 = vadd.f32 %v16603_v32, %v7146_v2  ;;  %v21997_v24 = vadd.f32 %v16623_v22, %v21841_v62 }
 0x3c7   : > { %v21994_v0 = vpop.f32.mrf.mxu0  ;;  %v21999_v17 = vpop.f32.mrf.mxu1 }
 0x3c8   : > { %24913 = vst [vmem:[#allocation94_spill] sm:$0xff] %v21994_v0  ;;  %24914 = vst [vmem:[#allocation95_spill] sm:$0xff] %v21997_v24 }
 0x3c9   : > { %v22001_v29 = vpop.f32.mrf.mxu0  ;;  %v16626_v63 = vpop.f32.mrf.mxu1 }
 0x3ca   : > { %v22006_v30 = vadd.f32 %v16626_v63, %v21852_v51 }
 0x3cb   : > { %v22003_v26 = vpop.f32.mrf.mxu0  ;;  %v7992_v8 = vpop.f32.mrf.mxu1 }
 0x3cc   : > { %24915 = vst [vmem:[#allocation96_spill] sm:$0xff] %v22006_v30  ;;  %v22011_v2 = vadd.f32 %v7992_v8, %v21855_v3 }
 0x3cd   : > { %v22008_v14 = vpop.f32.mrf.mxu0  ;;  %v16627_v43 = vpop.f32.mrf.mxu1 }
 0x3ce   : > { %24916 = vst [vmem:[#allocation97_spill] sm:$0xff] %v22011_v2  ;;  %v22016_v62 = vadd.f32 %v16627_v43, %v21858_v27 }
 0x3cf   : > { %v22013_v32 = vpop.f32.mrf.mxu0  ;;  %v22018_v22 = vpop.f32.mrf.mxu1 }
 0x3d0   : > { %24917 = vst [vmem:[#allocation98_spill] sm:$0xff] %v22016_v62 }
 0x3d1   : > { %v22020_v24 = vpop.f32.mrf.mxu0  ;;  %v16630_v0 = vpop.f32.mrf.mxu1 }
 0x3d2   : > { %24918 = vst [vmem:[#allocation99_spill] sm:$0xff] %v22020_v24  ;;  %v22025_v51 = vadd.f32 %v16630_v0, %v21865_v49 }
 0x3d3   : > { %v22022_v38 = vpop.f32.mrf.mxu0  ;;  %v8008_v63 = vpop.f32.mrf.mxu1 }
 0x3d4   : > { %24919 = vst [vmem:[#allocation100_spill] sm:$0xff] %v22022_v38  ;;  %24920 = vst [vmem:[#allocation101_spill] sm:$0xff] %v22025_v51  ;;  %v22030_v3 = vadd.f32 %v8008_v63, %v21871_v52 }
 0x3d5   : > { %v22027_v30 = vpop.f32.mrf.mxu0  ;;  %v16631_v8 = vpop.f32.mrf.mxu1 }
 0x3d6   : > { %v22035_v27 = vadd.f32 %v16631_v8, %v21874_v28  ;;  %v22054_v28 = vld [vmem:[%s24234_s6 + $0xf8] sm:$0xff]  }
 0x3d7   : > { %v22032_v2 = vpop.f32.mrf.mxu0  ;;  %v22037_v43 = vpop.f32.mrf.mxu1  ;;  %24925 = vst [vmem:[#allocation106_spill] sm:$0xff] %v22054_v28  ;;  %16916 = vmatprep.subr.bf16.mxu1 %v22054_v28 }
 0x3d8   : > { %24921 = vst [vmem:[#allocation102_spill] sm:$0xff] %v22035_v27 }
 0x3d9   : > { %v22039_v62 = vpop.f32.mrf.mxu0  ;;  %v16634_v38 = vpop.f32.mrf.mxu1 }
 0x3da   : > { %v22044_v49 = vadd.f32 %v16634_v38, %v21884_v7 }
 0x3db   : > { %v22041_v24 = vpop.f32.mrf.mxu0  ;;  %v8024_v0 = vpop.f32.mrf.mxu1 }
 0x3dc   : > { %24922 = vst [vmem:[#allocation103_spill] sm:$0xff] %v22044_v49  ;;  %v22049_v52 = vadd.f32 %v8024_v0, %v21893_v21 }
 0x3dd   : > { %v22046_v51 = vpop.f32.mrf.mxu0  ;;  %v16635_v63 = vpop.f32.mrf.mxu1 }
 0x3de   : > { %24923 = vst [vmem:[#allocation104_spill] sm:$0xff] %v22046_v51  ;;  %24924 = vst [vmem:[#allocation105_spill] sm:$0xff] %v22049_v52  ;;  %v22059_v27 = vadd.f32 %v16635_v63, %v21896_v1 }
 0x3df   : > { %v22056_v8 = vpop.f32.mrf.mxu0  ;;  %v22062_v7 = vpop.f32.mrf.mxu1 }
 0x3e0   : > { %24926 = vst [vmem:[#allocation107_spill] sm:$0xff] %v22056_v8  ;;  %24927 = vst [vmem:[#allocation108_spill] sm:$0xff] %v22059_v27 }
 0x3e1   : > { %24928 = vst [vmem:[#allocation109_spill] sm:$0xff] %v22062_v7  ;;  %v22064_v38 = vpop.f32.mrf.mxu0  ;;  %v16638_v49 = vpop.f32.mrf.mxu1 }
 0x3e2   : > { %24929 = vst [vmem:[#allocation110_spill] sm:$0xff] %v22064_v38  ;;  %v22069_v0 = vadd.f32 %v16638_v49, %v21903_v42 }
 0x3e3   : > { %v22066_v21 = vpop.f32.mrf.mxu0  ;;  %v8040_v52 = vpop.f32.mrf.mxu1 }
 0x3e4   : > { %24930 = vst [vmem:[#allocation111_spill] sm:$0xff] %v22066_v21  ;;  %24931 = vst [vmem:[#allocation112_spill] sm:$0xff] %v22069_v0  ;;  %v22074_v8 = vadd.f32 %v8040_v52, %v21915_v9 }
 0x3e5   : > { %v22071_v51 = vpop.f32.mrf.mxu0  ;;  %v16639_v1 = vpop.f32.mrf.mxu1 }
 0x3e6   : > { %24932 = vst [vmem:[#allocation113_spill] sm:$0xff] %v22074_v8  ;;  %v22079_v28 = vadd.f32 %v16639_v1, %v21918_v4 }
 0x3e7   : > { %v22076_v63 = vpop.f32.mrf.mxu0  ;;  %v22081_v27 = vpop.f32.mrf.mxu1 }
 0x3e8   : > { %24933 = vst [vmem:[#allocation114_spill] sm:$0xff] %v22079_v28 }
 0x3e9   : > { %v22083_v7 = vpop.f32.mrf.mxu0  ;;  %v16642_v21 = vpop.f32.mrf.mxu1 }
 0x3ea   : > { %24934 = vst [vmem:[#allocation115_spill] sm:$0xff] %v22083_v7  ;;  %v22088_v42 = vadd.f32 %v16642_v21, %v21925_v20 }
 0x3eb   : > { %v22085_v38 = vpop.f32.mrf.mxu0  ;;  %v8056_v49 = vpop.f32.mrf.mxu1 }
 0x3ec   : > { %24935 = vst [vmem:[#allocation116_spill] sm:$0xff] %v22085_v38  ;;  %24936 = vst [vmem:[#allocation117_spill] sm:$0xff] %v22088_v42  ;;  %v22093_v9 = vadd.f32 %v8056_v49, %v21928_v36 }
 0x3ed   : > { %v22090_v0 = vpop.f32.mrf.mxu0  ;;  %v16643_v52 = vpop.f32.mrf.mxu1 }
 0x3ee   : > { %24937 = vst [vmem:[#allocation118_spill] sm:$0xff] %v22093_v9  ;;  %v22098_v4 = vadd.f32 %v16643_v52, %v21940_v34 }
 0x3ef   : > { %v22095_v8 = vpop.f32.mrf.mxu0  ;;  %v22100_v1 = vpop.f32.mrf.mxu1 }
 0x3f0   : > { %24938 = vst [vmem:[#allocation119_spill] sm:$0xff] %v22098_v4 }
 0x3f1   : > { %v22102_v28 = vpop.f32.mrf.mxu0  ;;  %v16646_v38 = vpop.f32.mrf.mxu1 }
 0x3f2   : > { %24939 = vst [vmem:[#allocation120_spill] sm:$0xff] %v22102_v28  ;;  %v22107_v20 = vadd.f32 %v16646_v38, %v21947_v25 }
 0x3f3   : > { %v22104_v7 = vpop.f32.mrf.mxu0  ;;  %v8072_v21 = vpop.f32.mrf.mxu1 }
 0x3f4   : > { %24940 = vst [vmem:[#allocation121_spill] sm:$0xff] %v22104_v7  ;;  %24941 = vst [vmem:[#allocation122_spill] sm:$0xff] %v22107_v20  ;;  %v22112_v36 = vadd.f32 %v8072_v21, %v21953_v47  ;;  %v9387_v20 = vld [vmem:[#allocation3 + $0x8] sm:$0xf]  ;;  %v9386_v47 = vld [vmem:[#allocation3 + $0x4] sm:$0xc] }
 0x3f5   : > { %v22109_v42 = vpop.f32.mrf.mxu0  ;;  %v16647_v49 = vpop.f32.mrf.mxu1 }
 0x3f6   : > { %24942 = vst [vmem:[#allocation123_spill] sm:$0xff] %v22112_v36  ;;  %v22117_v34 = vadd.f32 %v16647_v49, %v21961_v33 }
 0x3f7   : > { %v22114_v9 = vpop.f32.mrf.mxu0  ;;  %v22119_v52 = vpop.f32.mrf.mxu1 }
 0x3f8   : > { %24943 = vst [vmem:[#allocation124_spill] sm:$0xff] %v22117_v34  ;;  %24944 = vst [vmem:[#allocation125_spill] sm:$0xff] %v22119_v52 }
 0x3f9   : > { %v22121_v4 = vpop.f32.mrf.mxu0  ;;  %v16650_v7 = vpop.f32.mrf.mxu1 }
 0x3fa   : > { %24945 = vst [vmem:[#allocation126_spill] sm:$0xff] %v22121_v4  ;;  %v22126_v25 = vadd.f32 %v16650_v7, %v21969_v13  ;;  %v14571_v4 = vcombine.low %v9386_v47, %v9387_v20  ;;  %v6798_v7 = vadd.f32 %v21688_v35, %v21673_v10  ;;  %v6814_v35 = vadd.f32 %v21753_v12, %v21741_v53 }
 0x3fb   : > { %v22123_v28 = vpop.f32.mrf.mxu0  ;;  %v8088_v38 = vpop.f32.mrf.mxu1 }
 0x3fc   : > { %24946 = vst [vmem:[#allocation127_spill] sm:$0xff] %v22123_v28  ;;  %24947 = vst [vmem:[#allocation128_spill] sm:$0xff] %v22126_v25  ;;  %v22131_v36 = vadd.f32 %v8088_v38, %v21972_v58  ;;  %v24949_v28 = vld [vmem:[#allocation83_spill] sm:$0xff]  ;;  %v6802_v25 = vadd.f32 %v21705_v50, %v21694_v55  ;;  %v6806_v58 = vadd.f32 %v21721_v39, %v21709_v37  ;;  %v9837_v10 = vshll.u32 %v14571_v4, 16  ;;  %v24950_v55 = vld [vmem:[#allocation81_spill] sm:$0xff] }
 0x3fd   : > { %v22128_v21 = vpop.f32.mrf.mxu0  ;;  %v16651_v33 = vpop.f32.mrf.mxu1  ;;  %v5841_v13 = vadd.f32 %v21667_v16, %v24949_v28  ;;  %v6810_v38 = vadd.f32 %v21737_v48, %v21725_v6  ;;  %v9439_v16 = vld [vmem:[#allocation3 + $0x4] sm:$0x8]  ;;  %v9834_v28 = vshrl.u32 %v14571_v4, 16  ;;  %v6818_v50 = vadd.f32 %v21772_v46, %v24950_v55  ;;  %v24951_v37 = vld [vmem:[#allocation84_spill] sm:$0xff]  ;;  %v24952_v6 = vld [vmem:[#allocation82_spill] sm:$0xff] }
 0x3fe   : > { %v22136_v34 = vadd.f32 %v16651_v33, %v21975_v61  ;;  %v6822_v39 = vadd.f32 %v24951_v37, %v21776_v56  ;;  %v6826_v48 = vadd.f32 %v21810_v19, %v24952_v6  ;;  %v7120_v53 = vadd.f32 %v21863_v31, %v6806_v58  ;;  %v24956_v58 = vld [vmem:[#allocation80_spill] sm:$0xff] }
 0x3ff   : > { %v22133_v49 = vpop.f32.mrf.mxu0  ;;  %v22138_v52 = vpop.f32.mrf.mxu1  ;;  %v6234_v47 = vadd.f32 %v21813_v18, %v5841_v13  ;;  %v7124_v12 = vadd.f32 %v21879_v57, %v6810_v38  ;;  %v7128_v46 = vadd.f32 %v21901_v23, %v6814_v35  ;;  %v22173_v55 = vcombine.low %v9439_v16, %v9387_v20  ;;  %v24958_v16 = vld [vmem:[#allocation86_spill] sm:$0xff] }
 0x400   : > { %24948 = vst [vmem:[#allocation129_spill] sm:$0xff] %v22136_v34  ;;  %v7132_v19 = vadd.f32 %v21923_v15, %v6818_v50  ;;  %v7136_v20 = vadd.f32 %v24956_v58, %v6822_v39  ;;  %v24957_v15 = vld [vmem:[#allocation87_spill] sm:$0xff] }
 0x401   : > { %v16654_v61 = vpop.f32.mrf.mxu1  ;;  %v22151_v33 = vpop.f32.mrf.mxu0  ;;  %v6830_v13 = vadd.f32 %v21825_v11, %v6234_v47  ;;  %v7567_v47 = vadd.f32 %v24957_v15, %v7124_v12  ;;  %v7571_v35 = vadd.f32 %v24958_v16, %v7128_v46  ;;  %v22204_v39 = vld [vmem:[%s24233_s5] ss:$0 sm:$0xff]  ;;  %v24988_v12 = vld [vmem:[#allocation9_spill] sm:$0xff] }
 0x402   : > { %v22154_v34 = vadd.f32 %v16654_v61, %v21982_v40  ;;  %v7112_v40 = vadd.f32 %v21828_v41, %v6798_v7  ;;  %v7116_v61 = vadd.f32 %v21847_v59, %v6802_v25  ;;  %v22181_v41 = vrot.slane %v9834_v28, 2  ;;  %v24954_v25 = vld [vmem:[#allocation88_spill] sm:$0xff]  ;;  %v24955_v7 = vld [vmem:[#allocation85_spill] sm:$0xff]  ;;  %v24966_v58 = vld [vmem:[#allocation99_spill] sm:$0xff] }
 0x403   : > { %v8104_v18 = vpop.f32.mrf.mxu1  ;;  %v22176_v37 = vpop.f32.mrf.mxu0  ;;  %v22183_v59 = vrot.slane %v9837_v10, 3  ;;  %v7563_v23 = vadd.f32 %v24955_v7, %v7120_v53  ;;  %v8456_v28 = vadd.f32 %v22001_v29, %v21985_v60  ;;  %v24960_v10 = vld [vmem:[#allocation91_spill] sm:$0xff]  ;;  %v8454_v60 = vadd.f32 %v22003_v26, %v21990_v45  ;;  %v24965_v26 = vld [vmem:[#allocation96_spill] sm:$0xff] }
 0x404   : > { %v22168_v4 = vadd.f32 %v8104_v18, %v21987_v5  ;;  %v24953_v5 = vld [vmem:[#allocation89_spill] sm:$0xff]  ;;  %v7559_v57 = vadd.f32 %v24954_v25, %v7116_v61  ;;  %v22197_v6 = vadd.f32 %v24960_v10, %v7136_v20  ;;  %v24961_v18 = vld [vmem:[#allocation92_spill] sm:$0xff]  ;;  %v7144_v61 = vadd.f32 %v21980_v44, %v6830_v13  ;;  %v24964_v25 = vld [vmem:[#allocation95_spill] sm:$0xff] }
 0x405   : > { %v16655_v56 = vpop.f32.mrf.mxu1  ;;  %v7555_v31 = vadd.f32 %v24953_v5, %v7112_v40  ;;  %v7140_v40 = vadd.f32 %v24961_v18, %v6826_v48  ;;  %v22210_v29 = vpop.f32.mrf.mxu0  ;;  %v24962_v44 = vld [vmem:[#allocation93_spill] sm:$0xff]  ;;  %v8457_v7 = vadd.f32 %v22008_v14, %v24964_v25  ;;  %v8460_v20 = vadd.f32 %v24966_v58, %v24965_v26  ;;  %v24969_v18 = vld [vmem:[#allocation98_spill] sm:$0xff]  ;;  %v24978_v26 = vld [vmem:[#allocation111_spill] sm:$0xff] }
 0x406   : > { %v22179_v11 = vadd.f32 %v16655_v56, %v21992_v54  ;;  %v24959_v54 = vld [vmem:[#allocation90_spill] sm:$0xff]  ;;  %v8128_v14 = vadd.f32 %v22037_v43, %v7563_v23  ;;  %v24974_v23 = vld [vmem:[#allocation103_spill] sm:$0xff] }
 0x407   : > { %v22189_v38 = vpop.f32.mrf.mxu1  ;;  %v7575_v50 = vadd.f32 %v24959_v54, %v7132_v19  ;;  %v8120_v46 = vadd.f32 %v21999_v17, %v7555_v31  ;;  %v22215_v13 = vadd.f32 %v24962_v44, %v7140_v40  ;;  %v24963_v19 = vld [vmem:[#allocation94_spill] sm:$0xff]  ;;  %v8124_v17 = vadd.f32 %v22018_v22, %v7559_v57  ;;  %v24967_v54 = vld [vmem:[#allocation97_spill] sm:$0xff] }
 0x408   : > { %v22218_v5 = vadd.f32 %v24963_v19, %v7144_v61  ;;  %v8461_v40 = vadd.f32 %v22027_v30, %v24969_v18  ;;  %v24970_v57 = vld [vmem:[#allocation101_spill] sm:$0xff]  ;;  %v24971_v44 = vld [vmem:[#allocation102_spill] sm:$0xff]  ;;  %v24972_v30 = vld [vmem:[#allocation104_spill] sm:$0xff] }
 0x409   : > { %v16726_v53 = vpop.f32.mrf.mxu1  ;;  %v8455_v45 = vadd.f32 %v22013_v32, %v8120_v46  ;;  %v8459_v61 = vadd.f32 %v22032_v2, %v8124_v17  ;;  %v22235_v32 = vadd.f32 %v22039_v62, %v24970_v57  ;;  %v22241_v46 = vpop.f32.mrf.mxu0  ;;  %v22246_v19 = vadd.f32 %v24972_v30, %v24971_v44  ;;  %v24973_v2 = vld [vmem:[#allocation107_spill] sm:$0xff]  ;;  %v24975_v25 = vld [vmem:[#allocation110_spill] sm:$0xff]  ;;  %v24976_v17 = vld [vmem:[#allocation109_spill] sm:$0xff] }
 0x40a   : > { %v9048_v56 = vadd.f32 %v16726_v53, %v8456_v28  ;;  %v24968_v28 = vld [vmem:[#allocation100_spill] sm:$0xff]  ;;  %v22239_v53 = vadd.f32 %v22041_v24, %v22030_v3  ;;  %v22249_v43 = vadd.f32 %v24973_v2, %v8128_v14  ;;  %v22253_v62 = vadd.f32 %v24975_v25, %v24974_v23  ;;  %v24977_v3 = vld [vmem:[#allocation105_spill] sm:$0xff]  ;;  %v24981_v23 = vld [vmem:[#allocation115_spill] sm:$0xff] }
 0x40b   : > { %v8903_v31 = vpop.f32.mrf.mxu1  ;;  %v8458_v10 = vadd.f32 %v24968_v28, %v24967_v54  ;;  %v22258_v58 = vadd.f32 %v24978_v26, %v24977_v3  ;;  %v24979_v28 = vld [vmem:[#allocation108_spill] sm:$0xff]  ;;  %v22270_v44 = vpop.f32.mrf.mxu0  ;;  %v24986_v26 = vld [vmem:[#allocation18_spill] sm:$0xff] }
 0x40c   : > { %v9091_v15 = vadd.f32 %v22204_v39, %v9048_v56  ;;  %v9046_v16 = vadd.f32 %v8903_v31, %v8454_v60  ;;  %v8132_v31 = vadd.f32 %v24976_v17, %v7567_v47  ;;  %v22263_v18 = vadd.f32 %v22071_v51, %v24979_v28  ;;  %v24982_v51 = vld [vmem:[#allocation113_spill] sm:$0xff]  ;;  %v24983_v17 = vld [vmem:[#allocation116_spill] sm:$0xff] }
 0x40d   : > { %v16727_v22 = vpop.f32.mrf.mxu1  ;;  %v10268_v47 = vshrl.u32 %v22173_v55, 16 }
 0x40e   : > { %v9089_v60 = vadd.f32 %v22204_v39, %v9046_v16  ;;  %v9049_v56 = vadd.f32 %v16727_v22, %v8457_v7  ;;  %v9127_v16 = vmax.f32 %v9091_v15, 0.0  ;;  %v22266_v14 = vadd.f32 %v22076_v63, %v8132_v31  ;;  %v24984_v31 = vld [vmem:[#allocation114_spill] sm:$0xff] }
 0x40f   : > { %v8906_v24 = vpop.f32.mrf.mxu1  ;;  %v8136_v22 = vadd.f32 %v22081_v27, %v7571_v35  ;;  %v22279_v63 = vadd.f32 %v24983_v17, %v24982_v51  ;;  %v22283_v27 = vadd.f32 %v22090_v0, %v24984_v31  ;;  %v22293_v51 = vrot.slane %v10268_v47, 3  ;;  %v8439_v0 = vpop.f32.mrf.mxu0  ;;  %v24987_v17 = vld [vmem:[#allocation8_spill] sm:$0xff] }
 0x410   : > { %v9092_v7 = vadd.f32 %v22204_v39, %v9049_v56  ;;  %v9047_v54 = vadd.f32 %v8906_v24, %v8455_v45  ;;  %v9125_v30 = vmax.f32 %v9089_v60, 0.0  ;;  %v24980_v45 = vld [vmem:[#allocation112_spill] sm:$0xff]  ;;  %v10271_v24 = vshll.u32 %v22173_v55, 16  ;;  %v24985_v60 = vld [vmem:[#allocation19_spill] sm:$0xff] }
 0x411   : > { %v16730_v57 = vpop.f32.mrf.mxu1  ;;  %v22275_v25 = vadd.f32 %v24981_v23, %v24980_v45  ;;  %v9172_v3 = vmul.f32 %v9127_v16, %v24985_v60  ;;  %v22289_v28 = vadd.f32 %v22095_v8, %v8136_v22  ;;  %v24991_v8 = vld [vmem:[#allocation118_spill] sm:$0xff]  ;;  %v24992_v22 = vld [vmem:[#allocation121_spill] sm:$0xff] }
 0x412   : > { %v9128_v2 = vmax.f32 %v9092_v7, 0.0  ;;  %v9090_v15 = vadd.f32 %v22204_v39, %v9047_v54  ;;  %v9052_v56 = vadd.f32 %v16730_v57, %v8460_v20  ;;  %v8140_v57 = vadd.f32 %v22100_v1, %v7575_v50 }
 0x413   : > { %v8919_v35 = vpop.f32.mrf.mxu1  ;;  %v9170_v31 = vmul.f32 %v9125_v30, %v24987_v17  ;;  %v22304_v1 = vadd.f32 %v24992_v22, %v24991_v8  ;;  %v22306_v47 = vrot.slane %v10271_v24, 4  ;;  %v24995_v24 = vld [vmem:[#allocation122_spill] sm:$0xff] }
 0x414   : > { %v9173_v7 = vmul.f32 %v9128_v2, %v24986_v26  ;;  %v9126_v20 = vmax.f32 %v9090_v15, 0.0  ;;  %v9050_v54 = vadd.f32 %v8919_v35, %v8458_v10  ;;  %v9095_v45 = vadd.f32 %v22204_v39, %v9052_v56  ;;  %v24989_v15 = vld [vmem:[#allocation117_spill] sm:$0xff]  ;;  %v24990_v10 = vld [vmem:[#allocation120_spill] sm:$0xff]  ;;  %v24993_v26 = vld [vmem:[#allocation119_spill] sm:$0xff] }
 0x415   : > { %v16731_v23 = vpop.f32.mrf.mxu1  ;;  %v22300_v35 = vadd.f32 %v24990_v10, %v24989_v15  ;;  %v22310_v30 = vadd.f32 %v22109_v42, %v24993_v26  ;;  %v24996_v22 = vld [vmem:[#allocation126_spill] sm:$0xff]  ;;  %v24997_v42 = vld [vmem:[#allocation123_spill] sm:$0xff] }
 0x416   : > { %v15002_v48 = vpack.c.bf16 %v9173_v7, %v9172_v3  ;;  %v9171_v16 = vmul.f32 %v9126_v20, %v24988_v12  ;;  %v9093_v2 = vadd.f32 %v22204_v39, %v9050_v54  ;;  %v9053_v50 = vadd.f32 %v16731_v23, %v8461_v40  ;;  %v24994_v54 = vld [vmem:[#allocation125_spill] sm:$0xff]  ;;  %v24998_v26 = vld [vmem:[#allocation127_spill] sm:$0xff] }
 0x417   : > { %v8922_v56 = vpop.f32.mrf.mxu1  ;;  %v22313_v3 = vadd.f32 %v22114_v9, %v8140_v57  ;;  %v8144_v15 = vadd.f32 %v24994_v54, %v22197_v6  ;;  %v9131_v10 = vmax.f32 %v9095_v45, 0.0  ;;  %v22320_v60 = vadd.f32 %v24996_v22, %v24995_v24  ;;  %v16707_v9 = vpop.f32.mrf.mxu0  ;;  %v24999_v6 = vld [vmem:[#allocation124_spill] sm:$0xff]  ;;  %v25004_v22 = vld [vmem:[#allocation14_spill] sm:$0xff] }
 0x418   : > { %15097 = vst [vmem:[#allocation3 + $0x18] sm:$0xff] %v15002_v48   ;;  %v14997_v7 = vpack.c.bf16 %v9171_v16, %v9170_v31  ;;  %v9051_v20 = vadd.f32 %v8922_v56, %v8459_v61  ;;  %v9129_v8 = vmax.f32 %v9093_v2, 0.0  ;;  %v9096_v40 = vadd.f32 %v22204_v39, %v9053_v50  ;;  %v25000_v50 = vld [vmem:[#allocation128_spill] sm:$0xff] }
 0x419   : > { %v16734_v23 = vpop.f32.mrf.mxu1  ;;  %v22324_v12 = vadd.f32 %v24998_v26, %v24997_v42  ;;  %v22330_v57 = vadd.f32 %v22128_v21, %v24999_v6  ;;  %v22333_v45 = vadd.f32 %v22133_v49, %v8144_v15  ;;  %v8148_v31 = vadd.f32 %v22138_v52, %v22215_v13  ;;  %v25001_v49 = vld [vmem:[#allocation36_spill] sm:$0xff]  ;;  %v25003_v52 = vld [vmem:[#allocation29_spill] sm:$0xff]  ;;  %v8442_v24 = vpop.f32.mrf.mxu0 }
 0x41a   : > { %15096 = vst [vmem:[#allocation3 + $0x10] sm:$0xff] %v14997_v7   ;;  %v9094_v48 = vadd.f32 %v22204_v39, %v9051_v20  ;;  %v9056_v61 = vadd.f32 %v16734_v23, %v22235_v32  ;;  %v9132_v16 = vmax.f32 %v9096_v40, 0.0  ;;  %v22339_v56 = vadd.f32 %v22151_v33, %v25000_v50  ;;  %v25002_v15 = vld [vmem:[#allocation28_spill] sm:$0xff] }
 0x41b   : > { %v8935_v2 = vpop.f32.mrf.mxu1  ;;  %v22345_v21 = vadd.f32 %v22176_v37, %v22131_v36  ;;  %v9176_v54 = vmul.f32 %v9131_v10, %v25001_v49  ;;  %v9174_v23 = vmul.f32 %v9129_v8, %v25002_v15  ;;  %v22358_v36 = vadd.f32 %v22241_v46, %v8148_v31 }
 0x41c   : > { %v9130_v7 = vmax.f32 %v9094_v48, 0.0  ;;  %v9099_v20 = vadd.f32 %v22204_v39, %v9056_v61  ;;  %v9054_v32 = vadd.f32 %v8935_v2, %v22239_v53  ;;  %v9177_v13 = vmul.f32 %v9132_v16, %v25003_v52  ;;  %v25005_v53 = vld [vmem:[#allocation129_spill] sm:$0xff] }
 0x41d   : > { %v16735_v40 = vpop.f32.mrf.mxu1  ;;  %v22355_v61 = vadd.f32 %v22210_v29, %v25005_v53  ;;  %v8152_v37 = vadd.f32 %v22189_v38, %v22218_v5  ;;  %v22364_v6 = vadd.f32 %v22270_v44, %v22154_v34  ;;  %v22368_v50 = vadd.f32 %v8439_v0, %v22168_v4  ;;  %v25006_v34 = vld [vmem:[#allocation17_spill] sm:$0xff] }
 0x41e   : > { %v9175_v33 = vmul.f32 %v9130_v7, %v25004_v22  ;;  %v9135_v42 = vmax.f32 %v9099_v20, 0.0  ;;  %v9097_v26 = vadd.f32 %v22204_v39, %v9054_v32  ;;  %v9057_v48 = vadd.f32 %v16735_v40, %v22246_v19  ;;  %v25007_v7 = vld [vmem:[#allocation37_spill] sm:$0xff] }
 0x41f   : > { %v15012_v10 = vpack.c.bf16 %v9177_v13, %v9176_v54  ;;  %v8938_v8 = vpop.f32.mrf.mxu1  ;;  %v22371_v29 = vadd.f32 %v16707_v9, %v22179_v11  ;;  %v22373_v46 = vadd.f32 %v8442_v24, %v8152_v37  ;;  %v25008_v13 = vld [vmem:[#allocation46_spill] sm:$0xff] }
 0x420   : > { %v15007_v16 = vpack.c.bf16 %v9175_v33, %v9174_v23  ;;  %v9133_v2 = vmax.f32 %v9097_v26, 0.0  ;;  %v9100_v19 = vadd.f32 %v22204_v39, %v9057_v48  ;;  %v9055_v38 = vadd.f32 %v8938_v8, %v22249_v43 }
 0x421   : > { %15099 = vst [vmem:[#allocation3 + $0x28] sm:$0xff] %v15012_v10   ;;  %v16738_v5 = vpop.f32.mrf.mxu1  ;;  %v22376_v31 = vld [vmem:[#allocation3 + $0xc] sm:$0xff]   ;;  %v9180_v44 = vmul.f32 %v9135_v42, %v25006_v34  ;;  %v22381_v0 = vld [vmem:[#allocation3 + $0x14] sm:$0xff]   ;;  %v25009_v48 = vrot.slane %v22173_v55, 3 }
 0x422   : > { %15098 = vst [vmem:[#allocation3 + $0x20] sm:$0xff] %v15007_v16   ;;  %v9178_v20 = vmul.f32 %v9133_v2, %v25007_v7  ;;  %v9136_v32 = vmax.f32 %v9100_v19, 0.0  ;;  %v9060_v4 = vadd.f32 %v16738_v5, %v22253_v62  ;;  %v9098_v11 = vadd.f32 %v22204_v39, %v9055_v38  ;;  %v17651_v19 = vld [vmem:[%s24234_s6 + $0xb0] sm:$0xff]   ;;  %v25010_v55 = vld [vmem:[#allocation16_spill] sm:$0xff] }
 0x423   : > { %v8951_v9 = vpop.f32.mrf.mxu1  ;;  %v9551_v54 = vrot.slane %v22376_v31, 3  ;;  %v9842_v43 = vshrl.u32 %v22376_v31, 16  ;;  %v24447_v23 = vshll.u32 %v22376_v31, 16  ;;  %v9553_v42 = vrot.slane %v22381_v0, 3 }
 0x424   : > { %v9181_v40 = vmul.f32 %v9136_v32, %v25008_v13  ;;  %v9103_v24 = vadd.f32 %v22204_v39, %v9060_v4  ;;  %v9058_v33 = vadd.f32 %v8951_v9, %v22258_v58  ;;  %v9134_v62 = vmax.f32 %v9098_v11, 0.0 }
 0x425   : > { %v16739_v26 = vpop.f32.mrf.mxu1  ;;  %v9552_v53 = vsel %vm576_vm0, %v25009_v48, %v9551_v54  ;;  %v9844_v37 = vrot.slane %v9842_v43, 2  ;;  %v9847_v10 = vrot.slane %v24447_v23, 3  ;;  %v9554_v32 = vsel %vm576_vm0, %v9551_v54, %v9553_v42  ;;  %v25012_v48 = vld [vmem:[#allocation79_spill] sm:$0xff] }
 0x426   : > { %v15022_v8 = vpack.c.bf16 %v9181_v40, %v9180_v44  ;;  %v9139_v16 = vmax.f32 %v9103_v24, 0.0  ;;  %v9101_v2 = vadd.f32 %v22204_v39, %v9058_v33  ;;  %v9061_v58 = vadd.f32 %v16739_v26, %v22263_v18  ;;  %16776 = vmatprep.mubr.bf16.mxu0 %v9552_v53  ;;  %v25011_v44 = vld [vmem:[#allocation51_spill] sm:$0xff] }
 0x427   : > { %v9179_v38 = vmul.f32 %v9134_v62, %v25010_v55  ;;  %v8954_v5 = vpop.f32.mrf.mxu1  ;;  %v9848_v4 = vor.u32 %v9847_v10, %v9844_v37  ;;  %v24446_v11 = vshrl.u32 %v22381_v0, 16  ;;  %16777 = vmatmul.mubr.bf16.vlgmr.msra.gmra.mxu0 %v9554_v32  ;;  %v25013_v62 = vor.u32 %v22183_v59, %v22181_v41  ;;  %v17654_v41 = vld [vmem:[%s24234_s6 + $0xa8] sm:$0xff]  }
 0x428   : > { %15101 = vst [vmem:[#allocation3 + $0x38] sm:$0xff] %v15022_v8   ;;  %v9184_v9 = vmul.f32 %v9139_v16, %v25011_v44  ;;  %v9137_v40 = vmax.f32 %v9101_v2, 0.0  ;;  %v9104_v24 = vadd.f32 %v22204_v39, %v9061_v58  ;;  %v9059_v18 = vadd.f32 %v8954_v5, %v22266_v14  ;;  %16865 = vmatpush3.bf16.msra.mxu0 %v25012_v48  ;;  %v25014_v14 = vld [vmem:[#allocation34_spill] sm:$0xff] }
 0x429   : > { %v15017_v33 = vpack.c.bf16 %v9179_v38, %v9178_v20  ;;  %v16742_v26 = vpop.f32.mrf.mxu1  ;;  %v9849_v54 = vsel %vm860_vm1, %v25013_v62, %v9848_v4  ;;  %v9853_v53 = vrot.slane %v24446_v11, 2  ;;  %v24445_v37 = vshll.u32 %v22381_v0, 16  ;;  %v22417_v10 = vld [vmem:[#allocation3 + $0x1c] sm:$0xff]   ;;  %v22419_v8 = vld [vmem:[#allocation3 + $0x24] sm:$0xff]   ;;  %16866 = vmatprep.subr.bf16.mxu0 %v17651_v19 }
 0x42a   : > { %v9182_v16 = vmul.f32 %v9137_v40, %v25014_v14  ;;  %v9140_v20 = vmax.f32 %v9104_v24, 0.0  ;;  %v9102_v2 = vadd.f32 %v22204_v39, %v9059_v18  ;;  %v9064_v58 = vadd.f32 %v16742_v26, %v22275_v25  ;;  %16828 = vmatprep.mubr.bf16.mxu1 %v9849_v54  ;;  %v25015_v24 = vld [vmem:[#allocation53_spill] sm:$0xff] }
 0x42b   : > { %15100 = vst [vmem:[#allocation3 + $0x30] sm:$0xff] %v15017_v33   ;;  %v8967_v59 = vpop.f32.mrf.mxu1  ;;  %v9856_v38 = vrot.slane %v24445_v37, 3  ;;  %v9555_v5 = vrot.slane %v22417_v10, 3  ;;  %v24449_v32 = vrot.slane %v22419_v8, 3  ;;  %v24448_v40 = vshrl.u32 %v22417_v10, 16 }
 0x42c   : > { %v9185_v18 = vmul.f32 %v9140_v20, %v25015_v24  ;;  %v9138_v25 = vmax.f32 %v9102_v2, 0.0  ;;  %v9107_v26 = vadd.f32 %v22204_v39, %v9064_v58  ;;  %v9062_v48 = vadd.f32 %v8967_v59, %v22279_v63  ;;  %16867 = vmatpush3.bf16.msra.mxu0 %v17651_v19  ;;  %v17657_v20 = vld [vmem:[%s24234_s6 + $0xa0] sm:$0xff]   ;;  %v25016_v58 = vld [vmem:[#allocation41_spill] sm:$0xff] }
 0x42d   : > { %v9857_v62 = vor.u32 %v9856_v38, %v9853_v53  ;;  %v16743_v54 = vpop.f32.mrf.mxu1  ;;  %v9556_v33 = vsel %vm576_vm0, %v9553_v42, %v9555_v5  ;;  %v9558_v37 = vsel %vm576_vm0, %v9555_v5, %v24449_v32  ;;  %v9862_v11 = vrot.slane %v24448_v40, 2  ;;  %16868 = vmatprep.subr.bf16.mxu0 %v17654_v41  ;;  %v17667_v42 = vld [vmem:[%s24234_s6 + $0xf0] sm:$0xff]  }
 0x42e   : > { %v15032_v2 = vpack.c.bf16 %v9185_v18, %v9184_v9  ;;  %v9183_v23 = vmul.f32 %v9138_v25, %v25016_v58  ;;  %v9143_v63 = vmax.f32 %v9107_v26, 0.0  ;;  %v9105_v53 = vadd.f32 %v22204_v39, %v9062_v48  ;;  %16780 = vmatprep.mubr.bf16.mxu0 %v9556_v33  ;;  %v25017_v25 = vld [vmem:[#allocation23_spill] sm:$0xff] }
 0x42f   : > { %v9858_v19 = vsel %vm860_vm1, %v9848_v4, %v9857_v62  ;;  %v9065_v59 = vadd.f32 %v16743_v54, %v22283_v27  ;;  %v8970_v38 = vpop.f32.mrf.mxu1  ;;  %v24452_v5 = vshll.u32 %v22417_v10, 16  ;;  %v24450_v9 = vshrl.u32 %v22419_v8, 16  ;;  %16781 = vmatmul.mubr.bf16.gmra.mxu0 %v9558_v37 }
 0x430   : > { %15103 = vst [vmem:[#allocation3 + $0x48] sm:$0xff] %v15032_v2   ;;  %v15027_v18 = vpack.c.bf16 %v9183_v23, %v9182_v16  ;;  %v9188_v26 = vmul.f32 %v9143_v63, %v25017_v25  ;;  %v9141_v48 = vmax.f32 %v9105_v53, 0.0  ;;  %16829 = vmatmul.mubr.bf16.vlgmr.msra.gmra.mxu1 %v9858_v19  ;;  %v9063_v33 = vadd.f32 %v8970_v38, %v22289_v28  ;;  %v17660_v23 = vld [vmem:[%s24234_s6 + $0x98] sm:$0xff]  }
 0x431   : > { %v9108_v40 = vadd.f32 %v22204_v39, %v9065_v59  ;;  %v16746_v32 = vpop.f32.mrf.mxu1  ;;  %v9865_v27 = vrot.slane %v24452_v5, 3  ;;  %v9871_v4 = vrot.slane %v24450_v9, 2  ;;  %v24451_v54 = vshll.u32 %v22419_v8, 16  ;;  %16869 = vmatpush3.bf16.msra.mxu0 %v17654_v41  ;;  %v25018_v16 = vld [vmem:[#allocation106_spill] sm:$0xff] }
 0x432   : > { %16917 = vmatpush3.bf16.msra.mxu1 %v25018_v16  ;;  %15102 = vst [vmem:[#allocation3 + $0x40] sm:$0xff] %v15027_v18   ;;  %v25019_v28 = vld [vmem:[#allocation42_spill] sm:$0xff]  ;;  %v9106_v2 = vadd.f32 %v22204_v39, %v9063_v33  ;;  %v9068_v63 = vadd.f32 %v16746_v32, %v22300_v35  ;;  %16870 = vmatprep.subr.bf16.mxu0 %v17657_v20  ;;  %v22472_v41 = vrot.slane %v9842_v43, 3  ;;  %v22476_v16 = vld [vmem:[#allocation3 + $0x34] sm:$0xff]   ;;  %v25020_v32 = vshll.u32 %v22376_v31, 16 }
 0x433   : > { %v9186_v37 = vmul.f32 %v9141_v48, %v25019_v28  ;;  %v22468_v53 = vld [vmem:[#allocation3 + $0x2c] sm:$0xff]   ;;  %16918 = vmatprep.subr.bf16.mxu1 %v17667_v42  ;;  %v9144_v19 = vmax.f32 %v9108_v40, 0.0  ;;  %v8983_v59 = vpop.f32.mrf.mxu1  ;;  %v9866_v38 = vor.u32 %v9865_v27, %v9862_v11  ;;  %v9874_v18 = vrot.slane %v24451_v54, 3  ;;  %v17668_v35 = vld [vmem:[%s24234_s6 + $0xe8] sm:$0xff]  }
 0x434   : > { %v22483_v48 = vrot.slane %v25020_v32, 4  ;;  %v9142_v33 = vmax.f32 %v9106_v2, 0.0  ;;  %v9111_v43 = vadd.f32 %v22204_v39, %v9068_v63  ;;  %v9066_v40 = vadd.f32 %v8983_v59, %v22304_v1  ;;  %v25021_v27 = vld [vmem:[#allocation30_spill] sm:$0xff]  ;;  %v25022_v31 = vld [vmem:[#allocation15_spill] sm:$0xff] }
 0x435   : > { %v9559_v11 = vrot.slane %v22468_v53, 3  ;;  %v9189_v9 = vmul.f32 %v9144_v19, %v25021_v27  ;;  %v9867_v54 = vsel %vm860_vm1, %v9857_v62, %v9866_v38  ;;  %v22490_v5 = vor.u32 %v9874_v18, %v9871_v4  ;;  %v16747_v25 = vpop.f32.mrf.mxu1  ;;  %16871 = vmatpush3.bf16.msra.mxu0 %v17657_v20  ;;  %v17672_v62 = vld [vmem:[%s24234_s6 + $0xe0] sm:$0xff]   ;;  %v25024_v18 = vld [vmem:[#allocation13_spill] sm:$0xff] }
 0x436   : > { %v24453_v28 = vrot.slane %v22476_v16, 3  ;;  %16919 = vmatpush3.bf16.msra.mxu1 %v17667_v42  ;;  %v9187_v32 = vmul.f32 %v9142_v33, %v25022_v31  ;;  %v9147_v2 = vmax.f32 %v9111_v43, 0.0  ;;  %v9109_v63 = vadd.f32 %v22204_v39, %v9066_v40  ;;  %16832 = vmatprep.mubr.bf16.mxu1 %v9867_v54 }
 0x437   : > { %v9069_v1 = vadd.f32 %v16747_v25, %v22310_v30  ;;  %16872 = vmatprep.subr.bf16.mxu0 %v17660_v23  ;;  %v15042_v4 = vpack.c.bf16 %v9189_v9, %v9188_v26  ;;  %v9876_v19 = vsel %vm860_vm1, %v9866_v38, %v22490_v5  ;;  %v8986_v59 = vpop.f32.mrf.mxu1  ;;  %v25023_v20 = vrot.slane %v22419_v8, 3  ;;  %v17664_v30 = vld [vmem:[%s24234_s6 + $0x90] sm:$0xff]   ;;  %16920 = vmatprep.subr.bf16.mxu1 %v17668_v35  ;;  %v22833_v49 = vld [vmem:[#allocation3 + $0x4c] sm:$0xf] }
 0x438   : > { %v9562_v54 = vsel %vm576_vm0, %v9559_v11, %v24453_v28  ;;  %v15037_v25 = vpack.c.bf16 %v9187_v32, %v9186_v37  ;;  %v9192_v9 = vmul.f32 %v9147_v2, %v25024_v18  ;;  %v9145_v26 = vmax.f32 %v9109_v63, 0.0  ;;  %16833 = vmatmul.mubr.bf16.gmra.mxu1 %v9876_v19  ;;  %v25025_v37 = vld [vmem:[#allocation55_spill] sm:$0xff] }
 0x439   : > { %v9560_v42 = vsel %vm576_vm0, %v25023_v20, %v9559_v11  ;;  %v9112_v38 = vadd.f32 %v22204_v39, %v9069_v1  ;;  %15105 = vst [vmem:[#allocation3 + $0x58] sm:$0xff] %v15042_v4   ;;  %v9067_v33 = vadd.f32 %v8986_v59, %v22313_v3  ;;  %v16750_v43 = vpop.f32.mrf.mxu1  ;;  %v24454_v40 = vshrl.u32 %v22468_v53, 16  ;;  %v22516_v28 = vld [vmem:[#allocation3 + $0x3c] sm:$0xff]   ;;  %v22521_v3 = vld [vmem:[#allocation3 + $0x44] sm:$0xff]   ;;  %16873 = vmatpush3.bf16.msra.mxu0 %v17660_v23 }
 0x43a   : > { %16784 = vmatprep.mubr.bf16.mxu0 %v9560_v42  ;;  %v24455_v11 = vshll.u32 %v22468_v53, 16  ;;  %v24456_v20 = vshrl.u32 %v22476_v16, 16  ;;  %16921 = vmatpush3.bf16.msra.mxu1 %v17668_v35  ;;  %15104 = vst [vmem:[#allocation3 + $0x50] sm:$0xff] %v15037_v25   ;;  %v9190_v32 = vmul.f32 %v9145_v26, %v25025_v37  ;;  %v9072_v63 = vadd.f32 %v16750_v43, %v22320_v60  ;;  %v17673_v4 = vld [vmem:[%s24234_s6 + $0xd8] sm:$0xff]   ;;  %v17669_v23 = vld [vmem:[%s24234_s6 + $0x88] sm:$0xff]  }
 0x43b   : > { %16785 = vmatmul.mubr.bf16.gmra.mxu0 %v9562_v54  ;;  %v9148_v2 = vmax.f32 %v9112_v38, 0.0  ;;  %v24459_v1 = vshll.u32 %v22476_v16, 16  ;;  %16922 = vmatprep.subr.bf16.mxu1 %v17672_v62  ;;  %v9110_v19 = vadd.f32 %v22204_v39, %v9067_v33  ;;  %v8999_v59 = vpop.f32.mrf.mxu1  ;;  %v9880_v35 = vrot.slane %v24454_v40, 2  ;;  %v25026_v54 = vld [vmem:[#allocation22_spill] sm:$0xff] }
 0x43c   : > { %v9883_v42 = vrot.slane %v24455_v11, 3  ;;  %v9889_v60 = vrot.slane %v24456_v20, 2  ;;  %16874 = vmatprep.subr.bf16.mxu0 %v17664_v30  ;;  %v9115_v26 = vadd.f32 %v22204_v39, %v9072_v63  ;;  %v9070_v38 = vadd.f32 %v8999_v59, %v22324_v12  ;;  %v17677_v12 = vld [vmem:[%s24234_s6 + $0xd0] sm:$0xff]   ;;  %v25027_v63 = vld [vmem:[#allocation35_spill] sm:$0xff] }
 0x43d   : > { %v9193_v25 = vmul.f32 %v9148_v2, %v25026_v54  ;;  %v9892_v33 = vrot.slane %v24459_v1, 3  ;;  %v9146_v43 = vmax.f32 %v9110_v19, 0.0  ;;  %v16751_v11 = vpop.f32.mrf.mxu1  ;;  %v9563_v18 = vrot.slane %v22516_v28, 3  ;;  %16875 = vmatpush3.bf16.msra.mxu0 %v17664_v30  ;;  %v25029_v30 = vld [vmem:[#allocation32_spill] sm:$0xff]  ;;  %v25034_v54 = vld [vmem:[#allocation66_spill] sm:$0xff] }
 0x43e   : > { %v9884_v40 = vor.u32 %v9883_v42, %v9880_v35  ;;  %v24460_v20 = vrot.slane %v22521_v3, 3  ;;  %16923 = vmatpush3.bf16.msra.mxu1 %v17672_v62  ;;  %v9151_v27 = vmax.f32 %v9115_v26, 0.0  ;;  %v9113_v31 = vadd.f32 %v22204_v39, %v9070_v38  ;;  %16876 = vmatprep.subr.bf16.mxu0 %v17669_v23 }
 0x43f   : > { %v15052_v37 = vpack.c.bf16 %v9193_v25, %v9192_v9  ;;  %v22544_v2 = vor.u32 %v9892_v33, %v9889_v60  ;;  %16924 = vmatprep.subr.bf16.mxu1 %v17673_v4  ;;  %v9191_v19 = vmul.f32 %v9146_v43, %v25027_v63  ;;  %v9073_v35 = vadd.f32 %v16751_v11, %v22330_v57  ;;  %v9002_v62 = vpop.f32.mrf.mxu1  ;;  %v17675_v57 = vld [vmem:[%s24234_s6 + $0x80] sm:$0xff]  }
 0x440   : > { %v9885_v59 = vsel %vm860_vm1, %v22490_v5, %v9884_v40  ;;  %v25028_v9 = vrot.slane %v22476_v16, 3  ;;  %v9196_v60 = vmul.f32 %v9151_v27, %v25029_v30  ;;  %v9149_v25 = vmax.f32 %v9113_v31, 0.0 }
 0x441   : > { %15107 = vst [vmem:[#allocation3 + $0x68] sm:$0xff] %v15052_v37   ;;  %16836 = vmatprep.mubr.bf16.mxu1 %v9885_v59  ;;  %v9894_v26 = vsel %vm860_vm1, %v9884_v40, %v22544_v2  ;;  %v9071_v38 = vadd.f32 %v9002_v62, %v22333_v45  ;;  %v15047_v5 = vpack.c.bf16 %v9191_v19, %v9190_v32  ;;  %v16754_v31 = vpop.f32.mrf.mxu1  ;;  %v24458_v37 = vshrl.u32 %v22516_v28, 16  ;;  %v22568_v33 = vld [vmem:[#allocation3 + $0x4c] sm:$0xff]  }
 0x442   : > { %v9564_v42 = vsel %vm576_vm0, %v25028_v9, %v9563_v18  ;;  %16837 = vmatmul.mubr.bf16.gmra.mxu1 %v9894_v26  ;;  %v9116_v11 = vadd.f32 %v22204_v39, %v9073_v35  ;;  %v9566_v27 = vsel %vm576_vm0, %v9563_v18, %v24460_v20  ;;  %v25030_v40 = vld [vmem:[#allocation38_spill] sm:$0xff]  ;;  %v9076_v59 = vadd.f32 %v16754_v31, %v22339_v56  ;;  %v17678_v26 = vld [vmem:[%s24234_s6 + $0xc8] sm:$0xff]  }
 0x443   : > { %16788 = vmatprep.mubr.bf16.mxu0 %v9564_v42  ;;  %v9194_v45 = vmul.f32 %v9149_v25, %v25030_v40  ;;  %v9114_v43 = vadd.f32 %v22204_v39, %v9071_v38  ;;  %v24457_v32 = vshll.u32 %v22516_v28, 16  ;;  %16925 = vmatpush3.bf16.msra.mxu1 %v17673_v4  ;;  %15106 = vst [vmem:[#allocation3 + $0x60] sm:$0xff] %v15047_v5   ;;  %v9015_v35 = vpop.f32.mrf.mxu1  ;;  %v9898_v18 = vrot.slane %v24458_v37, 2  ;;  %v22588_v38 = vld [vmem:[%s24234_s6 + $0x138] sm:$0xff]  }
 0x444   : > { %16789 = vmatmul.mubr.bf16.gmra.mxu0 %v9566_v27  ;;  %v9152_v19 = vmax.f32 %v9116_v11, 0.0  ;;  %v24461_v62 = vshrl.u32 %v22521_v3, 16  ;;  %v24462_v9 = vshll.u32 %v22521_v3, 16  ;;  %16926 = vmatprep.subr.bf16.mxu1 %v17677_v12  ;;  %v9119_v25 = vadd.f32 %v22204_v39, %v9076_v59  ;;  %v25032_v59 = vld [vmem:[#allocation11_spill] sm:$0xff] }
 0x445   : > { %16877 = vmatpush3.bf16.msra.mxu0 %v17669_v23  ;;  %v9150_v42 = vmax.f32 %v9114_v43, 0.0  ;;  %v9074_v56 = vadd.f32 %v9015_v35, %v22345_v21  ;;  %v9901_v4 = vrot.slane %v24457_v32, 3  ;;  %v25031_v23 = vld [vmem:[#allocation63_spill] sm:$0xff]  ;;  %v16755_v27 = vpop.f32.mrf.mxu1  ;;  %v9567_v31 = vrot.slane %v22568_v33, 3 }
 0x446   : > { %16878 = vmatprep.subr.bf16.mxu0 %v17675_v57  ;;  %v9197_v5 = vmul.f32 %v9152_v19, %v25031_v23  ;;  %v9907_v11 = vrot.slane %v24461_v62, 2  ;;  %v9910_v21 = vrot.slane %v24462_v9, 3  ;;  %v22596_v43 = vld [vmem:[#allocation3 + $0x54] sm:$0xff]   ;;  %v9155_v32 = vmax.f32 %v9119_v25, 0.0 }
 0x447   : > { %v9195_v35 = vmul.f32 %v9150_v42, %v25032_v59  ;;  %v9117_v37 = vadd.f32 %v22204_v39, %v9074_v56  ;;  %v9902_v1 = vor.u32 %v9901_v4, %v9898_v18  ;;  %16927 = vmatpush3.bf16.msra.mxu1 %v17677_v12  ;;  %v9077_v23 = vadd.f32 %v16755_v27, %v22355_v61  ;;  %v9018_v62 = vpop.f32.mrf.mxu1  ;;  %v17681_v12 = vld [vmem:[%s24234_s6 + $0xc0] sm:$0xff]  }
 0x448   : > { %v15062_v20 = vpack.c.bf16 %v9197_v5, %v9196_v60  ;;  %v9911_v19 = vor.u32 %v9910_v21, %v9907_v11  ;;  %v25033_v30 = vrot.slane %v22521_v3, 3  ;;  %v9200_v63 = vmul.f32 %v9155_v32, %v25034_v54  ;;  %16928 = vmatprep.subr.bf16.mxu1 %v17678_v26  ;;  %v25036_v5 = vld [vmem:[#allocation68_spill] sm:$0xff]  ;;  %v22764_v59 = vld [vmem:[#allocation3 + $0x30] sm:$0xf] }
 0x449   : > { %16879 = vmatpush3.bf16.msra.mxu0 %v17675_v57  ;;  %v15057_v40 = vpack.c.bf16 %v9195_v35, %v9194_v45  ;;  %v9153_v24 = vmax.f32 %v9117_v37, 0.0  ;;  %v9903_v42 = vsel %vm860_vm1, %v22544_v2, %v9902_v1  ;;  %v9075_v60 = vadd.f32 %v9018_v62, %v22358_v36  ;;  %v16758_v37 = vpop.f32.mrf.mxu1  ;;  %v25035_v2 = vld [vmem:[#allocation64_spill] sm:$0xff] }
 0x44a   : > { %v9568_v9 = vsel %vm576_vm0, %v25033_v30, %v9567_v31  ;;  %15109 = vst [vmem:[#allocation3 + $0x78] sm:$0xff] %v15062_v20   ;;  %16840 = vmatprep.mubr.bf16.mxu1 %v9903_v42  ;;  %v9912_v61 = vsel %vm860_vm1, %v9902_v1, %v9911_v19  ;;  %v9120_v30 = vadd.f32 %v22204_v39, %v9077_v23  ;;  %v9569_v57 = vrot.slane %v22596_v43, 3  ;;  %v22622_v56 = vld [vmem:[#allocation3 + $0x5c] sm:$0xff]   ;;  %v22633_v23 = vld [vmem:[%s24234_s6 + $0x178] sm:$0xff]  }
 0x44b   : > { %16792 = vmatprep.mubr.bf16.mxu0 %v9568_v9  ;;  %16968 = vmatprep.subr.bf16.mxu0 %v22588_v38  ;;  %15108 = vst [vmem:[#allocation3 + $0x70] sm:$0xff] %v15057_v40   ;;  %v9198_v45 = vmul.f32 %v9153_v24, %v25035_v2  ;;  %v9080_v32 = vadd.f32 %v16758_v37, %v22364_v6  ;;  %v24476_v20 = vshrl.u32 %v22568_v33, 16  ;;  %v24463_v18 = vshll.u32 %v22568_v33, 16  ;;  %v9031_v62 = vpop.f32.mrf.mxu1  ;;  %v25037_v37 = vld [vmem:[#allocation10_spill] sm:$0xff] }
 0x44c   : > { %16841 = vmatmul.mubr.bf16.gmra.mxu1 %v9912_v61  ;;  %v9156_v1 = vmax.f32 %v9120_v30, 0.0  ;;  %v9118_v9 = vadd.f32 %v22204_v39, %v9075_v60  ;;  %v9570_v36 = vsel %vm576_vm0, %v9567_v31, %v9569_v57  ;;  %v24469_v25 = vshrl.u32 %v22596_v43, 16  ;;  %v22641_v30 = vld [vmem:[#allocation3 + $0x64] sm:$0xff]   ;;  %v22762_v2 = vld [vmem:[#allocation3 + $0x2c] sm:$0xf] }
 0x44d   : > { %16929 = vmatpush3.bf16.msra.mxu1 %v17678_v26  ;;  %16793 = vmatmul.mubr.bf16.gmra.mxu0 %v9570_v36  ;;  %v9123_v24 = vadd.f32 %v22204_v39, %v9080_v32  ;;  %v9078_v6 = vadd.f32 %v9031_v62, %v22368_v50  ;;  %v9916_v40 = vrot.slane %v24476_v20, 2  ;;  %v9919_v4 = vrot.slane %v24463_v18, 3  ;;  %v16759_v27 = vpop.f32.mrf.mxu1  ;;  %v25038_v62 = vld [vmem:[#allocation75_spill] sm:$0xff]  ;;  %v22738_v20 = vld [vmem:[#allocation3 + $0x24] sm:$0xf] }
 0x44e   : > { %16930 = vmatprep.subr.bf16.mxu1 %v17681_v12  ;;  %v9201_v11 = vmul.f32 %v9156_v1, %v25036_v5  ;;  %v9154_v26 = vmax.f32 %v9118_v9, 0.0  ;;  %v9925_v21 = vrot.slane %v24469_v25, 2  ;;  %v24468_v50 = vshll.u32 %v22596_v43, 16 }
 0x44f   : > { %v9159_v31 = vmax.f32 %v9123_v24, 0.0  ;;  %v9121_v35 = vadd.f32 %v22204_v39, %v9078_v6  ;;  %v9920_v42 = vor.u32 %v9919_v4, %v9916_v40  ;;  %v9081_v61 = vadd.f32 %v16759_v27, %v22371_v29  ;;  %v9034_v9 = vpop.f32.mrf.mxu1  ;;  %v25039_v27 = vld [vmem:[#allocation69_spill] sm:$0xff] }
 0x450   : > { %v15072_v60 = vpack.c.bf16 %v9201_v11, %v9200_v63  ;;  %v9199_v32 = vmul.f32 %v9154_v26, %v25037_v37  ;;  %v9928_v1 = vrot.slane %v24468_v50, 3  ;;  %v9571_v36 = vrot.slane %v22622_v56, 3 }
 0x451   : > { %16931 = vmatpush3.bf16.msra.mxu1 %v17681_v12  ;;  %v9204_v18 = vmul.f32 %v9159_v31, %v25038_v62  ;;  %v9157_v24 = vmax.f32 %v9121_v35, 0.0  ;;  %v9921_v6 = vsel %vm860_vm1, %v9911_v19, %v9920_v42  ;;  %v9124_v40 = vadd.f32 %v22204_v39, %v9081_v61 }
 0x452   : > { %17020 = vmatprep.subr.bf16.mxu1 %v22633_v23  ;;  %15111 = vst [vmem:[#allocation3 + $0x88] sm:$0xff] %v15072_v60   ;;  %v15067_v29 = vpack.c.bf16 %v9199_v32, %v9198_v45  ;;  %16844 = vmatprep.mubr.bf16.mxu1 %v9921_v6  ;;  %v9929_v63 = vor.u32 %v9928_v1, %v9925_v21  ;;  %v22653_v26 = vld [vmem:[#allocation3 + $0x6c] sm:$0xff]   ;;  %v9573_v19 = vrot.slane %v22641_v30, 3  ;;  %v22657_v61 = vld [vmem:[#allocation3 + $0x74] sm:$0xff]   ;;  %v24466_v1 = vshrl.u32 %v22641_v30, 16 }
 0x453   : > { %v9079_v4 = vadd.f32 %v9034_v9, %v22373_v46  ;;  %v9572_v11 = vsel %vm576_vm0, %v9569_v57, %v9571_v36  ;;  %v14907_v12 = vpack.c.bf16 %v9204_v18, %v9204_v18  ;;  %v9202_v31 = vmul.f32 %v9157_v24, %v25039_v27  ;;  %v25040_v18 = vld [vmem:[#allocation78_spill] sm:$0xff] }
 0x454   : > { %v9160_v35 = vmax.f32 %v9124_v40, 0.0  ;;  %16796 = vmatprep.mubr.bf16.mxu0 %v9572_v11  ;;  %15110 = vst [vmem:[#allocation3 + $0x80] sm:$0xff] %v15067_v29   ;;  %v9930_v45 = vsel %vm860_vm1, %v9920_v42, %v9929_v63  ;;  %v24465_v46 = vshrl.u32 %v22622_v56, 16  ;;  %v24464_v57 = vshll.u32 %v22622_v56, 16  ;;  %v10631_v11 = vld [vmem:[#allocation3 + $0xc] sm:$0x8] }
 0x455   : > { %v9122_v21 = vadd.f32 %v22204_v39, %v9079_v4  ;;  %9384 = vst [vmem:[#allocation3 + $0x98] sm:$0xf] %v14907_v12  ;;  %16845 = vmatmul.mubr.bf16.gmra.mxu1 %v9930_v45  ;;  %v9574_v32 = vsel %vm576_vm0, %v9571_v36, %v9573_v19  ;;  %v24467_v9 = vshll.u32 %v22641_v30, 16  ;;  %v9575_v6 = vrot.slane %v22653_v26, 3  ;;  %v22677_v12 = vld [vmem:[#allocation3 + $0x10] sm:$0xf] }
 0x456   : > { %v9205_v60 = vmul.f32 %v9160_v35, %v25040_v18  ;;  %16797 = vmatmul.mubr.bf16.gmra.mxu0 %v9574_v32  ;;  %v9934_v42 = vrot.slane %v24465_v46, 2  ;;  %v9937_v39 = vrot.slane %v24464_v57, 3  ;;  %v9943_v29 = vrot.slane %v24466_v1, 2  ;;  %v25041_v35 = vld [vmem:[#allocation74_spill] sm:$0xff] }
 0x457   : > { %v9158_v24 = vmax.f32 %v9122_v21, 0.0  ;;  %v9946_v36 = vrot.slane %v24467_v9, 3  ;;  %v9577_v4 = vrot.slane %v22657_v61, 3  ;;  %v9576_v32 = vsel %vm576_vm0, %v9573_v19, %v9575_v6  ;;  %v22689_v19 = vld [vmem:[#allocation3 + $0x14] sm:$0xf] }
 0x458   : > { %v14908_v40 = vpack.c.bf16 %v9205_v60, %v9205_v60  ;;  %v9938_v21 = vor.u32 %v9937_v39, %v9934_v42  ;;  %v24474_v57 = vshrl.u32 %v22653_v26, 16  ;;  %16800 = vmatprep.mubr.bf16.mxu0 %v9576_v32  ;;  %v24471_v1 = vshll.u32 %v22653_v26, 16 }
 0x459   : > { %v9203_v45 = vmul.f32 %v9158_v24, %v25041_v35  ;;  %v9947_v60 = vor.u32 %v9946_v36, %v9943_v29  ;;  %v9578_v46 = vsel %vm576_vm0, %v9575_v6, %v9577_v4  ;;  %v24470_v9 = vshrl.u32 %v22657_v61, 16 }
 0x45a   : > { %9385 = vst [vmem:[#allocation3 + $0x9c] sm:$0x7] %v14908_v40  ;;  %v9939_v25 = vsel %vm860_vm1, %v9929_v63, %v9938_v21  ;;  %v9952_v24 = vrot.slane %v24474_v57, 2  ;;  %v24472_v42 = vshll.u32 %v22657_v61, 16  ;;  %v9955_v6 = vrot.slane %v24471_v1, 3 }
 0x45b   : > { %v15077_v50 = vpack.c.bf16 %v9203_v45, %v9202_v31  ;;  %16848 = vmatprep.mubr.bf16.mxu1 %v9939_v25  ;;  %v9948_v39 = vsel %vm860_vm1, %v9938_v21, %v9947_v60  ;;  %v9961_v40 = vrot.slane %v24470_v9, 2  ;;  %v22696_v29 = vld [vmem:[#allocation3 + $0x7c] sm:$0xff]   ;;  %v22698_v31 = vld [vmem:[#allocation3 + $0x84] sm:$0xff]   ;;  %v22702_v63 = vor.u32 %v22483_v48, %v22472_v41  ;;  %v22708_v45 = vld [vmem:[#allocation3 + $0x18] sm:$0xf] }
 0x45c   : > { %v9964_v25 = vrot.slane %v24472_v42, 3  ;;  %v10274_v36 = vor.u32 %v22306_v47, %v22293_v51  ;;  %v14621_v21 = vcombine.low %v10631_v11, %v22677_v12  ;;  %v9956_v32 = vor.u32 %v9955_v6, %v9952_v24 }
 0x45d   : > { %15112 = vst [vmem:[#allocation3 + $0x90] sm:$0xff] %v15077_v50   ;;  %16849 = vmatmul.mubr.bf16.gmra.mxu1 %v9948_v39  ;;  %v9579_v9 = vrot.slane %v22696_v29, 3  ;;  %v24473_v1 = vshrl.u32 %v22696_v29, 16  ;;  %v14622_v41 = vcombine.low %v22689_v19, %v22708_v45  ;;  %v24475_v50 = vshll.u32 %v22696_v29, 16 }
 0x45e   : > { %16801 = vmatmul.mubr.bf16.gmra.mxu0 %v9578_v46  ;;  %v9965_v48 = vor.u32 %v9964_v25, %v9961_v40  ;;  %v24477_v42 = vshrl.u32 %v22698_v31, 16  ;;  %v24478_v51 = vshll.u32 %v22698_v31, 16  ;;  %v9957_v47 = vsel %vm860_vm1, %v9947_v60, %v9956_v32  ;;  %v22733_v25 = vld [vmem:[#allocation3 + $0x20] sm:$0xf] }
 0x45f   : > { %v9580_v11 = vsel %vm576_vm0, %v9577_v4, %v9579_v9  ;;  %v9581_v24 = vrot.slane %v22698_v31, 3  ;;  %v9970_v39 = vrot.slane %v24473_v1, 2  ;;  %16852 = vmatprep.mubr.bf16.mxu1 %v9957_v47  ;;  %v9973_v46 = vrot.slane %v24475_v50, 3 }
 0x460   : > { %16804 = vmatprep.mubr.bf16.mxu0 %v9580_v11  ;;  %v9979_v6 = vrot.slane %v24477_v42, 2  ;;  %v9982_v40 = vrot.slane %v24478_v51, 3  ;;  %v22731_v60 = vsel %vm1295_vm2, %v10274_v36, %v22702_v63  ;;  %v10779_v4 = vshrl.u32 %v14621_v21, 16 }
 0x461   : > { %v9966_v1 = vsel %vm860_vm1, %v9956_v32, %v9965_v48  ;;  %v9974_v47 = vor.u32 %v9973_v46, %v9970_v39  ;;  %v10782_v11 = vshll.u32 %v14621_v21, 16  ;;  %v25042_v57 = vshrl.u32 %v22381_v0, 16 }
 0x462   : > { %v9582_v42 = vsel %vm576_vm0, %v9579_v9, %v9581_v24  ;;  %v10787_v51 = vshrl.u32 %v14622_v41, 16  ;;  %v9983_v18 = vor.u32 %v9982_v40, %v9979_v6  ;;  %v10790_v27 = vshll.u32 %v14622_v41, 16  ;;  %v22749_v9 = vld [vmem:[#allocation3 + $0x1c] sm:$0xf] }
 0x463   : > { %v10279_v50 = vrot.slane %v25042_v57, 3  ;;  %v9975_v36 = vsel %vm860_vm1, %v9965_v48, %v9974_v47  ;;  %v25043_v5 = vshll.u32 %v22381_v0, 16  ;;  %v10781_v46 = vrot.slane %v10779_v4, 3  ;;  %v22753_v0 = vld [vmem:[#allocation3 + $0x28] sm:$0xf] }
 0x464   : > { %v22741_v62 = vld [vmem:[#allocation3 + $0x8c] sm:$0xff]   ;;  %v17676_v35 = vld [vmem:[#allocation3 + $0x94] ss:$0 sps:$4 sm:$0x33]   ;;  %v14623_v41 = vcombine.low %v22749_v9, %v22733_v25  ;;  %v10784_v4 = vrot.slane %v10782_v11, 4  ;;  %v25044_v58 = vshrl.u32 %v22417_v10, 16  ;;  %v9984_v13 = vsel %vm860_vm1, %v9974_v47, %v9983_v18 }
 0x465   : > { %v10280_v32 = vrot.slane %v25043_v5, 4  ;;  %16853 = vmatmul.mubr.bf16.gmra.mxu1 %v9966_v1  ;;  %v9583_v21 = vrot.slane %v22741_v62, 3  ;;  %v24479_v57 = vshrl.u32 %v22741_v62, 16  ;;  %v24480_v39 = vshll.u32 %v22741_v62, 16 }
 0x466   : > { %16805 = vmatmul.mubr.bf16.gmra.mxu0 %v9582_v42  ;;  %16856 = vmatprep.mubr.bf16.mxu1 %v9975_v36  ;;  %v9585_v54 = vrot.slane %v17676_v35, 3  ;;  %v9995_v48 = vshrl.u32 %v17676_v35, 16  ;;  %v9998_v6 = vshll.u32 %v17676_v35, 16  ;;  %v14624_v42 = vcombine.low %v22738_v20, %v22753_v0 }
 0x467   : > { %v9584_v5 = vsel %vm576_vm0, %v9581_v24, %v9583_v21  ;;  %v9988_v1 = vrot.slane %v24479_v57, 2  ;;  %v9991_v40 = vrot.slane %v24480_v39, 3  ;;  %v10789_v36 = vrot.slane %v10787_v51, 3 }
 0x468   : > { %16808 = vmatprep.mubr.bf16.mxu0 %v9584_v5  ;;  %v10792_v35 = vrot.slane %v10790_v27, 4  ;;  %v10281_v37 = vor.u32 %v10280_v32, %v10279_v50  ;;  %v9997_v24 = vrot.slane %v9995_v48, 2  ;;  %v10283_v57 = vrot.slane %v25044_v58, 3 }
 0x469   : > { %v9992_v44 = vor.u32 %v9991_v40, %v9988_v1  ;;  %v25045_v14 = vshll.u32 %v22417_v10, 16  ;;  %v10000_v34 = vrot.slane %v9998_v6, 3  ;;  %v10796_v27 = vshrl.u32 %v14623_v41, 16  ;;  %v22781_v6 = vld [vmem:[#allocation3 + $0x34] sm:$0xf] }
 0x46a   : > { %v10282_v51 = vsel %vm1295_vm2, %v22702_v63, %v10281_v37  ;;  %v9586_v50 = vsel %vm576_vm0, %v9583_v21, %v9585_v54  ;;  %v14625_v48 = vcombine.low %v22762_v2, %v22764_v59  ;;  %v10785_v5 = vor.u32 %v10784_v4, %v10781_v46  ;;  %v22786_v46 = vld [vmem:[#allocation3 + $0x38] sm:$0xf] }
 0x46b   : > { %v10284_v39 = vrot.slane %v25045_v14, 4  ;;  %v9993_v11 = vsel %vm860_vm1, %v9983_v18, %v9992_v44  ;;  %v22777_v58 = vor.u32 %v10792_v35, %v10789_v36  ;;  %v10799_v10 = vshll.u32 %v14623_v41, 16  ;;  %v22788_v41 = vld [vmem:[#allocation3 + $0x40] sm:$0xf]  ;;  %v22797_v35 = vld [vmem:[#allocation3 + $0x3c] sm:$0xf] }
 0x46c   : > { %v25046_v14 = vshrl.u32 %v22419_v8, 16  ;;  %v10805_v1 = vshrl.u32 %v14624_v42, 16  ;;  %v10808_v54 = vshll.u32 %v14624_v42, 16  ;;  %v25047_v18 = vshll.u32 %v22419_v8, 16 }
 0x46d   : > { %v10285_v32 = vor.u32 %v10284_v39, %v10283_v57  ;;  %16857 = vmatmul.mubr.bf16.gmra.mxu1 %v9984_v13  ;;  %v10001_v57 = vor.u32 %v10000_v34, %v9997_v24  ;;  %v10798_v39 = vrot.slane %v10796_v27, 3  ;;  %v10814_v13 = vshrl.u32 %v14625_v48, 16 }
 0x46e   : > { %v10287_v47 = vrot.slane %v25046_v14, 3  ;;  %v10288_v21 = vrot.slane %v25047_v18, 4  ;;  %16809 = vmatmul.mubr.bf16.gmra.mxu0 %v9586_v50  ;;  %16860 = vmatprep.mubr.bf16.mxu1 %v9993_v11  ;;  %v10817_v4 = vshll.u32 %v14625_v48, 16  ;;  %v10801_v42 = vrot.slane %v10799_v10, 4  ;;  %v22805_v50 = vld [vmem:[#allocation3 + $0x44] sm:$0xf] }
 0x46f   : > { %v10286_v63 = vsel %vm1295_vm2, %v10281_v37, %v10285_v32  ;;  %16880 = vmatprep.mubr.bf16.mxu0 %v22731_v60  ;;  %v14626_v37 = vcombine.low %v22781_v6, %v22786_v46  ;;  %v25048_v8 = vshrl.u32 %v22476_v16, 16  ;;  %v10794_v34 = vsel %vm1295_vm2, %v10785_v5, %v22777_v58  ;;  %v22807_v11 = vld [vmem:[#allocation3 + $0x48] sm:$0xf] }
 0x470   : > { %v22791_v40 = vor.u32 %v10288_v21, %v10287_v47  ;;  %v10807_v24 = vrot.slane %v10805_v1, 3  ;;  %v10810_v27 = vrot.slane %v10808_v54, 4  ;;  %v10002_v48 = vsel %vm860_vm1, %v9992_v44, %v10001_v57  ;;  %v17685_v44 = vld [vmem:[%s24234_s6 + $0x130] sm:$0xff]  }
 0x471   : > { %v10295_v36 = vrot.slane %v25048_v8, 3  ;;  %v25049_v10 = vshrl.u32 %v22468_v53, 16  ;;  %v25050_v47 = vshll.u32 %v22468_v53, 16  ;;  %v25051_v5 = vshll.u32 %v22476_v16, 16 }
 0x472   : > { %v22803_v60 = vsel %vm1295_vm2, %v10285_v32, %v22791_v40  ;;  %v10816_v54 = vrot.slane %v10814_v13, 3  ;;  %v10819_v21 = vrot.slane %v10817_v4, 4  ;;  %v10823_v8 = vshrl.u32 %v14626_v37, 16 }
 0x473   : > { %v10291_v14 = vrot.slane %v25049_v10, 3  ;;  %v10292_v18 = vrot.slane %v25050_v47, 4  ;;  %v10296_v1 = vrot.slane %v25051_v5, 4  ;;  %v14627_v32 = vcombine.low %v22797_v35, %v22788_v41  ;;  %v22825_v10 = vld [vmem:[#allocation3 + $0x50] sm:$0xf] }
 0x474   : > { %v10802_v55 = vor.u32 %v10801_v42, %v10798_v39  ;;  %v10826_v57 = vshll.u32 %v14626_v37, 16  ;;  %v14628_v53 = vcombine.low %v22805_v50, %v22807_v11  ;;  %v10811_v16 = vor.u32 %v10810_v27, %v10807_v24  ;;  %v22829_v39 = vld [vmem:[#allocation3 + $0x54] sm:$0xf] }
 0x475   : > { %v22821_v7 = vor.u32 %v10296_v1, %v10295_v36  ;;  %16861 = vmatmul.mubr.bf16.gmra.mxu1 %v10002_v48  ;;  %v10832_v13 = vshrl.u32 %v14627_v32, 16  ;;  %v10835_v4 = vshll.u32 %v14627_v32, 16  ;;  %v25052_v47 = vshrl.u32 %v22521_v3, 16 }
 0x476   : > { %16932 = vmatprep.mubr.bf16.mxu1 %v10794_v34  ;;  %16881 = vmatmul.mubr.bf16.vlgmr.msra.gmra.mxu0 %v10282_v51  ;;  %v10293_v42 = vor.u32 %v10292_v18, %v10291_v14  ;;  %v25053_v37 = vshrl.u32 %v22516_v28, 16  ;;  %v10841_v1 = vshrl.u32 %v14628_v53, 16  ;;  %v10844_v52 = vshll.u32 %v14628_v53, 16  ;;  %v17688_v51 = vld [vmem:[%s24234_s6 + $0x128] sm:$0xff]  }
 0x477   : > { %v10303_v5 = vrot.slane %v25052_v47, 3  ;;  %16884 = vmatprep.mubr.bf16.mxu0 %v10286_v63  ;;  %16969 = vmatpush3.bf16.msra.mxu0 %v22588_v38  ;;  %v10820_v24 = vor.u32 %v10819_v21, %v10816_v54  ;;  %v10825_v27 = vrot.slane %v10823_v8, 3  ;;  %v25054_v48 = vshll.u32 %v22516_v28, 16  ;;  %v22847_v21 = vld [vmem:[#allocation3 + $0x58] sm:$0xf] }
 0x478   : > { %v10299_v36 = vrot.slane %v25053_v37, 3  ;;  %v25055_v34 = vshll.u32 %v22521_v3, 16  ;;  %16970 = vmatprep.subr.bf16.mxu0 %v17685_v44  ;;  %v10828_v18 = vrot.slane %v10826_v57, 4  ;;  %v10834_v53 = vrot.slane %v10832_v13, 3  ;;  %25057 = vst [vmem:[#allocation83_spill] sm:$0xff] %v22847_v21 }
 0x479   : > { %v10300_v32 = vrot.slane %v25054_v48, 4  ;;  %v10837_v47 = vrot.slane %v10835_v4, 4  ;;  %v10843_v37 = vrot.slane %v10841_v1, 3  ;;  %v10846_v63 = vrot.slane %v10844_v52, 4 }
 0x47a   : > { %v10304_v14 = vrot.slane %v25055_v34, 4  ;;  %v25056_v38 = vshrl.u32 %v22568_v33, 16  ;;  %v14629_v28 = vcombine.low %v22833_v49, %v22825_v10  ;;  %v14630_v8 = vcombine.low %v22829_v39, %v22847_v21 }
 0x47b   : > { %v25058_v3 = vshrl.u32 %v22596_v43, 16  ;;  %v25059_v57 = vshll.u32 %v22596_v43, 16  ;;  %v10803_v52 = vsel %vm1295_vm2, %v22777_v58, %v10802_v55  ;;  %v10812_v4 = vsel %vm1295_vm2, %v10802_v55, %v10811_v16  ;;  %16971 = vmatpush3.bf16.msra.mxu0 %v17685_v44  ;;  %v17691_v43 = vld [vmem:[%s24234_s6 + $0x120] sm:$0xff]  }
 0x47c   : > { %v10305_v22 = vor.u32 %v10304_v14, %v10303_v5  ;;  %v10307_v54 = vrot.slane %v25056_v38, 3  ;;  %v25060_v5 = vshll.u32 %v22568_v33, 16  ;;  %v10850_v34 = vshrl.u32 %v14629_v28, 16  ;;  %16972 = vmatprep.subr.bf16.mxu0 %v17688_v51 }
 0x47d   : > { %v10311_v48 = vrot.slane %v25058_v3, 3  ;;  %v10312_v13 = vrot.slane %v25059_v57, 4  ;;  %v10294_v14 = vsel %vm1295_vm2, %v22791_v40, %v10293_v42  ;;  %v10829_v38 = vor.u32 %v10828_v18, %v10825_v27  ;;  %v22865_v57 = vld [vmem:[#allocation3 + $0x60] sm:$0xf]  ;;  %16933 = vmatmul.mubr.bf16.vlgmr.msra.gmra.mxu1 %v10803_v52  ;;  %v22874_v40 = vld [vmem:[#allocation3 + $0x64] sm:$0xf] }
 0x47e   : > { %v10308_v1 = vrot.slane %v25060_v5, 4  ;;  %v10301_v15 = vor.u32 %v10300_v32, %v10299_v36  ;;  %v10853_v3 = vshll.u32 %v14629_v28, 16  ;;  %25061 = vst [vmem:[#allocation81_spill] sm:$0xff] %v22865_v57  ;;  %v10821_v55 = vsel %vm1295_vm2, %v10811_v16, %v10820_v24  ;;  %v22872_v5 = vld [vmem:[#allocation3 + $0x5c] sm:$0xf]  ;;  %25062 = vst [vmem:[#allocation84_spill] sm:$0xff] %v22874_v40  ;;  %16936 = vmatprep.mubr.bf16.mxu1 %v10812_v4 }
 0x47f   : > { %v10838_v58 = vor.u32 %v10837_v47, %v10834_v53  ;;  %v22868_v33 = vor.u32 %v10846_v63, %v10843_v37  ;;  %v22870_v44 = vor.u32 %v10312_v13, %v10311_v48  ;;  %v17701_v36 = vld [vmem:[%s24234_s6 + $0x170] sm:$0xff]   ;;  %16885 = vmatmul.mubr.bf16.gmra.mxu0 %v22803_v60  ;;  %v10298_v27 = vsel %vm1295_vm2, %v10293_v42, %v22821_v7  ;;  %v22882_v53 = vld [vmem:[#allocation3 + $0x68] sm:$0xf] }
 0x480   : > { %v10852_v16 = vrot.slane %v10850_v34, 3  ;;  %v10859_v32 = vshrl.u32 %v14630_v8, 16  ;;  %v10862_v18 = vshll.u32 %v14630_v8, 16  ;;  %25063 = vst [vmem:[#allocation82_spill] sm:$0xff] %v22882_v53  ;;  %16888 = vmatprep.mubr.bf16.mxu0 %v10294_v14  ;;  %16973 = vmatpush3.bf16.msra.mxu0 %v17688_v51  ;;  %v10309_v47 = vor.u32 %v10308_v1, %v10307_v54  ;;  %v17695_v8 = vld [vmem:[%s24234_s6 + $0x118] sm:$0xff]  }
 0x481   : > { %v10855_v37 = vrot.slane %v10853_v3, 4  ;;  %v14631_v63 = vcombine.low %v22872_v5, %v22865_v57  ;;  %v25064_v28 = vshrl.u32 %v22641_v30, 16  ;;  %v10830_v60 = vsel %vm1295_vm2, %v10820_v24, %v10829_v38  ;;  %16974 = vmatprep.subr.bf16.mxu0 %v17691_v43  ;;  %17021 = vmatpush3.bf16.msra.mxu1 %v22633_v23  ;;  %v22911_v34 = vld [vmem:[#allocation3 + $0x70] sm:$0xf]  ;;  %v22913_v14 = vld [vmem:[#allocation3 + $0x74] sm:$0xf] }
 0x482   : > { %v10302_v42 = vsel %vm1295_vm2, %v22821_v7, %v10301_v15  ;;  %v14632_v51 = vcombine.low %v22874_v40, %v22882_v53  ;;  %v25065_v54 = vshll.u32 %v22641_v30, 16  ;;  %v22900_v52 = vsel %vm1295_vm2, %v10829_v38, %v10838_v58  ;;  %25067 = vst [vmem:[#allocation89_spill] sm:$0xff] %v22911_v34  ;;  %25068 = vst [vmem:[#allocation88_spill] sm:$0xff] %v22913_v14  ;;  %v17703_v23 = vld [vmem:[%s24234_s6 + $0x168] sm:$0xff]   ;;  %v22927_v53 = vld [vmem:[#allocation3 + $0x6c] sm:$0xf] }
 0x483   : > { %v10319_v48 = vrot.slane %v25064_v28, 3  ;;  %v22904_v24 = vsel %vm1295_vm2, %v10838_v58, %v22868_v33  ;;  %v22907_v7 = vsel %vm1295_vm2, %v10301_v15, %v10305_v22  ;;  %v25066_v4 = vshrl.u32 %v22622_v56, 16  ;;  %17022 = vmatprep.subr.bf16.mxu1 %v17701_v36  ;;  %25070 = vst [vmem:[#allocation85_spill] sm:$0xff] %v22927_v53 }
 0x484   : > { %v10320_v13 = vrot.slane %v25065_v54, 4  ;;  %v10861_v30 = vrot.slane %v10859_v32, 3  ;;  %v10864_v38 = vrot.slane %v10862_v18, 4  ;;  %v25069_v3 = vshll.u32 %v22622_v56, 16  ;;  %16975 = vmatpush3.bf16.msra.mxu0 %v17691_v43  ;;  %v17700_v43 = vld [vmem:[%s24234_s6 + $0x110] sm:$0xff]  }
 0x485   : > { %v10315_v1 = vrot.slane %v25066_v4, 3  ;;  %v22923_v15 = vsel %vm1295_vm2, %v10305_v22, %v10309_v47  ;;  %v22925_v54 = vor.u32 %v10855_v37, %v10852_v16  ;;  %v10868_v4 = vshrl.u32 %v14631_v63, 16  ;;  %16976 = vmatprep.subr.bf16.mxu0 %v17695_v8  ;;  %v22935_v22 = vld [vmem:[#allocation3 + $0x78] sm:$0xf]  ;;  %17023 = vmatpush3.bf16.msra.mxu1 %v17701_v36 }
 0x486   : > { %v10316_v58 = vrot.slane %v25069_v3, 4  ;;  %v22920_v28 = vor.u32 %v10320_v13, %v10319_v48  ;;  %v10871_v17 = vshll.u32 %v14631_v63, 16  ;;  %v10877_v57 = vshrl.u32 %v14632_v51, 16  ;;  %25073 = vst [vmem:[#allocation80_spill] sm:$0xff] %v22935_v22  ;;  %16937 = vmatmul.mubr.bf16.gmra.mxu1 %v10821_v55  ;;  %17024 = vmatprep.subr.bf16.mxu1 %v17703_v23 }
 0x487   : > { %v25071_v32 = vshrl.u32 %v22653_v26, 16  ;;  %v25072_v56 = vshll.u32 %v22653_v26, 16  ;;  %v14633_v48 = vcombine.low %v22927_v53, %v22911_v34  ;;  %v22942_v16 = vsel %vm1295_vm2, %v10309_v47, %v22870_v44  ;;  %16940 = vmatprep.mubr.bf16.mxu1 %v10830_v60  ;;  %16889 = vmatmul.mubr.bf16.gmra.mxu0 %v10298_v27  ;;  %v22957_v34 = vld [vmem:[#allocation3 + $0x80] sm:$0xf]  ;;  %v22964_v60 = vld [vmem:[#allocation3 + $0x84] sm:$0xf] }
 0x488   : > { %v10880_v37 = vshll.u32 %v14632_v51, 16  ;;  %v14634_v26 = vcombine.low %v22913_v14, %v22935_v22  ;;  %v25074_v63 = vshrl.u32 %v22657_v61, 16  ;;  %v22951_v36 = vor.u32 %v10864_v38, %v10861_v30  ;;  %25076 = vst [vmem:[#allocation87_spill] sm:$0xff] %v22957_v34  ;;  %16892 = vmatprep.mubr.bf16.mxu0 %v10302_v42  ;;  %16977 = vmatpush3.bf16.msra.mxu0 %v17695_v8  ;;  %v22972_v38 = vld [vmem:[#allocation3 + $0x7c] sm:$0xf] }
 0x489   : > { %v10323_v18 = vrot.slane %v25071_v32, 3  ;;  %v10324_v3 = vrot.slane %v25072_v56, 4  ;;  %v17706_v32 = vld [vmem:[%s24234_s6 + $0x160] sm:$0xff]   ;;  %v22953_v55 = vor.u32 %v10316_v58, %v10315_v1  ;;  %v25075_v51 = vshll.u32 %v22657_v61, 16  ;;  %16978 = vmatprep.subr.bf16.mxu0 %v17700_v43  ;;  %17025 = vmatpush3.bf16.msra.mxu1 %v17703_v23 }
 0x48a   : > { %v10327_v13 = vrot.slane %v25074_v63, 3  ;;  %v22962_v63 = vsel %vm1295_vm2, %v22868_v33, %v22925_v54  ;;  %v10870_v22 = vrot.slane %v10868_v4, 3  ;;  %v10873_v14 = vrot.slane %v10871_v17, 4  ;;  %v17705_v17 = vld [vmem:[%s24234_s6 + $0x108] sm:$0xff]   ;;  %v17708_v33 = vld [vmem:[%s24234_s6 + $0x158] sm:$0xff]   ;;  %17026 = vmatprep.subr.bf16.mxu1 %v17706_v32 }
 0x48b   : > { %v10325_v47 = vor.u32 %v10324_v3, %v10323_v18  ;;  %v10328_v56 = vrot.slane %v25075_v51, 4  ;;  %v10886_v27 = vshrl.u32 %v14633_v48, 16  ;;  %v22966_v1 = vrot.slane %v10877_v57, 3 }
 0x48c   : > { %v10889_v30 = vshll.u32 %v14633_v48, 16  ;;  %v10882_v57 = vrot.slane %v10880_v37, 4  ;;  %v10895_v8 = vshrl.u32 %v14634_v26, 16  ;;  %v25077_v58 = vshrl.u32 %v22696_v29, 16  ;;  %v22984_v48 = vld [vmem:[#allocation3 + $0x88] sm:$0xf]  ;;  %16979 = vmatpush3.bf16.msra.mxu0 %v17700_v43 }
 0x48d   : > { %v22970_v61 = vsel %vm1295_vm2, %v22920_v28, %v10325_v47  ;;  %v10329_v42 = vor.u32 %v10328_v56, %v10327_v13  ;;  %v25078_v18 = vshll.u32 %v22696_v29, 16  ;;  %25079 = vst [vmem:[#allocation86_spill] sm:$0xff] %v22984_v48  ;;  %v10898_v23 = vshll.u32 %v14634_v26, 16  ;;  %v17710_v26 = vld [vmem:[%s24234_s6 + $0x100] sm:$0xff]   ;;  %16980 = vmatprep.subr.bf16.mxu0 %v17705_v17  ;;  %17027 = vmatpush3.bf16.msra.mxu1 %v17706_v32 }
 0x48e   : > { %v10331_v4 = vrot.slane %v25077_v58, 3  ;;  %v14635_v51 = vcombine.low %v22972_v38, %v22957_v34  ;;  %v14636_v37 = vcombine.low %v22964_v60, %v22984_v48  ;;  %v10888_v56 = vrot.slane %v10886_v27, 3  ;;  %v23000_v48 = vld [vmem:[#allocation3 + $0x90] sm:$0xf]  ;;  %16941 = vmatmul.mubr.bf16.gmra.mxu1 %v22900_v52  ;;  %17028 = vmatprep.subr.bf16.mxu1 %v17708_v33 }
 0x48f   : > { %v10332_v3 = vrot.slane %v25078_v18, 4  ;;  %v22987_v13 = vsel %vm1295_vm2, %v10325_v47, %v10329_v42  ;;  %v25081_v58 = vshrl.u32 %v22698_v31, 16  ;;  %v25082_v18 = vshll.u32 %v22698_v31, 16  ;;  %16944 = vmatprep.mubr.bf16.mxu1 %v22904_v24  ;;  %16893 = vmatmul.mubr.bf16.gmra.mxu0 %v22907_v7 }
 0x490   : > { %25080 = vst [vmem:[#allocation90_spill] sm:$0xff] %v22987_v13  ;;  %v10891_v47 = vrot.slane %v10889_v30, 4  ;;  %v10904_v13 = vshrl.u32 %v14635_v51, 16  ;;  %v10907_v21 = vshll.u32 %v14635_v51, 16  ;;  %v10913_v34 = vshrl.u32 %v14636_v37, 16  ;;  %v17712_v30 = vld [vmem:[%s24234_s6 + $0x150] sm:$0xff]   ;;  %16896 = vmatprep.mubr.bf16.mxu0 %v22923_v15  ;;  %16981 = vmatpush3.bf16.msra.mxu0 %v17705_v17 }
 0x491   : > { %v10333_v53 = vor.u32 %v10332_v3, %v10331_v4  ;;  %v10335_v29 = vrot.slane %v25081_v58, 3  ;;  %v10336_v40 = vrot.slane %v25082_v18, 4  ;;  %v10897_v43 = vrot.slane %v10895_v8, 3  ;;  %v23006_v3 = vld [vmem:[#allocation3 + $0x94] sm:$0xf]  ;;  %17029 = vmatpush3.bf16.msra.mxu1 %v17708_v33  ;;  %16982 = vmatprep.subr.bf16.mxu0 %v17710_v26 }
 0x492   : > { %v10916_v31 = vshll.u32 %v14636_v37, 16  ;;  %v10900_v32 = vrot.slane %v10898_v23, 4  ;;  %v10906_v51 = vrot.slane %v10904_v13, 3  ;;  %v10909_v52 = vrot.slane %v10907_v21, 4  ;;  %v23015_v58 = vld [vmem:[#allocation3 + $0x8c] sm:$0xf]  ;;  %17030 = vmatprep.subr.bf16.mxu1 %v17712_v30 }
 0x493   : > { %v23004_v27 = vsel %vm1295_vm2, %v10329_v42, %v10333_v53  ;;  %v10337_v4 = vor.u32 %v10336_v40, %v10335_v29  ;;  %v25083_v8 = vshrl.u32 %v22741_v62, 16  ;;  %v10866_v40 = vsel %vm1295_vm2, %v22925_v54, %v22951_v36  ;;  %v23028_v23 = vld [vmem:[#allocation3 + $0x98] sm:$0xf]  ;;  %v17711_v54 = vld [vmem:[#allocation3 + $0x94] ss:$0 sps:$4 sm:$0x77]  }
 0x494   : > { %v25084_v24 = vshll.u32 %v22741_v62, 16  ;;  %v14637_v21 = vcombine.low %v23015_v58, %v23000_v48  ;;  %v10874_v13 = vor.u32 %v10873_v14, %v10870_v22  ;;  %v10915_v29 = vrot.slane %v10913_v34, 3  ;;  %v17715_v22 = vld [vmem:[%s24234_s6 + $0x148] sm:$0xff]   ;;  %16983 = vmatpush3.bf16.msra.mxu0 %v17710_v26 }
 0x495   : > { %v10339_v42 = vrot.slane %v25083_v8, 3  ;;  %v23022_v37 = vsel %vm1295_vm2, %v10333_v53, %v10337_v4  ;;  %v10918_v18 = vrot.slane %v10916_v31, 4  ;;  %v14638_v15 = vcombine.low %v23006_v3, %v23028_v23  ;;  %v23035_v53 = vld [vmem:[%s24234_s6 + $0x1b8] sm:$0xff]   ;;  %17031 = vmatpush3.bf16.msra.mxu1 %v17712_v30 }
 0x496   : > { %v10340_v7 = vrot.slane %v25084_v24, 4  ;;  %v10318_v62 = vsel %vm1295_vm2, %v22870_v44, %v22953_v55  ;;  %v10883_v17 = vor.u32 %v10882_v57, %v22966_v1  ;;  %v10892_v14 = vor.u32 %v10891_v47, %v10888_v56  ;;  %17072 = vmatprep.subr.bf16.mxu0 %v23035_v53  ;;  %16945 = vmatmul.mubr.bf16.gmra.mxu1 %v22962_v63 }
 0x497   : > { %v23049_v33 = vsel %vm1295_vm2, %v22953_v55, %v22920_v28  ;;  %v10901_v31 = vor.u32 %v10900_v32, %v10897_v43  ;;  %v10910_v8 = vor.u32 %v10909_v52, %v10906_v51  ;;  %v10922_v24 = vshrl.u32 %v14637_v21, 16  ;;  %17032 = vmatprep.subr.bf16.mxu1 %v17715_v22  ;;  %16948 = vmatprep.mubr.bf16.mxu1 %v10866_v40  ;;  %v23091_v40 = vld [vmem:[#allocation3 + $0x9c] sm:$0x7] }
 0x498   : > { %v23041_v34 = vor.u32 %v10340_v7, %v10339_v42  ;;  %v10925_v1 = vshll.u32 %v14637_v21, 16  ;;  %v10931_v57 = vshrl.u32 %v14638_v15, 16  ;;  %v10934_v56 = vshll.u32 %v14638_v15, 16  ;;  %16897 = vmatmul.mubr.bf16.gmra.mxu0 %v22942_v16 }
 0x499   : > { %v10875_v47 = vsel %vm1295_vm2, %v22951_v36, %v10874_v13  ;;  %v23057_v42 = vor.u32 %v10918_v18, %v10915_v29  ;;  %v10344_v7 = vshrl.u32 %v17711_v54, 16  ;;  %v23061_v28 = vcombine.low %v22677_v12, %v22689_v19  ;;  %v17717_v12 = vld [vmem:[%s24234_s6 + $0x140] sm:$0xff]   ;;  %16900 = vmatprep.mubr.bf16.mxu0 %v10318_v62  ;;  %17033 = vmatpush3.bf16.msra.mxu1 %v17715_v22  ;;  %v23104_v62 = vld [vmem:[%s24234_s6 + $0x1f8] sm:$0xff]  }
 0x49a   : > { %v23053_v44 = vsel %vm1295_vm2, %v10337_v4, %v23041_v34  ;;  %v10884_v55 = vsel %vm1295_vm2, %v10874_v13, %v10883_v17  ;;  %v23067_v43 = vsel %vm1295_vm2, %v10883_v17, %v10892_v14  ;;  %v10347_v26 = vshll.u32 %v17711_v54, 16  ;;  %17034 = vmatprep.subr.bf16.mxu1 %v17717_v12 }
 0x49b   : > { %v23071_v36 = vcombine.low %v22708_v45, %v22749_v9  ;;  %v23078_v19 = vsel %vm1295_vm2, %v10892_v14, %v10901_v31  ;;  %v23081_v63 = vsel %vm1295_vm2, %v10901_v31, %v10910_v8  ;;  %v10924_v4 = vrot.slane %v10922_v24, 3 }
 0x49c   : > { %v11565_v30 = vshll.u32 %v23061_v28, 16  ;;  %v10927_v32 = vrot.slane %v10925_v1, 4  ;;  %v10933_v45 = vrot.slane %v10931_v57, 3  ;;  %v10936_v9 = vrot.slane %v10934_v56, 4 }
 0x49d   : > { %v11570_v51 = vshll.u32 %v23071_v36, 16  ;;  %v23087_v52 = vsel %vm1295_vm2, %v10910_v8, %v23057_v42  ;;  %v23089_v16 = vrot.slane %v10344_v7, 3  ;;  %v11563_v21 = vshrl.u32 %v23061_v28, 16  ;;  %17035 = vmatpush3.bf16.msra.mxu1 %v17717_v12 }
 0x49e   : > { %v11567_v13 = vrot.slane %v11565_v30, 1  ;;  %v23094_v29 = vrot.slane %v10347_v26, 4  ;;  %v11574_v15 = vshrl.u32 %v23071_v36, 16  ;;  %v23099_v54 = vcombine.low %v22733_v25, %v22738_v20  ;;  %16949 = vmatmul.mubr.bf16.gmra.mxu1 %v10875_v47  ;;  %17124 = vmatprep.subr.bf16.mxu1 %v23104_v62 }
 0x49f   : > { %v11572_v18 = vrot.slane %v11570_v51, 1  ;;  %v23108_v14 = vcombine.low %v22753_v0, %v22762_v2  ;;  %v23112_v22 = vcombine.low %v22764_v59, %v22781_v6  ;;  %v23116_v31 = vcombine.low %v22786_v46, %v22797_v35  ;;  %16952 = vmatprep.mubr.bf16.mxu1 %v10884_v55 }
 0x4a0   : > { %v11568_v17 = vor.u32 %v11567_v13, %v11563_v21  ;;  %v23118_v20 = vor.u32 %v10927_v32, %v10924_v4  ;;  %v23120_v25 = vor.u32 %v10936_v9, %v10933_v45  ;;  %v23124_v8 = vcombine.low %v23091_v40, %v23091_v40  ;;  %16901 = vmatmul.mubr.bf16.gmra.mxu0 %v23049_v33 }
 0x4a1   : > { %v11578_v24 = vshll.u32 %v23099_v54, 16  ;;  %v11576_v0 = vor.u32 %v11574_v15, %v11572_v18  ;;  %v11586_v59 = vshll.u32 %v23108_v14, 16  ;;  %v11594_v6 = vshll.u32 %v23112_v22, 16  ;;  %16904 = vmatprep.mubr.bf16.mxu0 %v22970_v61 }
 0x4a2   : > { %v23128_v2 = vsel %vm2591_vm4, %v11568_v17, %v11572_v18  ;;  %v11582_v35 = vshrl.u32 %v23099_v54, 16  ;;  %v11590_v1 = vshrl.u32 %v23108_v14, 16  ;;  %v11602_v57 = vshll.u32 %v23116_v31, 16 }
 0x4a3   : > { %v11580_v46 = vrot.slane %v11578_v24, 1  ;;  %v11588_v56 = vrot.slane %v11586_v59, 1  ;;  %v11596_v7 = vrot.slane %v11594_v6, 1  ;;  %v11598_v26 = vshrl.u32 %v23112_v22, 16  ;;  %v25085_v24 = vld [vmem:[#allocation83_spill] sm:$0xff]  ;;  %v25086_v59 = vld [vmem:[#allocation84_spill] sm:$0xff] }
 0x4a4   : > { %v23140_v12 = vcombine.low %v22788_v41, %v22805_v50  ;;  %v11604_v30 = vrot.slane %v11602_v57, 1  ;;  %v23148_v55 = vcombine.low %v22807_v11, %v22833_v49  ;;  %v11606_v45 = vshrl.u32 %v23116_v31, 16  ;;  %v25087_v6 = vld [vmem:[#allocation81_spill] sm:$0xff] }
 0x4a5   : > { %v23144_v47 = vsel %vm2591_vm4, %v11576_v0, %v11580_v46  ;;  %v11584_v4 = vor.u32 %v11582_v35, %v11580_v46  ;;  %v11592_v33 = vor.u32 %v11590_v1, %v11588_v56  ;;  %v11600_v32 = vor.u32 %v11598_v26, %v11596_v7  ;;  %v25088_v35 = vld [vmem:[#allocation85_spill] sm:$0xff]  ;;  %v25089_v1 = vld [vmem:[#allocation82_spill] sm:$0xff] }
 0x4a6   : > { %v11610_v9 = vshll.u32 %v23140_v12, 16  ;;  %v11614_v50 = vshrl.u32 %v23140_v12, 16  ;;  %v11618_v61 = vshll.u32 %v23148_v55, 16  ;;  %v23159_v51 = vcombine.low %v22825_v10, %v22829_v39  ;;  %16953 = vmatmul.mubr.bf16.gmra.mxu1 %v23067_v43 }
 0x4a7   : > { %v23153_v41 = vsel %vm2591_vm4, %v11584_v4, %v11588_v56  ;;  %v23162_v49 = vsel %vm2591_vm4, %v11592_v33, %v11596_v7  ;;  %v23165_v11 = vsel %vm2591_vm4, %v11600_v32, %v11604_v30  ;;  %v11608_v21 = vor.u32 %v11606_v45, %v11604_v30  ;;  %16956 = vmatprep.mubr.bf16.mxu1 %v23078_v19  ;;  %v25090_v4 = vld [vmem:[#allocation90_spill] sm:$0xff]  ;;  %v25092_v19 = vld [vmem:[#allocation89_spill] sm:$0xff] }
 0x4a8   : > { %v11612_v13 = vrot.slane %v11610_v9, 1  ;;  %v11620_v18 = vrot.slane %v11618_v61, 1  ;;  %v11622_v15 = vshrl.u32 %v23148_v55, 16  ;;  %v11626_v17 = vshll.u32 %v23159_v51, 16  ;;  %16905 = vmatmul.mubr.bf16.gmra.mxu0 %v25090_v4  ;;  %v25091_v61 = vld [vmem:[#allocation88_spill] sm:$0xff] }
 0x4a9   : > { %v23171_v0 = vcombine.low %v25085_v24, %v22872_v5  ;;  %v23178_v46 = vcombine.low %v25087_v6, %v25086_v59  ;;  %v23182_v57 = vcombine.low %v25089_v1, %v25088_v35  ;;  %v11630_v26 = vshrl.u32 %v23159_v51, 16  ;;  %16908 = vmatprep.mubr.bf16.mxu0 %v23004_v27 }
 0x4aa   : > { %v23174_v10 = vsel %vm2591_vm4, %v11608_v21, %v11612_v13  ;;  %v11616_v39 = vor.u32 %v11614_v50, %v11612_v13  ;;  %v11624_v56 = vor.u32 %v11622_v15, %v11620_v18  ;;  %v11628_v7 = vrot.slane %v11626_v17, 1  ;;  %v25093_v17 = vld [vmem:[#allocation80_spill] sm:$0xff] }
 0x4ab   : > { %v11634_v5 = vshll.u32 %v23171_v0, 16  ;;  %v11638_v33 = vshrl.u32 %v23171_v0, 16  ;;  %v11642_v32 = vshll.u32 %v23178_v46, 16  ;;  %v11650_v45 = vshll.u32 %v23182_v57, 16 }
 0x4ac   : > { %v23190_v30 = vsel %vm2591_vm4, %v11616_v39, %v11620_v18  ;;  %v23197_v43 = vsel %vm2591_vm4, %v11624_v56, %v11628_v7  ;;  %v11632_v9 = vor.u32 %v11630_v26, %v11628_v7  ;;  %v23201_v21 = vcombine.low %v25092_v19, %v25091_v61  ;;  %v25094_v7 = vld [vmem:[#allocation87_spill] sm:$0xff] }
 0x4ad   : > { %v11636_v50 = vrot.slane %v11634_v5, 1  ;;  %v11644_v13 = vrot.slane %v11642_v32, 1  ;;  %v11646_v18 = vshrl.u32 %v23178_v46, 16  ;;  %v11652_v15 = vrot.slane %v11650_v45, 1  ;;  %v11541_v45 = vld [vmem:[#allocation3 + $0x9c] sm:$0xf] }
 0x4ae   : > { %v23206_v24 = vcombine.low %v25093_v17, %v22972_v38  ;;  %v11654_v59 = vshrl.u32 %v23182_v57, 16  ;;  %v11658_v6 = vshll.u32 %v23201_v21, 16  ;;  %v11662_v1 = vshrl.u32 %v23201_v21, 16  ;;  %16957 = vmatmul.mubr.bf16.gmra.mxu1 %v23081_v63 }
 0x4af   : > { %v23209_v39 = vsel %vm2591_vm4, %v11632_v9, %v11636_v50  ;;  %v11640_v27 = vor.u32 %v11638_v33, %v11636_v50  ;;  %v11648_v35 = vor.u32 %v11646_v18, %v11644_v13  ;;  %v23217_v26 = vcombine.low %v25094_v7, %v22964_v60  ;;  %v25095_v33 = vld [vmem:[#allocation86_spill] sm:$0xff]  ;;  %16960 = vmatprep.mubr.bf16.mxu1 %v23087_v52 }
 0x4b0   : > { %v11666_v56 = vshll.u32 %v23206_v24, 16  ;;  %v11656_v5 = vor.u32 %v11654_v59, %v11652_v15  ;;  %v11660_v4 = vrot.slane %v11658_v6, 1  ;;  %v23224_v32 = vcombine.low %v25095_v33, %v23015_v58  ;;  %16909 = vmatmul.mubr.bf16.gmra.mxu0 %v23022_v37 }
 0x4b1   : > { %v23220_v38 = vsel %vm2591_vm4, %v11640_v27, %v11644_v13  ;;  %v23227_v9 = vsel %vm2591_vm4, %v11648_v35, %v11652_v15  ;;  %v11670_v61 = vshrl.u32 %v23206_v24, 16  ;;  %v11674_v19 = vshll.u32 %v23217_v26, 16  ;;  %16912 = vmatprep.mubr.bf16.mxu0 %v23053_v44 }
 0x4b2   : > { %v11668_v50 = vrot.slane %v11666_v56, 1  ;;  %v23233_v60 = vsel %vm2591_vm4, %v11656_v5, %v11660_v4  ;;  %v11664_v13 = vor.u32 %v11662_v1, %v11660_v4  ;;  %v11682_v18 = vshll.u32 %v23224_v32, 16 }
 0x4b3   : > { %v23238_v58 = vcombine.low %v23000_v48, %v23006_v3  ;;  %v11676_v17 = vrot.slane %v11674_v19, 1  ;;  %v11678_v27 = vshrl.u32 %v23217_v26, 16  ;;  %v23244_v63 = vcombine.low %v23028_v23, %v11541_v45 }
 0x4b4   : > { %v11672_v15 = vor.u32 %v11670_v61, %v11668_v50  ;;  %v23248_v59 = vsel %vm2591_vm4, %v11664_v13, %v11668_v50  ;;  %v11684_v6 = vrot.slane %v11682_v18, 1  ;;  %v11686_v48 = vshrl.u32 %v23224_v32, 16 }
 0x4b5   : > { %v11690_v3 = vshll.u32 %v23238_v58, 16  ;;  %v11680_v37 = vor.u32 %v11678_v27, %v11676_v17  ;;  %v11698_v35 = vshll.u32 %v23244_v63, 16  ;;  %v14681_v1 = vcombine.low %v23028_v23, %v23091_v40 }
 0x4b6   : > { %v23253_v52 = vsel %vm2591_vm4, %v11672_v15, %v11676_v17  ;;  %v10350_v44 = vor.u32 %v23094_v29, %v23089_v16  ;;  %v11688_v56 = vor.u32 %v11686_v48, %v11684_v6  ;;  %v11694_v5 = vshrl.u32 %v23238_v58, 16 }
 0x4b7   : > { %v11692_v7 = vrot.slane %v11690_v3, 1  ;;  %v10940_v4 = vshrl.u32 %v23124_v8, 16  ;;  %v10943_v33 = vshll.u32 %v23124_v8, 16  ;;  %v23264_v45 = vsel %vm2591_vm4, %v11680_v37, %v11684_v6 }
 0x4b8   : > { %v23269_v19 = vrot.slane %v11698_v35, 1  ;;  %v10929_v16 = vsel %vm1295_vm2, %v23057_v42, %v23118_v20  ;;  %v10938_v29 = vsel %vm1295_vm2, %v23118_v20, %v23120_v25  ;;  %v10351_v8 = vsel %vm1295_vm2, %v23041_v34, %v10350_v44  ;;  %v17722_v20 = vld [vmem:[%s24234_s6 + $0x1b0] sm:$0xff]   ;;  %v17725_v34 = vld [vmem:[%s24234_s6 + $0x1a8] sm:$0xff]   ;;  %v23381_v35 = vld [vmem:[#allocation3 + $0x28] sm:$0xff]  }
 0x4b9   : > { %v23267_v50 = vsel %vm2591_vm4, %v11688_v56, %v11692_v7  ;;  %v11696_v61 = vor.u32 %v11694_v5, %v11692_v7  ;;  %16961 = vmatmul.mubr.bf16.gmra.mxu1 %v10929_v16  ;;  %16913 = vmatmul.mubr.bf16.gmra.mxu0 %v10351_v8  ;;  %v10942_v18 = vrot.slane %v10940_v4, 3  ;;  %v10945_v15 = vrot.slane %v10943_v33, 4  ;;  %v23385_v4 = vld [vmem:[#allocation3 + $0x30] sm:$0xff]  }
 0x4ba   : > { %16964 = vmatprep.mubr.bf16.mxu1 %v10938_v29  ;;  %16984 = vmatprep.mubr.bf16.mxu0 %v23061_v28  ;;  %v17728_v28 = vld [vmem:[%s24234_s6 + $0x1a0] sm:$0xff]   ;;  %v12143_v16 = vshll.u32 %v23381_v35, 16  ;;  %v11702_v23 = vshrl.u32 %v23244_v63, 16  ;;  %v17759_v63 = vld [vmem:[%s24234_s6 + $0x230] sm:$0xff]  }
 0x4bb   : > { %v23281_v13 = vsel %vm2591_vm4, %v11696_v61, %v23269_v19  ;;  %v10946_v17 = vor.u32 %v10945_v15, %v10942_v18  ;;  %v12549_v61 = vld [vmem:[#allocation3 + $0x18] sm:$0xe] }
 0x4bd   : > { %v10947_v42 = vsel %vm1295_vm2, %v23120_v25, %v10946_v17  ;;  %v17744_v25 = vld [vmem:[%s24234_s6 + $0x1d8] sm:$0xff]   ;;  %v12151_v17 = vshll.u32 %v23385_v4, 16 }
 0x4c1   : > { %16965 = vmatmul.mubr.bf16.gmra.mxu1 %v10947_v42  ;;  %16985 = vmatmul.mubr.bf16.vlgmr.msra.gmra.mxu0 %v23071_v36  ;;  %v17737_v36 = vld [vmem:[%s24234_s6 + $0x1f0] sm:$0xff]  }
 0x4c2   : > { %17036 = vmatprep.mubr.bf16.mxu1 %v23128_v2  ;;  %16988 = vmatprep.mubr.bf16.mxu0 %v23099_v54  ;;  %v17739_v54 = vld [vmem:[%s24234_s6 + $0x1e8] sm:$0xff]   ;;  %v17748_v2 = vld [vmem:[%s24234_s6 + $0x1d0] sm:$0xff]  }
 0x4c3   : > { %17073 = vmatpush3.bf16.msra.mxu0 %v23035_v53  ;;  %v17731_v53 = vld [vmem:[%s24234_s6 + $0x198] sm:$0xff]  }
 0x4c4   : > { %17074 = vmatprep.subr.bf16.mxu0 %v17722_v20 }
 0x4c7   : > { %17075 = vmatpush3.bf16.msra.mxu0 %v17722_v20 }
 0x4c8   : > { %17076 = vmatprep.subr.bf16.mxu0 %v17725_v34 }
 0x4c9   : > { %17037 = vmatmul.mubr.bf16.vlgmr.msra.gmra.mxu1 %v23144_v47  ;;  %16989 = vmatmul.mubr.bf16.gmra.mxu0 %v23108_v14  ;;  %v17736_v14 = vld [vmem:[%s24234_s6 + $0x190] sm:$0xff]   ;;  %v17751_v47 = vld [vmem:[%s24234_s6 + $0x1c8] sm:$0xff]  }
 0x4ca   : > { %17040 = vmatprep.mubr.bf16.mxu1 %v23153_v41  ;;  %16992 = vmatprep.mubr.bf16.mxu0 %v23112_v22  ;;  %v17742_v22 = vld [vmem:[%s24234_s6 + $0x1e0] sm:$0xff]  }
 0x4cb   : > { %17077 = vmatpush3.bf16.msra.mxu0 %v17725_v34  ;;  %17125 = vmatpush3.bf16.msra.mxu1 %v23104_v62  ;;  %v17741_v62 = vld [vmem:[%s24234_s6 + $0x188] sm:$0xff]  }
 0x4cc   : > { %17078 = vmatprep.subr.bf16.mxu0 %v17728_v28  ;;  %17126 = vmatprep.subr.bf16.mxu1 %v17737_v36 }
 0x4cf   : > { %17079 = vmatpush3.bf16.msra.mxu0 %v17728_v28  ;;  %17127 = vmatpush3.bf16.msra.mxu1 %v17737_v36  ;;  %v12145_v28 = vrot.slane %v12143_v16, 1  ;;  %v23403_v36 = vld [vmem:[#allocation3 + $0x38] sm:$0xff]  }
 0x4d0   : > { %17080 = vmatprep.subr.bf16.mxu0 %v17731_v53  ;;  %17128 = vmatprep.subr.bf16.mxu1 %v17739_v54 }
 0x4d1   : > { %17041 = vmatmul.mubr.bf16.gmra.mxu1 %v23162_v49  ;;  %16993 = vmatmul.mubr.bf16.gmra.mxu0 %v23116_v31  ;;  %v17746_v31 = vld [vmem:[%s24234_s6 + $0x180] sm:$0xff]  }
 0x4d2   : > { %17044 = vmatprep.mubr.bf16.mxu1 %v23165_v11  ;;  %16996 = vmatprep.mubr.bf16.mxu0 %v23140_v12  ;;  %v23342_v12 = vld [vmem:[%s24234_s6 + $0x238] sm:$0xff]   ;;  %v11984_v11 = vld [vmem:[#allocation3 + $0x18] sm:$0xf] }
 0x4d3   : > { %17081 = vmatpush3.bf16.msra.mxu0 %v17731_v53  ;;  %17129 = vmatpush3.bf16.msra.mxu1 %v17739_v54  ;;  %v12147_v54 = vshrl.u32 %v23381_v35, 16 }
 0x4d4   : > { %17082 = vmatprep.subr.bf16.mxu0 %v17736_v14  ;;  %17130 = vmatprep.subr.bf16.mxu1 %v17742_v22 }
 0x4d7   : > { %17083 = vmatpush3.bf16.msra.mxu0 %v17736_v14  ;;  %17131 = vmatpush3.bf16.msra.mxu1 %v17742_v22  ;;  %v12153_v14 = vrot.slane %v12151_v17, 1  ;;  %v23408_v22 = vld [vmem:[#allocation3 + $0x40] sm:$0xff]  }
 0x4d8   : > { %17084 = vmatprep.subr.bf16.mxu0 %v17741_v62  ;;  %17132 = vmatprep.subr.bf16.mxu1 %v17744_v25 }
 0x4d9   : > { %17045 = vmatmul.mubr.bf16.gmra.mxu1 %v23174_v10  ;;  %16997 = vmatmul.mubr.bf16.gmra.mxu0 %v23148_v55  ;;  %v17754_v55 = vld [vmem:[%s24234_s6 + $0x1c0] sm:$0xff]  }
 0x4da   : > { %17048 = vmatprep.mubr.bf16.mxu1 %v23190_v30  ;;  %17000 = vmatprep.mubr.bf16.mxu0 %v23159_v51 }
 0x4db   : > { %17085 = vmatpush3.bf16.msra.mxu0 %v17741_v62  ;;  %17133 = vmatpush3.bf16.msra.mxu1 %v17744_v25  ;;  %v11704_v25 = vor.u32 %v11702_v23, %v23269_v19  ;;  %v17768_v23 = vld [vmem:[%s24234_s6 + $0x218] sm:$0xff]  }
 0x4dc   : > { %17086 = vmatprep.subr.bf16.mxu0 %v17746_v31  ;;  %17134 = vmatprep.subr.bf16.mxu1 %v17748_v2 }
 0x4df   : > { %17087 = vmatpush3.bf16.msra.mxu0 %v17746_v31  ;;  %17135 = vmatpush3.bf16.msra.mxu1 %v17748_v2 }
 0x4e0   : > { %17176 = vmatprep.subr.bf16.mxu0 %v23342_v12  ;;  %17136 = vmatprep.subr.bf16.mxu1 %v17751_v47 }
 0x4e1   : > { %17049 = vmatmul.mubr.bf16.gmra.mxu1 %v23197_v43  ;;  %17001 = vmatmul.mubr.bf16.gmra.mxu0 %v23171_v0  ;;  %v23360_v0 = vld [vmem:[#allocation3 + $0x1c] sm:$0xf] }
 0x4e2   : > { %17052 = vmatprep.mubr.bf16.mxu1 %v23209_v39  ;;  %17004 = vmatprep.mubr.bf16.mxu0 %v23178_v46  ;;  %v14731_v46 = vcombine.low %v11984_v11, %v23360_v0 }
 0x4e3   : > { %17137 = vmatpush3.bf16.msra.mxu1 %v17751_v47 }
 0x4e4   : > { %17138 = vmatprep.subr.bf16.mxu1 %v17754_v55  ;;  %v12128_v7 = vshrl.u32 %v14731_v46, 16 }
 0x4e7   : > { %17139 = vmatpush3.bf16.msra.mxu1 %v17754_v55  ;;  %v16778_v41 = vpop.f32.mrf.mxu0  ;;  %v12149_v55 = vor.u32 %v12147_v54, %v12145_v28  ;;  %v12579_v54 = vrot.slane %v23408_v22, 1 }
 0x4e9   : > { %17053 = vmatmul.mubr.bf16.gmra.mxu1 %v23220_v38  ;;  %17005 = vmatmul.mubr.bf16.gmra.mxu0 %v23182_v57  ;;  %v9687_v51 = vpop.f32.mrf.mxu0 }
 0x4ea   : > { %17056 = vmatprep.mubr.bf16.mxu1 %v23227_v9  ;;  %17008 = vmatprep.mubr.bf16.mxu0 %v23201_v21  ;;  %v23368_v21 = vld [vmem:[#allocation3 + $0x20] sm:$0xff]  }
 0x4eb   : > { %v16779_v49 = vpop.f32.mrf.mxu0  ;;  %v12139_v42 = vshrl.u32 %v23368_v21, 16  ;;  %v12571_v40 = vrot.slane %v23368_v21, 1 }
 0x4ed   : > { %v9690_v10 = vpop.f32.mrf.mxu0 }
 0x4ef   : > { %v16782_v30 = vpop.f32.mrf.mxu0 }
 0x4f0   : > { %v16830_v57 = vpop.f32.mrf.mxu1 }
 0x4f1   : > { %17057 = vmatmul.mubr.bf16.gmra.mxu1 %v23233_v60  ;;  %17009 = vmatmul.mubr.bf16.gmra.mxu0 %v23206_v24  ;;  %v23366_v43 = vadd.f32 %v16830_v57, %v16778_v41  ;;  %v9703_v38 = vpop.f32.mrf.mxu0  ;;  %v12130_v60 = vshll.u32 %v14731_v46, 16  ;;  %v12159_v41 = vshll.u32 %v23403_v36, 16  ;;  %v12167_v46 = vshll.u32 %v23408_v22, 16 }
 0x4f2   : > { %17060 = vmatprep.mubr.bf16.mxu1 %v23248_v59  ;;  %17012 = vmatprep.mubr.bf16.mxu0 %v23217_v26  ;;  %v10103_v39 = vpop.f32.mrf.mxu1  ;;  %v12135_v59 = vshll.u32 %v23368_v21, 16  ;;  %v12155_v21 = vshrl.u32 %v23385_v4, 16 }
 0x4f3   : > { %v23370_v9 = vadd.f32 %v10103_v39, %v9687_v51  ;;  %v16783_v24 = vpop.f32.mrf.mxu0  ;;  %v12132_v37 = vrot.slane %v12130_v60, 1  ;;  %v23427_v60 = vld [vmem:[#allocation3 + $0x48] sm:$0xff]  }
 0x4f4   : > { %v16831_v27 = vpop.f32.mrf.mxu1  ;;  %v12137_v5 = vrot.slane %v12135_v59, 1  ;;  %v12575_v59 = vrot.slane %v23385_v4, 1  ;;  %v17765_v4 = vld [vmem:[%s24234_s6 + $0x220] sm:$0xff]  }
 0x4f5   : > { %v23374_v26 = vadd.f32 %v16831_v27, %v16779_v49  ;;  %v9706_v48 = vpop.f32.mrf.mxu0  ;;  %v17762_v27 = vld [vmem:[%s24234_s6 + $0x228] sm:$0xff]  }
 0x4f6   : > { %v10106_v6 = vpop.f32.mrf.mxu1  ;;  %v12141_v53 = vor.u32 %v12139_v42, %v12137_v5 }
 0x4f7   : > { %v23379_v3 = vadd.f32 %v10106_v6, %v9690_v10  ;;  %v12154_v10 = vsel %vm2591_vm4, %v12149_v55, %v12153_v14  ;;  %v23465_v55 = vld [vmem:[#allocation3 + $0x60] sm:$0xff]  }
 0x4f8   : > { %v12146_v11 = vsel %vm2591_vm4, %v12141_v53, %v12145_v28  ;;  %v23455_v53 = vld [vmem:[#allocation3 + $0x58] sm:$0xff]  }
 0x4f9   : > { %17061 = vmatmul.mubr.bf16.gmra.mxu1 %v23253_v52  ;;  %17013 = vmatmul.mubr.bf16.gmra.mxu0 %v23224_v32  ;;  %v16834_v52 = vpop.f32.mrf.mxu1 }
 0x4fa   : > { %17064 = vmatprep.mubr.bf16.mxu1 %v23264_v45  ;;  %17016 = vmatprep.mubr.bf16.mxu0 %v23238_v58  ;;  %v23383_v44 = vadd.f32 %v16834_v52, %v16782_v30  ;;  %v12133_v45 = vor.u32 %v12132_v37, %v12128_v7  ;;  %v12163_v37 = vshrl.u32 %v23403_v36, 16  ;;  %v12169_v52 = vrot.slane %v12167_v46, 1 }
 0x4fb   : > { %v16786_v56 = vpop.f32.mrf.mxu0  ;;  %v10119_v32 = vpop.f32.mrf.mxu1 }
 0x4fc   : > { %v23387_v33 = vadd.f32 %v10119_v32, %v9703_v38  ;;  %v12138_v18 = vsel %vm2591_vm4, %v12133_v45, %v12137_v5  ;;  %v12161_v38 = vrot.slane %v12159_v41, 1 }
 0x4fd   : > { %v9719_v58 = vpop.f32.mrf.mxu0  ;;  %v16835_v29 = vpop.f32.mrf.mxu1 }
 0x4fe   : > { %v23392_v8 = vadd.f32 %v16835_v29, %v16783_v24  ;;  %v12165_v45 = vor.u32 %v12163_v37, %v12161_v38 }
 0x4ff   : > { %v16787_v15 = vpop.f32.mrf.mxu0  ;;  %v10122_v20 = vpop.f32.mrf.mxu1 }
 0x500   : > { %v23401_v34 = vadd.f32 %v10122_v20, %v9706_v48  ;;  %v12157_v48 = vor.u32 %v12155_v21, %v12153_v14  ;;  %v12199_v21 = vshll.u32 %v23465_v55, 16 }
 0x501   : > { %17065 = vmatmul.mubr.bf16.gmra.mxu1 %v23267_v50  ;;  %17017 = vmatmul.mubr.bf16.gmra.mxu0 %v14681_v1  ;;  %v14773_v50 = vcombine.low %v12549_v61, %v23360_v0 }
 0x502   : > { %17068 = vmatprep.mubr.bf16.mxu1 %v23281_v13  ;;  %17088 = vmatprep.mubr.bf16.mxu0 %v12138_v18  ;;  %v9722_v13 = vpop.f32.mrf.mxu0  ;;  %v16838_v1 = vpop.f32.mrf.mxu1  ;;  %v12162_v29 = vsel %vm2591_vm4, %v12157_v48, %v12161_v38  ;;  %v23481_v48 = vld [vmem:[#allocation3 + $0x68] sm:$0xff]  }
 0x503   : > { %v23410_v62 = vadd.f32 %v16838_v1, %v16786_v56  ;;  %v12570_v31 = vrot.slane %v14773_v50, 1  ;;  %v23437_v56 = vld [vmem:[#allocation3 + $0x50] sm:$0xff]   ;;  %v12171_v50 = vshrl.u32 %v23408_v22, 16  ;;  %v17771_v22 = vld [vmem:[%s24234_s6 + $0x210] sm:$0xff]  }
 0x504   : > { %v16790_v2 = vpop.f32.mrf.mxu0  ;;  %v10135_v47 = vpop.f32.mrf.mxu1  ;;  %v12183_v17 = vshll.u32 %v23437_v56, 16  ;;  %v12187_v38 = vshrl.u32 %v23437_v56, 16 }
 0x505   : > { %v12572_v51 = vsel %vm3600_vm3, %v12570_v31, %v12571_v40  ;;  %v23418_v49 = vadd.f32 %v10135_v47, %v9719_v58  ;;  %v12175_v58 = vshll.u32 %v23427_v60, 16  ;;  %v12173_v14 = vor.u32 %v12171_v50, %v12169_v52 }
 0x506   : > { %v9735_v0 = vpop.f32.mrf.mxu0  ;;  %v16839_v19 = vpop.f32.mrf.mxu1  ;;  %v12577_v31 = vrot.slane %v23403_v36, 1  ;;  %v12185_v47 = vrot.slane %v12183_v17, 1 }
 0x507   : > { %v23423_v57 = vadd.f32 %v16839_v19, %v16787_v15  ;;  %v12170_v15 = vsel %vm2591_vm4, %v12165_v45, %v12169_v52  ;;  %v12177_v28 = vrot.slane %v12175_v58, 1  ;;  %v12583_v52 = vrot.slane %v23437_v56, 1 }
 0x508   : > { %v16791_v30 = vpop.f32.mrf.mxu0  ;;  %v10138_v39 = vpop.f32.mrf.mxu1  ;;  %v12580_v36 = vsel %vm3600_vm3, %v12577_v31, %v12579_v54  ;;  %v12581_v58 = vrot.slane %v23427_v60, 1  ;;  %v12207_v56 = vshll.u32 %v23481_v48, 16 }
 0x509   : > { %17069 = vmatmul.mubr.bf16.gmra.mxu1 %v11704_v25  ;;  %17089 = vmatmul.mubr.bf16.vlgmr.msra.gmra.mxu0 %v12146_v11  ;;  %v23432_v24 = vadd.f32 %v10138_v39, %v9722_v13  ;;  %v12191_v11 = vshll.u32 %v23455_v53, 16  ;;  %v12178_v19 = vsel %vm2591_vm4, %v12173_v14, %v12177_v28 }
 0x50a   : > { %17140 = vmatprep.mubr.bf16.mxu1 %v12572_v51  ;;  %17092 = vmatprep.mubr.bf16.mxu0 %v12154_v10  ;;  %v9738_v6 = vpop.f32.mrf.mxu0  ;;  %v12584_v50 = vsel %vm3600_vm3, %v12581_v58, %v12583_v52 }
 0x50b   : > { %17177 = vmatpush3.bf16.msra.mxu0 %v23342_v12  ;;  %v12573_v12 = vrot.slane %v23381_v35, 1 }
 0x50c   : > { %17178 = vmatprep.subr.bf16.mxu0 %v17759_v63  ;;  %v16842_v7 = vpop.f32.mrf.mxu1 }
 0x50d   : > { %v23439_v5 = vadd.f32 %v16842_v7, %v16790_v2  ;;  %v12574_v32 = vsel %vm3600_vm3, %v12571_v40, %v12573_v12  ;;  %v12576_v35 = vsel %vm3600_vm3, %v12573_v12, %v12575_v59  ;;  %v16794_v16 = vpop.f32.mrf.mxu0  ;;  %v12179_v2 = vshrl.u32 %v23427_v60, 16  ;;  %v17774_v12 = vld [vmem:[%s24234_s6 + $0x208] sm:$0xff]   ;;  %v17777_v60 = vld [vmem:[%s24234_s6 + $0x200] sm:$0xff]  }
 0x50e   : > { %v10151_v61 = vpop.f32.mrf.mxu1  ;;  %v12189_v7 = vor.u32 %v12187_v38, %v12185_v47 }
 0x50f   : > { %17179 = vmatpush3.bf16.msra.mxu0 %v17759_v63  ;;  %v23448_v18 = vadd.f32 %v10151_v61, %v9735_v0  ;;  %v9751_v20 = vpop.f32.mrf.mxu0  ;;  %v12578_v63 = vsel %vm3600_vm3, %v12575_v59, %v12577_v31  ;;  %v12181_v51 = vor.u32 %v12179_v2, %v12177_v28  ;;  %v23491_v61 = vld [vmem:[#allocation3 + $0x70] sm:$0xff]   ;;  %v12203_v31 = vshrl.u32 %v23465_v55, 16 }
 0x510   : > { %17180 = vmatprep.subr.bf16.mxu0 %v17762_v27  ;;  %v16843_v42 = vpop.f32.mrf.mxu1 }
 0x511   : > { %17141 = vmatmul.mubr.bf16.vlgmr.msra.gmra.mxu1 %v12574_v32  ;;  %17093 = vmatmul.mubr.bf16.gmra.mxu0 %v12162_v29  ;;  %v23453_v13 = vadd.f32 %v16843_v42, %v16791_v30  ;;  %v16795_v1 = vpop.f32.mrf.mxu0  ;;  %v12186_v30 = vsel %vm2591_vm4, %v12181_v51, %v12185_v47 }
 0x512   : > { %17144 = vmatprep.mubr.bf16.mxu1 %v12576_v35  ;;  %17096 = vmatprep.mubr.bf16.mxu0 %v12170_v15  ;;  %v10154_v40 = vpop.f32.mrf.mxu1  ;;  %v12201_v35 = vrot.slane %v12199_v21, 1  ;;  %v12582_v15 = vsel %vm3600_vm3, %v12579_v54, %v12581_v58  ;;  %v12215_v54 = vshll.u32 %v23491_v61, 16  ;;  %v23516_v21 = vld [vmem:[#allocation3 + $0x80] sm:$0xff]  }
 0x513   : > { %17181 = vmatpush3.bf16.msra.mxu0 %v17762_v27  ;;  %v23461_v25 = vadd.f32 %v10154_v40, %v9738_v6  ;;  %v9754_v41 = vpop.f32.mrf.mxu0  ;;  %v12193_v6 = vrot.slane %v12191_v11, 1  ;;  %v12587_v11 = vrot.slane %v23465_v55, 1 }
 0x514   : > { %17182 = vmatprep.subr.bf16.mxu0 %v17765_v4 }
 0x515   : > { %v16846_v0 = vpop.f32.mrf.mxu1  ;;  %v12194_v28 = vsel %vm2591_vm4, %v12189_v7, %v12193_v6 }
 0x516   : > { %v23474_v10 = vadd.f32 %v16846_v0, %v16794_v16  ;;  %v16798_v46 = vpop.f32.mrf.mxu0 }
 0x517   : > { %17183 = vmatpush3.bf16.msra.mxu0 %v17765_v4  ;;  %v10167_v39 = vpop.f32.mrf.mxu1  ;;  %v12195_v4 = vshrl.u32 %v23455_v53, 16 }
 0x518   : > { %17184 = vmatprep.subr.bf16.mxu0 %v17768_v23  ;;  %v23479_v27 = vadd.f32 %v10167_v39, %v9751_v20  ;;  %v9767_v59 = vpop.f32.mrf.mxu0 }
 0x519   : > { %17145 = vmatmul.mubr.bf16.gmra.mxu1 %v12578_v63  ;;  %17097 = vmatmul.mubr.bf16.gmra.mxu0 %v12178_v19  ;;  %v16847_v37 = vpop.f32.mrf.mxu1  ;;  %v12197_v42 = vor.u32 %v12195_v4, %v12193_v6  ;;  %v23509_v63 = vld [vmem:[#allocation3 + $0x78] sm:$0xff]   ;;  %v12585_v19 = vrot.slane %v23455_v53, 1 }
 0x51a   : > { %17148 = vmatprep.mubr.bf16.mxu1 %v12580_v36  ;;  %17100 = vmatprep.mubr.bf16.mxu0 %v12186_v30  ;;  %v23487_v32 = vadd.f32 %v16847_v37, %v16795_v1  ;;  %v16799_v45 = vpop.f32.mrf.mxu0  ;;  %v12217_v30 = vrot.slane %v12215_v54, 1  ;;  %v12223_v55 = vshll.u32 %v23509_v63, 16  ;;  %v12227_v54 = vshrl.u32 %v23509_v63, 16 }
 0x51b   : > { %17185 = vmatpush3.bf16.msra.mxu0 %v17768_v23  ;;  %v10170_v16 = vpop.f32.mrf.mxu1  ;;  %v12202_v1 = vsel %vm2591_vm4, %v12197_v42, %v12201_v35  ;;  %v12588_v7 = vsel %vm3600_vm3, %v12585_v19, %v12587_v11 }
 0x51c   : > { %17186 = vmatprep.subr.bf16.mxu0 %v17771_v22  ;;  %v23493_v29 = vadd.f32 %v10170_v16, %v9754_v41  ;;  %v9770_v17 = vpop.f32.mrf.mxu0  ;;  %v12209_v41 = vrot.slane %v12207_v56, 1  ;;  %v12219_v16 = vshrl.u32 %v23491_v61, 16  ;;  %v12225_v42 = vrot.slane %v12223_v55, 1  ;;  %v23531_v56 = vld [vmem:[#allocation3 + $0x88] sm:$0xff]  }
 0x51d   : > { %v16850_v20 = vpop.f32.mrf.mxu1  ;;  %v12235_v55 = vshrl.u32 %v23516_v21, 16 }
 0x51e   : > { %v23502_v23 = vadd.f32 %v16850_v20, %v16798_v46  ;;  %v16802_v40 = vpop.f32.mrf.mxu0  ;;  %v12211_v46 = vshrl.u32 %v23481_v48, 16  ;;  %v12591_v20 = vrot.slane %v23491_v61, 1  ;;  %v12239_v61 = vshll.u32 %v23531_v56, 16 }
 0x51f   : > { %17187 = vmatpush3.bf16.msra.mxu0 %v17771_v22  ;;  %v10183_v14 = vpop.f32.mrf.mxu1  ;;  %v12205_v22 = vor.u32 %v12203_v31, %v12201_v35  ;;  %v12231_v35 = vshll.u32 %v23516_v21, 16  ;;  %v23538_v31 = vld [vmem:[#allocation3 + $0x90] sm:$0xff]  }
 0x520   : > { %17188 = vmatprep.subr.bf16.mxu0 %v17774_v12  ;;  %v23507_v2 = vadd.f32 %v10183_v14, %v9767_v59  ;;  %v9783_v47 = vpop.f32.mrf.mxu0  ;;  %v12586_v59 = vsel %vm3600_vm3, %v12583_v52, %v12585_v19  ;;  %v12229_v19 = vor.u32 %v12227_v54, %v12225_v42 }
 0x521   : > { %17149 = vmatmul.mubr.bf16.gmra.mxu1 %v12582_v15  ;;  %17101 = vmatmul.mubr.bf16.gmra.mxu0 %v12194_v28  ;;  %v16851_v51 = vpop.f32.mrf.mxu1  ;;  %v12210_v53 = vsel %vm2591_vm4, %v12205_v22, %v12209_v41  ;;  %v12233_v14 = vrot.slane %v12231_v35, 1  ;;  %v12595_v35 = vrot.slane %v23516_v21, 1  ;;  %v23566_v21 = vld [vmem:[#allocation3 + $0xa0] sm:$0xff]  }
 0x522   : > { %17152 = vmatprep.mubr.bf16.mxu1 %v12584_v50  ;;  %17104 = vmatprep.mubr.bf16.mxu0 %v12202_v1  ;;  %v23512_v0 = vadd.f32 %v16851_v51, %v16799_v45  ;;  %v16803_v36 = vpop.f32.mrf.mxu0  ;;  %v12221_v50 = vor.u32 %v12219_v16, %v12217_v30  ;;  %v12589_v1 = vrot.slane %v23481_v48, 1 }
 0x523   : > { %17189 = vmatpush3.bf16.msra.mxu0 %v17774_v12  ;;  %v10186_v39 = vpop.f32.mrf.mxu1  ;;  %v12213_v12 = vor.u32 %v12211_v46, %v12209_v41 }
 0x524   : > { %17190 = vmatprep.subr.bf16.mxu0 %v17777_v60  ;;  %v23518_v38 = vadd.f32 %v10186_v39, %v9770_v17  ;;  %v9786_v6 = vpop.f32.mrf.mxu0  ;;  %v12590_v51 = vsel %vm3600_vm3, %v12587_v11, %v12589_v1  ;;  %v12226_v48 = vsel %vm2591_vm4, %v12221_v50, %v12225_v42  ;;  %v12247_v11 = vshll.u32 %v23538_v31, 16 }
 0x525   : > { %v16854_v37 = vpop.f32.mrf.mxu1  ;;  %v12218_v4 = vsel %vm2591_vm4, %v12213_v12, %v12217_v30  ;;  %v23546_v30 = vld [vmem:[#allocation3 + $0x98] sm:$0xff]   ;;  %v12243_v50 = vshrl.u32 %v23531_v56, 16 }
 0x526   : > { %v23524_v45 = vadd.f32 %v16854_v37, %v16802_v40  ;;  %v16806_v58 = vpop.f32.mrf.mxu0 }
 0x527   : > { %17191 = vmatpush3.bf16.msra.mxu0 %v17777_v60  ;;  %v10199_v52 = vpop.f32.mrf.mxu1 }
 0x528   : > { %v23529_v15 = vadd.f32 %v10199_v52, %v9783_v47  ;;  %v9799_v17 = vpop.f32.mrf.mxu0  ;;  %v12255_v52 = vshll.u32 %v23546_v30, 16 }
 0x529   : > { %17153 = vmatmul.mubr.bf16.gmra.mxu1 %v12586_v59  ;;  %17105 = vmatmul.mubr.bf16.gmra.mxu0 %v12210_v53  ;;  %v16855_v60 = vpop.f32.mrf.mxu1  ;;  %v12241_v53 = vrot.slane %v12239_v61, 1 }
 0x52a   : > { %17156 = vmatprep.mubr.bf16.mxu1 %v12588_v7  ;;  %17108 = vmatprep.mubr.bf16.mxu0 %v12218_v4  ;;  %v23534_v28 = vadd.f32 %v16855_v60, %v16803_v36  ;;  %v16807_v40 = vpop.f32.mrf.mxu0  ;;  %v12592_v36 = vsel %vm3600_vm3, %v12589_v1, %v12591_v20  ;;  %v12593_v60 = vrot.slane %v23509_v63, 1  ;;  %v12249_v1 = vrot.slane %v12247_v11, 1 }
 0x52b   : > { %v10202_v47 = vpop.f32.mrf.mxu1  ;;  %v12257_v63 = vrot.slane %v12255_v52, 1 }
 0x52c   : > { %v23540_v41 = vadd.f32 %v10202_v47, %v9786_v6  ;;  %v9802_v22 = vpop.f32.mrf.mxu0  ;;  %v12234_v6 = vsel %vm2591_vm4, %v12229_v19, %v12233_v14  ;;  %v12245_v19 = vor.u32 %v12243_v50, %v12241_v53  ;;  %v12599_v50 = vrot.slane %v23538_v31, 1 }
 0x52d   : > { %v16858_v46 = vpop.f32.mrf.mxu1 }
 0x52e   : > { %v23548_v39 = vadd.f32 %v16858_v46, %v16806_v58  ;;  %v16810_v59 = vpop.f32.mrf.mxu0  ;;  %v12237_v58 = vor.u32 %v12235_v55, %v12233_v14  ;;  %v12259_v55 = vshrl.u32 %v23546_v30, 16 }
 0x52f   : > { %v10215_v12 = vpop.f32.mrf.mxu1 }
 0x530   : > { %v23553_v37 = vadd.f32 %v10215_v12, %v9799_v17  ;;  %v9815_v7 = vpop.f32.mrf.mxu0  ;;  %v12594_v17 = vsel %vm3600_vm3, %v12591_v20, %v12593_v60  ;;  %v12242_v61 = vsel %vm2591_vm4, %v12237_v58, %v12241_v53  ;;  %v12263_v20 = vshll.u32 %v23566_v21, 16  ;;  %v17778_v58 = vld [vmem:[#allocation3 + $0x18] sm:$0xfe]  }
 0x531   : > { %17157 = vmatmul.mubr.bf16.gmra.mxu1 %v12590_v51  ;;  %17109 = vmatmul.mubr.bf16.gmra.mxu0 %v12226_v48  ;;  %v16859_v4 = vpop.f32.mrf.mxu1  ;;  %v17779_v48 = vld [vmem:[#allocation3 + $0x20] sm:$0xff]   ;;  %v12251_v12 = vshrl.u32 %v23538_v31, 16 }
 0x532   : > { %17160 = vmatprep.mubr.bf16.mxu1 %v12592_v36  ;;  %17112 = vmatprep.mubr.bf16.mxu0 %v12234_v6  ;;  %v23557_v16 = vadd.f32 %v16859_v4, %v16807_v40  ;;  %v16811_v42 = vpop.f32.mrf.mxu0  ;;  %v12596_v40 = vsel %vm3600_vm3, %v12593_v60, %v12595_v35  ;;  %v12597_v4 = vrot.slane %v23531_v56, 1 }
 0x533   : > { %v10218_v54 = vpop.f32.mrf.mxu1 }
 0x534   : > { %v23561_v47 = vadd.f32 %v10218_v54, %v9802_v22  ;;  %v23564_v51 = vpop.f32.mrf.mxu0  ;;  %v12250_v22 = vsel %vm2591_vm4, %v12245_v19, %v12249_v1  ;;  %v12253_v54 = vor.u32 %v12251_v12, %v12249_v1  ;;  %v12598_v56 = vsel %vm3600_vm3, %v12595_v35, %v12597_v4 }
 0x535   : > { %25096 = vst [vmem:[#allocation91_spill] sm:$0xff] %v23564_v51  ;;  %v16862_v14 = vpop.f32.mrf.mxu1  ;;  %v13035_v51 = vshll.u32 %v17778_v58, 16  ;;  %v12600_v31 = vsel %vm3600_vm3, %v12597_v4, %v12599_v50  ;;  %v17780_v4 = vld [vmem:[#allocation3 + $0x28] sm:$0xff]  }
 0x536   : > { %v23570_v46 = vadd.f32 %v16862_v14, %v16810_v59  ;;  %v16882_v36 = vpop.f32.mrf.mxu0  ;;  %v12265_v14 = vrot.slane %v12263_v20, 1  ;;  %v12258_v1 = vsel %vm2591_vm4, %v12253_v54, %v12257_v63  ;;  %v12267_v20 = vshrl.u32 %v23566_v21, 16 }
 0x537   : > { %v10231_v6 = vpop.f32.mrf.mxu1  ;;  %v10597_v11 = vadd.f32 %v16882_v36, %v23366_v43 }
 0x538   : > { %v23577_v53 = vadd.f32 %v10231_v6, %v9815_v7  ;;  %v10452_v59 = vpop.f32.mrf.mxu0  ;;  %v13032_v6 = vshrl.u32 %v17778_v58, 16 }
 0x539   : > { %17161 = vmatmul.mubr.bf16.gmra.mxu1 %v12594_v17  ;;  %17113 = vmatmul.mubr.bf16.gmra.mxu0 %v12242_v61  ;;  %v16863_v52 = vpop.f32.mrf.mxu1  ;;  %v10595_v60 = vadd.f32 %v10452_v59, %v23370_v9  ;;  %v12261_v17 = vor.u32 %v12259_v55, %v12257_v63  ;;  %v13043_v61 = vshll.u32 %v17779_v48, 16  ;;  %v17781_v59 = vld [vmem:[#allocation3 + $0x30] sm:$0xff]  }
 0x53a   : > { %17164 = vmatprep.mubr.bf16.mxu1 %v12596_v40  ;;  %17116 = vmatprep.mubr.bf16.mxu0 %v12250_v22  ;;  %v23582_v19 = vadd.f32 %v16863_v52, %v16811_v42  ;;  %v16883_v43 = vpop.f32.mrf.mxu0  ;;  %v13040_v40 = vshrl.u32 %v17779_v48, 16  ;;  %v13034_v54 = vrot.slane %v13032_v6, 1  ;;  %v13052_v6 = vshll.u32 %v17780_v4, 16 }
 0x53b   : > { %v23584_v36 = vpop.f32.mrf.mxu1  ;;  %v10598_v7 = vadd.f32 %v16883_v43, %v23374_v26  ;;  %v12266_v26 = vsel %vm2591_vm4, %v12261_v17, %v12265_v14  ;;  %v13045_v55 = vrot.slane %v13043_v61, 2  ;;  %v13037_v43 = vrot.slane %v13035_v51, 2 }
 0x53c   : > { %v10455_v22 = vpop.f32.mrf.mxu0  ;;  %v13042_v35 = vrot.slane %v13040_v40, 1  ;;  %v12603_v17 = vrot.slane %v23566_v21, 1  ;;  %v12269_v40 = vor.u32 %v12267_v20, %v12265_v14 }
 0x53d   : > { %v16934_v9 = vpop.f32.mrf.mxu1  ;;  %v10596_v42 = vadd.f32 %v10455_v22, %v23379_v3  ;;  %v12601_v22 = vrot.slane %v23546_v30, 1  ;;  %v13038_v30 = vor.u32 %v13037_v43, %v13034_v54  ;;  %v13054_v54 = vrot.slane %v13052_v6, 2  ;;  %v17782_v43 = vld [vmem:[#allocation3 + $0x38] sm:$0xff]  }
 0x53e   : > { %v23592_v48 = vadd.f32 %v16934_v9, %v10597_v11 }
 0x53f   : > { %v16886_v12 = vpop.f32.mrf.mxu0  ;;  %v11048_v58 = vpop.f32.mrf.mxu1  ;;  %v12604_v21 = vsel %vm3600_vm3, %v12601_v22, %v12603_v17 }
 0x540   : > { %v10601_v52 = vadd.f32 %v16886_v12, %v23383_v44  ;;  %v23596_v3 = vadd.f32 %v11048_v58, %v10595_v60  ;;  %v13058_v44 = vshrl.u32 %v17781_v59, 16 }
 0x541   : > { %17165 = vmatmul.mubr.bf16.gmra.mxu1 %v12598_v56  ;;  %17117 = vmatmul.mubr.bf16.gmra.mxu0 %v12258_v1  ;;  %v10468_v63 = vpop.f32.mrf.mxu0  ;;  %v16935_v11 = vpop.f32.mrf.mxu1  ;;  %v13061_v1 = vshll.u32 %v17781_v59, 16 }
 0x542   : > { %17168 = vmatprep.mubr.bf16.mxu1 %v12600_v31  ;;  %17120 = vmatprep.mubr.bf16.mxu0 %v12266_v26  ;;  %v10599_v56 = vadd.f32 %v10468_v63, %v23387_v33  ;;  %v23601_v61 = vadd.f32 %v16935_v11, %v10598_v7  ;;  %v13046_v31 = vor.u32 %v13045_v55, %v13042_v35  ;;  %v13049_v26 = vshrl.u32 %v17780_v4, 16  ;;  %v17783_v55 = vld [vmem:[#allocation3 + $0x40] sm:$0xff]  }
 0x543   : > { %v16887_v9 = vpop.f32.mrf.mxu0  ;;  %v11051_v12 = vpop.f32.mrf.mxu1  ;;  %v12602_v33 = vsel %vm3600_vm3, %v12599_v50, %v12601_v22  ;;  %v13060_v35 = vrot.slane %v13058_v44, 1  ;;  %v13076_v44 = vshrl.u32 %v17783_v55, 16 }
 0x544   : > { %v10602_v60 = vadd.f32 %v16887_v9, %v23392_v8  ;;  %v23604_v51 = vadd.f32 %v11051_v12, %v10596_v42  ;;  %v13047_v8 = vsel %vm4062_vm5, %v13038_v30, %v13046_v31  ;;  %v13063_v42 = vrot.slane %v13061_v1, 2 }
 0x545   : > { %v10471_v58 = vpop.f32.mrf.mxu0  ;;  %v13051_v4 = vrot.slane %v13049_v26, 1  ;;  %v13079_v1 = vshll.u32 %v17783_v55, 16  ;;  %v13067_v30 = vshrl.u32 %v17782_v43, 16  ;;  %v13070_v26 = vshll.u32 %v17782_v43, 16 }
 0x546   : > { %v16938_v63 = vpop.f32.mrf.mxu1  ;;  %v10600_v14 = vadd.f32 %v10471_v58, %v23401_v34  ;;  %v13064_v12 = vor.u32 %v13063_v42, %v13060_v35  ;;  %v13078_v35 = vrot.slane %v13076_v44, 1  ;;  %v17785_v42 = vld [vmem:[#allocation3 + $0x50] sm:$0xff]  }
 0x547   : > { %v23609_v7 = vadd.f32 %v16938_v63, %v10601_v52  ;;  %v16890_v20 = vpop.f32.mrf.mxu0  ;;  %v13097_v44 = vshll.u32 %v17785_v42, 16 }
 0x548   : > { %v11064_v59 = vpop.f32.mrf.mxu1  ;;  %v10605_v50 = vadd.f32 %v16890_v20, %v23410_v62  ;;  %v13055_v62 = vor.u32 %v13054_v54, %v13051_v4  ;;  %v13072_v4 = vrot.slane %v13070_v26, 2 }
 0x549   : > { %17169 = vmatmul.mubr.bf16.gmra.mxu1 %v12602_v33  ;;  %17121 = vmatmul.mubr.bf16.gmra.mxu0 %v12269_v40  ;;  %v23613_v11 = vadd.f32 %v11064_v59, %v10599_v56  ;;  %v10484_v34 = vpop.f32.mrf.mxu0  ;;  %v13069_v59 = vrot.slane %v13067_v30, 1 }
 0x54a   : > { %17172 = vmatprep.mubr.bf16.mxu1 %v12604_v21  ;;  %17192 = vmatprep.mubr.bf16.mxu0 %v13047_v8  ;;  %v16939_v52 = vpop.f32.mrf.mxu1  ;;  %v10603_v22 = vadd.f32 %v10484_v34, %v23418_v49  ;;  %v13056_v49 = vsel %vm4062_vm5, %v13046_v31, %v13055_v62  ;;  %v13065_v8 = vsel %vm4062_vm5, %v13055_v62, %v13064_v12 }
 0x54b   : > { %v23616_v9 = vadd.f32 %v16939_v52, %v10602_v60  ;;  %v16891_v40 = vpop.f32.mrf.mxu0 }
 0x54c   : > { %v11067_v33 = vpop.f32.mrf.mxu1  ;;  %v10606_v58 = vadd.f32 %v16891_v40, %v23423_v57  ;;  %v13081_v57 = vrot.slane %v13079_v1, 2  ;;  %v13094_v40 = vshrl.u32 %v17785_v42, 16 }
 0x54d   : > { %v23619_v6 = vadd.f32 %v11067_v33, %v10600_v14  ;;  %v10487_v56 = vpop.f32.mrf.mxu0 }
 0x54e   : > { %v16942_v63 = vpop.f32.mrf.mxu1  ;;  %v10604_v21 = vadd.f32 %v10487_v56, %v23432_v24  ;;  %v13082_v52 = vor.u32 %v13081_v57, %v13078_v35  ;;  %v13099_v35 = vrot.slane %v13097_v44, 2 }
 0x54f   : > { %v23623_v60 = vadd.f32 %v16942_v63, %v10605_v50  ;;  %v16894_v20 = vpop.f32.mrf.mxu0 }
 0x550   : > { %v11080_v55 = vpop.f32.mrf.mxu1  ;;  %v10609_v14 = vadd.f32 %v16894_v20, %v23439_v5  ;;  %v13073_v5 = vor.u32 %v13072_v4, %v13069_v59  ;;  %v17786_v59 = vld [vmem:[#allocation3 + $0x58] sm:$0xff]  }
 0x551   : > { %17173 = vmatmul.mubr.bf16.gmra.mxu1 %v12603_v17  ;;  %17193 = vmatmul.mubr.bf16.vlgmr.msra.gmra.mxu0 %v13056_v49  ;;  %v17784_v17 = vld [vmem:[#allocation3 + $0x48] sm:$0xff]   ;;  %v23627_v54 = vadd.f32 %v11080_v55, %v10603_v22  ;;  %v10500_v24 = vpop.f32.mrf.mxu0 }
 0x552   : > { %17196 = vmatprep.mubr.bf16.mxu0 %v13065_v8  ;;  %v16943_v31 = vpop.f32.mrf.mxu1  ;;  %v10607_v50 = vadd.f32 %v10500_v24, %v23448_v18  ;;  %v13085_v62 = vshrl.u32 %v17784_v17, 16  ;;  %v13088_v30 = vshll.u32 %v17784_v17, 16  ;;  %v13074_v18 = vsel %vm4062_vm5, %v13064_v12, %v13073_v5 }
 0x553   : > { %v23630_v43 = vadd.f32 %v16943_v31, %v10606_v58  ;;  %v16895_v34 = vpop.f32.mrf.mxu0  ;;  %v13083_v20 = vsel %vm4062_vm5, %v13073_v5, %v13082_v52  ;;  %v13096_v8 = vrot.slane %v13094_v40, 1  ;;  %v13103_v5 = vshrl.u32 %v17786_v59, 16 }
 0x554   : > { %v11083_v1 = vpop.f32.mrf.mxu1  ;;  %v10610_v33 = vadd.f32 %v16895_v34, %v23453_v13  ;;  %v17787_v13 = vld [vmem:[#allocation3 + $0x60] sm:$0xff]   ;;  %v13090_v55 = vrot.slane %v13088_v30, 2 }
 0x555   : > { %v23633_v26 = vadd.f32 %v11083_v1, %v10604_v21  ;;  %v10503_v22 = vpop.f32.mrf.mxu0  ;;  %v13087_v21 = vrot.slane %v13085_v62, 1  ;;  %v13100_v31 = vor.u32 %v13099_v35, %v13096_v8  ;;  %v13112_v34 = vshrl.u32 %v17787_v13, 16 }
 0x556   : > { %v16946_v56 = vpop.f32.mrf.mxu1  ;;  %v10608_v63 = vadd.f32 %v10503_v22, %v23461_v25  ;;  %v13115_v40 = vshll.u32 %v17787_v13, 16  ;;  %v13106_v62 = vshll.u32 %v17786_v59, 16 }
 0x557   : > { %v23637_v58 = vadd.f32 %v16946_v56, %v10609_v14 }
 0x558   : > { %v16898_v49 = vpop.f32.mrf.mxu0  ;;  %v11096_v57 = vpop.f32.mrf.mxu1  ;;  %v13117_v8 = vrot.slane %v13115_v40, 2 }
 0x559   : > { %17197 = vmatmul.mubr.bf16.gmra.mxu0 %v13074_v18  ;;  %v10613_v42 = vadd.f32 %v16898_v49, %v23474_v10  ;;  %v23641_v4 = vadd.f32 %v11096_v57, %v10607_v50  ;;  %v13091_v10 = vor.u32 %v13090_v55, %v13087_v21  ;;  %v13108_v57 = vrot.slane %v13106_v62, 2  ;;  %v17788_v21 = vld [vmem:[#allocation3 + $0x68] sm:$0xff]  }
 0x55a   : > { %17200 = vmatprep.mubr.bf16.mxu0 %v13083_v20  ;;  %v10516_v25 = vpop.f32.mrf.mxu0  ;;  %v16947_v12 = vpop.f32.mrf.mxu1  ;;  %v13114_v20 = vrot.slane %v13112_v34, 1 }
 0x55b   : > { %v10611_v14 = vadd.f32 %v10516_v25, %v23479_v27  ;;  %v23644_v17 = vadd.f32 %v16947_v12, %v10610_v33  ;;  %v13092_v27 = vsel %vm4062_vm5, %v13082_v52, %v13091_v10  ;;  %v13101_v49 = vsel %vm4062_vm5, %v13091_v10, %v13100_v31 }
 0x55c   : > { %v16899_v24 = vpop.f32.mrf.mxu0  ;;  %v11099_v44 = vpop.f32.mrf.mxu1  ;;  %v13118_v12 = vor.u32 %v13117_v8, %v13114_v20  ;;  %v13121_v10 = vshrl.u32 %v17788_v21, 16 }
 0x55d   : > { %v10614_v1 = vadd.f32 %v16899_v24, %v23487_v32  ;;  %v23647_v30 = vadd.f32 %v11099_v44, %v10608_v63  ;;  %v17789_v32 = vld [vmem:[#allocation3 + $0x70] sm:$0xff]   ;;  %v13105_v63 = vrot.slane %v13103_v5, 1  ;;  %v13124_v5 = vshll.u32 %v17788_v21, 16 }
 0x55e   : > { %v10519_v50 = vpop.f32.mrf.mxu0  ;;  %v16950_v22 = vpop.f32.mrf.mxu1  ;;  %v13130_v24 = vshrl.u32 %v17789_v32, 16  ;;  %v13133_v34 = vshll.u32 %v17789_v32, 16 }
 0x55f   : > { %v10612_v56 = vadd.f32 %v10519_v50, %v23493_v29  ;;  %v23651_v33 = vadd.f32 %v16950_v22, %v10613_v42 }
 0x560   : > { %v16902_v18 = vpop.f32.mrf.mxu0  ;;  %v11112_v35 = vpop.f32.mrf.mxu1  ;;  %v13135_v20 = vrot.slane %v13133_v34, 2 }
 0x561   : > { %17201 = vmatmul.mubr.bf16.gmra.mxu0 %v13092_v27  ;;  %v10617_v13 = vadd.f32 %v16902_v18, %v23502_v23  ;;  %v23655_v55 = vadd.f32 %v11112_v35, %v10611_v14  ;;  %v13109_v23 = vor.u32 %v13108_v57, %v13105_v63  ;;  %v13126_v35 = vrot.slane %v13124_v5, 2  ;;  %v17790_v63 = vld [vmem:[#allocation3 + $0x78] sm:$0xff]  }
 0x562   : > { %17204 = vmatprep.mubr.bf16.mxu0 %v13101_v49  ;;  %v10532_v29 = vpop.f32.mrf.mxu0  ;;  %v16951_v52 = vpop.f32.mrf.mxu1  ;;  %v13132_v49 = vrot.slane %v13130_v24, 1 }
 0x563   : > { %v10615_v42 = vadd.f32 %v10532_v29, %v23507_v2  ;;  %v23658_v59 = vadd.f32 %v16951_v52, %v10614_v1  ;;  %v13110_v2 = vsel %vm4062_vm5, %v13100_v31, %v13109_v23  ;;  %v13119_v18 = vsel %vm4062_vm5, %v13109_v23, %v13118_v12 }
 0x564   : > { %v16903_v25 = vpop.f32.mrf.mxu0  ;;  %v11115_v40 = vpop.f32.mrf.mxu1  ;;  %v13136_v52 = vor.u32 %v13135_v20, %v13132_v49  ;;  %v13139_v23 = vshrl.u32 %v17790_v63, 16 }
 0x565   : > { %v10618_v44 = vadd.f32 %v16903_v25, %v23512_v0  ;;  %v23661_v62 = vadd.f32 %v11115_v40, %v10612_v56  ;;  %v17791_v0 = vld [vmem:[#allocation3 + $0x80] sm:$0xff]   ;;  %v13123_v56 = vrot.slane %v13121_v10, 1  ;;  %v13142_v10 = vshll.u32 %v17790_v63, 16 }
 0x566   : > { %v10535_v14 = vpop.f32.mrf.mxu0  ;;  %v16954_v50 = vpop.f32.mrf.mxu1  ;;  %v13148_v25 = vshrl.u32 %v17791_v0, 16  ;;  %v13151_v24 = vshll.u32 %v17791_v0, 16 }
 0x567   : > { %v10616_v22 = vadd.f32 %v10535_v14, %v23518_v38  ;;  %v23665_v1 = vadd.f32 %v16954_v50, %v10617_v13 }
 0x568   : > { %v16906_v27 = vpop.f32.mrf.mxu0  ;;  %v11128_v8 = vpop.f32.mrf.mxu1  ;;  %v13153_v49 = vrot.slane %v13151_v24, 2 }
 0x569   : > { %17205 = vmatmul.mubr.bf16.gmra.mxu0 %v13110_v2  ;;  %v10621_v32 = vadd.f32 %v16906_v27, %v23524_v45  ;;  %v23669_v57 = vadd.f32 %v11128_v8, %v10615_v42  ;;  %v13127_v45 = vor.u32 %v13126_v35, %v13123_v56  ;;  %v13144_v8 = vrot.slane %v13142_v10, 2  ;;  %v17792_v56 = vld [vmem:[#allocation3 + $0x88] sm:$0xff]  }
 0x56a   : > { %17208 = vmatprep.mubr.bf16.mxu0 %v13119_v18  ;;  %v10548_v38 = vpop.f32.mrf.mxu0  ;;  %v16955_v31 = vpop.f32.mrf.mxu1  ;;  %v13150_v18 = vrot.slane %v13148_v25, 1 }
 0x56b   : > { %v10619_v13 = vadd.f32 %v10548_v38, %v23529_v15  ;;  %v23672_v21 = vadd.f32 %v16955_v31, %v10618_v44  ;;  %v13128_v15 = vsel %vm4062_vm5, %v13118_v12, %v13127_v45  ;;  %v13137_v27 = vsel %vm4062_vm5, %v13127_v45, %v13136_v52 }
 0x56c   : > { %v16907_v29 = vpop.f32.mrf.mxu0  ;;  %v11131_v34 = vpop.f32.mrf.mxu1  ;;  %v13154_v31 = vor.u32 %v13153_v49, %v13150_v18  ;;  %v13157_v45 = vshrl.u32 %v17792_v56, 16  ;;  %v17795_v49 = vld [vmem:[#allocation3 + $0xa0] sm:$0xff]  }
 0x56d   : > { %v10622_v40 = vadd.f32 %v16907_v29, %v23534_v28  ;;  %v23675_v5 = vadd.f32 %v11131_v34, %v10616_v22  ;;  %v17793_v28 = vld [vmem:[#allocation3 + $0x90] sm:$0xff]   ;;  %v13141_v22 = vrot.slane %v13139_v23, 1  ;;  %v13160_v23 = vshll.u32 %v17792_v56, 16 }
 0x56e   : > { %v10551_v42 = vpop.f32.mrf.mxu0  ;;  %v16958_v14 = vpop.f32.mrf.mxu1  ;;  %v13166_v29 = vshrl.u32 %v17793_v28, 16  ;;  %v13169_v25 = vshll.u32 %v17793_v28, 16 }
 0x56f   : > { %v10620_v50 = vadd.f32 %v10551_v42, %v23540_v41  ;;  %v23679_v44 = vadd.f32 %v16958_v14, %v10621_v32 }
 0x570   : > { %v16910_v2 = vpop.f32.mrf.mxu0  ;;  %v11144_v20 = vpop.f32.mrf.mxu1  ;;  %v13168_v18 = vrot.slane %v13166_v29, 1 }
 0x571   : > { %17209 = vmatmul.mubr.bf16.gmra.mxu0 %v13128_v15  ;;  %v10625_v0 = vadd.f32 %v16910_v2, %v23548_v39  ;;  %v23683_v35 = vadd.f32 %v11144_v20, %v10619_v13  ;;  %v13145_v39 = vor.u32 %v13144_v8, %v13141_v22  ;;  %v13159_v20 = vrot.slane %v13157_v45, 1 }
 0x572   : > { %17212 = vmatprep.mubr.bf16.mxu0 %v13137_v27  ;;  %v10564_v41 = vpop.f32.mrf.mxu0  ;;  %v16959_v12 = vpop.f32.mrf.mxu1  ;;  %v13162_v22 = vrot.slane %v13160_v23, 2 }
 0x573   : > { %v10623_v32 = vadd.f32 %v10564_v41, %v23553_v37  ;;  %v23686_v63 = vadd.f32 %v16959_v12, %v10622_v40  ;;  %v13146_v37 = vsel %vm4062_vm5, %v13136_v52, %v13145_v39  ;;  %v17794_v40 = vld [vmem:[#allocation3 + $0x98] sm:$0xff]   ;;  %v13155_v27 = vsel %vm4062_vm5, %v13145_v39, %v13154_v31  ;;  %v25097_v39 = vld [vmem:[#allocation91_spill] sm:$0xff] }
 0x574   : > { %v16911_v38 = vpop.f32.mrf.mxu0  ;;  %v11147_v24 = vpop.f32.mrf.mxu1  ;;  %v13175_v56 = vshrl.u32 %v17794_v40, 16  ;;  %v13178_v41 = vshll.u32 %v17794_v40, 16 }
 0x575   : > { %v10626_v34 = vadd.f32 %v16911_v38, %v23557_v16  ;;  %v23689_v10 = vadd.f32 %v11147_v24, %v10620_v50  ;;  %v13171_v16 = vrot.slane %v13169_v25, 2  ;;  %v13184_v25 = vshrl.u32 %v17795_v49, 16 }
 0x576   : > { %v10567_v13 = vpop.f32.mrf.mxu0  ;;  %v13187_v24 = vshll.u32 %v17795_v49, 16 }
 0x577   : > { %v10624_v14 = vadd.f32 %v10567_v13, %v23561_v47  ;;  %v13172_v29 = vor.u32 %v13171_v16, %v13168_v18 }
 0x578   : > { %v13189_v49 = vrot.slane %v13187_v24, 2 }
 0x579   : > { %v16962_v42 = vpop.f32.mrf.mxu1  ;;  %v16914_v2 = vpop.f32.mrf.mxu0  ;;  %17213 = vmatmul.mubr.bf16.gmra.mxu0 %v13146_v37 }
 0x57a   : > { %v23693_v15 = vadd.f32 %v16962_v42, %v10625_v0  ;;  %v10629_v50 = vadd.f32 %v16914_v2, %v23570_v46  ;;  %17216 = vmatprep.mubr.bf16.mxu0 %v13155_v27  ;;  %v10235_v46 = vadd.f32 %v23584_v36, %v25097_v39  ;;  %v13180_v2 = vrot.slane %v13178_v41, 2 }
 0x57b   : > { %v11160_v28 = vpop.f32.mrf.mxu1  ;;  %v10580_v47 = vpop.f32.mrf.mxu0  ;;  %v13186_v36 = vrot.slane %v13184_v25, 1 }
 0x57c   : > { %v23697_v8 = vadd.f32 %v11160_v28, %v10623_v32  ;;  %v10627_v0 = vadd.f32 %v10580_v47, %v23577_v53  ;;  %v13163_v32 = vor.u32 %v13162_v22, %v13159_v20 }
 0x57d   : > { %v16963_v52 = vpop.f32.mrf.mxu1  ;;  %v16915_v38 = vpop.f32.mrf.mxu0  ;;  %v13190_v41 = vor.u32 %v13189_v49, %v13186_v36 }
 0x57e   : > { %v23700_v12 = vadd.f32 %v16963_v52, %v10626_v34  ;;  %v10630_v45 = vadd.f32 %v16915_v38, %v23582_v19  ;;  %v13164_v40 = vsel %vm4062_vm5, %v13154_v31, %v13163_v32  ;;  %v13177_v34 = vrot.slane %v13175_v56, 1 }
 0x57f   : > { %v11163_v13 = vpop.f32.mrf.mxu1  ;;  %v10583_v42 = vpop.f32.mrf.mxu0  ;;  %v13173_v16 = vsel %vm4062_vm5, %v13163_v32, %v13172_v29 }
 0x580   : > { %v23705_v23 = vadd.f32 %v11163_v13, %v10624_v14  ;;  %v10628_v53 = vadd.f32 %v10583_v42, %v10235_v46  ;;  %v17796_v14 = vld [vmem:[#allocation3 + $0xa8] ss:$0 sps:$4 sm:$0x11]   ;;  %v13181_v56 = vor.u32 %v13180_v2, %v13177_v34 }
 0x581   : > { %v16966_v37 = vpop.f32.mrf.mxu1  ;;  %v16986_v18 = vpop.f32.mrf.mxu0  ;;  %17217 = vmatmul.mubr.bf16.gmra.mxu0 %v13164_v40  ;;  %v13193_v24 = vshll.u32 %v17796_v14, 16 }
 0x582   : > { %v23708_v27 = vadd.f32 %v16966_v37, %v10629_v50  ;;  %v11507_v19 = vadd.f32 %v16986_v18, %v23592_v48  ;;  %17220 = vmatprep.mubr.bf16.mxu0 %v13173_v16  ;;  %v13182_v13 = vsel %vm4062_vm5, %v13172_v29, %v13181_v56 }
 0x583   : > { %v11176_v28 = vpop.f32.mrf.mxu1  ;;  %v11362_v22 = vpop.f32.mrf.mxu0 }
 0x584   : > { %v23712_v20 = vadd.f32 %v11176_v28, %v10627_v0  ;;  %v11505_v31 = vadd.f32 %v11362_v22, %v23596_v3 }
 0x585   : > { %v16967_v47 = vpop.f32.mrf.mxu1  ;;  %v16987_v50 = vpop.f32.mrf.mxu0 }
 0x586   : > { %v23715_v52 = vadd.f32 %v16967_v47, %v10630_v45  ;;  %v11508_v25 = vadd.f32 %v16987_v50, %v23601_v61  ;;  %v13191_v45 = vsel %vm4062_vm5, %v13181_v56, %v13190_v41  ;;  %v13195_v61 = vrot.slane %v13193_v24, 2 }
 0x587   : > { %v11179_v38 = vpop.f32.mrf.mxu1  ;;  %v11365_v48 = vpop.f32.mrf.mxu0 }
 0x588   : > { %v23718_v39 = vadd.f32 %v11179_v38, %v10628_v53  ;;  %v11506_v0 = vadd.f32 %v11365_v48, %v23604_v51  ;;  %v13196_v36 = vsel %vm4062_vm5, %v13190_v41, %v13195_v61 }
 0x589   : > { %v17038_v46 = vpop.f32.mrf.mxu1  ;;  %v16990_v3 = vpop.f32.mrf.mxu0  ;;  %17221 = vmatmul.mubr.bf16.gmra.mxu0 %v13182_v13 }
 0x58a   : > { %v23722_v32 = vadd.f32 %v17038_v46, %v11507_v19  ;;  %v11511_v37 = vadd.f32 %v16990_v3, %v23609_v7  ;;  %17224 = vmatprep.mubr.bf16.mxu0 %v13191_v45 }
 0x58b   : > { %v11805_v42 = vpop.f32.mrf.mxu1  ;;  %v11378_v53 = vpop.f32.mrf.mxu0 }
 0x58c   : > { %v23726_v40 = vadd.f32 %v11805_v42, %v11505_v31  ;;  %v11509_v2 = vadd.f32 %v11378_v53, %v23613_v11 }
 0x58d   : > { %v17039_v34 = vpop.f32.mrf.mxu1  ;;  %v16991_v29 = vpop.f32.mrf.mxu0 }
 0x58e   : > { %v23729_v51 = vadd.f32 %v17039_v34, %v11508_v25  ;;  %v11512_v16 = vadd.f32 %v16991_v29, %v23616_v9 }
 0x58f   : > { %v11808_v18 = vpop.f32.mrf.mxu1  ;;  %v11381_v28 = vpop.f32.mrf.mxu0 }
 0x590   : > { %v23733_v49 = vadd.f32 %v11808_v18, %v11506_v0  ;;  %v11510_v19 = vadd.f32 %v11381_v28, %v23619_v6 }
 0x591   : > { %v17042_v7 = vpop.f32.mrf.mxu1  ;;  %v16994_v22 = vpop.f32.mrf.mxu0  ;;  %17225 = vmatmul.mubr.bf16.gmra.mxu0 %v13196_v36 }
 0x592   : > { %v23736_v14 = vadd.f32 %v17042_v7, %v11511_v37  ;;  %v11515_v11 = vadd.f32 %v16994_v22, %v23623_v60 }
 0x593   : > { %v11821_v47 = vpop.f32.mrf.mxu1  ;;  %v11394_v50 = vpop.f32.mrf.mxu0 }
 0x594   : > { %v23739_v31 = vadd.f32 %v11821_v47, %v11509_v2  ;;  %v11513_v9 = vadd.f32 %v11394_v50, %v23627_v54 }
 0x595   : > { %v17043_v56 = vpop.f32.mrf.mxu1  ;;  %v16995_v38 = vpop.f32.mrf.mxu0 }
 0x596   : > { %v23742_v41 = vadd.f32 %v17043_v56, %v11512_v16  ;;  %v11516_v24 = vadd.f32 %v16995_v38, %v23630_v43 }
 0x597   : > { %v11824_v25 = vpop.f32.mrf.mxu1  ;;  %v11397_v48 = vpop.f32.mrf.mxu0 }
 0x598   : > { %v23745_v6 = vadd.f32 %v11824_v25, %v11510_v19  ;;  %v11514_v0 = vadd.f32 %v11397_v48, %v23633_v26 }
 0x599   : > { %v17046_v46 = vpop.f32.mrf.mxu1  ;;  %v16998_v60 = vpop.f32.mrf.mxu0 }
 0x59a   : > { %v23748_v13 = vadd.f32 %v17046_v46, %v11515_v11  ;;  %v11519_v45 = vadd.f32 %v16998_v60, %v23637_v58 }
 0x59b   : > { %v11837_v3 = vpop.f32.mrf.mxu1  ;;  %v11410_v54 = vpop.f32.mrf.mxu0 }
 0x59c   : > { %v23751_v42 = vadd.f32 %v11837_v3, %v11513_v9  ;;  %v11517_v61 = vadd.f32 %v11410_v54, %v23641_v4 }
 0x59d   : > { %v17047_v37 = vpop.f32.mrf.mxu1  ;;  %v16999_v43 = vpop.f32.mrf.mxu0 }
 0x59e   : > { %v23754_v53 = vadd.f32 %v17047_v37, %v11516_v24  ;;  %v11520_v2 = vadd.f32 %v16999_v43, %v23644_v17 }
 0x59f   : > { %v11840_v34 = vpop.f32.mrf.mxu1  ;;  %v11413_v26 = vpop.f32.mrf.mxu0 }
 0x5a0   : > { %v23757_v29 = vadd.f32 %v11840_v34, %v11514_v0  ;;  %v11518_v16 = vadd.f32 %v11413_v26, %v23647_v30 }
 0x5a1   : > { %v17050_v18 = vpop.f32.mrf.mxu1  ;;  %v17002_v58 = vpop.f32.mrf.mxu0 }
 0x5a2   : > { %v23760_v36 = vadd.f32 %v17050_v18, %v11519_v45  ;;  %v11523_v7 = vadd.f32 %v17002_v58, %v23651_v33 }
 0x5a3   : > { %v11853_v28 = vpop.f32.mrf.mxu1  ;;  %v11426_v4 = vpop.f32.mrf.mxu0 }
 0x5a4   : > { %v23763_v19 = vadd.f32 %v11853_v28, %v11517_v61  ;;  %v11521_v47 = vadd.f32 %v11426_v4, %v23655_v55 }
 0x5a5   : > { %v17051_v22 = vpop.f32.mrf.mxu1  ;;  %v17003_v17 = vpop.f32.mrf.mxu0 }
 0x5a6   : > { %v23766_v11 = vadd.f32 %v17051_v22, %v11520_v2  ;;  %v11524_v56 = vadd.f32 %v17003_v17, %v23658_v59 }
 0x5a7   : > { %v11856_v50 = vpop.f32.mrf.mxu1  ;;  %v11429_v30 = vpop.f32.mrf.mxu0 }
 0x5a8   : > { %v23769_v9 = vadd.f32 %v11856_v50, %v11518_v16  ;;  %v11522_v25 = vadd.f32 %v11429_v30, %v23661_v62 }
 0x5a9   : > { %v17054_v38 = vpop.f32.mrf.mxu1  ;;  %v17006_v33 = vpop.f32.mrf.mxu0 }
 0x5aa   : > { %v23772_v24 = vadd.f32 %v17054_v38, %v11523_v7  ;;  %v11527_v46 = vadd.f32 %v17006_v33, %v23665_v1 }
 0x5ab   : > { %v11869_v48 = vpop.f32.mrf.mxu1  ;;  %v11442_v55 = vpop.f32.mrf.mxu0 }
 0x5ac   : > { %v23775_v0 = vadd.f32 %v11869_v48, %v11521_v47  ;;  %v11525_v3 = vadd.f32 %v11442_v55, %v23669_v57 }
 0x5ad   : > { %v17055_v60 = vpop.f32.mrf.mxu1  ;;  %v17007_v59 = vpop.f32.mrf.mxu0 }
 0x5ae   : > { %v23778_v45 = vadd.f32 %v17055_v60, %v11524_v56  ;;  %v11528_v37 = vadd.f32 %v17007_v59, %v23672_v21  ;;  %v17848_v60 = vmov 0.0  }
 0x5af   : > { %v11872_v54 = vpop.f32.mrf.mxu1  ;;  %v11445_v62 = vpop.f32.mrf.mxu0  ;;  %17228 = vmatprep.subr.bf16.mxu1 %v17848_v60  ;;  %17244 = vmatprep.mubr.msk.bf16.mxu1 %vm17849_vm6, %v17848_v60 }
 0x5b0   : > { %v23781_v61 = vadd.f32 %v11872_v54, %v11522_v25  ;;  %v11526_v34 = vadd.f32 %v11445_v62, %v23675_v5 }
 0x5b1   : > { %v17058_v43 = vpop.f32.mrf.mxu1  ;;  %v17010_v1 = vpop.f32.mrf.mxu0 }
 0x5b2   : > { %v23784_v2 = vadd.f32 %v17058_v43, %v11527_v46  ;;  %v11531_v18 = vadd.f32 %v17010_v1, %v23679_v44  ;;  %v17797_v46 = vld [vmem:[#allocation4 + $0x38] sm:$0xff]  }
 0x5b3   : > { %v11885_v26 = vpop.f32.mrf.mxu1  ;;  %v11458_v57 = vpop.f32.mrf.mxu0  ;;  %17229 = vmatpush3.bf16.msra.mxu1 %v17797_v46 }
 0x5b4   : > { %v23787_v16 = vadd.f32 %v11885_v26, %v11525_v3  ;;  %v11529_v28 = vadd.f32 %v11458_v57, %v23683_v35  ;;  %17230 = vmatprep.subr.bf16.mxu1 %v17848_v60 }
 0x5b5   : > { %v17059_v58 = vpop.f32.mrf.mxu1  ;;  %v17011_v21 = vpop.f32.mrf.mxu0 }
 0x5b6   : > { %v23790_v7 = vadd.f32 %v17059_v58, %v11528_v37  ;;  %v11532_v22 = vadd.f32 %v17011_v21, %v23686_v63 }
 0x5b7   : > { %v11888_v4 = vpop.f32.mrf.mxu1  ;;  %v11461_v5 = vpop.f32.mrf.mxu0 }
 0x5b8   : > { %v23793_v47 = vadd.f32 %v11888_v4, %v11526_v34  ;;  %v11530_v50 = vadd.f32 %v11461_v5, %v23689_v10 }
 0x5b9   : > { %v17062_v17 = vpop.f32.mrf.mxu1  ;;  %v17014_v44 = vpop.f32.mrf.mxu0 }
 0x5ba   : > { %v23796_v56 = vadd.f32 %v17062_v17, %v11531_v18  ;;  %v11535_v38 = vadd.f32 %v17014_v44, %v23693_v15 }
 0x5bb   : > { %v11901_v30 = vpop.f32.mrf.mxu1  ;;  %v11474_v35 = vpop.f32.mrf.mxu0 }
 0x5bc   : > { %v23799_v25 = vadd.f32 %v11901_v30, %v11529_v28  ;;  %v11533_v48 = vadd.f32 %v11474_v35, %v23697_v8 }
 0x5bd   : > { %v17063_v33 = vpop.f32.mrf.mxu1  ;;  %v17015_v55 = vpop.f32.mrf.mxu0 }
 0x5be   : > { %v23802_v63 = vadd.f32 %v17063_v33, %v11532_v22  ;;  %v11536_v3 = vadd.f32 %v17015_v55, %v23700_v12 }
 0x5bf   : > { %v11904_v10 = vpop.f32.mrf.mxu1  ;;  %v11477_v15 = vpop.f32.mrf.mxu0 }
 0x5c0   : > { %v23806_v59 = vadd.f32 %v11904_v10, %v11530_v50  ;;  %v11534_v37 = vadd.f32 %v11477_v15, %v23705_v23  ;;  %v17798_v50 = vld [vmem:[#allocation4 + $0x30] sm:$0xff]  }
 0x5c1   : > { %v17066_v54 = vpop.f32.mrf.mxu1  ;;  %v17018_v62 = vpop.f32.mrf.mxu0  ;;  %17231 = vmatpush3.bf16.msra.mxu1 %v17798_v50 }
 0x5c2   : > { %v23810_v8 = vadd.f32 %v17066_v54, %v11535_v38  ;;  %v11539_v34 = vadd.f32 %v17018_v62, %v23708_v27  ;;  %17232 = vmatprep.subr.bf16.mxu1 %v17848_v60 }
 0x5c3   : > { %v11917_v43 = vpop.f32.mrf.mxu1  ;;  %v11490_v26 = vpop.f32.mrf.mxu0 }
 0x5c4   : > { %v23813_v1 = vadd.f32 %v11917_v43, %v11533_v48  ;;  %v11537_v12 = vadd.f32 %v11490_v26, %v23712_v20 }
 0x5c5   : > { %v17067_v18 = vpop.f32.mrf.mxu1  ;;  %v17019_v58 = vpop.f32.mrf.mxu0 }
 0x5c6   : > { %v23816_v57 = vadd.f32 %v17067_v18, %v11536_v3  ;;  %v11540_v21 = vadd.f32 %v17019_v58, %v23715_v52 }
 0x5c7   : > { %v11920_v28 = vpop.f32.mrf.mxu1  ;;  %v11493_v23 = vpop.f32.mrf.mxu0 }
 0x5c8   : > { %v23819_v4 = vadd.f32 %v11920_v28, %v11534_v37  ;;  %v11538_v5 = vadd.f32 %v11493_v23, %v23718_v39  ;;  %v17800_v28 = vld [vmem:[#allocation4 + $0x20] sm:$0xff]  }
 0x5c9   : > { %v17070_v22 = vpop.f32.mrf.mxu1  ;;  %v17090_v27 = vpop.f32.mrf.mxu0 }
 0x5ca   : > { %v23822_v17 = vadd.f32 %v17070_v22, %v11539_v34  ;;  %v23825_v30 = vadd.f32 %v17090_v27, %v23722_v32 }
 0x5cb   : > { %v11933_v44 = vpop.f32.mrf.mxu1  ;;  %v12370_v38 = vpop.f32.mrf.mxu0 }
 0x5cc   : > { %v23827_v20 = vadd.f32 %v11933_v44, %v11537_v12  ;;  %v23830_v52 = vadd.f32 %v12370_v38, %v23726_v40  ;;  %v17799_v40 = vld [vmem:[#allocation4 + $0x28] sm:$0xff]   ;;  %v17801_v44 = vld [vmem:[#allocation4 + $0x18] sm:$0xff]  }
 0x5cd   : > { %v17071_v35 = vpop.f32.mrf.mxu1  ;;  %v17091_v39 = vpop.f32.mrf.mxu0  ;;  %17233 = vmatpush3.bf16.msra.mxu1 %v17799_v40 }
 0x5ce   : > { %v23833_v33 = vadd.f32 %v17071_v35, %v11540_v21  ;;  %v23836_v46 = vadd.f32 %v17091_v39, %v23729_v51  ;;  %17234 = vmatprep.subr.bf16.mxu1 %v17848_v60 }
 0x5cf   : > { %v11936_v48 = vpop.f32.mrf.mxu1  ;;  %v12373_v32 = vpop.f32.mrf.mxu0 }
 0x5d0   : > { %v23838_v55 = vadd.f32 %v11936_v48, %v11538_v5  ;;  %v23843_v3 = vadd.f32 %v12373_v32, %v23733_v49 }
 0x5d1   : > { %v23840_v10 = vpop.f32.mrf.mxu1  ;;  %v17094_v15 = vpop.f32.mrf.mxu0  ;;  %17235 = vmatpush3.bf16.msra.mxu1 %v17800_v28 }
 0x5d2   : > { %v23848_v37 = vadd.f32 %v17094_v15, %v23736_v14  ;;  %17236 = vmatprep.subr.bf16.mxu1 %v17848_v60 }
 0x5d3   : > { %v23845_v54 = vpop.f32.mrf.mxu1  ;;  %v12386_v62 = vpop.f32.mrf.mxu0 }
 0x5d4   : > { %v23853_v51 = vadd.f32 %v12386_v62, %v23739_v31 }
 0x5d5   : > { %v23850_v43 = vpop.f32.mrf.mxu1  ;;  %v17095_v34 = vpop.f32.mrf.mxu0  ;;  %17237 = vmatpush3.bf16.msra.mxu1 %v17801_v44  ;;  %v17803_v44 = vld [vmem:[#allocation4 + $0x8] sm:$0xff]  }
 0x5d6   : > { %v23859_v49 = vadd.f32 %v17095_v34, %v23742_v41  ;;  %17238 = vmatprep.subr.bf16.mxu1 %v17848_v60 }
 0x5d7   : > { %v23856_v26 = vpop.f32.mrf.mxu1  ;;  %v12389_v18 = vpop.f32.mrf.mxu0 }
 0x5d8   : > { %v23864_v14 = vadd.f32 %v12389_v18, %v23745_v6 }
 0x5d9   : > { %v23861_v12 = vpop.f32.mrf.mxu1  ;;  %v17098_v58 = vpop.f32.mrf.mxu0 }
 0x5da   : > { %v23867_v21 = vadd.f32 %v17098_v58, %v23748_v13 }
 0x5db   : > { %v23869_v31 = vpop.f32.mrf.mxu1  ;;  %v12402_v23 = vpop.f32.mrf.mxu0 }
 0x5dc   : > { %v23872_v22 = vadd.f32 %v12402_v23, %v23751_v42 }
 0x5dd   : > { %v17099_v41 = vpop.f32.mrf.mxu0  ;;  %v23878_v6 = vpop.f32.mrf.mxu1 }
 0x5de   : > { %v23876_v5 = vadd.f32 %v17099_v41, %v23754_v53 }
 0x5df   : > { %v12405_v27 = vpop.f32.mrf.mxu0  ;;  %v23886_v35 = vpop.f32.mrf.mxu1 }
 0x5e0   : > { %v23881_v50 = vadd.f32 %v12405_v27, %v23757_v29 }
 0x5e1   : > { %v17102_v13 = vpop.f32.mrf.mxu0  ;;  %v23895_v29 = vpop.f32.mrf.mxu1 }
 0x5e2   : > { %v23884_v38 = vadd.f32 %v17102_v13, %v23760_v36  ;;  %v17802_v13 = vld [vmem:[#allocation4 + $0x10] sm:$0xff]  }
 0x5e3   : > { %v12418_v42 = vpop.f32.mrf.mxu0  ;;  %v23903_v62 = vpop.f32.mrf.mxu1  ;;  %17239 = vmatpush3.bf16.msra.mxu1 %v17802_v13 }
 0x5e4   : > { %v23889_v39 = vadd.f32 %v12418_v42, %v23763_v19  ;;  %17240 = vmatprep.subr.bf16.mxu1 %v17848_v60 }
 0x5e5   : > { %v17103_v53 = vpop.f32.mrf.mxu0  ;;  %v23911_v58 = vpop.f32.mrf.mxu1 }
 0x5e6   : > { %v23893_v48 = vadd.f32 %v17103_v53, %v23766_v11 }
 0x5e7   : > { %v12421_v32 = vpop.f32.mrf.mxu0  ;;  %v23919_v41 = vpop.f32.mrf.mxu1  ;;  %17241 = vmatpush3.bf16.msra.mxu1 %v17803_v44 }
 0x5e8   : > { %v23898_v15 = vadd.f32 %v12421_v32, %v23769_v9  ;;  %17242 = vmatprep.subr.bf16.mxu1 %v17848_v60 }
 0x5e9   : > { %v17106_v36 = vpop.f32.mrf.mxu0 }
 0x5ea   : > { %v23901_v40 = vadd.f32 %v17106_v36, %v23772_v24 }
 0x5eb   : > { %v12434_v19 = vpop.f32.mrf.mxu0 }
 0x5ec   : > { %v23906_v34 = vadd.f32 %v12434_v19, %v23775_v0 }
 0x5ed   : > { %v17107_v18 = vpop.f32.mrf.mxu0 }
 0x5ee   : > { %v23909_v11 = vadd.f32 %v17107_v18, %v23778_v45 }
 0x5ef   : > { %v12437_v28 = vpop.f32.mrf.mxu0 }
 0x5f0   : > { %v23914_v9 = vadd.f32 %v12437_v28, %v23781_v61 }
 0x5f1   : > { %v17110_v23 = vpop.f32.mrf.mxu0 }
 0x5f2   : > { %v23917_v24 = vadd.f32 %v17110_v23, %v23784_v2  ;;  %v23929_v2 = vpop.f32.mrf.mxu1 }
 0x5f3   : > { %v12450_v27 = vpop.f32.mrf.mxu0 }
 0x5f4   : > { %v23922_v0 = vadd.f32 %v12450_v27, %v23787_v16  ;;  %v17804_v16 = vld [vmem:[#allocation4] sm:$0xff]   ;;  %v23938_v19 = vpop.f32.mrf.mxu1 }
 0x5f5   : > { %v17111_v45 = vpop.f32.mrf.mxu0  ;;  %17243 = vmatpush3.bf16.msra.mxu1 %v17804_v16 }
 0x5f6   : > { %v23926_v61 = vadd.f32 %v17111_v45, %v23790_v7 }
 0x5f7   : > { %v12453_v42 = vpop.f32.mrf.mxu0 }
 0x5f8   : > { %v23932_v53 = vadd.f32 %v12453_v42, %v23793_v47  ;;  %v23946_v47 = vpop.f32.mrf.mxu1 }
 0x5f9   : > { %v17114_v32 = vpop.f32.mrf.mxu0 }
 0x5fa   : > { %v23935_v36 = vadd.f32 %v17114_v32, %v23796_v56  ;;  %v23954_v45 = vpop.f32.mrf.mxu1 }
 0x5fb   : > { %v12466_v7 = vpop.f32.mrf.mxu0 }
 0x5fc   : > { %v23941_v18 = vadd.f32 %v12466_v7, %v23799_v25  ;;  %v23962_v32 = vpop.f32.mrf.mxu1 }
 0x5fd   : > { %v17115_v28 = vpop.f32.mrf.mxu0 }
 0x5fe   : > { %v23944_v23 = vadd.f32 %v17115_v28, %v23802_v63  ;;  %v23970_v28 = vpop.f32.mrf.mxu1 }
 0x5ff   : > { %v12469_v27 = vpop.f32.mrf.mxu0 }
 0x600   : > { %v23949_v13 = vadd.f32 %v12469_v27, %v23806_v59 }
 0x601   : > { %v17118_v56 = vpop.f32.mrf.mxu0 }
 0x602   : > { %v23952_v60 = vadd.f32 %v17118_v56, %v23810_v8 }
 0x603   : > { %v12482_v44 = vpop.f32.mrf.mxu0 }
 0x604   : > { %v23957_v25 = vadd.f32 %v12482_v44, %v23813_v1  ;;  %v23978_v44 = vpop.f32.mrf.mxu1 }
 0x605   : > { %v17119_v42 = vpop.f32.mrf.mxu0 }
 0x606   : > { %v23960_v63 = vadd.f32 %v17119_v42, %v23816_v57 }
 0x607   : > { %v12485_v16 = vpop.f32.mrf.mxu0 }
 0x608   : > { %25098 = vst [vmem:[#allocation92_spill] sm:$0xff] %v23960_v63  ;;  %v23965_v59 = vadd.f32 %v12485_v16, %v23819_v4  ;;  %v12850_v4 = vadd.f32 %v23840_v10, %v23825_v30 }
 0x609   : > { %v17122_v7 = vpop.f32.mrf.mxu0 }
 0x60a   : > { %25099 = vst [vmem:[#allocation93_spill] sm:$0xff] %v23965_v59  ;;  %v23968_v8 = vadd.f32 %v17122_v7, %v23822_v17  ;;  %v12848_v7 = vadd.f32 %v23845_v54, %v23830_v52 }
 0x60b   : > { %v12498_v27 = vpop.f32.mrf.mxu0 }
 0x60c   : > { %25100 = vst [vmem:[#allocation94_spill] sm:$0xff] %v23968_v8  ;;  %v23973_v1 = vadd.f32 %v12498_v27, %v23827_v20  ;;  %v23987_v20 = vpop.f32.mrf.mxu1 }
 0x60d   : > { %v17123_v56 = vpop.f32.mrf.mxu0 }
 0x60e   : > { %25101 = vst [vmem:[#allocation95_spill] sm:$0xff] %v23973_v1  ;;  %v23976_v57 = vadd.f32 %v17123_v56, %v23833_v33  ;;  %v23992_v33 = vld [vmem:[%s24235_s7] ss:$0 sm:$0xff]  ;;  %v12851_v56 = vadd.f32 %v23850_v43, %v23836_v46  ;;  %v12854_v46 = vadd.f32 %v23861_v12, %v23848_v37  ;;  %v12855_v37 = vadd.f32 %v23878_v6, %v23859_v49 }
 0x60f   : > { %v12501_v42 = vpop.f32.mrf.mxu0  ;;  %v25110_v12 = vld [vmem:[#allocation47_spill] sm:$0xff] }
 0x610   : > { %25102 = vst [vmem:[#allocation96_spill] sm:$0xff] %v23976_v57  ;;  %v23983_v16 = vadd.f32 %v12501_v42, %v23838_v55  ;;  %v12849_v55 = vadd.f32 %v23856_v26, %v23843_v3  ;;  %v12852_v3 = vadd.f32 %v23869_v31, %v23853_v51  ;;  %v25106_v26 = vld [vmem:[#allocation26_spill] sm:$0xff]  ;;  %v12853_v31 = vadd.f32 %v23886_v35, %v23864_v14 }
 0x611   : > { %v17194_v17 = vpop.f32.mrf.mxu0 }
 0x612   : > { %25103 = vst [vmem:[#allocation99_spill] sm:$0xff] %v23983_v16  ;;  %v13442_v8 = vadd.f32 %v17194_v17, %v12850_v4  ;;  %v24000_v4 = vpop.f32.mrf.mxu1  ;;  %v25104_v16 = vld [vmem:[#allocation45_spill] sm:$0xff] }
 0x613   : > { %v13297_v27 = vpop.f32.mrf.mxu0  ;;  %v25105_v57 = vmax.f32 %v25104_v16, 0.0  ;;  %v25108_v16 = vld [vmem:[#allocation40_spill] sm:$0xff] }
 0x614   : > { %v13440_v30 = vadd.f32 %v13297_v27, %v12848_v7  ;;  %v13485_v42 = vadd.f32 %v23992_v33, %v13442_v8  ;;  %v25107_v8 = vmax.f32 %v25106_v26, 0.0 }
 0x615   : > { %v17195_v10 = vpop.f32.mrf.mxu0 }
 0x616   : > { %v13483_v52 = vadd.f32 %v23992_v33, %v13440_v30  ;;  %v13443_v54 = vadd.f32 %v17195_v10, %v12851_v56  ;;  %v13521_v7 = vadd.f32 %v13485_v42, %v25107_v8  ;;  %v24012_v56 = vpop.f32.mrf.mxu1 }
 0x617   : > { %v13300_v17 = vpop.f32.mrf.mxu0 }
 0x618   : > { %v13519_v1 = vadd.f32 %v13483_v52, %v25105_v57  ;;  %v13486_v59 = vadd.f32 %v23992_v33, %v13443_v54  ;;  %v13441_v63 = vadd.f32 %v13300_v17, %v12849_v55  ;;  %v25109_v57 = vmax.f32 %v25108_v16, 0.0 }
 0x619   : > { %v17198_v43 = vpop.f32.mrf.mxu0  ;;  %v25111_v54 = vmax.f32 %v25110_v12, 0.0  ;;  %v13557_v26 = vmax.f32 %v13521_v7, 0.0  ;;  %v12858_v7 = vadd.f32 %v23895_v29, %v23867_v21  ;;  %v12859_v29 = vadd.f32 %v23911_v58, %v23876_v5 }
 0x61a   : > { %v13484_v27 = vadd.f32 %v23992_v33, %v13441_v63  ;;  %v13555_v30 = vmax.f32 %v13519_v1, 0.0  ;;  %v13522_v10 = vadd.f32 %v13486_v59, %v25109_v57  ;;  %v13446_v52 = vadd.f32 %v17198_v43, %v12854_v46  ;;  %v24024_v46 = vpop.f32.mrf.mxu1  ;;  %v25112_v43 = vld [vmem:[#allocation8_spill] sm:$0xff]  ;;  %v25113_v57 = vld [vmem:[#allocation9_spill] sm:$0xff] }
 0x61b   : > { %v13313_v55 = vpop.f32.mrf.mxu0  ;;  %v12862_v5 = vadd.f32 %v23929_v2, %v23884_v38  ;;  %v25129_v38 = vld [vmem:[#allocation54_spill] sm:$0xff] }
 0x61c   : > { %v13520_v17 = vadd.f32 %v13484_v27, %v25111_v54  ;;  %v13444_v51 = vadd.f32 %v13313_v55, %v12852_v3  ;;  %v13489_v63 = vadd.f32 %v23992_v33, %v13446_v52  ;;  %v13591_v16 = vmul.f32 %v13555_v30, %v25112_v43  ;;  %v25114_v3 = vld [vmem:[#allocation7_spill] sm:$0xff] }
 0x61d   : > { %v17199_v42 = vpop.f32.mrf.mxu0  ;;  %v13558_v49 = vmax.f32 %v13522_v10, 0.0  ;;  %v25115_v55 = vmax.f32 %v25114_v3, 0.0  ;;  %v25116_v52 = vld [vmem:[#allocation39_spill] sm:$0xff]  ;;  %v25130_v2 = vmax.f32 %v25129_v38, 0.0 }
 0x61e   : > { %v13556_v1 = vmax.f32 %v13520_v17, 0.0  ;;  %v13487_v8 = vadd.f32 %v23992_v33, %v13444_v51  ;;  %v13447_v59 = vadd.f32 %v17199_v42, %v12855_v37  ;;  %v25117_v54 = vmax.f32 %v25116_v52, 0.0  ;;  %v25118_v51 = vld [vmem:[#allocation19_spill] sm:$0xff] }
 0x61f   : > { %v13316_v6 = vpop.f32.mrf.mxu0  ;;  %v13593_v42 = vmul.f32 %v13557_v26, %v25118_v51 }
 0x620   : > { %v13592_v27 = vmul.f32 %v13556_v1, %v25113_v57  ;;  %v13523_v12 = vadd.f32 %v13487_v8, %v25115_v55  ;;  %v13490_v14 = vadd.f32 %v23992_v33, %v13447_v59  ;;  %v13445_v35 = vadd.f32 %v13316_v6, %v12853_v31  ;;  %v24039_v8 = vpop.f32.mrf.mxu1  ;;  %v25119_v59 = vld [vmem:[#allocation48_spill] sm:$0xff] }
 0x621   : > { %v13525_v37 = vadd.f32 %v13489_v63, %v25117_v54  ;;  %v17202_v17 = vpop.f32.mrf.mxu0  ;;  %v12856_v1 = vadd.f32 %v23903_v62, %v23872_v22  ;;  %v25120_v31 = vmax.f32 %v25119_v59, 0.0  ;;  %v25121_v63 = vld [vmem:[#allocation18_spill] sm:$0xff]  ;;  %v25124_v62 = vld [vmem:[#allocation28_spill] sm:$0xff] }
 0x622   : > { %v13627_v30 = vadd.f32 %v13592_v27, %v13591_v16  ;;  %v13559_v10 = vmax.f32 %v13523_v12, 0.0  ;;  %v13488_v43 = vadd.f32 %v23992_v33, %v13445_v35  ;;  %v13450_v57 = vadd.f32 %v17202_v17, %v12858_v7  ;;  %v25122_v16 = vld [vmem:[#allocation12_spill] sm:$0xff]  ;;  %v24054_v58 = vpop.f32.mrf.mxu1 }
 0x623   : > { %v13526_v6 = vadd.f32 %v13490_v14, %v25120_v31  ;;  %v13329_v21 = vpop.f32.mrf.mxu0  ;;  %v13594_v3 = vmul.f32 %v13558_v49, %v25121_v63  ;;  %v25123_v27 = vmax.f32 %v25122_v16, 0.0  ;;  %v12857_v12 = vadd.f32 %v23919_v41, %v23881_v50  ;;  %v25125_v41 = vld [vmem:[#allocation14_spill] sm:$0xff]  ;;  %v25127_v31 = vld [vmem:[#allocation43_spill] sm:$0xff] }
 0x624   : > { %v13628_v26 = vadd.f32 %v13627_v30, %v13593_v42  ;;  %v13561_v22 = vmax.f32 %v13525_v37, 0.0  ;;  %v13595_v35 = vmul.f32 %v13559_v10, %v25124_v62  ;;  %v13448_v52 = vadd.f32 %v13329_v21, %v12856_v1  ;;  %v25126_v1 = vld [vmem:[#allocation36_spill] sm:$0xff] }
 0x625   : > { %v13524_v55 = vadd.f32 %v13488_v43, %v25123_v27  ;;  %v17203_v54 = vpop.f32.mrf.mxu0  ;;  %v13493_v17 = vadd.f32 %v23992_v33, %v13450_v57  ;;  %v13562_v49 = vmax.f32 %v13526_v6, 0.0  ;;  %v25128_v57 = vmax.f32 %v25127_v31, 0.0  ;;  %v24067_v27 = vpop.f32.mrf.mxu1 }
 0x626   : > { %v13629_v14 = vadd.f32 %v13628_v26, %v13594_v3  ;;  %v13451_v51 = vadd.f32 %v17203_v54, %v12859_v29  ;;  %v13491_v42 = vadd.f32 %v23992_v33, %v13448_v52  ;;  %v13597_v59 = vmul.f32 %v13561_v22, %v25126_v1  ;;  %v25133_v52 = vld [vmem:[#allocation29_spill] sm:$0xff] }
 0x627   : > { %v13560_v7 = vmax.f32 %v13524_v55, 0.0  ;;  %v13332_v30 = vpop.f32.mrf.mxu0  ;;  %v13529_v3 = vadd.f32 %v13493_v17, %v25130_v2  ;;  %v12860_v16 = vadd.f32 %v23938_v19, %v23889_v39  ;;  %v13598_v54 = vmul.f32 %v13562_v49, %v25133_v52  ;;  %v24080_v49 = vpop.f32.mrf.mxu1  ;;  %v25143_v52 = vld [vmem:[#allocation46_spill] sm:$0xff] }
 0x628   : > { %v13630_v50 = vadd.f32 %v13629_v14, %v13595_v35  ;;  %v13494_v10 = vadd.f32 %v23992_v33, %v13451_v51  ;;  %v13449_v43 = vadd.f32 %v13332_v30, %v12857_v12  ;;  %v13527_v21 = vadd.f32 %v13491_v42, %v25128_v57  ;;  %v25131_v12 = vld [vmem:[#allocation20_spill] sm:$0xff] }
 0x629   : > { %v13596_v37 = vmul.f32 %v13560_v7, %v25125_v41  ;;  %v17206_v29 = vpop.f32.mrf.mxu0  ;;  %v25132_v62 = vmax.f32 %v25131_v12, 0.0  ;;  %v25134_v7 = vld [vmem:[#allocation21_spill] sm:$0xff]  ;;  %v12863_v17 = vadd.f32 %v23946_v47, %v23893_v48  ;;  %v12866_v48 = vadd.f32 %v23962_v32, %v23901_v40  ;;  %v25137_v47 = vld [vmem:[#allocation16_spill] sm:$0xff] }
 0x62a   : > { %v13492_v6 = vadd.f32 %v23992_v33, %v13449_v43  ;;  %v13454_v26 = vadd.f32 %v17206_v29, %v12862_v5  ;;  %v13563_v55 = vmax.f32 %v13527_v21, 0.0  ;;  %v25135_v51 = vmax.f32 %v25134_v7, 0.0  ;;  %v25136_v41 = vld [vmem:[#allocation37_spill] sm:$0xff]  ;;  %v25144_v7 = vld [vmem:[#allocation31_spill] sm:$0xff] }
 0x62b   : > { %v13631_v63 = vadd.f32 %v13630_v50, %v13596_v37  ;;  %v13530_v22 = vadd.f32 %v13494_v10, %v25132_v62  ;;  %v13345_v35 = vpop.f32.mrf.mxu0  ;;  %v12861_v5 = vadd.f32 %v23954_v45, %v23898_v15  ;;  %v13565_v50 = vmax.f32 %v13529_v3, 0.0  ;;  %v25140_v3 = vld [vmem:[#allocation27_spill] sm:$0xff]  ;;  %v25142_v12 = vld [vmem:[#allocation17_spill] sm:$0xff] }
 0x62c   : > { %v13528_v42 = vadd.f32 %v13492_v6, %v25135_v51  ;;  %v13497_v39 = vadd.f32 %v23992_v33, %v13454_v26  ;;  %v13452_v19 = vadd.f32 %v13345_v35, %v12860_v16  ;;  %v13599_v37 = vmul.f32 %v13563_v55, %v25136_v41  ;;  %v24095_v35 = vpop.f32.mrf.mxu1 }
 0x62d   : > { %v13632_v14 = vadd.f32 %v13631_v63, %v13597_v59  ;;  %v17207_v30 = vpop.f32.mrf.mxu0  ;;  %v13566_v1 = vmax.f32 %v13530_v22, 0.0  ;;  %v12864_v29 = vadd.f32 %v23970_v28, %v23906_v34  ;;  %v25138_v63 = vld [vmem:[#allocation24_spill] sm:$0xff]  ;;  %v25141_v6 = vmax.f32 %v25140_v3, 0.0 }
 0x62e   : > { %v13564_v43 = vmax.f32 %v13528_v42, 0.0  ;;  %v13495_v59 = vadd.f32 %v23992_v33, %v13452_v19  ;;  %v13455_v31 = vadd.f32 %v17207_v30, %v12863_v17  ;;  %v25139_v38 = vmax.f32 %v25138_v63, 0.0  ;;  %v25146_v17 = vld [vmem:[#allocation33_spill] sm:$0xff]  ;;  %v25150_v63 = vld [vmem:[#allocation56_spill] sm:$0xff] }
 0x62f   : > { %v13633_v10 = vadd.f32 %v13632_v14, %v13598_v54  ;;  %v13348_v57 = vpop.f32.mrf.mxu0  ;;  %v13601_v62 = vmul.f32 %v13565_v50, %v25142_v12  ;;  %v13602_v54 = vmul.f32 %v13566_v1, %v25143_v52  ;;  %v25145_v51 = vmax.f32 %v25144_v7, 0.0  ;;  %v25156_v7 = vld [vmem:[#allocation42_spill] sm:$0xff] }
 0x630   : > { %v13600_v45 = vmul.f32 %v13564_v43, %v25137_v47  ;;  %v13453_v21 = vadd.f32 %v13348_v57, %v12861_v5  ;;  %v13533_v2 = vadd.f32 %v13497_v39, %v25139_v38  ;;  %v13531_v26 = vadd.f32 %v13495_v59, %v25141_v6  ;;  %v25152_v6 = vld [vmem:[#allocation49_spill] sm:$0xff] }
 0x631   : > { %v13634_v15 = vadd.f32 %v13633_v10, %v13599_v37  ;;  %v13498_v16 = vadd.f32 %v23992_v33, %v13455_v31  ;;  %v17210_v55 = vpop.f32.mrf.mxu0  ;;  %v25147_v5 = vmax.f32 %v25146_v17, 0.0  ;;  %v12867_v30 = vadd.f32 %v23978_v44, %v23909_v11  ;;  %v25148_v10 = vld [vmem:[#allocation34_spill] sm:$0xff] }
 0x632   : > { %v13496_v40 = vadd.f32 %v23992_v33, %v13453_v21  ;;  %v13458_v32 = vadd.f32 %v17210_v55, %v12866_v48  ;;  %v13567_v34 = vmax.f32 %v13531_v26, 0.0  ;;  %v13569_v50 = vmax.f32 %v13533_v2, 0.0  ;;  %v25149_v21 = vld [vmem:[#allocation41_spill] sm:$0xff] }
 0x633   : > { %v13635_v22 = vadd.f32 %v13634_v15, %v13600_v45  ;;  %v13361_v28 = vpop.f32.mrf.mxu0  ;;  %v13534_v42 = vadd.f32 %v13498_v16, %v25145_v51  ;;  %v12865_v57 = vadd.f32 %v23987_v20, %v23914_v9  ;;  %v12870_v48 = vadd.f32 %v24000_v4, %v23917_v24  ;;  %v24111_v15 = vpop.f32.mrf.mxu1  ;;  %v25154_v16 = vld [vmem:[#allocation51_spill] sm:$0xff] }
 0x634   : > { %v13532_v39 = vadd.f32 %v13496_v40, %v25147_v5  ;;  %v13456_v19 = vadd.f32 %v13361_v28, %v12864_v29  ;;  %v13501_v41 = vadd.f32 %v23992_v33, %v13458_v32  ;;  %v13603_v43 = vmul.f32 %v13567_v34, %v25148_v10 }
 0x635   : > { %v13636_v14 = vadd.f32 %v13635_v22, %v13601_v62  ;;  %v17211_v37 = vpop.f32.mrf.mxu0  ;;  %v13570_v45 = vmax.f32 %v13534_v42, 0.0  ;;  %v25151_v38 = vmax.f32 %v25150_v63, 0.0  ;;  %v12868_v3 = vadd.f32 %v24012_v56, %v23922_v0  ;;  %v12817_v40 = vpop.f32.mrf.mxu1  ;;  %v25155_v0 = vld [vmem:[#allocation53_spill] sm:$0xff] }
 0x636   : > { %v13568_v59 = vmax.f32 %v13532_v39, 0.0  ;;  %v13499_v31 = vadd.f32 %v23992_v33, %v13456_v19  ;;  %v13459_v47 = vadd.f32 %v17211_v37, %v12867_v30  ;;  %v25153_v26 = vmax.f32 %v25152_v6, 0.0  ;;  %v25157_v42 = vld [vmem:[#allocation57_spill] sm:$0xff]  ;;  %v25159_v39 = vld [vmem:[#allocation58_spill] sm:$0xff] }
 0x637   : > { %v13637_v1 = vadd.f32 %v13636_v14, %v13602_v54  ;;  %v13364_v11 = vpop.f32.mrf.mxu0  ;;  %v13605_v55 = vmul.f32 %v13569_v50, %v25154_v16  ;;  %v12871_v54 = vadd.f32 %v24024_v46, %v23926_v61  ;;  %v13606_v56 = vmul.f32 %v13570_v45, %v25155_v0  ;;  %v25163_v45 = vld [vmem:[#allocation15_spill] sm:$0xff] }
 0x638   : > { %v13604_v29 = vmul.f32 %v13568_v59, %v25149_v21  ;;  %v13535_v2 = vadd.f32 %v13499_v31, %v25151_v38  ;;  %v13537_v9 = vadd.f32 %v13501_v41, %v25153_v26  ;;  %v13502_v20 = vadd.f32 %v23992_v33, %v13459_v47 }
 0x639   : > { %v13638_v44 = vadd.f32 %v13637_v1, %v13603_v43  ;;  %v13457_v24 = vadd.f32 %v13364_v11, %v12865_v57  ;;  %v17214_v4 = vpop.f32.mrf.mxu0  ;;  %v25158_v17 = vmax.f32 %v25157_v42, 0.0  ;;  %v25160_v19 = vmax.f32 %v25159_v39, 0.0  ;;  %v17171_v43 = vpop.f32.mrf.mxu1 }
 0x63a   : > { %v13571_v62 = vmax.f32 %v13535_v2, 0.0  ;;  %v13462_v22 = vadd.f32 %v17214_v4, %v12870_v48  ;;  %v13573_v14 = vmax.f32 %v13537_v9, 0.0  ;;  %v12869_v46 = vadd.f32 %v24039_v8, %v23932_v53  ;;  %v25161_v48 = vld [vmem:[#allocation59_spill] sm:$0xff] }
 0x63b   : > { %v13639_v12 = vadd.f32 %v13638_v44, %v13604_v29  ;;  %v13500_v32 = vadd.f32 %v23992_v33, %v13457_v24  ;;  %v13377_v52 = vpop.f32.mrf.mxu0  ;;  %v13538_v5 = vadd.f32 %v13502_v20, %v25158_v17  ;;  %v12874_v31 = vadd.f32 %v24054_v58, %v23935_v36  ;;  %v25164_v8 = vld [vmem:[#allocation23_spill] sm:$0xff]  ;;  %v12820_v36 = vpop.f32.mrf.mxu1 }
 0x63c   : > { %v13460_v28 = vadd.f32 %v13377_v52, %v12868_v3  ;;  %v13607_v51 = vmul.f32 %v13571_v62, %v25156_v7  ;;  %v13505_v37 = vadd.f32 %v23992_v33, %v13462_v22  ;;  %v25162_v47 = vmax.f32 %v25161_v48, 0.0  ;;  %v25165_v3 = vld [vmem:[#allocation25_spill] sm:$0xff] }
 0x63d   : > { %v13640_v34 = vadd.f32 %v13639_v12, %v13605_v55  ;;  %v13536_v30 = vadd.f32 %v13500_v32, %v25160_v19  ;;  %v17215_v50 = vpop.f32.mrf.mxu0  ;;  %v13574_v44 = vmax.f32 %v13538_v5, 0.0  ;;  %v12872_v53 = vadd.f32 %v24067_v27, %v23941_v18  ;;  %v25167_v12 = vld [vmem:[#allocation30_spill] sm:$0xff]  ;;  %v25168_v18 = vld [vmem:[#allocation60_spill] sm:$0xff]  ;;  %v25170_v52 = vld [vmem:[#allocation61_spill] sm:$0xff] }
 0x63e   : > { %v13503_v10 = vadd.f32 %v23992_v33, %v13460_v28  ;;  %v13463_v61 = vadd.f32 %v17215_v50, %v12871_v54  ;;  %v13609_v2 = vmul.f32 %v13573_v14, %v25164_v8  ;;  %v25166_v6 = vmax.f32 %v25165_v3, 0.0 }
 0x63f   : > { %v13641_v41 = vadd.f32 %v13640_v34, %v13606_v56  ;;  %v13572_v1 = vmax.f32 %v13536_v30, 0.0  ;;  %v13380_v59 = vpop.f32.mrf.mxu0  ;;  %v12875_v16 = vadd.f32 %v24080_v49, %v23944_v23  ;;  %v13610_v62 = vmul.f32 %v13574_v44, %v25167_v12  ;;  %v25172_v23 = vld [vmem:[#allocation55_spill] sm:$0xff]  ;;  %v25173_v30 = vld [vmem:[#allocation62_spill] sm:$0xff] }
 0x640   : > { %v13539_v11 = vadd.f32 %v13503_v10, %v25162_v47  ;;  %v13506_v29 = vadd.f32 %v23992_v33, %v13463_v61  ;;  %v13461_v63 = vadd.f32 %v13380_v59, %v12869_v46  ;;  %v13541_v26 = vadd.f32 %v13505_v37, %v25166_v6  ;;  %v25175_v10 = vld [vmem:[#allocation35_spill] sm:$0xff]  ;;  %v25182_v6 = vld [vmem:[#allocation93_spill] sm:$0xff] }
 0x641   : > { %v13642_v57 = vadd.f32 %v13641_v41, %v13607_v51  ;;  %v13608_v21 = vmul.f32 %v13572_v1, %v25163_v45  ;;  %v17218_v38 = vpop.f32.mrf.mxu0  ;;  %v25169_v27 = vmax.f32 %v25168_v18, 0.0  ;;  %v25171_v54 = vmax.f32 %v25170_v52, 0.0  ;;  %v17174_v51 = vpop.f32.mrf.mxu1  ;;  %v25186_v18 = vld [vmem:[#allocation38_spill] sm:$0xff] }
 0x642   : > { %v13575_v9 = vmax.f32 %v13539_v11, 0.0  ;;  %v13504_v20 = vadd.f32 %v23992_v33, %v13461_v63  ;;  %v13466_v24 = vadd.f32 %v17218_v38, %v12874_v31  ;;  %v12873_v34 = vadd.f32 %v24095_v35, %v23949_v13  ;;  %v25176_v31 = vld [vmem:[#allocation13_spill] sm:$0xff]  ;;  %v25179_v63 = vld [vmem:[#allocation92_spill] sm:$0xff] }
 0x643   : > { %v13643_v58 = vadd.f32 %v13642_v57, %v13608_v21  ;;  %v13393_v4 = vpop.f32.mrf.mxu0  ;;  %v13542_v32 = vadd.f32 %v13506_v29, %v25169_v27  ;;  %v13577_v28 = vmax.f32 %v13541_v26, 0.0  ;;  %v12878_v19 = vadd.f32 %v24111_v15, %v23952_v60  ;;  %v12833_v47 = vpop.f32.mrf.mxu1  ;;  %v25177_v60 = vld [vmem:[#allocation44_spill] sm:$0xff] }
 0x644   : > { %v13464_v55 = vadd.f32 %v13393_v4, %v12872_v53  ;;  %v13540_v0 = vadd.f32 %v13504_v20, %v25171_v54  ;;  %v13611_v49 = vmul.f32 %v13575_v9, %v25172_v23  ;;  %v13509_v5 = vadd.f32 %v23992_v33, %v13466_v24  ;;  %v25180_v53 = vld [vmem:[#allocation52_spill] sm:$0xff]  ;;  %v25184_v9 = vld [vmem:[#allocation50_spill] sm:$0xff] }
 0x645   : > { %v13644_v22 = vadd.f32 %v13643_v58, %v13609_v2  ;;  %v17219_v56 = vpop.f32.mrf.mxu0  ;;  %v25174_v50 = vmax.f32 %v25173_v30, 0.0  ;;  %v13578_v35 = vmax.f32 %v13542_v32, 0.0  ;;  %v12876_v59 = vadd.f32 %v12817_v40, %v23957_v25  ;;  %v25183_v40 = vld [vmem:[#allocation22_spill] sm:$0xff] }
 0x646   : > { %v13507_v14 = vadd.f32 %v23992_v33, %v13464_v55  ;;  %v13467_v7 = vadd.f32 %v17219_v56, %v12875_v16  ;;  %v13576_v17 = vmax.f32 %v13540_v0, 0.0  ;;  %v13613_v57 = vmul.f32 %v13577_v28, %v25176_v31  ;;  %v25188_v0 = vld [vmem:[#allocation67_spill] sm:$0xff] }
 0x647   : > { %v13645_v42 = vadd.f32 %v13644_v22, %v13610_v62  ;;  %v13396_v39 = vpop.f32.mrf.mxu0  ;;  %v25178_v15 = vmax.f32 %v25177_v60, 0.0  ;;  %v12879_v38 = vadd.f32 %v17171_v43, %v25179_v63  ;;  %v25181_v8 = vmax.f32 %v25180_v53, 0.0  ;;  %v17175_v43 = vpop.f32.mrf.mxu1  ;;  %v25196_v31 = vld [vmem:[#allocation71_spill] sm:$0xff] }
 0x648   : > { %v13543_v41 = vadd.f32 %v13507_v14, %v25174_v50  ;;  %v13465_v37 = vadd.f32 %v13396_v39, %v12873_v34  ;;  %v13612_v61 = vmul.f32 %v13576_v17, %v25175_v10  ;;  %v13510_v46 = vadd.f32 %v23992_v33, %v13467_v7  ;;  %v25190_v14 = vld [vmem:[#allocation94_spill] sm:$0xff]  ;;  %v25201_v63 = vld [vmem:[#allocation99_spill] sm:$0xff] }
 0x649   : > { %v13646_v13 = vadd.f32 %v13645_v42, %v13611_v49  ;;  %v17222_v1 = vpop.f32.mrf.mxu0  ;;  %v13545_v44 = vadd.f32 %v13509_v5, %v25178_v15  ;;  %v12877_v25 = vadd.f32 %v12820_v36, %v25182_v6  ;;  %v13614_v26 = vmul.f32 %v13578_v35, %v25183_v40  ;;  %v25187_v36 = vld [vmem:[#allocation11_spill] sm:$0xff]  ;;  %v25199_v15 = vld [vmem:[#allocation70_spill] sm:$0xff] }
 0x64a   : > { %v13508_v48 = vadd.f32 %v23992_v33, %v13465_v37  ;;  %v13579_v45 = vmax.f32 %v13543_v41, 0.0  ;;  %v13470_v21 = vadd.f32 %v17222_v1, %v12878_v19  ;;  %v25185_v20 = vmax.f32 %v25184_v9, 0.0  ;;  %v25191_v5 = vld [vmem:[#allocation95_spill] sm:$0xff]  ;;  %v25192_v19 = vld [vmem:[#allocation65_spill] sm:$0xff]  ;;  %v12836_v37 = vpop.f32.mrf.mxu1  ;;  %v25203_v9 = vld [vmem:[#allocation10_spill] sm:$0xff] }
 0x64b   : > { %v13647_v11 = vadd.f32 %v13646_v13, %v13612_v61  ;;  %v13409_v29 = vpop.f32.mrf.mxu0  ;;  %v13581_v22 = vmax.f32 %v13545_v44, 0.0  ;;  %v25189_v56 = vmax.f32 %v25188_v0, 0.0  ;;  %v12882_v7 = vadd.f32 %v17174_v51, %v25190_v14  ;;  %v25194_v13 = vld [vmem:[#allocation32_spill] sm:$0xff]  ;;  %v25211_v14 = vld [vmem:[#allocation77_spill] sm:$0xff] }
 0x64c   : > { %v13544_v2 = vadd.f32 %v13508_v48, %v25181_v8  ;;  %v13468_v3 = vadd.f32 %v13409_v29, %v12876_v59  ;;  %v13546_v24 = vadd.f32 %v13510_v46, %v25185_v20  ;;  %v13513_v55 = vadd.f32 %v23992_v33, %v13470_v21  ;;  %v25195_v51 = vld [vmem:[#allocation96_spill] sm:$0xff] }
 0x64d   : > { %v13648_v58 = vadd.f32 %v13647_v11, %v13613_v57  ;;  %v17223_v4 = vpop.f32.mrf.mxu0  ;;  %v13615_v27 = vmul.f32 %v13579_v45, %v25186_v18  ;;  %v12880_v39 = vadd.f32 %v12833_v47, %v25191_v5  ;;  %v25193_v30 = vmax.f32 %v25192_v19, 0.0  ;;  %v25198_v11 = vld [vmem:[#allocation63_spill] sm:$0xff]  ;;  %v25209_v0 = vld [vmem:[#allocation72_spill] sm:$0xff] }
 0x64e   : > { %v13580_v16 = vmax.f32 %v13544_v2, 0.0  ;;  %v13511_v12 = vadd.f32 %v23992_v33, %v13468_v3  ;;  %v13471_v62 = vadd.f32 %v17223_v4, %v12879_v38  ;;  %v13582_v49 = vmax.f32 %v13546_v24, 0.0  ;;  %v25202_v3 = vld [vmem:[#allocation64_spill] sm:$0xff] }
 0x64f   : > { %v13649_v32 = vadd.f32 %v13648_v58, %v13614_v26  ;;  %v13412_v52 = vpop.f32.mrf.mxu0  ;;  %v13549_v50 = vadd.f32 %v13513_v55, %v25193_v30  ;;  %v13617_v35 = vmul.f32 %v13581_v22, %v25194_v13  ;;  %v12883_v59 = vadd.f32 %v17175_v43, %v25195_v51  ;;  %v25206_v22 = vld [vmem:[#allocation76_spill] sm:$0xff]  ;;  %v25214_v30 = vld [vmem:[#allocation69_spill] sm:$0xff] }
 0x650   : > { %v13616_v54 = vmul.f32 %v13580_v16, %v25187_v36  ;;  %v13547_v34 = vadd.f32 %v13511_v12, %v25189_v56  ;;  %v13469_v28 = vadd.f32 %v13412_v52, %v12877_v25  ;;  %v13514_v42 = vadd.f32 %v23992_v33, %v13471_v62  ;;  %v25204_v12 = vld [vmem:[#allocation73_spill] sm:$0xff]  ;;  %v25208_v52 = vld [vmem:[#allocation66_spill] sm:$0xff] }
 0x651   : > { %v13650_v23 = vadd.f32 %v13649_v32, %v13615_v27  ;;  %v17226_v17 = vpop.f32.mrf.mxu0  ;;  %v25197_v57 = vmax.f32 %v25196_v31, 0.0  ;;  %v13618_v60 = vmul.f32 %v13582_v49, %v25198_v11  ;;  %v25200_v44 = vmax.f32 %v25199_v15, 0.0  ;;  %v25213_v49 = vld [vmem:[#allocation68_spill] sm:$0xff] }
 0x652   : > { %v13512_v41 = vadd.f32 %v23992_v33, %v13469_v28  ;;  %v13583_v61 = vmax.f32 %v13547_v34, 0.0  ;;  %v13474_v46 = vadd.f32 %v17226_v17, %v12882_v7  ;;  %v12881_v38 = vadd.f32 %v12836_v37, %v25201_v63 }
 0x653   : > { %v13651_v10 = vadd.f32 %v13650_v23, %v13616_v54  ;;  %v13425_v1 = vpop.f32.mrf.mxu0  ;;  %v13550_v45 = vadd.f32 %v13514_v42, %v25200_v44  ;;  %v13585_v53 = vmax.f32 %v13549_v50, 0.0  ;;  %v25205_v62 = vmax.f32 %v25204_v12, 0.0 }
 0x654   : > { %v13548_v48 = vadd.f32 %v13512_v41, %v25197_v57  ;;  %v13472_v21 = vadd.f32 %v13425_v1, %v12880_v39  ;;  %v13619_v6 = vmul.f32 %v13583_v61, %v25202_v3  ;;  %v13517_v40 = vadd.f32 %v23992_v33, %v13474_v46  ;;  %v25217_v61 = vld [vmem:[#allocation75_spill] sm:$0xff] }
 0x655   : > { %v13652_v47 = vadd.f32 %v13651_v10, %v13617_v35  ;;  %v17227_v29 = vpop.f32.mrf.mxu0  ;;  %v13586_v55 = vmax.f32 %v13550_v45, 0.0  ;;  %v25207_v18 = vmax.f32 %v25206_v22, 0.0  ;;  %v13621_v36 = vmul.f32 %v13585_v53, %v25208_v52  ;;  %v25216_v35 = vld [vmem:[#allocation78_spill] sm:$0xff] }
 0x656   : > { %v13584_v8 = vmax.f32 %v13548_v48, 0.0  ;;  %v13475_v2 = vadd.f32 %v17227_v29, %v12883_v59  ;;  %v13515_v26 = vadd.f32 %v23992_v33, %v13472_v21  ;;  %v25210_v56 = vmax.f32 %v25209_v0, 0.0  ;;  %v14826_v29 = vld [vmem:[%s24237_s9] ss:$0 sm:$0xff] }
 0x657   : > { %v13653_v25 = vadd.f32 %v13652_v47, %v13618_v60  ;;  %v13428_v58 = vpop.f32.mrf.mxu0  ;;  %v25212_v7 = vmax.f32 %v25211_v14, 0.0  ;;  %v13622_v42 = vmul.f32 %v13586_v55, %v25213_v49 }
 0x658   : > { %v13620_v20 = vmul.f32 %v13584_v8, %v25203_v9  ;;  %v13518_v24 = vadd.f32 %v23992_v33, %v13475_v2  ;;  %v13473_v4 = vadd.f32 %v13428_v58, %v12881_v38  ;;  %v13551_v43 = vadd.f32 %v13515_v26, %v25205_v62 }
 0x659   : > { %v13654_v16 = vadd.f32 %v13653_v25, %v13619_v6  ;;  %v13553_v34 = vadd.f32 %v13517_v40, %v25210_v56 }
 0x65a   : > { %v13554_v27 = vadd.f32 %v13518_v24, %v25207_v18  ;;  %v13516_v32 = vadd.f32 %v23992_v33, %v13473_v4  ;;  %v13587_v28 = vmax.f32 %v13551_v43, 0.0  ;;  %v25215_v33 = vld [vmem:[#allocation74_spill] sm:$0xff] }
 0x65b   : > { %v13655_v54 = vadd.f32 %v13654_v16, %v13620_v20  ;;  %v13589_v19 = vmax.f32 %v13553_v34, 0.0 }
 0x65c   : > { %v13552_v23 = vadd.f32 %v13516_v32, %v25212_v7  ;;  %v13590_v5 = vmax.f32 %v13554_v27, 0.0  ;;  %v13623_v50 = vmul.f32 %v13587_v28, %v25214_v30 }
 0x65d   : > { %v13656_v17 = vadd.f32 %v13655_v54, %v13621_v36  ;;  %v13625_v46 = vmul.f32 %v13589_v19, %v25217_v61 }
 0x65e   : > { %v13588_v39 = vmax.f32 %v13552_v23, 0.0  ;;  %v13626_v10 = vmul.f32 %v13590_v5, %v25216_v35 }
 0x65f   : > { %v13657_v41 = vadd.f32 %v13656_v17, %v13622_v42 }
 0x660   : > { %v13624_v37 = vmul.f32 %v13588_v39, %v25215_v33  ;;  %v13662_v59 = vsel %vm13661_vm7, %v13626_v10, 0.0 }
 0x661   : > { %v13658_v13 = vadd.f32 %v13657_v41, %v13623_v50 }
 0x663   : > { %v13659_v1 = vadd.f32 %v13658_v13, %v13624_v37 }
 0x665   : > { %v13660_v51 = vadd.f32 %v13659_v1, %v13625_v46 }
 0x667   : > { %v13663_v31 = vadd.f32 %v13662_v59, %v13660_v51 }
 0x669   : > { %v13664_v57 = vrot.slane %v13663_v31, 4 }
 0x66b   : > { %v13665_v48 = vadd.f32 %v13664_v57, %v13663_v31 }
 0x66d   : > { %v13666_v11 = vrot.slane %v13665_v48, 2 }
 0x66f   : > { %v13667_v60 = vadd.f32 %v13666_v11, %v13665_v48 }
 0x671   : > { %v13668_v47 = vrot.slane %v13667_v60, 1 }
 0x673   : > { %v13669_v15 = vadd.f32 %v13668_v47, %v13667_v60 }
 0x675   : > { %v13671_v44 = vsel %vm13670_vm8, %v13669_v15, 0.0 }
 0x676   : > { %v13672_v45 = vmul.f32 0.00390625, %v13671_v44 }
 0x678   : > { %v13673_v21 = vpack.c.bf16 %v13672_v45, %v13672_v45 }
 0x67a   : > { %17245 = vmatmul.mubr.bf16.vlgmr.msra.gmra.mxu1 %v13673_v21 }
 0x73a   : > { %v13779_v63 = vpop.f32.mrf.mxu1 }
 0x73b   : > { %v13780_v38 = vadd.f32 %v14826_v29, %v13779_v63 }
 0x73c   : > { %v17246_v53 = vpop.f32.mrf.mxu1 }
 0x73d   : > { %13785 = vst [vmem:[%s374_s17] sm:$0xff] %v13780_v38 }
 0x73e   : > { %v13782_v8 = vpop.f32.mrf.mxu1 }
 0x740   : > { %v17247_v2 = vpop.f32.mrf.mxu1 }
 0x741 PF: > { %s21_s13 = sadd.s32 1, %s17842_s13  }
 0x742   : > { %p18_p2 = scmp.ge.s32.totalorder %s21_s13, 4  }
 0x744   :  { %20 = sbr.rel (!%p18_p2) target bundleno = 1 (0x1), region = 119 }
 0x749   :  { %13805 = vsyncpa [#allocation5], 1 }
 0x74a   :  { %13807 = vsyncpa [#allocation5 + $0x1], 1 }

</bundles_post_ra>
